<compile_context>
chip_gen: v6e
topology: v6e:2x2x1
jax: 0.10.0
libtpu: 0.0.40
codegen_flags: <defaults>
</compile_context>

<pallas_src>
import math

import jax
import jax.numpy as jnp
from jax import lax
from jax.experimental import pallas as pl
from jax.experimental.pallas import tpu as pltpu

VOCAB = 10000
D_EMB = 232      # model feature width (PyTorch)
D_PAD = 256      # lane-padded feature width (multiple of 128)
H1 = 100
H2 = 64
SEQ = 8          # tokens per sequence (the module runs on x = [1, S])


def symbolnet_kernel(ids_ref, emb_hbm, wc_ref, bc_ref, out_ref, wv_ref, sem):
    """One grid step == TB sequences.

    ids_ref : SMEM [B*S] int32      flattened token ids (scalar prefetch)
    emb_hbm : HBM  [VOCAB, D_PAD]   f32 embedding table (raw ref, manual DMA)
    wc_ref  : VMEM [D_PAD, D_PAD]   bf16 collapsed pfc1..3 weight
    bc_ref  : VMEM [1, D_PAD]       f32  collapsed bias
    out_ref : VMEM [TB, S, D_PAD]   f32
    wv_ref  : VMEM [TB*S, D_PAD]    f32 scratch (gathered embeddings)
    sem     : single shared DMA semaphore
    """
    tb, S, _ = out_ref.shape
    rows = tb * S
    base = pl.program_id(0) * rows

    # 1) DMA-gather all TB*S embedding rows for this tile straight from HBM
    #    into VMEM scratch.  One shared semaphore; every start is issued
    #    before any wait so the row DMAs overlap.
    copies = [
        pltpu.make_async_copy(
            emb_hbm.at[pl.ds(ids_ref[base + k], 1), :],   # [1, D_PAD] row in HBM
            wv_ref.at[pl.ds(k, 1), :],                    # [1, D_PAD] row in VMEM
            sem,
        )
        for k in range(rows)
    ]
    for c in copies:
        c.start()
    for c in copies:
        c.wait()

    wv = wv_ref[...]                                      # [TB*S, 256] f32

    # 2) q = pfc3(pfc2(pfc1(wv))) collapsed (exact) into one matmul, stacked
    #    over the whole tile so the MXU sees TB*S (=128) rows, not 8.
    wc = wc_ref[...].astype(jnp.float32)                  # bf16 -> f32 (DMA halved)
    q = jnp.dot(wv, wc, preferred_element_type=jnp.float32) + bc_ref[...]

    # 3) Per-sequence attention:
    #      softmax(words @ q.T, axis=-2).T @ words
    #   == softmax(q @ words.T, axis=-1) @ words          (no explicit transposes)
    #    [TB*S, 256] -> [TB, S, 256] is a pure metadata reshape (S == 8 sublanes).
    q3 = q.reshape(tb, S, D_PAD)
    wv3 = wv.reshape(tb, S, D_PAD)
    scores = jnp.einsum("bqd,bkd->bqk", q3, wv3,
                        preferred_element_type=jnp.float32)        # [TB, S, S]
    m = jnp.max(scores, axis=-1, keepdims=True)
    e = jnp.exp(scores - m)
    denom = jnp.sum(e, axis=-1, keepdims=True)
    p = e * pl.reciprocal(denom, approx=True)             # EUP divide (free slot)
    out_ref[...] = jnp.einsum("bqk,bkd->bqd", p, wv3,
                              preferred_element_type=jnp.float32)  # [TB, S, 256]


def init_params(key):
    """Deterministic synthetic parameters matching SymbolNet.__init__ shapes."""
    ks = jax.random.split(key, 7)
    return {
        "emb": jax.random.normal(ks[0], (VOCAB, D_EMB), jnp.float32) * 0.02,
        # Linear weights stored [in, out] (transpose of PyTorch's [out, in]).
        "w1": jax.random.normal(ks[1], (D_EMB, H1), jnp.float32) * (D_EMB ** -0.5),
        "b1": jax.random.normal(ks[2], (1, H1), jnp.float32) * 0.01,
        "w2": jax.random.normal(ks[3], (H1, H2), jnp.float32) * (H1 ** -0.5),
        "b2": jax.random.normal(ks[4], (1, H2), jnp.float32) * 0.01,
        "w3": jax.random.normal(ks[5], (H2, D_EMB), jnp.float32) * (H2 ** -0.5),
        "b3": jax.random.normal(ks[6], (1, D_EMB), jnp.float32) * 0.01,
    }


def fold_params(params):
    """One-time host precompute: collapse the bias-only linear chain (exact),
    zero-pad feature axes 232 -> 256 lanes, and store Wc in bf16."""
    w1, w2, w3 = params["w1"], params["w2"], params["w3"]
    b1, b2, b3 = params["b1"], params["b2"], params["b3"]
    wc = w1 @ w2 @ w3                                    # [232, 232]
    bc = b1 @ w2 @ w3 + b2 @ w3 + b3                     # [1, 232]
    emb_p = jnp.zeros((VOCAB, D_PAD), jnp.float32).at[:, :D_EMB].set(params["emb"])
    wc_p = (jnp.zeros((D_PAD, D_PAD), jnp.float32)
            .at[:D_EMB, :D_EMB].set(wc).astype(jnp.bfloat16))   # halve weight DMA
    bc_p = jnp.zeros((1, D_PAD), jnp.float32).at[:, :D_EMB].set(bc)
    return {"emb": emb_p, "wc": wc_p, "bc": bc_p}


def symbolnet_forward(x, folded, *, tile_b=16):
    """x: [B, S] int32 token ids — B independent SymbolNet.forward calls fused
    into one pallas_call.

    Returns lane-padded embeds [B, S, 256] f32; lanes [:232] hold the module's
    embeds, lanes [232:] are zero.  The padding is kept (no per-call host
    slice) so stores stay unmasked; downstream consumers read [..., :232].
    """
    B, S = x.shape
    tb = math.gcd(B, tile_b)                 # sequences per grid step
    ids = x.reshape(-1).astype(jnp.int32)    # flat -> compact SMEM layout

    grid_spec = pltpu.PrefetchScalarGridSpec(
        num_scalar_prefetch=1,
        grid=(B // tb,),
        in_specs=[
            pl.BlockSpec(memory_space=pl.ANY),                      # emb table (HBM)
            pl.BlockSpec((D_PAD, D_PAD), lambda g, ids: (0, 0)),    # Wc (bf16), VMEM
            pl.BlockSpec((1, D_PAD), lambda g, ids: (0, 0)),        # bc
        ],
        out_specs=pl.BlockSpec((tb, S, D_PAD), lambda g, ids: (g, 0, 0)),
        scratch_shapes=[
            pltpu.VMEM((tb * S, D_PAD), jnp.float32),   # gathered embedding tile
            pltpu.SemaphoreType.DMA(()),                # one shared gather sem
        ],
    )

    return pl.pallas_call(
        symbolnet_kernel,
        out_shape=jax.ShapeDtypeStruct((B, S, D_PAD), jnp.float32),
        grid_spec=grid_spec,
        compiler_params=pltpu.CompilerParams(
            dimension_semantics=("parallel",)),   # v7x: shard batch over both TCs
    )(ids, folded["emb"], folded["wc"], folded["bc"])


def symbolnet_reference(x, params):
    """Batched pure-JAX reference in the original (unfolded, transposed) form."""
    wv = params["emb"][x]                                               # [B,S,232]
    q = ((wv @ params["w1"] + params["b1"]) @ params["w2"] + params["b2"]) \
        @ params["w3"] + params["b3"]                                   # [B,S,232]
    att = jax.nn.softmax(jnp.einsum("bid,bjd->bij", wv, q), axis=-2)    # words @ q.T
    return jnp.einsum("bij,bid->bjd", att, wv)                          # att.T @ words


if __name__ == "__main__":
    key = jax.random.PRNGKey(0)
    k_params, k_x = jax.random.split(key)

    params = init_params(k_params)
    folded = fold_params(params)

    B = 32   # batch of sequences per pallas_call (amortizes launch / weight DMA)
    x = jax.random.randint(k_x, (B, SEQ), 0, VOCAB, dtype=jnp.int32)

    out_pad = symbolnet_forward(x, folded)
    jax.block_until_ready(out_pad)

    ref = symbolnet_reference(x, params)
    assert out_pad.shape == (B, SEQ, D_PAD) and out_pad.dtype == jnp.float32
    out = out_pad[..., :D_EMB]   # test-only slice; production keeps the padded slab
    assert jnp.allclose(out, ref, rtol=5e-2, atol=5e-3), \
        float(jnp.max(jnp.abs(out - ref)))
    assert jnp.allclose(out_pad[..., D_EMB:], 0.0)
    print("KERNEL_OK")
</pallas_src>

<mosaic_0001>
module attributes {stable_mosaic.version = 11 : i64} {
  func.func @symbolnet_kernel(%arg0: i32, %arg1: memref<256xi32, #tpu.memory_space<smem>>, %arg2: memref<10000x256xf32, #tpu.memory_space<any>>, %arg3: memref<256x256xbf16, #tpu.memory_space<vmem>>, %arg4: memref<1x256xf32, #tpu.memory_space<vmem>>, %arg5: memref<16x8x256xf32, #tpu.memory_space<vmem>>, %arg6: memref<128x256xf32, #tpu.memory_space<vmem>>, %arg7: memref<!tpu.dma_semaphore, #tpu.memory_space<semaphore_mem>>) attributes {dimension_semantics = [#tpu.dimension_semantics<parallel>], iteration_bounds = array<i64: 2>, scalar_prefetch = 1 : i64, scratch_operands = 2 : i64, tpu.core_type = #tpu.core_type<tc>, window_params = [{}, {pipeline_mode = #tpu.pipeline_mode<synchronous>, transform_indices = @transform_1, window_bounds = array<i64: 256, 256>}, {pipeline_mode = #tpu.pipeline_mode<synchronous>, transform_indices = @transform_2, window_bounds = array<i64: 1, 256>}, {transform_indices = @transform_3, window_bounds = array<i64: 16, 8, 256>}]} {
    %c128_i32 = arith.constant 128 : i32
    %0 = arith.muli %arg0, %c128_i32 : i32
    %c0_i32 = arith.constant 0 : i32
    %1 = arith.addi %0, %c0_i32 : i32
    %2 = arith.index_cast %1 : i32 to index
    %3 = memref.load %arg1[%2] : memref<256xi32, #tpu.memory_space<smem>>
    %c1_i32 = arith.constant 1 : i32
    %4 = arith.addi %0, %c1_i32 : i32
    %5 = arith.index_cast %4 : i32 to index
    %6 = memref.load %arg1[%5] : memref<256xi32, #tpu.memory_space<smem>>
    %c2_i32 = arith.constant 2 : i32
    %7 = arith.addi %0, %c2_i32 : i32
    %8 = arith.index_cast %7 : i32 to index
    %9 = memref.load %arg1[%8] : memref<256xi32, #tpu.memory_space<smem>>
    %c3_i32 = arith.constant 3 : i32
    %10 = arith.addi %0, %c3_i32 : i32
    %11 = arith.index_cast %10 : i32 to index
    %12 = memref.load %arg1[%11] : memref<256xi32, #tpu.memory_space<smem>>
    %c4_i32 = arith.constant 4 : i32
    %13 = arith.addi %0, %c4_i32 : i32
    %14 = arith.index_cast %13 : i32 to index
    %15 = memref.load %arg1[%14] : memref<256xi32, #tpu.memory_space<smem>>
    %c5_i32 = arith.constant 5 : i32
    %16 = arith.addi %0, %c5_i32 : i32
    %17 = arith.index_cast %16 : i32 to index
    %18 = memref.load %arg1[%17] : memref<256xi32, #tpu.memory_space<smem>>
    %c6_i32 = arith.constant 6 : i32
    %19 = arith.addi %0, %c6_i32 : i32
    %20 = arith.index_cast %19 : i32 to index
    %21 = memref.load %arg1[%20] : memref<256xi32, #tpu.memory_space<smem>>
    %c7_i32 = arith.constant 7 : i32
    %22 = arith.addi %0, %c7_i32 : i32
    %23 = arith.index_cast %22 : i32 to index
    %24 = memref.load %arg1[%23] : memref<256xi32, #tpu.memory_space<smem>>
    %c8_i32 = arith.constant 8 : i32
    %25 = arith.addi %0, %c8_i32 : i32
    %26 = arith.index_cast %25 : i32 to index
    %27 = memref.load %arg1[%26] : memref<256xi32, #tpu.memory_space<smem>>
    %c9_i32 = arith.constant 9 : i32
    %28 = arith.addi %0, %c9_i32 : i32
    %29 = arith.index_cast %28 : i32 to index
    %30 = memref.load %arg1[%29] : memref<256xi32, #tpu.memory_space<smem>>
    %c10_i32 = arith.constant 10 : i32
    %31 = arith.addi %0, %c10_i32 : i32
    %32 = arith.index_cast %31 : i32 to index
    %33 = memref.load %arg1[%32] : memref<256xi32, #tpu.memory_space<smem>>
    %c11_i32 = arith.constant 11 : i32
    %34 = arith.addi %0, %c11_i32 : i32
    %35 = arith.index_cast %34 : i32 to index
    %36 = memref.load %arg1[%35] : memref<256xi32, #tpu.memory_space<smem>>
    %c12_i32 = arith.constant 12 : i32
    %37 = arith.addi %0, %c12_i32 : i32
    %38 = arith.index_cast %37 : i32 to index
    %39 = memref.load %arg1[%38] : memref<256xi32, #tpu.memory_space<smem>>
    %c13_i32 = arith.constant 13 : i32
    %40 = arith.addi %0, %c13_i32 : i32
    %41 = arith.index_cast %40 : i32 to index
    %42 = memref.load %arg1[%41] : memref<256xi32, #tpu.memory_space<smem>>
    %c14_i32 = arith.constant 14 : i32
    %43 = arith.addi %0, %c14_i32 : i32
    %44 = arith.index_cast %43 : i32 to index
    %45 = memref.load %arg1[%44] : memref<256xi32, #tpu.memory_space<smem>>
    %c15_i32 = arith.constant 15 : i32
    %46 = arith.addi %0, %c15_i32 : i32
    %47 = arith.index_cast %46 : i32 to index
    %48 = memref.load %arg1[%47] : memref<256xi32, #tpu.memory_space<smem>>
    %c16_i32 = arith.constant 16 : i32
    %49 = arith.addi %0, %c16_i32 : i32
    %50 = arith.index_cast %49 : i32 to index
    %51 = memref.load %arg1[%50] : memref<256xi32, #tpu.memory_space<smem>>
    %c17_i32 = arith.constant 17 : i32
    %52 = arith.addi %0, %c17_i32 : i32
    %53 = arith.index_cast %52 : i32 to index
    %54 = memref.load %arg1[%53] : memref<256xi32, #tpu.memory_space<smem>>
    %c18_i32 = arith.constant 18 : i32
    %55 = arith.addi %0, %c18_i32 : i32
    %56 = arith.index_cast %55 : i32 to index
    %57 = memref.load %arg1[%56] : memref<256xi32, #tpu.memory_space<smem>>
    %c19_i32 = arith.constant 19 : i32
    %58 = arith.addi %0, %c19_i32 : i32
    %59 = arith.index_cast %58 : i32 to index
    %60 = memref.load %arg1[%59] : memref<256xi32, #tpu.memory_space<smem>>
    %c20_i32 = arith.constant 20 : i32
    %61 = arith.addi %0, %c20_i32 : i32
    %62 = arith.index_cast %61 : i32 to index
    %63 = memref.load %arg1[%62] : memref<256xi32, #tpu.memory_space<smem>>
    %c21_i32 = arith.constant 21 : i32
    %64 = arith.addi %0, %c21_i32 : i32
    %65 = arith.index_cast %64 : i32 to index
    %66 = memref.load %arg1[%65] : memref<256xi32, #tpu.memory_space<smem>>
    %c22_i32 = arith.constant 22 : i32
    %67 = arith.addi %0, %c22_i32 : i32
    %68 = arith.index_cast %67 : i32 to index
    %69 = memref.load %arg1[%68] : memref<256xi32, #tpu.memory_space<smem>>
    %c23_i32 = arith.constant 23 : i32
    %70 = arith.addi %0, %c23_i32 : i32
    %71 = arith.index_cast %70 : i32 to index
    %72 = memref.load %arg1[%71] : memref<256xi32, #tpu.memory_space<smem>>
    %c24_i32 = arith.constant 24 : i32
    %73 = arith.addi %0, %c24_i32 : i32
    %74 = arith.index_cast %73 : i32 to index
    %75 = memref.load %arg1[%74] : memref<256xi32, #tpu.memory_space<smem>>
    %c25_i32 = arith.constant 25 : i32
    %76 = arith.addi %0, %c25_i32 : i32
    %77 = arith.index_cast %76 : i32 to index
    %78 = memref.load %arg1[%77] : memref<256xi32, #tpu.memory_space<smem>>
    %c26_i32 = arith.constant 26 : i32
    %79 = arith.addi %0, %c26_i32 : i32
    %80 = arith.index_cast %79 : i32 to index
    %81 = memref.load %arg1[%80] : memref<256xi32, #tpu.memory_space<smem>>
    %c27_i32 = arith.constant 27 : i32
    %82 = arith.addi %0, %c27_i32 : i32
    %83 = arith.index_cast %82 : i32 to index
    %84 = memref.load %arg1[%83] : memref<256xi32, #tpu.memory_space<smem>>
    %c28_i32 = arith.constant 28 : i32
    %85 = arith.addi %0, %c28_i32 : i32
    %86 = arith.index_cast %85 : i32 to index
    %87 = memref.load %arg1[%86] : memref<256xi32, #tpu.memory_space<smem>>
    %c29_i32 = arith.constant 29 : i32
    %88 = arith.addi %0, %c29_i32 : i32
    %89 = arith.index_cast %88 : i32 to index
    %90 = memref.load %arg1[%89] : memref<256xi32, #tpu.memory_space<smem>>
    %c30_i32 = arith.constant 30 : i32
    %91 = arith.addi %0, %c30_i32 : i32
    %92 = arith.index_cast %91 : i32 to index
    %93 = memref.load %arg1[%92] : memref<256xi32, #tpu.memory_space<smem>>
    %c31_i32 = arith.constant 31 : i32
    %94 = arith.addi %0, %c31_i32 : i32
    %95 = arith.index_cast %94 : i32 to index
    %96 = memref.load %arg1[%95] : memref<256xi32, #tpu.memory_space<smem>>
    %c32_i32 = arith.constant 32 : i32
    %97 = arith.addi %0, %c32_i32 : i32
    %98 = arith.index_cast %97 : i32 to index
    %99 = memref.load %arg1[%98] : memref<256xi32, #tpu.memory_space<smem>>
    %c33_i32 = arith.constant 33 : i32
    %100 = arith.addi %0, %c33_i32 : i32
    %101 = arith.index_cast %100 : i32 to index
    %102 = memref.load %arg1[%101] : memref<256xi32, #tpu.memory_space<smem>>
    %c34_i32 = arith.constant 34 : i32
    %103 = arith.addi %0, %c34_i32 : i32
    %104 = arith.index_cast %103 : i32 to index
    %105 = memref.load %arg1[%104] : memref<256xi32, #tpu.memory_space<smem>>
    %c35_i32 = arith.constant 35 : i32
    %106 = arith.addi %0, %c35_i32 : i32
    %107 = arith.index_cast %106 : i32 to index
    %108 = memref.load %arg1[%107] : memref<256xi32, #tpu.memory_space<smem>>
    %c36_i32 = arith.constant 36 : i32
    %109 = arith.addi %0, %c36_i32 : i32
    %110 = arith.index_cast %109 : i32 to index
    %111 = memref.load %arg1[%110] : memref<256xi32, #tpu.memory_space<smem>>
    %c37_i32 = arith.constant 37 : i32
    %112 = arith.addi %0, %c37_i32 : i32
    %113 = arith.index_cast %112 : i32 to index
    %114 = memref.load %arg1[%113] : memref<256xi32, #tpu.memory_space<smem>>
    %c38_i32 = arith.constant 38 : i32
    %115 = arith.addi %0, %c38_i32 : i32
    %116 = arith.index_cast %115 : i32 to index
    %117 = memref.load %arg1[%116] : memref<256xi32, #tpu.memory_space<smem>>
    %c39_i32 = arith.constant 39 : i32
    %118 = arith.addi %0, %c39_i32 : i32
    %119 = arith.index_cast %118 : i32 to index
    %120 = memref.load %arg1[%119] : memref<256xi32, #tpu.memory_space<smem>>
    %c40_i32 = arith.constant 40 : i32
    %121 = arith.addi %0, %c40_i32 : i32
    %122 = arith.index_cast %121 : i32 to index
    %123 = memref.load %arg1[%122] : memref<256xi32, #tpu.memory_space<smem>>
    %c41_i32 = arith.constant 41 : i32
    %124 = arith.addi %0, %c41_i32 : i32
    %125 = arith.index_cast %124 : i32 to index
    %126 = memref.load %arg1[%125] : memref<256xi32, #tpu.memory_space<smem>>
    %c42_i32 = arith.constant 42 : i32
    %127 = arith.addi %0, %c42_i32 : i32
    %128 = arith.index_cast %127 : i32 to index
    %129 = memref.load %arg1[%128] : memref<256xi32, #tpu.memory_space<smem>>
    %c43_i32 = arith.constant 43 : i32
    %130 = arith.addi %0, %c43_i32 : i32
    %131 = arith.index_cast %130 : i32 to index
    %132 = memref.load %arg1[%131] : memref<256xi32, #tpu.memory_space<smem>>
    %c44_i32 = arith.constant 44 : i32
    %133 = arith.addi %0, %c44_i32 : i32
    %134 = arith.index_cast %133 : i32 to index
    %135 = memref.load %arg1[%134] : memref<256xi32, #tpu.memory_space<smem>>
    %c45_i32 = arith.constant 45 : i32
    %136 = arith.addi %0, %c45_i32 : i32
    %137 = arith.index_cast %136 : i32 to index
    %138 = memref.load %arg1[%137] : memref<256xi32, #tpu.memory_space<smem>>
    %c46_i32 = arith.constant 46 : i32
    %139 = arith.addi %0, %c46_i32 : i32
    %140 = arith.index_cast %139 : i32 to index
    %141 = memref.load %arg1[%140] : memref<256xi32, #tpu.memory_space<smem>>
    %c47_i32 = arith.constant 47 : i32
    %142 = arith.addi %0, %c47_i32 : i32
    %143 = arith.index_cast %142 : i32 to index
    %144 = memref.load %arg1[%143] : memref<256xi32, #tpu.memory_space<smem>>
    %c48_i32 = arith.constant 48 : i32
    %145 = arith.addi %0, %c48_i32 : i32
    %146 = arith.index_cast %145 : i32 to index
    %147 = memref.load %arg1[%146] : memref<256xi32, #tpu.memory_space<smem>>
    %c49_i32 = arith.constant 49 : i32
    %148 = arith.addi %0, %c49_i32 : i32
    %149 = arith.index_cast %148 : i32 to index
    %150 = memref.load %arg1[%149] : memref<256xi32, #tpu.memory_space<smem>>
    %c50_i32 = arith.constant 50 : i32
    %151 = arith.addi %0, %c50_i32 : i32
    %152 = arith.index_cast %151 : i32 to index
    %153 = memref.load %arg1[%152] : memref<256xi32, #tpu.memory_space<smem>>
    %c51_i32 = arith.constant 51 : i32
    %154 = arith.addi %0, %c51_i32 : i32
    %155 = arith.index_cast %154 : i32 to index
    %156 = memref.load %arg1[%155] : memref<256xi32, #tpu.memory_space<smem>>
    %c52_i32 = arith.constant 52 : i32
    %157 = arith.addi %0, %c52_i32 : i32
    %158 = arith.index_cast %157 : i32 to index
    %159 = memref.load %arg1[%158] : memref<256xi32, #tpu.memory_space<smem>>
    %c53_i32 = arith.constant 53 : i32
    %160 = arith.addi %0, %c53_i32 : i32
    %161 = arith.index_cast %160 : i32 to index
    %162 = memref.load %arg1[%161] : memref<256xi32, #tpu.memory_space<smem>>
    %c54_i32 = arith.constant 54 : i32
    %163 = arith.addi %0, %c54_i32 : i32
    %164 = arith.index_cast %163 : i32 to index
    %165 = memref.load %arg1[%164] : memref<256xi32, #tpu.memory_space<smem>>
    %c55_i32 = arith.constant 55 : i32
    %166 = arith.addi %0, %c55_i32 : i32
    %167 = arith.index_cast %166 : i32 to index
    %168 = memref.load %arg1[%167] : memref<256xi32, #tpu.memory_space<smem>>
    %c56_i32 = arith.constant 56 : i32
    %169 = arith.addi %0, %c56_i32 : i32
    %170 = arith.index_cast %169 : i32 to index
    %171 = memref.load %arg1[%170] : memref<256xi32, #tpu.memory_space<smem>>
    %c57_i32 = arith.constant 57 : i32
    %172 = arith.addi %0, %c57_i32 : i32
    %173 = arith.index_cast %172 : i32 to index
    %174 = memref.load %arg1[%173] : memref<256xi32, #tpu.memory_space<smem>>
    %c58_i32 = arith.constant 58 : i32
    %175 = arith.addi %0, %c58_i32 : i32
    %176 = arith.index_cast %175 : i32 to index
    %177 = memref.load %arg1[%176] : memref<256xi32, #tpu.memory_space<smem>>
    %c59_i32 = arith.constant 59 : i32
    %178 = arith.addi %0, %c59_i32 : i32
    %179 = arith.index_cast %178 : i32 to index
    %180 = memref.load %arg1[%179] : memref<256xi32, #tpu.memory_space<smem>>
    %c60_i32 = arith.constant 60 : i32
    %181 = arith.addi %0, %c60_i32 : i32
    %182 = arith.index_cast %181 : i32 to index
    %183 = memref.load %arg1[%182] : memref<256xi32, #tpu.memory_space<smem>>
    %c61_i32 = arith.constant 61 : i32
    %184 = arith.addi %0, %c61_i32 : i32
    %185 = arith.index_cast %184 : i32 to index
    %186 = memref.load %arg1[%185] : memref<256xi32, #tpu.memory_space<smem>>
    %c62_i32 = arith.constant 62 : i32
    %187 = arith.addi %0, %c62_i32 : i32
    %188 = arith.index_cast %187 : i32 to index
    %189 = memref.load %arg1[%188] : memref<256xi32, #tpu.memory_space<smem>>
    %c63_i32 = arith.constant 63 : i32
    %190 = arith.addi %0, %c63_i32 : i32
    %191 = arith.index_cast %190 : i32 to index
    %192 = memref.load %arg1[%191] : memref<256xi32, #tpu.memory_space<smem>>
    %c64_i32 = arith.constant 64 : i32
    %193 = arith.addi %0, %c64_i32 : i32
    %194 = arith.index_cast %193 : i32 to index
    %195 = memref.load %arg1[%194] : memref<256xi32, #tpu.memory_space<smem>>
    %c65_i32 = arith.constant 65 : i32
    %196 = arith.addi %0, %c65_i32 : i32
    %197 = arith.index_cast %196 : i32 to index
    %198 = memref.load %arg1[%197] : memref<256xi32, #tpu.memory_space<smem>>
    %c66_i32 = arith.constant 66 : i32
    %199 = arith.addi %0, %c66_i32 : i32
    %200 = arith.index_cast %199 : i32 to index
    %201 = memref.load %arg1[%200] : memref<256xi32, #tpu.memory_space<smem>>
    %c67_i32 = arith.constant 67 : i32
    %202 = arith.addi %0, %c67_i32 : i32
    %203 = arith.index_cast %202 : i32 to index
    %204 = memref.load %arg1[%203] : memref<256xi32, #tpu.memory_space<smem>>
    %c68_i32 = arith.constant 68 : i32
    %205 = arith.addi %0, %c68_i32 : i32
    %206 = arith.index_cast %205 : i32 to index
    %207 = memref.load %arg1[%206] : memref<256xi32, #tpu.memory_space<smem>>
    %c69_i32 = arith.constant 69 : i32
    %208 = arith.addi %0, %c69_i32 : i32
    %209 = arith.index_cast %208 : i32 to index
    %210 = memref.load %arg1[%209] : memref<256xi32, #tpu.memory_space<smem>>
    %c70_i32 = arith.constant 70 : i32
    %211 = arith.addi %0, %c70_i32 : i32
    %212 = arith.index_cast %211 : i32 to index
    %213 = memref.load %arg1[%212] : memref<256xi32, #tpu.memory_space<smem>>
    %c71_i32 = arith.constant 71 : i32
    %214 = arith.addi %0, %c71_i32 : i32
    %215 = arith.index_cast %214 : i32 to index
    %216 = memref.load %arg1[%215] : memref<256xi32, #tpu.memory_space<smem>>
    %c72_i32 = arith.constant 72 : i32
    %217 = arith.addi %0, %c72_i32 : i32
    %218 = arith.index_cast %217 : i32 to index
    %219 = memref.load %arg1[%218] : memref<256xi32, #tpu.memory_space<smem>>
    %c73_i32 = arith.constant 73 : i32
    %220 = arith.addi %0, %c73_i32 : i32
    %221 = arith.index_cast %220 : i32 to index
    %222 = memref.load %arg1[%221] : memref<256xi32, #tpu.memory_space<smem>>
    %c74_i32 = arith.constant 74 : i32
    %223 = arith.addi %0, %c74_i32 : i32
    %224 = arith.index_cast %223 : i32 to index
    %225 = memref.load %arg1[%224] : memref<256xi32, #tpu.memory_space<smem>>
    %c75_i32 = arith.constant 75 : i32
    %226 = arith.addi %0, %c75_i32 : i32
    %227 = arith.index_cast %226 : i32 to index
    %228 = memref.load %arg1[%227] : memref<256xi32, #tpu.memory_space<smem>>
    %c76_i32 = arith.constant 76 : i32
    %229 = arith.addi %0, %c76_i32 : i32
    %230 = arith.index_cast %229 : i32 to index
    %231 = memref.load %arg1[%230] : memref<256xi32, #tpu.memory_space<smem>>
    %c77_i32 = arith.constant 77 : i32
    %232 = arith.addi %0, %c77_i32 : i32
    %233 = arith.index_cast %232 : i32 to index
    %234 = memref.load %arg1[%233] : memref<256xi32, #tpu.memory_space<smem>>
    %c78_i32 = arith.constant 78 : i32
    %235 = arith.addi %0, %c78_i32 : i32
    %236 = arith.index_cast %235 : i32 to index
    %237 = memref.load %arg1[%236] : memref<256xi32, #tpu.memory_space<smem>>
    %c79_i32 = arith.constant 79 : i32
    %238 = arith.addi %0, %c79_i32 : i32
    %239 = arith.index_cast %238 : i32 to index
    %240 = memref.load %arg1[%239] : memref<256xi32, #tpu.memory_space<smem>>
    %c80_i32 = arith.constant 80 : i32
    %241 = arith.addi %0, %c80_i32 : i32
    %242 = arith.index_cast %241 : i32 to index
    %243 = memref.load %arg1[%242] : memref<256xi32, #tpu.memory_space<smem>>
    %c81_i32 = arith.constant 81 : i32
    %244 = arith.addi %0, %c81_i32 : i32
    %245 = arith.index_cast %244 : i32 to index
    %246 = memref.load %arg1[%245] : memref<256xi32, #tpu.memory_space<smem>>
    %c82_i32 = arith.constant 82 : i32
    %247 = arith.addi %0, %c82_i32 : i32
    %248 = arith.index_cast %247 : i32 to index
    %249 = memref.load %arg1[%248] : memref<256xi32, #tpu.memory_space<smem>>
    %c83_i32 = arith.constant 83 : i32
    %250 = arith.addi %0, %c83_i32 : i32
    %251 = arith.index_cast %250 : i32 to index
    %252 = memref.load %arg1[%251] : memref<256xi32, #tpu.memory_space<smem>>
    %c84_i32 = arith.constant 84 : i32
    %253 = arith.addi %0, %c84_i32 : i32
    %254 = arith.index_cast %253 : i32 to index
    %255 = memref.load %arg1[%254] : memref<256xi32, #tpu.memory_space<smem>>
    %c85_i32 = arith.constant 85 : i32
    %256 = arith.addi %0, %c85_i32 : i32
    %257 = arith.index_cast %256 : i32 to index
    %258 = memref.load %arg1[%257] : memref<256xi32, #tpu.memory_space<smem>>
    %c86_i32 = arith.constant 86 : i32
    %259 = arith.addi %0, %c86_i32 : i32
    %260 = arith.index_cast %259 : i32 to index
    %261 = memref.load %arg1[%260] : memref<256xi32, #tpu.memory_space<smem>>
    %c87_i32 = arith.constant 87 : i32
    %262 = arith.addi %0, %c87_i32 : i32
    %263 = arith.index_cast %262 : i32 to index
    %264 = memref.load %arg1[%263] : memref<256xi32, #tpu.memory_space<smem>>
    %c88_i32 = arith.constant 88 : i32
    %265 = arith.addi %0, %c88_i32 : i32
    %266 = arith.index_cast %265 : i32 to index
    %267 = memref.load %arg1[%266] : memref<256xi32, #tpu.memory_space<smem>>
    %c89_i32 = arith.constant 89 : i32
    %268 = arith.addi %0, %c89_i32 : i32
    %269 = arith.index_cast %268 : i32 to index
    %270 = memref.load %arg1[%269] : memref<256xi32, #tpu.memory_space<smem>>
    %c90_i32 = arith.constant 90 : i32
    %271 = arith.addi %0, %c90_i32 : i32
    %272 = arith.index_cast %271 : i32 to index
    %273 = memref.load %arg1[%272] : memref<256xi32, #tpu.memory_space<smem>>
    %c91_i32 = arith.constant 91 : i32
    %274 = arith.addi %0, %c91_i32 : i32
    %275 = arith.index_cast %274 : i32 to index
    %276 = memref.load %arg1[%275] : memref<256xi32, #tpu.memory_space<smem>>
    %c92_i32 = arith.constant 92 : i32
    %277 = arith.addi %0, %c92_i32 : i32
    %278 = arith.index_cast %277 : i32 to index
    %279 = memref.load %arg1[%278] : memref<256xi32, #tpu.memory_space<smem>>
    %c93_i32 = arith.constant 93 : i32
    %280 = arith.addi %0, %c93_i32 : i32
    %281 = arith.index_cast %280 : i32 to index
    %282 = memref.load %arg1[%281] : memref<256xi32, #tpu.memory_space<smem>>
    %c94_i32 = arith.constant 94 : i32
    %283 = arith.addi %0, %c94_i32 : i32
    %284 = arith.index_cast %283 : i32 to index
    %285 = memref.load %arg1[%284] : memref<256xi32, #tpu.memory_space<smem>>
    %c95_i32 = arith.constant 95 : i32
    %286 = arith.addi %0, %c95_i32 : i32
    %287 = arith.index_cast %286 : i32 to index
    %288 = memref.load %arg1[%287] : memref<256xi32, #tpu.memory_space<smem>>
    %c96_i32 = arith.constant 96 : i32
    %289 = arith.addi %0, %c96_i32 : i32
    %290 = arith.index_cast %289 : i32 to index
    %291 = memref.load %arg1[%290] : memref<256xi32, #tpu.memory_space<smem>>
    %c97_i32 = arith.constant 97 : i32
    %292 = arith.addi %0, %c97_i32 : i32
    %293 = arith.index_cast %292 : i32 to index
    %294 = memref.load %arg1[%293] : memref<256xi32, #tpu.memory_space<smem>>
    %c98_i32 = arith.constant 98 : i32
    %295 = arith.addi %0, %c98_i32 : i32
    %296 = arith.index_cast %295 : i32 to index
    %297 = memref.load %arg1[%296] : memref<256xi32, #tpu.memory_space<smem>>
    %c99_i32 = arith.constant 99 : i32
    %298 = arith.addi %0, %c99_i32 : i32
    %299 = arith.index_cast %298 : i32 to index
    %300 = memref.load %arg1[%299] : memref<256xi32, #tpu.memory_space<smem>>
    %c100_i32 = arith.constant 100 : i32
    %301 = arith.addi %0, %c100_i32 : i32
    %302 = arith.index_cast %301 : i32 to index
    %303 = memref.load %arg1[%302] : memref<256xi32, #tpu.memory_space<smem>>
    %c101_i32 = arith.constant 101 : i32
    %304 = arith.addi %0, %c101_i32 : i32
    %305 = arith.index_cast %304 : i32 to index
    %306 = memref.load %arg1[%305] : memref<256xi32, #tpu.memory_space<smem>>
    %c102_i32 = arith.constant 102 : i32
    %307 = arith.addi %0, %c102_i32 : i32
    %308 = arith.index_cast %307 : i32 to index
    %309 = memref.load %arg1[%308] : memref<256xi32, #tpu.memory_space<smem>>
    %c103_i32 = arith.constant 103 : i32
    %310 = arith.addi %0, %c103_i32 : i32
    %311 = arith.index_cast %310 : i32 to index
    %312 = memref.load %arg1[%311] : memref<256xi32, #tpu.memory_space<smem>>
    %c104_i32 = arith.constant 104 : i32
    %313 = arith.addi %0, %c104_i32 : i32
    %314 = arith.index_cast %313 : i32 to index
    %315 = memref.load %arg1[%314] : memref<256xi32, #tpu.memory_space<smem>>
    %c105_i32 = arith.constant 105 : i32
    %316 = arith.addi %0, %c105_i32 : i32
    %317 = arith.index_cast %316 : i32 to index
    %318 = memref.load %arg1[%317] : memref<256xi32, #tpu.memory_space<smem>>
    %c106_i32 = arith.constant 106 : i32
    %319 = arith.addi %0, %c106_i32 : i32
    %320 = arith.index_cast %319 : i32 to index
    %321 = memref.load %arg1[%320] : memref<256xi32, #tpu.memory_space<smem>>
    %c107_i32 = arith.constant 107 : i32
    %322 = arith.addi %0, %c107_i32 : i32
    %323 = arith.index_cast %322 : i32 to index
    %324 = memref.load %arg1[%323] : memref<256xi32, #tpu.memory_space<smem>>
    %c108_i32 = arith.constant 108 : i32
    %325 = arith.addi %0, %c108_i32 : i32
    %326 = arith.index_cast %325 : i32 to index
    %327 = memref.load %arg1[%326] : memref<256xi32, #tpu.memory_space<smem>>
    %c109_i32 = arith.constant 109 : i32
    %328 = arith.addi %0, %c109_i32 : i32
    %329 = arith.index_cast %328 : i32 to index
    %330 = memref.load %arg1[%329] : memref<256xi32, #tpu.memory_space<smem>>
    %c110_i32 = arith.constant 110 : i32
    %331 = arith.addi %0, %c110_i32 : i32
    %332 = arith.index_cast %331 : i32 to index
    %333 = memref.load %arg1[%332] : memref<256xi32, #tpu.memory_space<smem>>
    %c111_i32 = arith.constant 111 : i32
    %334 = arith.addi %0, %c111_i32 : i32
    %335 = arith.index_cast %334 : i32 to index
    %336 = memref.load %arg1[%335] : memref<256xi32, #tpu.memory_space<smem>>
    %c112_i32 = arith.constant 112 : i32
    %337 = arith.addi %0, %c112_i32 : i32
    %338 = arith.index_cast %337 : i32 to index
    %339 = memref.load %arg1[%338] : memref<256xi32, #tpu.memory_space<smem>>
    %c113_i32 = arith.constant 113 : i32
    %340 = arith.addi %0, %c113_i32 : i32
    %341 = arith.index_cast %340 : i32 to index
    %342 = memref.load %arg1[%341] : memref<256xi32, #tpu.memory_space<smem>>
    %c114_i32 = arith.constant 114 : i32
    %343 = arith.addi %0, %c114_i32 : i32
    %344 = arith.index_cast %343 : i32 to index
    %345 = memref.load %arg1[%344] : memref<256xi32, #tpu.memory_space<smem>>
    %c115_i32 = arith.constant 115 : i32
    %346 = arith.addi %0, %c115_i32 : i32
    %347 = arith.index_cast %346 : i32 to index
    %348 = memref.load %arg1[%347] : memref<256xi32, #tpu.memory_space<smem>>
    %c116_i32 = arith.constant 116 : i32
    %349 = arith.addi %0, %c116_i32 : i32
    %350 = arith.index_cast %349 : i32 to index
    %351 = memref.load %arg1[%350] : memref<256xi32, #tpu.memory_space<smem>>
    %c117_i32 = arith.constant 117 : i32
    %352 = arith.addi %0, %c117_i32 : i32
    %353 = arith.index_cast %352 : i32 to index
    %354 = memref.load %arg1[%353] : memref<256xi32, #tpu.memory_space<smem>>
    %c118_i32 = arith.constant 118 : i32
    %355 = arith.addi %0, %c118_i32 : i32
    %356 = arith.index_cast %355 : i32 to index
    %357 = memref.load %arg1[%356] : memref<256xi32, #tpu.memory_space<smem>>
    %c119_i32 = arith.constant 119 : i32
    %358 = arith.addi %0, %c119_i32 : i32
    %359 = arith.index_cast %358 : i32 to index
    %360 = memref.load %arg1[%359] : memref<256xi32, #tpu.memory_space<smem>>
    %c120_i32 = arith.constant 120 : i32
    %361 = arith.addi %0, %c120_i32 : i32
    %362 = arith.index_cast %361 : i32 to index
    %363 = memref.load %arg1[%362] : memref<256xi32, #tpu.memory_space<smem>>
    %c121_i32 = arith.constant 121 : i32
    %364 = arith.addi %0, %c121_i32 : i32
    %365 = arith.index_cast %364 : i32 to index
    %366 = memref.load %arg1[%365] : memref<256xi32, #tpu.memory_space<smem>>
    %c122_i32 = arith.constant 122 : i32
    %367 = arith.addi %0, %c122_i32 : i32
    %368 = arith.index_cast %367 : i32 to index
    %369 = memref.load %arg1[%368] : memref<256xi32, #tpu.memory_space<smem>>
    %c123_i32 = arith.constant 123 : i32
    %370 = arith.addi %0, %c123_i32 : i32
    %371 = arith.index_cast %370 : i32 to index
    %372 = memref.load %arg1[%371] : memref<256xi32, #tpu.memory_space<smem>>
    %c124_i32 = arith.constant 124 : i32
    %373 = arith.addi %0, %c124_i32 : i32
    %374 = arith.index_cast %373 : i32 to index
    %375 = memref.load %arg1[%374] : memref<256xi32, #tpu.memory_space<smem>>
    %c125_i32 = arith.constant 125 : i32
    %376 = arith.addi %0, %c125_i32 : i32
    %377 = arith.index_cast %376 : i32 to index
    %378 = memref.load %arg1[%377] : memref<256xi32, #tpu.memory_space<smem>>
    %c126_i32 = arith.constant 126 : i32
    %379 = arith.addi %0, %c126_i32 : i32
    %380 = arith.index_cast %379 : i32 to index
    %381 = memref.load %arg1[%380] : memref<256xi32, #tpu.memory_space<smem>>
    %c127_i32 = arith.constant 127 : i32
    %382 = arith.addi %0, %c127_i32 : i32
    %383 = arith.index_cast %382 : i32 to index
    %384 = memref.load %arg1[%383] : memref<256xi32, #tpu.memory_space<smem>>
    %c0_i32_0 = arith.constant 0 : i32
    %385 = tpu.memref_slice %arg2[%3, %c0_i32_0] : memref<10000x256xf32, #tpu.memory_space<any>> -> memref<1x256xf32, #tpu.memory_space<any>>
    %c0_i32_1 = arith.constant 0 : i32
    %c0_i32_2 = arith.constant 0 : i32
    %386 = tpu.memref_slice %arg6[%c0_i32_1, %c0_i32_2] : memref<128x256xf32, #tpu.memory_space<vmem>> -> memref<1x256xf32, #tpu.memory_space<vmem>>
    tpu.enqueue_dma source(%385 : memref<1x256xf32, #tpu.memory_space<any>>) target(%386 : memref<1x256xf32, #tpu.memory_space<vmem>>) target_semaphore(%arg7 : memref<!tpu.dma_semaphore, #tpu.memory_space<semaphore_mem>>)
    %c0_i32_3 = arith.constant 0 : i32
    %387 = tpu.memref_slice %arg2[%6, %c0_i32_3] : memref<10000x256xf32, #tpu.memory_space<any>> -> memref<1x256xf32, #tpu.memory_space<any>>
    %c1_i32_4 = arith.constant 1 : i32
    %c0_i32_5 = arith.constant 0 : i32
    %388 = tpu.memref_slice %arg6[%c1_i32_4, %c0_i32_5] : memref<128x256xf32, #tpu.memory_space<vmem>> -> memref<1x256xf32, #tpu.memory_space<vmem>>
    tpu.enqueue_dma source(%387 : memref<1x256xf32, #tpu.memory_space<any>>) target(%388 : memref<1x256xf32, #tpu.memory_space<vmem>>) target_semaphore(%arg7 : memref<!tpu.dma_semaphore, #tpu.memory_space<semaphore_mem>>)
    %c0_i32_6 = arith.constant 0 : i32
    %389 = tpu.memref_slice %arg2[%9, %c0_i32_6] : memref<10000x256xf32, #tpu.memory_space<any>> -> memref<1x256xf32, #tpu.memory_space<any>>
    %c2_i32_7 = arith.constant 2 : i32
    %c0_i32_8 = arith.constant 0 : i32
    %390 = tpu.memref_slice %arg6[%c2_i32_7, %c0_i32_8] : memref<128x256xf32, #tpu.memory_space<vmem>> -> memref<1x256xf32, #tpu.memory_space<vmem>>
    tpu.enqueue_dma source(%389 : memref<1x256xf32, #tpu.memory_space<any>>) target(%390 : memref<1x256xf32, #tpu.memory_space<vmem>>) target_semaphore(%arg7 : memref<!tpu.dma_semaphore, #tpu.memory_space<semaphore_mem>>)
    %c0_i32_9 = arith.constant 0 : i32
    %391 = tpu.memref_slice %arg2[%12, %c0_i32_9] : memref<10000x256xf32, #tpu.memory_space<any>> -> memref<1x256xf32, #tpu.memory_space<any>>
    %c3_i32_10 = arith.constant 3 : i32
    %c0_i32_11 = arith.constant 0 : i32
    %392 = tpu.memref_slice %arg6[%c3_i32_10, %c0_i32_11] : memref<128x256xf32, #tpu.memory_space<vmem>> -> memref<1x256xf32, #tpu.memory_space<vmem>>
    tpu.enqueue_dma source(%391 : memref<1x256xf32, #tpu.memory_space<any>>) target(%392 : memref<1x256xf32, #tpu.memory_space<vmem>>) target_semaphore(%arg7 : memref<!tpu.dma_semaphore, #tpu.memory_space<semaphore_mem>>)
    %c0_i32_12 = arith.constant 0 : i32
    %393 = tpu.memref_slice %arg2[%15, %c0_i32_12] : memref<10000x256xf32, #tpu.memory_space<any>> -> memref<1x256xf32, #tpu.memory_space<any>>
    %c4_i32_13 = arith.constant 4 : i32
    %c0_i32_14 = arith.constant 0 : i32
    %394 = tpu.memref_slice %arg6[%c4_i32_13, %c0_i32_14] : memref<128x256xf32, #tpu.memory_space<vmem>> -> memref<1x256xf32, #tpu.memory_space<vmem>>
    tpu.enqueue_dma source(%393 : memref<1x256xf32, #tpu.memory_space<any>>) target(%394 : memref<1x256xf32, #tpu.memory_space<vmem>>) target_semaphore(%arg7 : memref<!tpu.dma_semaphore, #tpu.memory_space<semaphore_mem>>)
    %c0_i32_15 = arith.constant 0 : i32
    %395 = tpu.memref_slice %arg2[%18, %c0_i32_15] : memref<10000x256xf32, #tpu.memory_space<any>> -> memref<1x256xf32, #tpu.memory_space<any>>
    %c5_i32_16 = arith.constant 5 : i32
    %c0_i32_17 = arith.constant 0 : i32
    %396 = tpu.memref_slice %arg6[%c5_i32_16, %c0_i32_17] : memref<128x256xf32, #tpu.memory_space<vmem>> -> memref<1x256xf32, #tpu.memory_space<vmem>>
    tpu.enqueue_dma source(%395 : memref<1x256xf32, #tpu.memory_space<any>>) target(%396 : memref<1x256xf32, #tpu.memory_space<vmem>>) target_semaphore(%arg7 : memref<!tpu.dma_semaphore, #tpu.memory_space<semaphore_mem>>)
    %c0_i32_18 = arith.constant 0 : i32
    %397 = tpu.memref_slice %arg2[%21, %c0_i32_18] : memref<10000x256xf32, #tpu.memory_space<any>> -> memref<1x256xf32, #tpu.memory_space<any>>
    %c6_i32_19 = arith.constant 6 : i32
    %c0_i32_20 = arith.constant 0 : i32
    %398 = tpu.memref_slice %arg6[%c6_i32_19, %c0_i32_20] : memref<128x256xf32, #tpu.memory_space<vmem>> -> memref<1x256xf32, #tpu.memory_space<vmem>>
    tpu.enqueue_dma source(%397 : memref<1x256xf32, #tpu.memory_space<any>>) target(%398 : memref<1x256xf32, #tpu.memory_space<vmem>>) target_semaphore(%arg7 : memref<!tpu.dma_semaphore, #tpu.memory_space<semaphore_mem>>)
    %c0_i32_21 = arith.constant 0 : i32
    %399 = tpu.memref_slice %arg2[%24, %c0_i32_21] : memref<10000x256xf32, #tpu.memory_space<any>> -> memref<1x256xf32, #tpu.memory_space<any>>
    %c7_i32_22 = arith.constant 7 : i32
    %c0_i32_23 = arith.constant 0 : i32
    %400 = tpu.memref_slice %arg6[%c7_i32_22, %c0_i32_23] : memref<128x256xf32, #tpu.memory_space<vmem>> -> memref<1x256xf32, #tpu.memory_space<vmem>>
    tpu.enqueue_dma source(%399 : memref<1x256xf32, #tpu.memory_space<any>>) target(%400 : memref<1x256xf32, #tpu.memory_space<vmem>>) target_semaphore(%arg7 : memref<!tpu.dma_semaphore, #tpu.memory_space<semaphore_mem>>)
    %c0_i32_24 = arith.constant 0 : i32
    %401 = tpu.memref_slice %arg2[%27, %c0_i32_24] : memref<10000x256xf32, #tpu.memory_space<any>> -> memref<1x256xf32, #tpu.memory_space<any>>
    %c8_i32_25 = arith.constant 8 : i32
    %c0_i32_26 = arith.constant 0 : i32
    %402 = tpu.memref_slice %arg6[%c8_i32_25, %c0_i32_26] : memref<128x256xf32, #tpu.memory_space<vmem>> -> memref<1x256xf32, #tpu.memory_space<vmem>>
    tpu.enqueue_dma source(%401 : memref<1x256xf32, #tpu.memory_space<any>>) target(%402 : memref<1x256xf32, #tpu.memory_space<vmem>>) target_semaphore(%arg7 : memref<!tpu.dma_semaphore, #tpu.memory_space<semaphore_mem>>)
    %c0_i32_27 = arith.constant 0 : i32
    %403 = tpu.memref_slice %arg2[%30, %c0_i32_27] : memref<10000x256xf32, #tpu.memory_space<any>> -> memref<1x256xf32, #tpu.memory_space<any>>
    %c9_i32_28 = arith.constant 9 : i32
    %c0_i32_29 = arith.constant 0 : i32
    %404 = tpu.memref_slice %arg6[%c9_i32_28, %c0_i32_29] : memref<128x256xf32, #tpu.memory_space<vmem>> -> memref<1x256xf32, #tpu.memory_space<vmem>>
    tpu.enqueue_dma source(%403 : memref<1x256xf32, #tpu.memory_space<any>>) target(%404 : memref<1x256xf32, #tpu.memory_space<vmem>>) target_semaphore(%arg7 : memref<!tpu.dma_semaphore, #tpu.memory_space<semaphore_mem>>)
    %c0_i32_30 = arith.constant 0 : i32
    %405 = tpu.memref_slice %arg2[%33, %c0_i32_30] : memref<10000x256xf32, #tpu.memory_space<any>> -> memref<1x256xf32, #tpu.memory_space<any>>
    %c10_i32_31 = arith.constant 10 : i32
    %c0_i32_32 = arith.constant 0 : i32
    %406 = tpu.memref_slice %arg6[%c10_i32_31, %c0_i32_32] : memref<128x256xf32, #tpu.memory_space<vmem>> -> memref<1x256xf32, #tpu.memory_space<vmem>>
    tpu.enqueue_dma source(%405 : memref<1x256xf32, #tpu.memory_space<any>>) target(%406 : memref<1x256xf32, #tpu.memory_space<vmem>>) target_semaphore(%arg7 : memref<!tpu.dma_semaphore, #tpu.memory_space<semaphore_mem>>)
    %c0_i32_33 = arith.constant 0 : i32
    %407 = tpu.memref_slice %arg2[%36, %c0_i32_33] : memref<10000x256xf32, #tpu.memory_space<any>> -> memref<1x256xf32, #tpu.memory_space<any>>
    %c11_i32_34 = arith.constant 11 : i32
    %c0_i32_35 = arith.constant 0 : i32
    %408 = tpu.memref_slice %arg6[%c11_i32_34, %c0_i32_35] : memref<128x256xf32, #tpu.memory_space<vmem>> -> memref<1x256xf32, #tpu.memory_space<vmem>>
    tpu.enqueue_dma source(%407 : memref<1x256xf32, #tpu.memory_space<any>>) target(%408 : memref<1x256xf32, #tpu.memory_space<vmem>>) target_semaphore(%arg7 : memref<!tpu.dma_semaphore, #tpu.memory_space<semaphore_mem>>)
    %c0_i32_36 = arith.constant 0 : i32
    %409 = tpu.memref_slice %arg2[%39, %c0_i32_36] : memref<10000x256xf32, #tpu.memory_space<any>> -> memref<1x256xf32, #tpu.memory_space<any>>
    %c12_i32_37 = arith.constant 12 : i32
    %c0_i32_38 = arith.constant 0 : i32
    %410 = tpu.memref_slice %arg6[%c12_i32_37, %c0_i32_38] : memref<128x256xf32, #tpu.memory_space<vmem>> -> memref<1x256xf32, #tpu.memory_space<vmem>>
    tpu.enqueue_dma source(%409 : memref<1x256xf32, #tpu.memory_space<any>>) target(%410 : memref<1x256xf32, #tpu.memory_space<vmem>>) target_semaphore(%arg7 : memref<!tpu.dma_semaphore, #tpu.memory_space<semaphore_mem>>)
    %c0_i32_39 = arith.constant 0 : i32
    %411 = tpu.memref_slice %arg2[%42, %c0_i32_39] : memref<10000x256xf32, #tpu.memory_space<any>> -> memref<1x256xf32, #tpu.memory_space<any>>
    %c13_i32_40 = arith.constant 13 : i32
    %c0_i32_41 = arith.constant 0 : i32
    %412 = tpu.memref_slice %arg6[%c13_i32_40, %c0_i32_41] : memref<128x256xf32, #tpu.memory_space<vmem>> -> memref<1x256xf32, #tpu.memory_space<vmem>>
    tpu.enqueue_dma source(%411 : memref<1x256xf32, #tpu.memory_space<any>>) target(%412 : memref<1x256xf32, #tpu.memory_space<vmem>>) target_semaphore(%arg7 : memref<!tpu.dma_semaphore, #tpu.memory_space<semaphore_mem>>)
    %c0_i32_42 = arith.constant 0 : i32
    %413 = tpu.memref_slice %arg2[%45, %c0_i32_42] : memref<10000x256xf32, #tpu.memory_space<any>> -> memref<1x256xf32, #tpu.memory_space<any>>
    %c14_i32_43 = arith.constant 14 : i32
    %c0_i32_44 = arith.constant 0 : i32
    %414 = tpu.memref_slice %arg6[%c14_i32_43, %c0_i32_44] : memref<128x256xf32, #tpu.memory_space<vmem>> -> memref<1x256xf32, #tpu.memory_space<vmem>>
    tpu.enqueue_dma source(%413 : memref<1x256xf32, #tpu.memory_space<any>>) target(%414 : memref<1x256xf32, #tpu.memory_space<vmem>>) target_semaphore(%arg7 : memref<!tpu.dma_semaphore, #tpu.memory_space<semaphore_mem>>)
    %c0_i32_45 = arith.constant 0 : i32
    %415 = tpu.memref_slice %arg2[%48, %c0_i32_45] : memref<10000x256xf32, #tpu.memory_space<any>> -> memref<1x256xf32, #tpu.memory_space<any>>
    %c15_i32_46 = arith.constant 15 : i32
    %c0_i32_47 = arith.constant 0 : i32
    %416 = tpu.memref_slice %arg6[%c15_i32_46, %c0_i32_47] : memref<128x256xf32, #tpu.memory_space<vmem>> -> memref<1x256xf32, #tpu.memory_space<vmem>>
    tpu.enqueue_dma source(%415 : memref<1x256xf32, #tpu.memory_space<any>>) target(%416 : memref<1x256xf32, #tpu.memory_space<vmem>>) target_semaphore(%arg7 : memref<!tpu.dma_semaphore, #tpu.memory_space<semaphore_mem>>)
    %c0_i32_48 = arith.constant 0 : i32
    %417 = tpu.memref_slice %arg2[%51, %c0_i32_48] : memref<10000x256xf32, #tpu.memory_space<any>> -> memref<1x256xf32, #tpu.memory_space<any>>
    %c16_i32_49 = arith.constant 16 : i32
    %c0_i32_50 = arith.constant 0 : i32
    %418 = tpu.memref_slice %arg6[%c16_i32_49, %c0_i32_50] : memref<128x256xf32, #tpu.memory_space<vmem>> -> memref<1x256xf32, #tpu.memory_space<vmem>>
    tpu.enqueue_dma source(%417 : memref<1x256xf32, #tpu.memory_space<any>>) target(%418 : memref<1x256xf32, #tpu.memory_space<vmem>>) target_semaphore(%arg7 : memref<!tpu.dma_semaphore, #tpu.memory_space<semaphore_mem>>)
    %c0_i32_51 = arith.constant 0 : i32
    %419 = tpu.memref_slice %arg2[%54, %c0_i32_51] : memref<10000x256xf32, #tpu.memory_space<any>> -> memref<1x256xf32, #tpu.memory_space<any>>
    %c17_i32_52 = arith.constant 17 : i32
    %c0_i32_53 = arith.constant 0 : i32
    %420 = tpu.memref_slice %arg6[%c17_i32_52, %c0_i32_53] : memref<128x256xf32, #tpu.memory_space<vmem>> -> memref<1x256xf32, #tpu.memory_space<vmem>>
    tpu.enqueue_dma source(%419 : memref<1x256xf32, #tpu.memory_space<any>>) target(%420 : memref<1x256xf32, #tpu.memory_space<vmem>>) target_semaphore(%arg7 : memref<!tpu.dma_semaphore, #tpu.memory_space<semaphore_mem>>)
    %c0_i32_54 = arith.constant 0 : i32
    %421 = tpu.memref_slice %arg2[%57, %c0_i32_54] : memref<10000x256xf32, #tpu.memory_space<any>> -> memref<1x256xf32, #tpu.memory_space<any>>
    %c18_i32_55 = arith.constant 18 : i32
    %c0_i32_56 = arith.constant 0 : i32
    %422 = tpu.memref_slice %arg6[%c18_i32_55, %c0_i32_56] : memref<128x256xf32, #tpu.memory_space<vmem>> -> memref<1x256xf32, #tpu.memory_space<vmem>>
    tpu.enqueue_dma source(%421 : memref<1x256xf32, #tpu.memory_space<any>>) target(%422 : memref<1x256xf32, #tpu.memory_space<vmem>>) target_semaphore(%arg7 : memref<!tpu.dma_semaphore, #tpu.memory_space<semaphore_mem>>)
    %c0_i32_57 = arith.constant 0 : i32
    %423 = tpu.memref_slice %arg2[%60, %c0_i32_57] : memref<10000x256xf32, #tpu.memory_space<any>> -> memref<1x256xf32, #tpu.memory_space<any>>
    %c19_i32_58 = arith.constant 19 : i32
    %c0_i32_59 = arith.constant 0 : i32
    %424 = tpu.memref_slice %arg6[%c19_i32_58, %c0_i32_59] : memref<128x256xf32, #tpu.memory_space<vmem>> -> memref<1x256xf32, #tpu.memory_space<vmem>>
    tpu.enqueue_dma source(%423 : memref<1x256xf32, #tpu.memory_space<any>>) target(%424 : memref<1x256xf32, #tpu.memory_space<vmem>>) target_semaphore(%arg7 : memref<!tpu.dma_semaphore, #tpu.memory_space<semaphore_mem>>)
    %c0_i32_60 = arith.constant 0 : i32
    %425 = tpu.memref_slice %arg2[%63, %c0_i32_60] : memref<10000x256xf32, #tpu.memory_space<any>> -> memref<1x256xf32, #tpu.memory_space<any>>
    %c20_i32_61 = arith.constant 20 : i32
    %c0_i32_62 = arith.constant 0 : i32
    %426 = tpu.memref_slice %arg6[%c20_i32_61, %c0_i32_62] : memref<128x256xf32, #tpu.memory_space<vmem>> -> memref<1x256xf32, #tpu.memory_space<vmem>>
    tpu.enqueue_dma source(%425 : memref<1x256xf32, #tpu.memory_space<any>>) target(%426 : memref<1x256xf32, #tpu.memory_space<vmem>>) target_semaphore(%arg7 : memref<!tpu.dma_semaphore, #tpu.memory_space<semaphore_mem>>)
    %c0_i32_63 = arith.constant 0 : i32
    %427 = tpu.memref_slice %arg2[%66, %c0_i32_63] : memref<10000x256xf32, #tpu.memory_space<any>> -> memref<1x256xf32, #tpu.memory_space<any>>
    %c21_i32_64 = arith.constant 21 : i32
    %c0_i32_65 = arith.constant 0 : i32
    %428 = tpu.memref_slice %arg6[%c21_i32_64, %c0_i32_65] : memref<128x256xf32, #tpu.memory_space<vmem>> -> memref<1x256xf32, #tpu.memory_space<vmem>>
    tpu.enqueue_dma source(%427 : memref<1x256xf32, #tpu.memory_space<any>>) target(%428 : memref<1x256xf32, #tpu.memory_space<vmem>>) target_semaphore(%arg7 : memref<!tpu.dma_semaphore, #tpu.memory_space<semaphore_mem>>)
    %c0_i32_66 = arith.constant 0 : i32
    %429 = tpu.memref_slice %arg2[%69, %c0_i32_66] : memref<10000x256xf32, #tpu.memory_space<any>> -> memref<1x256xf32, #tpu.memory_space<any>>
    %c22_i32_67 = arith.constant 22 : i32
    %c0_i32_68 = arith.constant 0 : i32
    %430 = tpu.memref_slice %arg6[%c22_i32_67, %c0_i32_68] : memref<128x256xf32, #tpu.memory_space<vmem>> -> memref<1x256xf32, #tpu.memory_space<vmem>>
    tpu.enqueue_dma source(%429 : memref<1x256xf32, #tpu.memory_space<any>>) target(%430 : memref<1x256xf32, #tpu.memory_space<vmem>>) target_semaphore(%arg7 : memref<!tpu.dma_semaphore, #tpu.memory_space<semaphore_mem>>)
    %c0_i32_69 = arith.constant 0 : i32
    %431 = tpu.memref_slice %arg2[%72, %c0_i32_69] : memref<10000x256xf32, #tpu.memory_space<any>> -> memref<1x256xf32, #tpu.memory_space<any>>
    %c23_i32_70 = arith.constant 23 : i32
    %c0_i32_71 = arith.constant 0 : i32
    %432 = tpu.memref_slice %arg6[%c23_i32_70, %c0_i32_71] : memref<128x256xf32, #tpu.memory_space<vmem>> -> memref<1x256xf32, #tpu.memory_space<vmem>>
    tpu.enqueue_dma source(%431 : memref<1x256xf32, #tpu.memory_space<any>>) target(%432 : memref<1x256xf32, #tpu.memory_space<vmem>>) target_semaphore(%arg7 : memref<!tpu.dma_semaphore, #tpu.memory_space<semaphore_mem>>)
    %c0_i32_72 = arith.constant 0 : i32
    %433 = tpu.memref_slice %arg2[%75, %c0_i32_72] : memref<10000x256xf32, #tpu.memory_space<any>> -> memref<1x256xf32, #tpu.memory_space<any>>
    %c24_i32_73 = arith.constant 24 : i32
    %c0_i32_74 = arith.constant 0 : i32
    %434 = tpu.memref_slice %arg6[%c24_i32_73, %c0_i32_74] : memref<128x256xf32, #tpu.memory_space<vmem>> -> memref<1x256xf32, #tpu.memory_space<vmem>>
    tpu.enqueue_dma source(%433 : memref<1x256xf32, #tpu.memory_space<any>>) target(%434 : memref<1x256xf32, #tpu.memory_space<vmem>>) target_semaphore(%arg7 : memref<!tpu.dma_semaphore, #tpu.memory_space<semaphore_mem>>)
    %c0_i32_75 = arith.constant 0 : i32
    %435 = tpu.memref_slice %arg2[%78, %c0_i32_75] : memref<10000x256xf32, #tpu.memory_space<any>> -> memref<1x256xf32, #tpu.memory_space<any>>
    %c25_i32_76 = arith.constant 25 : i32
    %c0_i32_77 = arith.constant 0 : i32
    %436 = tpu.memref_slice %arg6[%c25_i32_76, %c0_i32_77] : memref<128x256xf32, #tpu.memory_space<vmem>> -> memref<1x256xf32, #tpu.memory_space<vmem>>
    tpu.enqueue_dma source(%435 : memref<1x256xf32, #tpu.memory_space<any>>) target(%436 : memref<1x256xf32, #tpu.memory_space<vmem>>) target_semaphore(%arg7 : memref<!tpu.dma_semaphore, #tpu.memory_space<semaphore_mem>>)
    %c0_i32_78 = arith.constant 0 : i32
    %437 = tpu.memref_slice %arg2[%81, %c0_i32_78] : memref<10000x256xf32, #tpu.memory_space<any>> -> memref<1x256xf32, #tpu.memory_space<any>>
    %c26_i32_79 = arith.constant 26 : i32
    %c0_i32_80 = arith.constant 0 : i32
    %438 = tpu.memref_slice %arg6[%c26_i32_79, %c0_i32_80] : memref<128x256xf32, #tpu.memory_space<vmem>> -> memref<1x256xf32, #tpu.memory_space<vmem>>
    tpu.enqueue_dma source(%437 : memref<1x256xf32, #tpu.memory_space<any>>) target(%438 : memref<1x256xf32, #tpu.memory_space<vmem>>) target_semaphore(%arg7 : memref<!tpu.dma_semaphore, #tpu.memory_space<semaphore_mem>>)
    %c0_i32_81 = arith.constant 0 : i32
    %439 = tpu.memref_slice %arg2[%84, %c0_i32_81] : memref<10000x256xf32, #tpu.memory_space<any>> -> memref<1x256xf32, #tpu.memory_space<any>>
    %c27_i32_82 = arith.constant 27 : i32
    %c0_i32_83 = arith.constant 0 : i32
    %440 = tpu.memref_slice %arg6[%c27_i32_82, %c0_i32_83] : memref<128x256xf32, #tpu.memory_space<vmem>> -> memref<1x256xf32, #tpu.memory_space<vmem>>
    tpu.enqueue_dma source(%439 : memref<1x256xf32, #tpu.memory_space<any>>) target(%440 : memref<1x256xf32, #tpu.memory_space<vmem>>) target_semaphore(%arg7 : memref<!tpu.dma_semaphore, #tpu.memory_space<semaphore_mem>>)
    %c0_i32_84 = arith.constant 0 : i32
    %441 = tpu.memref_slice %arg2[%87, %c0_i32_84] : memref<10000x256xf32, #tpu.memory_space<any>> -> memref<1x256xf32, #tpu.memory_space<any>>
    %c28_i32_85 = arith.constant 28 : i32
    %c0_i32_86 = arith.constant 0 : i32
    %442 = tpu.memref_slice %arg6[%c28_i32_85, %c0_i32_86] : memref<128x256xf32, #tpu.memory_space<vmem>> -> memref<1x256xf32, #tpu.memory_space<vmem>>
    tpu.enqueue_dma source(%441 : memref<1x256xf32, #tpu.memory_space<any>>) target(%442 : memref<1x256xf32, #tpu.memory_space<vmem>>) target_semaphore(%arg7 : memref<!tpu.dma_semaphore, #tpu.memory_space<semaphore_mem>>)
    %c0_i32_87 = arith.constant 0 : i32
    %443 = tpu.memref_slice %arg2[%90, %c0_i32_87] : memref<10000x256xf32, #tpu.memory_space<any>> -> memref<1x256xf32, #tpu.memory_space<any>>
    %c29_i32_88 = arith.constant 29 : i32
    %c0_i32_89 = arith.constant 0 : i32
    %444 = tpu.memref_slice %arg6[%c29_i32_88, %c0_i32_89] : memref<128x256xf32, #tpu.memory_space<vmem>> -> memref<1x256xf32, #tpu.memory_space<vmem>>
    tpu.enqueue_dma source(%443 : memref<1x256xf32, #tpu.memory_space<any>>) target(%444 : memref<1x256xf32, #tpu.memory_space<vmem>>) target_semaphore(%arg7 : memref<!tpu.dma_semaphore, #tpu.memory_space<semaphore_mem>>)
    %c0_i32_90 = arith.constant 0 : i32
    %445 = tpu.memref_slice %arg2[%93, %c0_i32_90] : memref<10000x256xf32, #tpu.memory_space<any>> -> memref<1x256xf32, #tpu.memory_space<any>>
    %c30_i32_91 = arith.constant 30 : i32
    %c0_i32_92 = arith.constant 0 : i32
    %446 = tpu.memref_slice %arg6[%c30_i32_91, %c0_i32_92] : memref<128x256xf32, #tpu.memory_space<vmem>> -> memref<1x256xf32, #tpu.memory_space<vmem>>
    tpu.enqueue_dma source(%445 : memref<1x256xf32, #tpu.memory_space<any>>) target(%446 : memref<1x256xf32, #tpu.memory_space<vmem>>) target_semaphore(%arg7 : memref<!tpu.dma_semaphore, #tpu.memory_space<semaphore_mem>>)
    %c0_i32_93 = arith.constant 0 : i32
    %447 = tpu.memref_slice %arg2[%96, %c0_i32_93] : memref<10000x256xf32, #tpu.memory_space<any>> -> memref<1x256xf32, #tpu.memory_space<any>>
    %c31_i32_94 = arith.constant 31 : i32
    %c0_i32_95 = arith.constant 0 : i32
    %448 = tpu.memref_slice %arg6[%c31_i32_94, %c0_i32_95] : memref<128x256xf32, #tpu.memory_space<vmem>> -> memref<1x256xf32, #tpu.memory_space<vmem>>
    tpu.enqueue_dma source(%447 : memref<1x256xf32, #tpu.memory_space<any>>) target(%448 : memref<1x256xf32, #tpu.memory_space<vmem>>) target_semaphore(%arg7 : memref<!tpu.dma_semaphore, #tpu.memory_space<semaphore_mem>>)
    %c0_i32_96 = arith.constant 0 : i32
    %449 = tpu.memref_slice %arg2[%99, %c0_i32_96] : memref<10000x256xf32, #tpu.memory_space<any>> -> memref<1x256xf32, #tpu.memory_space<any>>
    %c32_i32_97 = arith.constant 32 : i32
    %c0_i32_98 = arith.constant 0 : i32
    %450 = tpu.memref_slice %arg6[%c32_i32_97, %c0_i32_98] : memref<128x256xf32, #tpu.memory_space<vmem>> -> memref<1x256xf32, #tpu.memory_space<vmem>>
    tpu.enqueue_dma source(%449 : memref<1x256xf32, #tpu.memory_space<any>>) target(%450 : memref<1x256xf32, #tpu.memory_space<vmem>>) target_semaphore(%arg7 : memref<!tpu.dma_semaphore, #tpu.memory_space<semaphore_mem>>)
    %c0_i32_99 = arith.constant 0 : i32
    %451 = tpu.memref_slice %arg2[%102, %c0_i32_99] : memref<10000x256xf32, #tpu.memory_space<any>> -> memref<1x256xf32, #tpu.memory_space<any>>
    %c33_i32_100 = arith.constant 33 : i32
    %c0_i32_101 = arith.constant 0 : i32
    %452 = tpu.memref_slice %arg6[%c33_i32_100, %c0_i32_101] : memref<128x256xf32, #tpu.memory_space<vmem>> -> memref<1x256xf32, #tpu.memory_space<vmem>>
    tpu.enqueue_dma source(%451 : memref<1x256xf32, #tpu.memory_space<any>>) target(%452 : memref<1x256xf32, #tpu.memory_space<vmem>>) target_semaphore(%arg7 : memref<!tpu.dma_semaphore, #tpu.memory_space<semaphore_mem>>)
    %c0_i32_102 = arith.constant 0 : i32
    %453 = tpu.memref_slice %arg2[%105, %c0_i32_102] : memref<10000x256xf32, #tpu.memory_space<any>> -> memref<1x256xf32, #tpu.memory_space<any>>
    %c34_i32_103 = arith.constant 34 : i32
    %c0_i32_104 = arith.constant 0 : i32
    %454 = tpu.memref_slice %arg6[%c34_i32_103, %c0_i32_104] : memref<128x256xf32, #tpu.memory_space<vmem>> -> memref<1x256xf32, #tpu.memory_space<vmem>>
    tpu.enqueue_dma source(%453 : memref<1x256xf32, #tpu.memory_space<any>>) target(%454 : memref<1x256xf32, #tpu.memory_space<vmem>>) target_semaphore(%arg7 : memref<!tpu.dma_semaphore, #tpu.memory_space<semaphore_mem>>)
    %c0_i32_105 = arith.constant 0 : i32
    %455 = tpu.memref_slice %arg2[%108, %c0_i32_105] : memref<10000x256xf32, #tpu.memory_space<any>> -> memref<1x256xf32, #tpu.memory_space<any>>
    %c35_i32_106 = arith.constant 35 : i32
    %c0_i32_107 = arith.constant 0 : i32
    %456 = tpu.memref_slice %arg6[%c35_i32_106, %c0_i32_107] : memref<128x256xf32, #tpu.memory_space<vmem>> -> memref<1x256xf32, #tpu.memory_space<vmem>>
    tpu.enqueue_dma source(%455 : memref<1x256xf32, #tpu.memory_space<any>>) target(%456 : memref<1x256xf32, #tpu.memory_space<vmem>>) target_semaphore(%arg7 : memref<!tpu.dma_semaphore, #tpu.memory_space<semaphore_mem>>)
    %c0_i32_108 = arith.constant 0 : i32
    %457 = tpu.memref_slice %arg2[%111, %c0_i32_108] : memref<10000x256xf32, #tpu.memory_space<any>> -> memref<1x256xf32, #tpu.memory_space<any>>
    %c36_i32_109 = arith.constant 36 : i32
    %c0_i32_110 = arith.constant 0 : i32
    %458 = tpu.memref_slice %arg6[%c36_i32_109, %c0_i32_110] : memref<128x256xf32, #tpu.memory_space<vmem>> -> memref<1x256xf32, #tpu.memory_space<vmem>>
    tpu.enqueue_dma source(%457 : memref<1x256xf32, #tpu.memory_space<any>>) target(%458 : memref<1x256xf32, #tpu.memory_space<vmem>>) target_semaphore(%arg7 : memref<!tpu.dma_semaphore, #tpu.memory_space<semaphore_mem>>)
    %c0_i32_111 = arith.constant 0 : i32
    %459 = tpu.memref_slice %arg2[%114, %c0_i32_111] : memref<10000x256xf32, #tpu.memory_space<any>> -> memref<1x256xf32, #tpu.memory_space<any>>
    %c37_i32_112 = arith.constant 37 : i32
    %c0_i32_113 = arith.constant 0 : i32
    %460 = tpu.memref_slice %arg6[%c37_i32_112, %c0_i32_113] : memref<128x256xf32, #tpu.memory_space<vmem>> -> memref<1x256xf32, #tpu.memory_space<vmem>>
    tpu.enqueue_dma source(%459 : memref<1x256xf32, #tpu.memory_space<any>>) target(%460 : memref<1x256xf32, #tpu.memory_space<vmem>>) target_semaphore(%arg7 : memref<!tpu.dma_semaphore, #tpu.memory_space<semaphore_mem>>)
    %c0_i32_114 = arith.constant 0 : i32
    %461 = tpu.memref_slice %arg2[%117, %c0_i32_114] : memref<10000x256xf32, #tpu.memory_space<any>> -> memref<1x256xf32, #tpu.memory_space<any>>
    %c38_i32_115 = arith.constant 38 : i32
    %c0_i32_116 = arith.constant 0 : i32
    %462 = tpu.memref_slice %arg6[%c38_i32_115, %c0_i32_116] : memref<128x256xf32, #tpu.memory_space<vmem>> -> memref<1x256xf32, #tpu.memory_space<vmem>>
    tpu.enqueue_dma source(%461 : memref<1x256xf32, #tpu.memory_space<any>>) target(%462 : memref<1x256xf32, #tpu.memory_space<vmem>>) target_semaphore(%arg7 : memref<!tpu.dma_semaphore, #tpu.memory_space<semaphore_mem>>)
    %c0_i32_117 = arith.constant 0 : i32
    %463 = tpu.memref_slice %arg2[%120, %c0_i32_117] : memref<10000x256xf32, #tpu.memory_space<any>> -> memref<1x256xf32, #tpu.memory_space<any>>
    %c39_i32_118 = arith.constant 39 : i32
    %c0_i32_119 = arith.constant 0 : i32
    %464 = tpu.memref_slice %arg6[%c39_i32_118, %c0_i32_119] : memref<128x256xf32, #tpu.memory_space<vmem>> -> memref<1x256xf32, #tpu.memory_space<vmem>>
    tpu.enqueue_dma source(%463 : memref<1x256xf32, #tpu.memory_space<any>>) target(%464 : memref<1x256xf32, #tpu.memory_space<vmem>>) target_semaphore(%arg7 : memref<!tpu.dma_semaphore, #tpu.memory_space<semaphore_mem>>)
    %c0_i32_120 = arith.constant 0 : i32
    %465 = tpu.memref_slice %arg2[%123, %c0_i32_120] : memref<10000x256xf32, #tpu.memory_space<any>> -> memref<1x256xf32, #tpu.memory_space<any>>
    %c40_i32_121 = arith.constant 40 : i32
    %c0_i32_122 = arith.constant 0 : i32
    %466 = tpu.memref_slice %arg6[%c40_i32_121, %c0_i32_122] : memref<128x256xf32, #tpu.memory_space<vmem>> -> memref<1x256xf32, #tpu.memory_space<vmem>>
    tpu.enqueue_dma source(%465 : memref<1x256xf32, #tpu.memory_space<any>>) target(%466 : memref<1x256xf32, #tpu.memory_space<vmem>>) target_semaphore(%arg7 : memref<!tpu.dma_semaphore, #tpu.memory_space<semaphore_mem>>)
    %c0_i32_123 = arith.constant 0 : i32
    %467 = tpu.memref_slice %arg2[%126, %c0_i32_123] : memref<10000x256xf32, #tpu.memory_space<any>> -> memref<1x256xf32, #tpu.memory_space<any>>
    %c41_i32_124 = arith.constant 41 : i32
    %c0_i32_125 = arith.constant 0 : i32
    %468 = tpu.memref_slice %arg6[%c41_i32_124, %c0_i32_125] : memref<128x256xf32, #tpu.memory_space<vmem>> -> memref<1x256xf32, #tpu.memory_space<vmem>>
    tpu.enqueue_dma source(%467 : memref<1x256xf32, #tpu.memory_space<any>>) target(%468 : memref<1x256xf32, #tpu.memory_space<vmem>>) target_semaphore(%arg7 : memref<!tpu.dma_semaphore, #tpu.memory_space<semaphore_mem>>)
    %c0_i32_126 = arith.constant 0 : i32
    %469 = tpu.memref_slice %arg2[%129, %c0_i32_126] : memref<10000x256xf32, #tpu.memory_space<any>> -> memref<1x256xf32, #tpu.memory_space<any>>
    %c42_i32_127 = arith.constant 42 : i32
    %c0_i32_128 = arith.constant 0 : i32
    %470 = tpu.memref_slice %arg6[%c42_i32_127, %c0_i32_128] : memref<128x256xf32, #tpu.memory_space<vmem>> -> memref<1x256xf32, #tpu.memory_space<vmem>>
    tpu.enqueue_dma source(%469 : memref<1x256xf32, #tpu.memory_space<any>>) target(%470 : memref<1x256xf32, #tpu.memory_space<vmem>>) target_semaphore(%arg7 : memref<!tpu.dma_semaphore, #tpu.memory_space<semaphore_mem>>)
    %c0_i32_129 = arith.constant 0 : i32
    %471 = tpu.memref_slice %arg2[%132, %c0_i32_129] : memref<10000x256xf32, #tpu.memory_space<any>> -> memref<1x256xf32, #tpu.memory_space<any>>
    %c43_i32_130 = arith.constant 43 : i32
    %c0_i32_131 = arith.constant 0 : i32
    %472 = tpu.memref_slice %arg6[%c43_i32_130, %c0_i32_131] : memref<128x256xf32, #tpu.memory_space<vmem>> -> memref<1x256xf32, #tpu.memory_space<vmem>>
    tpu.enqueue_dma source(%471 : memref<1x256xf32, #tpu.memory_space<any>>) target(%472 : memref<1x256xf32, #tpu.memory_space<vmem>>) target_semaphore(%arg7 : memref<!tpu.dma_semaphore, #tpu.memory_space<semaphore_mem>>)
    %c0_i32_132 = arith.constant 0 : i32
    %473 = tpu.memref_slice %arg2[%135, %c0_i32_132] : memref<10000x256xf32, #tpu.memory_space<any>> -> memref<1x256xf32, #tpu.memory_space<any>>
    %c44_i32_133 = arith.constant 44 : i32
    %c0_i32_134 = arith.constant 0 : i32
    %474 = tpu.memref_slice %arg6[%c44_i32_133, %c0_i32_134] : memref<128x256xf32, #tpu.memory_space<vmem>> -> memref<1x256xf32, #tpu.memory_space<vmem>>
    tpu.enqueue_dma source(%473 : memref<1x256xf32, #tpu.memory_space<any>>) target(%474 : memref<1x256xf32, #tpu.memory_space<vmem>>) target_semaphore(%arg7 : memref<!tpu.dma_semaphore, #tpu.memory_space<semaphore_mem>>)
    %c0_i32_135 = arith.constant 0 : i32
    %475 = tpu.memref_slice %arg2[%138, %c0_i32_135] : memref<10000x256xf32, #tpu.memory_space<any>> -> memref<1x256xf32, #tpu.memory_space<any>>
    %c45_i32_136 = arith.constant 45 : i32
    %c0_i32_137 = arith.constant 0 : i32
    %476 = tpu.memref_slice %arg6[%c45_i32_136, %c0_i32_137] : memref<128x256xf32, #tpu.memory_space<vmem>> -> memref<1x256xf32, #tpu.memory_space<vmem>>
    tpu.enqueue_dma source(%475 : memref<1x256xf32, #tpu.memory_space<any>>) target(%476 : memref<1x256xf32, #tpu.memory_space<vmem>>) target_semaphore(%arg7 : memref<!tpu.dma_semaphore, #tpu.memory_space<semaphore_mem>>)
    %c0_i32_138 = arith.constant 0 : i32
    %477 = tpu.memref_slice %arg2[%141, %c0_i32_138] : memref<10000x256xf32, #tpu.memory_space<any>> -> memref<1x256xf32, #tpu.memory_space<any>>
    %c46_i32_139 = arith.constant 46 : i32
    %c0_i32_140 = arith.constant 0 : i32
    %478 = tpu.memref_slice %arg6[%c46_i32_139, %c0_i32_140] : memref<128x256xf32, #tpu.memory_space<vmem>> -> memref<1x256xf32, #tpu.memory_space<vmem>>
    tpu.enqueue_dma source(%477 : memref<1x256xf32, #tpu.memory_space<any>>) target(%478 : memref<1x256xf32, #tpu.memory_space<vmem>>) target_semaphore(%arg7 : memref<!tpu.dma_semaphore, #tpu.memory_space<semaphore_mem>>)
    %c0_i32_141 = arith.constant 0 : i32
    %479 = tpu.memref_slice %arg2[%144, %c0_i32_141] : memref<10000x256xf32, #tpu.memory_space<any>> -> memref<1x256xf32, #tpu.memory_space<any>>
    %c47_i32_142 = arith.constant 47 : i32
    %c0_i32_143 = arith.constant 0 : i32
    %480 = tpu.memref_slice %arg6[%c47_i32_142, %c0_i32_143] : memref<128x256xf32, #tpu.memory_space<vmem>> -> memref<1x256xf32, #tpu.memory_space<vmem>>
    tpu.enqueue_dma source(%479 : memref<1x256xf32, #tpu.memory_space<any>>) target(%480 : memref<1x256xf32, #tpu.memory_space<vmem>>) target_semaphore(%arg7 : memref<!tpu.dma_semaphore, #tpu.memory_space<semaphore_mem>>)
    %c0_i32_144 = arith.constant 0 : i32
    %481 = tpu.memref_slice %arg2[%147, %c0_i32_144] : memref<10000x256xf32, #tpu.memory_space<any>> -> memref<1x256xf32, #tpu.memory_space<any>>
    %c48_i32_145 = arith.constant 48 : i32
    %c0_i32_146 = arith.constant 0 : i32
    %482 = tpu.memref_slice %arg6[%c48_i32_145, %c0_i32_146] : memref<128x256xf32, #tpu.memory_space<vmem>> -> memref<1x256xf32, #tpu.memory_space<vmem>>
    tpu.enqueue_dma source(%481 : memref<1x256xf32, #tpu.memory_space<any>>) target(%482 : memref<1x256xf32, #tpu.memory_space<vmem>>) target_semaphore(%arg7 : memref<!tpu.dma_semaphore, #tpu.memory_space<semaphore_mem>>)
    %c0_i32_147 = arith.constant 0 : i32
    %483 = tpu.memref_slice %arg2[%150, %c0_i32_147] : memref<10000x256xf32, #tpu.memory_space<any>> -> memref<1x256xf32, #tpu.memory_space<any>>
    %c49_i32_148 = arith.constant 49 : i32
    %c0_i32_149 = arith.constant 0 : i32
    %484 = tpu.memref_slice %arg6[%c49_i32_148, %c0_i32_149] : memref<128x256xf32, #tpu.memory_space<vmem>> -> memref<1x256xf32, #tpu.memory_space<vmem>>
    tpu.enqueue_dma source(%483 : memref<1x256xf32, #tpu.memory_space<any>>) target(%484 : memref<1x256xf32, #tpu.memory_space<vmem>>) target_semaphore(%arg7 : memref<!tpu.dma_semaphore, #tpu.memory_space<semaphore_mem>>)
    %c0_i32_150 = arith.constant 0 : i32
    %485 = tpu.memref_slice %arg2[%153, %c0_i32_150] : memref<10000x256xf32, #tpu.memory_space<any>> -> memref<1x256xf32, #tpu.memory_space<any>>
    %c50_i32_151 = arith.constant 50 : i32
    %c0_i32_152 = arith.constant 0 : i32
    %486 = tpu.memref_slice %arg6[%c50_i32_151, %c0_i32_152] : memref<128x256xf32, #tpu.memory_space<vmem>> -> memref<1x256xf32, #tpu.memory_space<vmem>>
    tpu.enqueue_dma source(%485 : memref<1x256xf32, #tpu.memory_space<any>>) target(%486 : memref<1x256xf32, #tpu.memory_space<vmem>>) target_semaphore(%arg7 : memref<!tpu.dma_semaphore, #tpu.memory_space<semaphore_mem>>)
    %c0_i32_153 = arith.constant 0 : i32
    %487 = tpu.memref_slice %arg2[%156, %c0_i32_153] : memref<10000x256xf32, #tpu.memory_space<any>> -> memref<1x256xf32, #tpu.memory_space<any>>
    %c51_i32_154 = arith.constant 51 : i32
    %c0_i32_155 = arith.constant 0 : i32
    %488 = tpu.memref_slice %arg6[%c51_i32_154, %c0_i32_155] : memref<128x256xf32, #tpu.memory_space<vmem>> -> memref<1x256xf32, #tpu.memory_space<vmem>>
    tpu.enqueue_dma source(%487 : memref<1x256xf32, #tpu.memory_space<any>>) target(%488 : memref<1x256xf32, #tpu.memory_space<vmem>>) target_semaphore(%arg7 : memref<!tpu.dma_semaphore, #tpu.memory_space<semaphore_mem>>)
    %c0_i32_156 = arith.constant 0 : i32
    %489 = tpu.memref_slice %arg2[%159, %c0_i32_156] : memref<10000x256xf32, #tpu.memory_space<any>> -> memref<1x256xf32, #tpu.memory_space<any>>
    %c52_i32_157 = arith.constant 52 : i32
    %c0_i32_158 = arith.constant 0 : i32
    %490 = tpu.memref_slice %arg6[%c52_i32_157, %c0_i32_158] : memref<128x256xf32, #tpu.memory_space<vmem>> -> memref<1x256xf32, #tpu.memory_space<vmem>>
    tpu.enqueue_dma source(%489 : memref<1x256xf32, #tpu.memory_space<any>>) target(%490 : memref<1x256xf32, #tpu.memory_space<vmem>>) target_semaphore(%arg7 : memref<!tpu.dma_semaphore, #tpu.memory_space<semaphore_mem>>)
    %c0_i32_159 = arith.constant 0 : i32
    %491 = tpu.memref_slice %arg2[%162, %c0_i32_159] : memref<10000x256xf32, #tpu.memory_space<any>> -> memref<1x256xf32, #tpu.memory_space<any>>
    %c53_i32_160 = arith.constant 53 : i32
    %c0_i32_161 = arith.constant 0 : i32
    %492 = tpu.memref_slice %arg6[%c53_i32_160, %c0_i32_161] : memref<128x256xf32, #tpu.memory_space<vmem>> -> memref<1x256xf32, #tpu.memory_space<vmem>>
    tpu.enqueue_dma source(%491 : memref<1x256xf32, #tpu.memory_space<any>>) target(%492 : memref<1x256xf32, #tpu.memory_space<vmem>>) target_semaphore(%arg7 : memref<!tpu.dma_semaphore, #tpu.memory_space<semaphore_mem>>)
    %c0_i32_162 = arith.constant 0 : i32
    %493 = tpu.memref_slice %arg2[%165, %c0_i32_162] : memref<10000x256xf32, #tpu.memory_space<any>> -> memref<1x256xf32, #tpu.memory_space<any>>
    %c54_i32_163 = arith.constant 54 : i32
    %c0_i32_164 = arith.constant 0 : i32
    %494 = tpu.memref_slice %arg6[%c54_i32_163, %c0_i32_164] : memref<128x256xf32, #tpu.memory_space<vmem>> -> memref<1x256xf32, #tpu.memory_space<vmem>>
    tpu.enqueue_dma source(%493 : memref<1x256xf32, #tpu.memory_space<any>>) target(%494 : memref<1x256xf32, #tpu.memory_space<vmem>>) target_semaphore(%arg7 : memref<!tpu.dma_semaphore, #tpu.memory_space<semaphore_mem>>)
    %c0_i32_165 = arith.constant 0 : i32
    %495 = tpu.memref_slice %arg2[%168, %c0_i32_165] : memref<10000x256xf32, #tpu.memory_space<any>> -> memref<1x256xf32, #tpu.memory_space<any>>
    %c55_i32_166 = arith.constant 55 : i32
    %c0_i32_167 = arith.constant 0 : i32
    %496 = tpu.memref_slice %arg6[%c55_i32_166, %c0_i32_167] : memref<128x256xf32, #tpu.memory_space<vmem>> -> memref<1x256xf32, #tpu.memory_space<vmem>>
    tpu.enqueue_dma source(%495 : memref<1x256xf32, #tpu.memory_space<any>>) target(%496 : memref<1x256xf32, #tpu.memory_space<vmem>>) target_semaphore(%arg7 : memref<!tpu.dma_semaphore, #tpu.memory_space<semaphore_mem>>)
    %c0_i32_168 = arith.constant 0 : i32
    %497 = tpu.memref_slice %arg2[%171, %c0_i32_168] : memref<10000x256xf32, #tpu.memory_space<any>> -> memref<1x256xf32, #tpu.memory_space<any>>
    %c56_i32_169 = arith.constant 56 : i32
    %c0_i32_170 = arith.constant 0 : i32
    %498 = tpu.memref_slice %arg6[%c56_i32_169, %c0_i32_170] : memref<128x256xf32, #tpu.memory_space<vmem>> -> memref<1x256xf32, #tpu.memory_space<vmem>>
    tpu.enqueue_dma source(%497 : memref<1x256xf32, #tpu.memory_space<any>>) target(%498 : memref<1x256xf32, #tpu.memory_space<vmem>>) target_semaphore(%arg7 : memref<!tpu.dma_semaphore, #tpu.memory_space<semaphore_mem>>)
    %c0_i32_171 = arith.constant 0 : i32
    %499 = tpu.memref_slice %arg2[%174, %c0_i32_171] : memref<10000x256xf32, #tpu.memory_space<any>> -> memref<1x256xf32, #tpu.memory_space<any>>
    %c57_i32_172 = arith.constant 57 : i32
    %c0_i32_173 = arith.constant 0 : i32
    %500 = tpu.memref_slice %arg6[%c57_i32_172, %c0_i32_173] : memref<128x256xf32, #tpu.memory_space<vmem>> -> memref<1x256xf32, #tpu.memory_space<vmem>>
    tpu.enqueue_dma source(%499 : memref<1x256xf32, #tpu.memory_space<any>>) target(%500 : memref<1x256xf32, #tpu.memory_space<vmem>>) target_semaphore(%arg7 : memref<!tpu.dma_semaphore, #tpu.memory_space<semaphore_mem>>)
    %c0_i32_174 = arith.constant 0 : i32
    %501 = tpu.memref_slice %arg2[%177, %c0_i32_174] : memref<10000x256xf32, #tpu.memory_space<any>> -> memref<1x256xf32, #tpu.memory_space<any>>
    %c58_i32_175 = arith.constant 58 : i32
    %c0_i32_176 = arith.constant 0 : i32
    %502 = tpu.memref_slice %arg6[%c58_i32_175, %c0_i32_176] : memref<128x256xf32, #tpu.memory_space<vmem>> -> memref<1x256xf32, #tpu.memory_space<vmem>>
    tpu.enqueue_dma source(%501 : memref<1x256xf32, #tpu.memory_space<any>>) target(%502 : memref<1x256xf32, #tpu.memory_space<vmem>>) target_semaphore(%arg7 : memref<!tpu.dma_semaphore, #tpu.memory_space<semaphore_mem>>)
    %c0_i32_177 = arith.constant 0 : i32
    %503 = tpu.memref_slice %arg2[%180, %c0_i32_177] : memref<10000x256xf32, #tpu.memory_space<any>> -> memref<1x256xf32, #tpu.memory_space<any>>
    %c59_i32_178 = arith.constant 59 : i32
    %c0_i32_179 = arith.constant 0 : i32
    %504 = tpu.memref_slice %arg6[%c59_i32_178, %c0_i32_179] : memref<128x256xf32, #tpu.memory_space<vmem>> -> memref<1x256xf32, #tpu.memory_space<vmem>>
    tpu.enqueue_dma source(%503 : memref<1x256xf32, #tpu.memory_space<any>>) target(%504 : memref<1x256xf32, #tpu.memory_space<vmem>>) target_semaphore(%arg7 : memref<!tpu.dma_semaphore, #tpu.memory_space<semaphore_mem>>)
    %c0_i32_180 = arith.constant 0 : i32
    %505 = tpu.memref_slice %arg2[%183, %c0_i32_180] : memref<10000x256xf32, #tpu.memory_space<any>> -> memref<1x256xf32, #tpu.memory_space<any>>
    %c60_i32_181 = arith.constant 60 : i32
    %c0_i32_182 = arith.constant 0 : i32
    %506 = tpu.memref_slice %arg6[%c60_i32_181, %c0_i32_182] : memref<128x256xf32, #tpu.memory_space<vmem>> -> memref<1x256xf32, #tpu.memory_space<vmem>>
    tpu.enqueue_dma source(%505 : memref<1x256xf32, #tpu.memory_space<any>>) target(%506 : memref<1x256xf32, #tpu.memory_space<vmem>>) target_semaphore(%arg7 : memref<!tpu.dma_semaphore, #tpu.memory_space<semaphore_mem>>)
    %c0_i32_183 = arith.constant 0 : i32
    %507 = tpu.memref_slice %arg2[%186, %c0_i32_183] : memref<10000x256xf32, #tpu.memory_space<any>> -> memref<1x256xf32, #tpu.memory_space<any>>
    %c61_i32_184 = arith.constant 61 : i32
    %c0_i32_185 = arith.constant 0 : i32
    %508 = tpu.memref_slice %arg6[%c61_i32_184, %c0_i32_185] : memref<128x256xf32, #tpu.memory_space<vmem>> -> memref<1x256xf32, #tpu.memory_space<vmem>>
    tpu.enqueue_dma source(%507 : memref<1x256xf32, #tpu.memory_space<any>>) target(%508 : memref<1x256xf32, #tpu.memory_space<vmem>>) target_semaphore(%arg7 : memref<!tpu.dma_semaphore, #tpu.memory_space<semaphore_mem>>)
    %c0_i32_186 = arith.constant 0 : i32
    %509 = tpu.memref_slice %arg2[%189, %c0_i32_186] : memref<10000x256xf32, #tpu.memory_space<any>> -> memref<1x256xf32, #tpu.memory_space<any>>
    %c62_i32_187 = arith.constant 62 : i32
    %c0_i32_188 = arith.constant 0 : i32
    %510 = tpu.memref_slice %arg6[%c62_i32_187, %c0_i32_188] : memref<128x256xf32, #tpu.memory_space<vmem>> -> memref<1x256xf32, #tpu.memory_space<vmem>>
    tpu.enqueue_dma source(%509 : memref<1x256xf32, #tpu.memory_space<any>>) target(%510 : memref<1x256xf32, #tpu.memory_space<vmem>>) target_semaphore(%arg7 : memref<!tpu.dma_semaphore, #tpu.memory_space<semaphore_mem>>)
    %c0_i32_189 = arith.constant 0 : i32
    %511 = tpu.memref_slice %arg2[%192, %c0_i32_189] : memref<10000x256xf32, #tpu.memory_space<any>> -> memref<1x256xf32, #tpu.memory_space<any>>
    %c63_i32_190 = arith.constant 63 : i32
    %c0_i32_191 = arith.constant 0 : i32
    %512 = tpu.memref_slice %arg6[%c63_i32_190, %c0_i32_191] : memref<128x256xf32, #tpu.memory_space<vmem>> -> memref<1x256xf32, #tpu.memory_space<vmem>>
    tpu.enqueue_dma source(%511 : memref<1x256xf32, #tpu.memory_space<any>>) target(%512 : memref<1x256xf32, #tpu.memory_space<vmem>>) target_semaphore(%arg7 : memref<!tpu.dma_semaphore, #tpu.memory_space<semaphore_mem>>)
    %c0_i32_192 = arith.constant 0 : i32
    %513 = tpu.memref_slice %arg2[%195, %c0_i32_192] : memref<10000x256xf32, #tpu.memory_space<any>> -> memref<1x256xf32, #tpu.memory_space<any>>
    %c64_i32_193 = arith.constant 64 : i32
    %c0_i32_194 = arith.constant 0 : i32
    %514 = tpu.memref_slice %arg6[%c64_i32_193, %c0_i32_194] : memref<128x256xf32, #tpu.memory_space<vmem>> -> memref<1x256xf32, #tpu.memory_space<vmem>>
    tpu.enqueue_dma source(%513 : memref<1x256xf32, #tpu.memory_space<any>>) target(%514 : memref<1x256xf32, #tpu.memory_space<vmem>>) target_semaphore(%arg7 : memref<!tpu.dma_semaphore, #tpu.memory_space<semaphore_mem>>)
    %c0_i32_195 = arith.constant 0 : i32
    %515 = tpu.memref_slice %arg2[%198, %c0_i32_195] : memref<10000x256xf32, #tpu.memory_space<any>> -> memref<1x256xf32, #tpu.memory_space<any>>
    %c65_i32_196 = arith.constant 65 : i32
    %c0_i32_197 = arith.constant 0 : i32
    %516 = tpu.memref_slice %arg6[%c65_i32_196, %c0_i32_197] : memref<128x256xf32, #tpu.memory_space<vmem>> -> memref<1x256xf32, #tpu.memory_space<vmem>>
    tpu.enqueue_dma source(%515 : memref<1x256xf32, #tpu.memory_space<any>>) target(%516 : memref<1x256xf32, #tpu.memory_space<vmem>>) target_semaphore(%arg7 : memref<!tpu.dma_semaphore, #tpu.memory_space<semaphore_mem>>)
    %c0_i32_198 = arith.constant 0 : i32
    %517 = tpu.memref_slice %arg2[%201, %c0_i32_198] : memref<10000x256xf32, #tpu.memory_space<any>> -> memref<1x256xf32, #tpu.memory_space<any>>
    %c66_i32_199 = arith.constant 66 : i32
    %c0_i32_200 = arith.constant 0 : i32
    %518 = tpu.memref_slice %arg6[%c66_i32_199, %c0_i32_200] : memref<128x256xf32, #tpu.memory_space<vmem>> -> memref<1x256xf32, #tpu.memory_space<vmem>>
    tpu.enqueue_dma source(%517 : memref<1x256xf32, #tpu.memory_space<any>>) target(%518 : memref<1x256xf32, #tpu.memory_space<vmem>>) target_semaphore(%arg7 : memref<!tpu.dma_semaphore, #tpu.memory_space<semaphore_mem>>)
    %c0_i32_201 = arith.constant 0 : i32
    %519 = tpu.memref_slice %arg2[%204, %c0_i32_201] : memref<10000x256xf32, #tpu.memory_space<any>> -> memref<1x256xf32, #tpu.memory_space<any>>
    %c67_i32_202 = arith.constant 67 : i32
    %c0_i32_203 = arith.constant 0 : i32
    %520 = tpu.memref_slice %arg6[%c67_i32_202, %c0_i32_203] : memref<128x256xf32, #tpu.memory_space<vmem>> -> memref<1x256xf32, #tpu.memory_space<vmem>>
    tpu.enqueue_dma source(%519 : memref<1x256xf32, #tpu.memory_space<any>>) target(%520 : memref<1x256xf32, #tpu.memory_space<vmem>>) target_semaphore(%arg7 : memref<!tpu.dma_semaphore, #tpu.memory_space<semaphore_mem>>)
    %c0_i32_204 = arith.constant 0 : i32
    %521 = tpu.memref_slice %arg2[%207, %c0_i32_204] : memref<10000x256xf32, #tpu.memory_space<any>> -> memref<1x256xf32, #tpu.memory_space<any>>
    %c68_i32_205 = arith.constant 68 : i32
    %c0_i32_206 = arith.constant 0 : i32
    %522 = tpu.memref_slice %arg6[%c68_i32_205, %c0_i32_206] : memref<128x256xf32, #tpu.memory_space<vmem>> -> memref<1x256xf32, #tpu.memory_space<vmem>>
    tpu.enqueue_dma source(%521 : memref<1x256xf32, #tpu.memory_space<any>>) target(%522 : memref<1x256xf32, #tpu.memory_space<vmem>>) target_semaphore(%arg7 : memref<!tpu.dma_semaphore, #tpu.memory_space<semaphore_mem>>)
    %c0_i32_207 = arith.constant 0 : i32
    %523 = tpu.memref_slice %arg2[%210, %c0_i32_207] : memref<10000x256xf32, #tpu.memory_space<any>> -> memref<1x256xf32, #tpu.memory_space<any>>
    %c69_i32_208 = arith.constant 69 : i32
    %c0_i32_209 = arith.constant 0 : i32
    %524 = tpu.memref_slice %arg6[%c69_i32_208, %c0_i32_209] : memref<128x256xf32, #tpu.memory_space<vmem>> -> memref<1x256xf32, #tpu.memory_space<vmem>>
    tpu.enqueue_dma source(%523 : memref<1x256xf32, #tpu.memory_space<any>>) target(%524 : memref<1x256xf32, #tpu.memory_space<vmem>>) target_semaphore(%arg7 : memref<!tpu.dma_semaphore, #tpu.memory_space<semaphore_mem>>)
    %c0_i32_210 = arith.constant 0 : i32
    %525 = tpu.memref_slice %arg2[%213, %c0_i32_210] : memref<10000x256xf32, #tpu.memory_space<any>> -> memref<1x256xf32, #tpu.memory_space<any>>
    %c70_i32_211 = arith.constant 70 : i32
    %c0_i32_212 = arith.constant 0 : i32
    %526 = tpu.memref_slice %arg6[%c70_i32_211, %c0_i32_212] : memref<128x256xf32, #tpu.memory_space<vmem>> -> memref<1x256xf32, #tpu.memory_space<vmem>>
    tpu.enqueue_dma source(%525 : memref<1x256xf32, #tpu.memory_space<any>>) target(%526 : memref<1x256xf32, #tpu.memory_space<vmem>>) target_semaphore(%arg7 : memref<!tpu.dma_semaphore, #tpu.memory_space<semaphore_mem>>)
    %c0_i32_213 = arith.constant 0 : i32
    %527 = tpu.memref_slice %arg2[%216, %c0_i32_213] : memref<10000x256xf32, #tpu.memory_space<any>> -> memref<1x256xf32, #tpu.memory_space<any>>
    %c71_i32_214 = arith.constant 71 : i32
    %c0_i32_215 = arith.constant 0 : i32
    %528 = tpu.memref_slice %arg6[%c71_i32_214, %c0_i32_215] : memref<128x256xf32, #tpu.memory_space<vmem>> -> memref<1x256xf32, #tpu.memory_space<vmem>>
    tpu.enqueue_dma source(%527 : memref<1x256xf32, #tpu.memory_space<any>>) target(%528 : memref<1x256xf32, #tpu.memory_space<vmem>>) target_semaphore(%arg7 : memref<!tpu.dma_semaphore, #tpu.memory_space<semaphore_mem>>)
    %c0_i32_216 = arith.constant 0 : i32
    %529 = tpu.memref_slice %arg2[%219, %c0_i32_216] : memref<10000x256xf32, #tpu.memory_space<any>> -> memref<1x256xf32, #tpu.memory_space<any>>
    %c72_i32_217 = arith.constant 72 : i32
    %c0_i32_218 = arith.constant 0 : i32
    %530 = tpu.memref_slice %arg6[%c72_i32_217, %c0_i32_218] : memref<128x256xf32, #tpu.memory_space<vmem>> -> memref<1x256xf32, #tpu.memory_space<vmem>>
    tpu.enqueue_dma source(%529 : memref<1x256xf32, #tpu.memory_space<any>>) target(%530 : memref<1x256xf32, #tpu.memory_space<vmem>>) target_semaphore(%arg7 : memref<!tpu.dma_semaphore, #tpu.memory_space<semaphore_mem>>)
    %c0_i32_219 = arith.constant 0 : i32
    %531 = tpu.memref_slice %arg2[%222, %c0_i32_219] : memref<10000x256xf32, #tpu.memory_space<any>> -> memref<1x256xf32, #tpu.memory_space<any>>
    %c73_i32_220 = arith.constant 73 : i32
    %c0_i32_221 = arith.constant 0 : i32
    %532 = tpu.memref_slice %arg6[%c73_i32_220, %c0_i32_221] : memref<128x256xf32, #tpu.memory_space<vmem>> -> memref<1x256xf32, #tpu.memory_space<vmem>>
    tpu.enqueue_dma source(%531 : memref<1x256xf32, #tpu.memory_space<any>>) target(%532 : memref<1x256xf32, #tpu.memory_space<vmem>>) target_semaphore(%arg7 : memref<!tpu.dma_semaphore, #tpu.memory_space<semaphore_mem>>)
    %c0_i32_222 = arith.constant 0 : i32
    %533 = tpu.memref_slice %arg2[%225, %c0_i32_222] : memref<10000x256xf32, #tpu.memory_space<any>> -> memref<1x256xf32, #tpu.memory_space<any>>
    %c74_i32_223 = arith.constant 74 : i32
    %c0_i32_224 = arith.constant 0 : i32
    %534 = tpu.memref_slice %arg6[%c74_i32_223, %c0_i32_224] : memref<128x256xf32, #tpu.memory_space<vmem>> -> memref<1x256xf32, #tpu.memory_space<vmem>>
    tpu.enqueue_dma source(%533 : memref<1x256xf32, #tpu.memory_space<any>>) target(%534 : memref<1x256xf32, #tpu.memory_space<vmem>>) target_semaphore(%arg7 : memref<!tpu.dma_semaphore, #tpu.memory_space<semaphore_mem>>)
    %c0_i32_225 = arith.constant 0 : i32
    %535 = tpu.memref_slice %arg2[%228, %c0_i32_225] : memref<10000x256xf32, #tpu.memory_space<any>> -> memref<1x256xf32, #tpu.memory_space<any>>
    %c75_i32_226 = arith.constant 75 : i32
    %c0_i32_227 = arith.constant 0 : i32
    %536 = tpu.memref_slice %arg6[%c75_i32_226, %c0_i32_227] : memref<128x256xf32, #tpu.memory_space<vmem>> -> memref<1x256xf32, #tpu.memory_space<vmem>>
    tpu.enqueue_dma source(%535 : memref<1x256xf32, #tpu.memory_space<any>>) target(%536 : memref<1x256xf32, #tpu.memory_space<vmem>>) target_semaphore(%arg7 : memref<!tpu.dma_semaphore, #tpu.memory_space<semaphore_mem>>)
    %c0_i32_228 = arith.constant 0 : i32
    %537 = tpu.memref_slice %arg2[%231, %c0_i32_228] : memref<10000x256xf32, #tpu.memory_space<any>> -> memref<1x256xf32, #tpu.memory_space<any>>
    %c76_i32_229 = arith.constant 76 : i32
    %c0_i32_230 = arith.constant 0 : i32
    %538 = tpu.memref_slice %arg6[%c76_i32_229, %c0_i32_230] : memref<128x256xf32, #tpu.memory_space<vmem>> -> memref<1x256xf32, #tpu.memory_space<vmem>>
    tpu.enqueue_dma source(%537 : memref<1x256xf32, #tpu.memory_space<any>>) target(%538 : memref<1x256xf32, #tpu.memory_space<vmem>>) target_semaphore(%arg7 : memref<!tpu.dma_semaphore, #tpu.memory_space<semaphore_mem>>)
    %c0_i32_231 = arith.constant 0 : i32
    %539 = tpu.memref_slice %arg2[%234, %c0_i32_231] : memref<10000x256xf32, #tpu.memory_space<any>> -> memref<1x256xf32, #tpu.memory_space<any>>
    %c77_i32_232 = arith.constant 77 : i32
    %c0_i32_233 = arith.constant 0 : i32
    %540 = tpu.memref_slice %arg6[%c77_i32_232, %c0_i32_233] : memref<128x256xf32, #tpu.memory_space<vmem>> -> memref<1x256xf32, #tpu.memory_space<vmem>>
    tpu.enqueue_dma source(%539 : memref<1x256xf32, #tpu.memory_space<any>>) target(%540 : memref<1x256xf32, #tpu.memory_space<vmem>>) target_semaphore(%arg7 : memref<!tpu.dma_semaphore, #tpu.memory_space<semaphore_mem>>)
    %c0_i32_234 = arith.constant 0 : i32
    %541 = tpu.memref_slice %arg2[%237, %c0_i32_234] : memref<10000x256xf32, #tpu.memory_space<any>> -> memref<1x256xf32, #tpu.memory_space<any>>
    %c78_i32_235 = arith.constant 78 : i32
    %c0_i32_236 = arith.constant 0 : i32
    %542 = tpu.memref_slice %arg6[%c78_i32_235, %c0_i32_236] : memref<128x256xf32, #tpu.memory_space<vmem>> -> memref<1x256xf32, #tpu.memory_space<vmem>>
    tpu.enqueue_dma source(%541 : memref<1x256xf32, #tpu.memory_space<any>>) target(%542 : memref<1x256xf32, #tpu.memory_space<vmem>>) target_semaphore(%arg7 : memref<!tpu.dma_semaphore, #tpu.memory_space<semaphore_mem>>)
    %c0_i32_237 = arith.constant 0 : i32
    %543 = tpu.memref_slice %arg2[%240, %c0_i32_237] : memref<10000x256xf32, #tpu.memory_space<any>> -> memref<1x256xf32, #tpu.memory_space<any>>
    %c79_i32_238 = arith.constant 79 : i32
    %c0_i32_239 = arith.constant 0 : i32
    %544 = tpu.memref_slice %arg6[%c79_i32_238, %c0_i32_239] : memref<128x256xf32, #tpu.memory_space<vmem>> -> memref<1x256xf32, #tpu.memory_space<vmem>>
    tpu.enqueue_dma source(%543 : memref<1x256xf32, #tpu.memory_space<any>>) target(%544 : memref<1x256xf32, #tpu.memory_space<vmem>>) target_semaphore(%arg7 : memref<!tpu.dma_semaphore, #tpu.memory_space<semaphore_mem>>)
    %c0_i32_240 = arith.constant 0 : i32
    %545 = tpu.memref_slice %arg2[%243, %c0_i32_240] : memref<10000x256xf32, #tpu.memory_space<any>> -> memref<1x256xf32, #tpu.memory_space<any>>
    %c80_i32_241 = arith.constant 80 : i32
    %c0_i32_242 = arith.constant 0 : i32
    %546 = tpu.memref_slice %arg6[%c80_i32_241, %c0_i32_242] : memref<128x256xf32, #tpu.memory_space<vmem>> -> memref<1x256xf32, #tpu.memory_space<vmem>>
    tpu.enqueue_dma source(%545 : memref<1x256xf32, #tpu.memory_space<any>>) target(%546 : memref<1x256xf32, #tpu.memory_space<vmem>>) target_semaphore(%arg7 : memref<!tpu.dma_semaphore, #tpu.memory_space<semaphore_mem>>)
    %c0_i32_243 = arith.constant 0 : i32
    %547 = tpu.memref_slice %arg2[%246, %c0_i32_243] : memref<10000x256xf32, #tpu.memory_space<any>> -> memref<1x256xf32, #tpu.memory_space<any>>
    %c81_i32_244 = arith.constant 81 : i32
    %c0_i32_245 = arith.constant 0 : i32
    %548 = tpu.memref_slice %arg6[%c81_i32_244, %c0_i32_245] : memref<128x256xf32, #tpu.memory_space<vmem>> -> memref<1x256xf32, #tpu.memory_space<vmem>>
    tpu.enqueue_dma source(%547 : memref<1x256xf32, #tpu.memory_space<any>>) target(%548 : memref<1x256xf32, #tpu.memory_space<vmem>>) target_semaphore(%arg7 : memref<!tpu.dma_semaphore, #tpu.memory_space<semaphore_mem>>)
    %c0_i32_246 = arith.constant 0 : i32
    %549 = tpu.memref_slice %arg2[%249, %c0_i32_246] : memref<10000x256xf32, #tpu.memory_space<any>> -> memref<1x256xf32, #tpu.memory_space<any>>
    %c82_i32_247 = arith.constant 82 : i32
    %c0_i32_248 = arith.constant 0 : i32
    %550 = tpu.memref_slice %arg6[%c82_i32_247, %c0_i32_248] : memref<128x256xf32, #tpu.memory_space<vmem>> -> memref<1x256xf32, #tpu.memory_space<vmem>>
    tpu.enqueue_dma source(%549 : memref<1x256xf32, #tpu.memory_space<any>>) target(%550 : memref<1x256xf32, #tpu.memory_space<vmem>>) target_semaphore(%arg7 : memref<!tpu.dma_semaphore, #tpu.memory_space<semaphore_mem>>)
    %c0_i32_249 = arith.constant 0 : i32
    %551 = tpu.memref_slice %arg2[%252, %c0_i32_249] : memref<10000x256xf32, #tpu.memory_space<any>> -> memref<1x256xf32, #tpu.memory_space<any>>
    %c83_i32_250 = arith.constant 83 : i32
    %c0_i32_251 = arith.constant 0 : i32
    %552 = tpu.memref_slice %arg6[%c83_i32_250, %c0_i32_251] : memref<128x256xf32, #tpu.memory_space<vmem>> -> memref<1x256xf32, #tpu.memory_space<vmem>>
    tpu.enqueue_dma source(%551 : memref<1x256xf32, #tpu.memory_space<any>>) target(%552 : memref<1x256xf32, #tpu.memory_space<vmem>>) target_semaphore(%arg7 : memref<!tpu.dma_semaphore, #tpu.memory_space<semaphore_mem>>)
    %c0_i32_252 = arith.constant 0 : i32
    %553 = tpu.memref_slice %arg2[%255, %c0_i32_252] : memref<10000x256xf32, #tpu.memory_space<any>> -> memref<1x256xf32, #tpu.memory_space<any>>
    %c84_i32_253 = arith.constant 84 : i32
    %c0_i32_254 = arith.constant 0 : i32
    %554 = tpu.memref_slice %arg6[%c84_i32_253, %c0_i32_254] : memref<128x256xf32, #tpu.memory_space<vmem>> -> memref<1x256xf32, #tpu.memory_space<vmem>>
    tpu.enqueue_dma source(%553 : memref<1x256xf32, #tpu.memory_space<any>>) target(%554 : memref<1x256xf32, #tpu.memory_space<vmem>>) target_semaphore(%arg7 : memref<!tpu.dma_semaphore, #tpu.memory_space<semaphore_mem>>)
    %c0_i32_255 = arith.constant 0 : i32
    %555 = tpu.memref_slice %arg2[%258, %c0_i32_255] : memref<10000x256xf32, #tpu.memory_space<any>> -> memref<1x256xf32, #tpu.memory_space<any>>
    %c85_i32_256 = arith.constant 85 : i32
    %c0_i32_257 = arith.constant 0 : i32
    %556 = tpu.memref_slice %arg6[%c85_i32_256, %c0_i32_257] : memref<128x256xf32, #tpu.memory_space<vmem>> -> memref<1x256xf32, #tpu.memory_space<vmem>>
    tpu.enqueue_dma source(%555 : memref<1x256xf32, #tpu.memory_space<any>>) target(%556 : memref<1x256xf32, #tpu.memory_space<vmem>>) target_semaphore(%arg7 : memref<!tpu.dma_semaphore, #tpu.memory_space<semaphore_mem>>)
    %c0_i32_258 = arith.constant 0 : i32
    %557 = tpu.memref_slice %arg2[%261, %c0_i32_258] : memref<10000x256xf32, #tpu.memory_space<any>> -> memref<1x256xf32, #tpu.memory_space<any>>
    %c86_i32_259 = arith.constant 86 : i32
    %c0_i32_260 = arith.constant 0 : i32
    %558 = tpu.memref_slice %arg6[%c86_i32_259, %c0_i32_260] : memref<128x256xf32, #tpu.memory_space<vmem>> -> memref<1x256xf32, #tpu.memory_space<vmem>>
    tpu.enqueue_dma source(%557 : memref<1x256xf32, #tpu.memory_space<any>>) target(%558 : memref<1x256xf32, #tpu.memory_space<vmem>>) target_semaphore(%arg7 : memref<!tpu.dma_semaphore, #tpu.memory_space<semaphore_mem>>)
    %c0_i32_261 = arith.constant 0 : i32
    %559 = tpu.memref_slice %arg2[%264, %c0_i32_261] : memref<10000x256xf32, #tpu.memory_space<any>> -> memref<1x256xf32, #tpu.memory_space<any>>
    %c87_i32_262 = arith.constant 87 : i32
    %c0_i32_263 = arith.constant 0 : i32
    %560 = tpu.memref_slice %arg6[%c87_i32_262, %c0_i32_263] : memref<128x256xf32, #tpu.memory_space<vmem>> -> memref<1x256xf32, #tpu.memory_space<vmem>>
    tpu.enqueue_dma source(%559 : memref<1x256xf32, #tpu.memory_space<any>>) target(%560 : memref<1x256xf32, #tpu.memory_space<vmem>>) target_semaphore(%arg7 : memref<!tpu.dma_semaphore, #tpu.memory_space<semaphore_mem>>)
    %c0_i32_264 = arith.constant 0 : i32
    %561 = tpu.memref_slice %arg2[%267, %c0_i32_264] : memref<10000x256xf32, #tpu.memory_space<any>> -> memref<1x256xf32, #tpu.memory_space<any>>
    %c88_i32_265 = arith.constant 88 : i32
    %c0_i32_266 = arith.constant 0 : i32
    %562 = tpu.memref_slice %arg6[%c88_i32_265, %c0_i32_266] : memref<128x256xf32, #tpu.memory_space<vmem>> -> memref<1x256xf32, #tpu.memory_space<vmem>>
    tpu.enqueue_dma source(%561 : memref<1x256xf32, #tpu.memory_space<any>>) target(%562 : memref<1x256xf32, #tpu.memory_space<vmem>>) target_semaphore(%arg7 : memref<!tpu.dma_semaphore, #tpu.memory_space<semaphore_mem>>)
    %c0_i32_267 = arith.constant 0 : i32
    %563 = tpu.memref_slice %arg2[%270, %c0_i32_267] : memref<10000x256xf32, #tpu.memory_space<any>> -> memref<1x256xf32, #tpu.memory_space<any>>
    %c89_i32_268 = arith.constant 89 : i32
    %c0_i32_269 = arith.constant 0 : i32
    %564 = tpu.memref_slice %arg6[%c89_i32_268, %c0_i32_269] : memref<128x256xf32, #tpu.memory_space<vmem>> -> memref<1x256xf32, #tpu.memory_space<vmem>>
    tpu.enqueue_dma source(%563 : memref<1x256xf32, #tpu.memory_space<any>>) target(%564 : memref<1x256xf32, #tpu.memory_space<vmem>>) target_semaphore(%arg7 : memref<!tpu.dma_semaphore, #tpu.memory_space<semaphore_mem>>)
    %c0_i32_270 = arith.constant 0 : i32
    %565 = tpu.memref_slice %arg2[%273, %c0_i32_270] : memref<10000x256xf32, #tpu.memory_space<any>> -> memref<1x256xf32, #tpu.memory_space<any>>
    %c90_i32_271 = arith.constant 90 : i32
    %c0_i32_272 = arith.constant 0 : i32
    %566 = tpu.memref_slice %arg6[%c90_i32_271, %c0_i32_272] : memref<128x256xf32, #tpu.memory_space<vmem>> -> memref<1x256xf32, #tpu.memory_space<vmem>>
    tpu.enqueue_dma source(%565 : memref<1x256xf32, #tpu.memory_space<any>>) target(%566 : memref<1x256xf32, #tpu.memory_space<vmem>>) target_semaphore(%arg7 : memref<!tpu.dma_semaphore, #tpu.memory_space<semaphore_mem>>)
    %c0_i32_273 = arith.constant 0 : i32
    %567 = tpu.memref_slice %arg2[%276, %c0_i32_273] : memref<10000x256xf32, #tpu.memory_space<any>> -> memref<1x256xf32, #tpu.memory_space<any>>
    %c91_i32_274 = arith.constant 91 : i32
    %c0_i32_275 = arith.constant 0 : i32
    %568 = tpu.memref_slice %arg6[%c91_i32_274, %c0_i32_275] : memref<128x256xf32, #tpu.memory_space<vmem>> -> memref<1x256xf32, #tpu.memory_space<vmem>>
    tpu.enqueue_dma source(%567 : memref<1x256xf32, #tpu.memory_space<any>>) target(%568 : memref<1x256xf32, #tpu.memory_space<vmem>>) target_semaphore(%arg7 : memref<!tpu.dma_semaphore, #tpu.memory_space<semaphore_mem>>)
    %c0_i32_276 = arith.constant 0 : i32
    %569 = tpu.memref_slice %arg2[%279, %c0_i32_276] : memref<10000x256xf32, #tpu.memory_space<any>> -> memref<1x256xf32, #tpu.memory_space<any>>
    %c92_i32_277 = arith.constant 92 : i32
    %c0_i32_278 = arith.constant 0 : i32
    %570 = tpu.memref_slice %arg6[%c92_i32_277, %c0_i32_278] : memref<128x256xf32, #tpu.memory_space<vmem>> -> memref<1x256xf32, #tpu.memory_space<vmem>>
    tpu.enqueue_dma source(%569 : memref<1x256xf32, #tpu.memory_space<any>>) target(%570 : memref<1x256xf32, #tpu.memory_space<vmem>>) target_semaphore(%arg7 : memref<!tpu.dma_semaphore, #tpu.memory_space<semaphore_mem>>)
    %c0_i32_279 = arith.constant 0 : i32
    %571 = tpu.memref_slice %arg2[%282, %c0_i32_279] : memref<10000x256xf32, #tpu.memory_space<any>> -> memref<1x256xf32, #tpu.memory_space<any>>
    %c93_i32_280 = arith.constant 93 : i32
    %c0_i32_281 = arith.constant 0 : i32
    %572 = tpu.memref_slice %arg6[%c93_i32_280, %c0_i32_281] : memref<128x256xf32, #tpu.memory_space<vmem>> -> memref<1x256xf32, #tpu.memory_space<vmem>>
    tpu.enqueue_dma source(%571 : memref<1x256xf32, #tpu.memory_space<any>>) target(%572 : memref<1x256xf32, #tpu.memory_space<vmem>>) target_semaphore(%arg7 : memref<!tpu.dma_semaphore, #tpu.memory_space<semaphore_mem>>)
    %c0_i32_282 = arith.constant 0 : i32
    %573 = tpu.memref_slice %arg2[%285, %c0_i32_282] : memref<10000x256xf32, #tpu.memory_space<any>> -> memref<1x256xf32, #tpu.memory_space<any>>
    %c94_i32_283 = arith.constant 94 : i32
    %c0_i32_284 = arith.constant 0 : i32
    %574 = tpu.memref_slice %arg6[%c94_i32_283, %c0_i32_284] : memref<128x256xf32, #tpu.memory_space<vmem>> -> memref<1x256xf32, #tpu.memory_space<vmem>>
    tpu.enqueue_dma source(%573 : memref<1x256xf32, #tpu.memory_space<any>>) target(%574 : memref<1x256xf32, #tpu.memory_space<vmem>>) target_semaphore(%arg7 : memref<!tpu.dma_semaphore, #tpu.memory_space<semaphore_mem>>)
    %c0_i32_285 = arith.constant 0 : i32
    %575 = tpu.memref_slice %arg2[%288, %c0_i32_285] : memref<10000x256xf32, #tpu.memory_space<any>> -> memref<1x256xf32, #tpu.memory_space<any>>
    %c95_i32_286 = arith.constant 95 : i32
    %c0_i32_287 = arith.constant 0 : i32
    %576 = tpu.memref_slice %arg6[%c95_i32_286, %c0_i32_287] : memref<128x256xf32, #tpu.memory_space<vmem>> -> memref<1x256xf32, #tpu.memory_space<vmem>>
    tpu.enqueue_dma source(%575 : memref<1x256xf32, #tpu.memory_space<any>>) target(%576 : memref<1x256xf32, #tpu.memory_space<vmem>>) target_semaphore(%arg7 : memref<!tpu.dma_semaphore, #tpu.memory_space<semaphore_mem>>)
    %c0_i32_288 = arith.constant 0 : i32
    %577 = tpu.memref_slice %arg2[%291, %c0_i32_288] : memref<10000x256xf32, #tpu.memory_space<any>> -> memref<1x256xf32, #tpu.memory_space<any>>
    %c96_i32_289 = arith.constant 96 : i32
    %c0_i32_290 = arith.constant 0 : i32
    %578 = tpu.memref_slice %arg6[%c96_i32_289, %c0_i32_290] : memref<128x256xf32, #tpu.memory_space<vmem>> -> memref<1x256xf32, #tpu.memory_space<vmem>>
    tpu.enqueue_dma source(%577 : memref<1x256xf32, #tpu.memory_space<any>>) target(%578 : memref<1x256xf32, #tpu.memory_space<vmem>>) target_semaphore(%arg7 : memref<!tpu.dma_semaphore, #tpu.memory_space<semaphore_mem>>)
    %c0_i32_291 = arith.constant 0 : i32
    %579 = tpu.memref_slice %arg2[%294, %c0_i32_291] : memref<10000x256xf32, #tpu.memory_space<any>> -> memref<1x256xf32, #tpu.memory_space<any>>
    %c97_i32_292 = arith.constant 97 : i32
    %c0_i32_293 = arith.constant 0 : i32
    %580 = tpu.memref_slice %arg6[%c97_i32_292, %c0_i32_293] : memref<128x256xf32, #tpu.memory_space<vmem>> -> memref<1x256xf32, #tpu.memory_space<vmem>>
    tpu.enqueue_dma source(%579 : memref<1x256xf32, #tpu.memory_space<any>>) target(%580 : memref<1x256xf32, #tpu.memory_space<vmem>>) target_semaphore(%arg7 : memref<!tpu.dma_semaphore, #tpu.memory_space<semaphore_mem>>)
    %c0_i32_294 = arith.constant 0 : i32
    %581 = tpu.memref_slice %arg2[%297, %c0_i32_294] : memref<10000x256xf32, #tpu.memory_space<any>> -> memref<1x256xf32, #tpu.memory_space<any>>
    %c98_i32_295 = arith.constant 98 : i32
    %c0_i32_296 = arith.constant 0 : i32
    %582 = tpu.memref_slice %arg6[%c98_i32_295, %c0_i32_296] : memref<128x256xf32, #tpu.memory_space<vmem>> -> memref<1x256xf32, #tpu.memory_space<vmem>>
    tpu.enqueue_dma source(%581 : memref<1x256xf32, #tpu.memory_space<any>>) target(%582 : memref<1x256xf32, #tpu.memory_space<vmem>>) target_semaphore(%arg7 : memref<!tpu.dma_semaphore, #tpu.memory_space<semaphore_mem>>)
    %c0_i32_297 = arith.constant 0 : i32
    %583 = tpu.memref_slice %arg2[%300, %c0_i32_297] : memref<10000x256xf32, #tpu.memory_space<any>> -> memref<1x256xf32, #tpu.memory_space<any>>
    %c99_i32_298 = arith.constant 99 : i32
    %c0_i32_299 = arith.constant 0 : i32
    %584 = tpu.memref_slice %arg6[%c99_i32_298, %c0_i32_299] : memref<128x256xf32, #tpu.memory_space<vmem>> -> memref<1x256xf32, #tpu.memory_space<vmem>>
    tpu.enqueue_dma source(%583 : memref<1x256xf32, #tpu.memory_space<any>>) target(%584 : memref<1x256xf32, #tpu.memory_space<vmem>>) target_semaphore(%arg7 : memref<!tpu.dma_semaphore, #tpu.memory_space<semaphore_mem>>)
    %c0_i32_300 = arith.constant 0 : i32
    %585 = tpu.memref_slice %arg2[%303, %c0_i32_300] : memref<10000x256xf32, #tpu.memory_space<any>> -> memref<1x256xf32, #tpu.memory_space<any>>
    %c100_i32_301 = arith.constant 100 : i32
    %c0_i32_302 = arith.constant 0 : i32
    %586 = tpu.memref_slice %arg6[%c100_i32_301, %c0_i32_302] : memref<128x256xf32, #tpu.memory_space<vmem>> -> memref<1x256xf32, #tpu.memory_space<vmem>>
    tpu.enqueue_dma source(%585 : memref<1x256xf32, #tpu.memory_space<any>>) target(%586 : memref<1x256xf32, #tpu.memory_space<vmem>>) target_semaphore(%arg7 : memref<!tpu.dma_semaphore, #tpu.memory_space<semaphore_mem>>)
    %c0_i32_303 = arith.constant 0 : i32
    %587 = tpu.memref_slice %arg2[%306, %c0_i32_303] : memref<10000x256xf32, #tpu.memory_space<any>> -> memref<1x256xf32, #tpu.memory_space<any>>
    %c101_i32_304 = arith.constant 101 : i32
    %c0_i32_305 = arith.constant 0 : i32
    %588 = tpu.memref_slice %arg6[%c101_i32_304, %c0_i32_305] : memref<128x256xf32, #tpu.memory_space<vmem>> -> memref<1x256xf32, #tpu.memory_space<vmem>>
    tpu.enqueue_dma source(%587 : memref<1x256xf32, #tpu.memory_space<any>>) target(%588 : memref<1x256xf32, #tpu.memory_space<vmem>>) target_semaphore(%arg7 : memref<!tpu.dma_semaphore, #tpu.memory_space<semaphore_mem>>)
    %c0_i32_306 = arith.constant 0 : i32
    %589 = tpu.memref_slice %arg2[%309, %c0_i32_306] : memref<10000x256xf32, #tpu.memory_space<any>> -> memref<1x256xf32, #tpu.memory_space<any>>
    %c102_i32_307 = arith.constant 102 : i32
    %c0_i32_308 = arith.constant 0 : i32
    %590 = tpu.memref_slice %arg6[%c102_i32_307, %c0_i32_308] : memref<128x256xf32, #tpu.memory_space<vmem>> -> memref<1x256xf32, #tpu.memory_space<vmem>>
    tpu.enqueue_dma source(%589 : memref<1x256xf32, #tpu.memory_space<any>>) target(%590 : memref<1x256xf32, #tpu.memory_space<vmem>>) target_semaphore(%arg7 : memref<!tpu.dma_semaphore, #tpu.memory_space<semaphore_mem>>)
    %c0_i32_309 = arith.constant 0 : i32
    %591 = tpu.memref_slice %arg2[%312, %c0_i32_309] : memref<10000x256xf32, #tpu.memory_space<any>> -> memref<1x256xf32, #tpu.memory_space<any>>
    %c103_i32_310 = arith.constant 103 : i32
    %c0_i32_311 = arith.constant 0 : i32
    %592 = tpu.memref_slice %arg6[%c103_i32_310, %c0_i32_311] : memref<128x256xf32, #tpu.memory_space<vmem>> -> memref<1x256xf32, #tpu.memory_space<vmem>>
    tpu.enqueue_dma source(%591 : memref<1x256xf32, #tpu.memory_space<any>>) target(%592 : memref<1x256xf32, #tpu.memory_space<vmem>>) target_semaphore(%arg7 : memref<!tpu.dma_semaphore, #tpu.memory_space<semaphore_mem>>)
    %c0_i32_312 = arith.constant 0 : i32
    %593 = tpu.memref_slice %arg2[%315, %c0_i32_312] : memref<10000x256xf32, #tpu.memory_space<any>> -> memref<1x256xf32, #tpu.memory_space<any>>
    %c104_i32_313 = arith.constant 104 : i32
    %c0_i32_314 = arith.constant 0 : i32
    %594 = tpu.memref_slice %arg6[%c104_i32_313, %c0_i32_314] : memref<128x256xf32, #tpu.memory_space<vmem>> -> memref<1x256xf32, #tpu.memory_space<vmem>>
    tpu.enqueue_dma source(%593 : memref<1x256xf32, #tpu.memory_space<any>>) target(%594 : memref<1x256xf32, #tpu.memory_space<vmem>>) target_semaphore(%arg7 : memref<!tpu.dma_semaphore, #tpu.memory_space<semaphore_mem>>)
    %c0_i32_315 = arith.constant 0 : i32
    %595 = tpu.memref_slice %arg2[%318, %c0_i32_315] : memref<10000x256xf32, #tpu.memory_space<any>> -> memref<1x256xf32, #tpu.memory_space<any>>
    %c105_i32_316 = arith.constant 105 : i32
    %c0_i32_317 = arith.constant 0 : i32
    %596 = tpu.memref_slice %arg6[%c105_i32_316, %c0_i32_317] : memref<128x256xf32, #tpu.memory_space<vmem>> -> memref<1x256xf32, #tpu.memory_space<vmem>>
    tpu.enqueue_dma source(%595 : memref<1x256xf32, #tpu.memory_space<any>>) target(%596 : memref<1x256xf32, #tpu.memory_space<vmem>>) target_semaphore(%arg7 : memref<!tpu.dma_semaphore, #tpu.memory_space<semaphore_mem>>)
    %c0_i32_318 = arith.constant 0 : i32
    %597 = tpu.memref_slice %arg2[%321, %c0_i32_318] : memref<10000x256xf32, #tpu.memory_space<any>> -> memref<1x256xf32, #tpu.memory_space<any>>
    %c106_i32_319 = arith.constant 106 : i32
    %c0_i32_320 = arith.constant 0 : i32
    %598 = tpu.memref_slice %arg6[%c106_i32_319, %c0_i32_320] : memref<128x256xf32, #tpu.memory_space<vmem>> -> memref<1x256xf32, #tpu.memory_space<vmem>>
    tpu.enqueue_dma source(%597 : memref<1x256xf32, #tpu.memory_space<any>>) target(%598 : memref<1x256xf32, #tpu.memory_space<vmem>>) target_semaphore(%arg7 : memref<!tpu.dma_semaphore, #tpu.memory_space<semaphore_mem>>)
    %c0_i32_321 = arith.constant 0 : i32
    %599 = tpu.memref_slice %arg2[%324, %c0_i32_321] : memref<10000x256xf32, #tpu.memory_space<any>> -> memref<1x256xf32, #tpu.memory_space<any>>
    %c107_i32_322 = arith.constant 107 : i32
    %c0_i32_323 = arith.constant 0 : i32
    %600 = tpu.memref_slice %arg6[%c107_i32_322, %c0_i32_323] : memref<128x256xf32, #tpu.memory_space<vmem>> -> memref<1x256xf32, #tpu.memory_space<vmem>>
    tpu.enqueue_dma source(%599 : memref<1x256xf32, #tpu.memory_space<any>>) target(%600 : memref<1x256xf32, #tpu.memory_space<vmem>>) target_semaphore(%arg7 : memref<!tpu.dma_semaphore, #tpu.memory_space<semaphore_mem>>)
    %c0_i32_324 = arith.constant 0 : i32
    %601 = tpu.memref_slice %arg2[%327, %c0_i32_324] : memref<10000x256xf32, #tpu.memory_space<any>> -> memref<1x256xf32, #tpu.memory_space<any>>
    %c108_i32_325 = arith.constant 108 : i32
    %c0_i32_326 = arith.constant 0 : i32
    %602 = tpu.memref_slice %arg6[%c108_i32_325, %c0_i32_326] : memref<128x256xf32, #tpu.memory_space<vmem>> -> memref<1x256xf32, #tpu.memory_space<vmem>>
    tpu.enqueue_dma source(%601 : memref<1x256xf32, #tpu.memory_space<any>>) target(%602 : memref<1x256xf32, #tpu.memory_space<vmem>>) target_semaphore(%arg7 : memref<!tpu.dma_semaphore, #tpu.memory_space<semaphore_mem>>)
    %c0_i32_327 = arith.constant 0 : i32
    %603 = tpu.memref_slice %arg2[%330, %c0_i32_327] : memref<10000x256xf32, #tpu.memory_space<any>> -> memref<1x256xf32, #tpu.memory_space<any>>
    %c109_i32_328 = arith.constant 109 : i32
    %c0_i32_329 = arith.constant 0 : i32
    %604 = tpu.memref_slice %arg6[%c109_i32_328, %c0_i32_329] : memref<128x256xf32, #tpu.memory_space<vmem>> -> memref<1x256xf32, #tpu.memory_space<vmem>>
    tpu.enqueue_dma source(%603 : memref<1x256xf32, #tpu.memory_space<any>>) target(%604 : memref<1x256xf32, #tpu.memory_space<vmem>>) target_semaphore(%arg7 : memref<!tpu.dma_semaphore, #tpu.memory_space<semaphore_mem>>)
    %c0_i32_330 = arith.constant 0 : i32
    %605 = tpu.memref_slice %arg2[%333, %c0_i32_330] : memref<10000x256xf32, #tpu.memory_space<any>> -> memref<1x256xf32, #tpu.memory_space<any>>
    %c110_i32_331 = arith.constant 110 : i32
    %c0_i32_332 = arith.constant 0 : i32
    %606 = tpu.memref_slice %arg6[%c110_i32_331, %c0_i32_332] : memref<128x256xf32, #tpu.memory_space<vmem>> -> memref<1x256xf32, #tpu.memory_space<vmem>>
    tpu.enqueue_dma source(%605 : memref<1x256xf32, #tpu.memory_space<any>>) target(%606 : memref<1x256xf32, #tpu.memory_space<vmem>>) target_semaphore(%arg7 : memref<!tpu.dma_semaphore, #tpu.memory_space<semaphore_mem>>)
    %c0_i32_333 = arith.constant 0 : i32
    %607 = tpu.memref_slice %arg2[%336, %c0_i32_333] : memref<10000x256xf32, #tpu.memory_space<any>> -> memref<1x256xf32, #tpu.memory_space<any>>
    %c111_i32_334 = arith.constant 111 : i32
    %c0_i32_335 = arith.constant 0 : i32
    %608 = tpu.memref_slice %arg6[%c111_i32_334, %c0_i32_335] : memref<128x256xf32, #tpu.memory_space<vmem>> -> memref<1x256xf32, #tpu.memory_space<vmem>>
    tpu.enqueue_dma source(%607 : memref<1x256xf32, #tpu.memory_space<any>>) target(%608 : memref<1x256xf32, #tpu.memory_space<vmem>>) target_semaphore(%arg7 : memref<!tpu.dma_semaphore, #tpu.memory_space<semaphore_mem>>)
    %c0_i32_336 = arith.constant 0 : i32
    %609 = tpu.memref_slice %arg2[%339, %c0_i32_336] : memref<10000x256xf32, #tpu.memory_space<any>> -> memref<1x256xf32, #tpu.memory_space<any>>
    %c112_i32_337 = arith.constant 112 : i32
    %c0_i32_338 = arith.constant 0 : i32
    %610 = tpu.memref_slice %arg6[%c112_i32_337, %c0_i32_338] : memref<128x256xf32, #tpu.memory_space<vmem>> -> memref<1x256xf32, #tpu.memory_space<vmem>>
    tpu.enqueue_dma source(%609 : memref<1x256xf32, #tpu.memory_space<any>>) target(%610 : memref<1x256xf32, #tpu.memory_space<vmem>>) target_semaphore(%arg7 : memref<!tpu.dma_semaphore, #tpu.memory_space<semaphore_mem>>)
    %c0_i32_339 = arith.constant 0 : i32
    %611 = tpu.memref_slice %arg2[%342, %c0_i32_339] : memref<10000x256xf32, #tpu.memory_space<any>> -> memref<1x256xf32, #tpu.memory_space<any>>
    %c113_i32_340 = arith.constant 113 : i32
    %c0_i32_341 = arith.constant 0 : i32
    %612 = tpu.memref_slice %arg6[%c113_i32_340, %c0_i32_341] : memref<128x256xf32, #tpu.memory_space<vmem>> -> memref<1x256xf32, #tpu.memory_space<vmem>>
    tpu.enqueue_dma source(%611 : memref<1x256xf32, #tpu.memory_space<any>>) target(%612 : memref<1x256xf32, #tpu.memory_space<vmem>>) target_semaphore(%arg7 : memref<!tpu.dma_semaphore, #tpu.memory_space<semaphore_mem>>)
    %c0_i32_342 = arith.constant 0 : i32
    %613 = tpu.memref_slice %arg2[%345, %c0_i32_342] : memref<10000x256xf32, #tpu.memory_space<any>> -> memref<1x256xf32, #tpu.memory_space<any>>
    %c114_i32_343 = arith.constant 114 : i32
    %c0_i32_344 = arith.constant 0 : i32
    %614 = tpu.memref_slice %arg6[%c114_i32_343, %c0_i32_344] : memref<128x256xf32, #tpu.memory_space<vmem>> -> memref<1x256xf32, #tpu.memory_space<vmem>>
    tpu.enqueue_dma source(%613 : memref<1x256xf32, #tpu.memory_space<any>>) target(%614 : memref<1x256xf32, #tpu.memory_space<vmem>>) target_semaphore(%arg7 : memref<!tpu.dma_semaphore, #tpu.memory_space<semaphore_mem>>)
    %c0_i32_345 = arith.constant 0 : i32
    %615 = tpu.memref_slice %arg2[%348, %c0_i32_345] : memref<10000x256xf32, #tpu.memory_space<any>> -> memref<1x256xf32, #tpu.memory_space<any>>
    %c115_i32_346 = arith.constant 115 : i32
    %c0_i32_347 = arith.constant 0 : i32
    %616 = tpu.memref_slice %arg6[%c115_i32_346, %c0_i32_347] : memref<128x256xf32, #tpu.memory_space<vmem>> -> memref<1x256xf32, #tpu.memory_space<vmem>>
    tpu.enqueue_dma source(%615 : memref<1x256xf32, #tpu.memory_space<any>>) target(%616 : memref<1x256xf32, #tpu.memory_space<vmem>>) target_semaphore(%arg7 : memref<!tpu.dma_semaphore, #tpu.memory_space<semaphore_mem>>)
    %c0_i32_348 = arith.constant 0 : i32
    %617 = tpu.memref_slice %arg2[%351, %c0_i32_348] : memref<10000x256xf32, #tpu.memory_space<any>> -> memref<1x256xf32, #tpu.memory_space<any>>
    %c116_i32_349 = arith.constant 116 : i32
    %c0_i32_350 = arith.constant 0 : i32
    %618 = tpu.memref_slice %arg6[%c116_i32_349, %c0_i32_350] : memref<128x256xf32, #tpu.memory_space<vmem>> -> memref<1x256xf32, #tpu.memory_space<vmem>>
    tpu.enqueue_dma source(%617 : memref<1x256xf32, #tpu.memory_space<any>>) target(%618 : memref<1x256xf32, #tpu.memory_space<vmem>>) target_semaphore(%arg7 : memref<!tpu.dma_semaphore, #tpu.memory_space<semaphore_mem>>)
    %c0_i32_351 = arith.constant 0 : i32
    %619 = tpu.memref_slice %arg2[%354, %c0_i32_351] : memref<10000x256xf32, #tpu.memory_space<any>> -> memref<1x256xf32, #tpu.memory_space<any>>
    %c117_i32_352 = arith.constant 117 : i32
    %c0_i32_353 = arith.constant 0 : i32
    %620 = tpu.memref_slice %arg6[%c117_i32_352, %c0_i32_353] : memref<128x256xf32, #tpu.memory_space<vmem>> -> memref<1x256xf32, #tpu.memory_space<vmem>>
    tpu.enqueue_dma source(%619 : memref<1x256xf32, #tpu.memory_space<any>>) target(%620 : memref<1x256xf32, #tpu.memory_space<vmem>>) target_semaphore(%arg7 : memref<!tpu.dma_semaphore, #tpu.memory_space<semaphore_mem>>)
    %c0_i32_354 = arith.constant 0 : i32
    %621 = tpu.memref_slice %arg2[%357, %c0_i32_354] : memref<10000x256xf32, #tpu.memory_space<any>> -> memref<1x256xf32, #tpu.memory_space<any>>
    %c118_i32_355 = arith.constant 118 : i32
    %c0_i32_356 = arith.constant 0 : i32
    %622 = tpu.memref_slice %arg6[%c118_i32_355, %c0_i32_356] : memref<128x256xf32, #tpu.memory_space<vmem>> -> memref<1x256xf32, #tpu.memory_space<vmem>>
    tpu.enqueue_dma source(%621 : memref<1x256xf32, #tpu.memory_space<any>>) target(%622 : memref<1x256xf32, #tpu.memory_space<vmem>>) target_semaphore(%arg7 : memref<!tpu.dma_semaphore, #tpu.memory_space<semaphore_mem>>)
    %c0_i32_357 = arith.constant 0 : i32
    %623 = tpu.memref_slice %arg2[%360, %c0_i32_357] : memref<10000x256xf32, #tpu.memory_space<any>> -> memref<1x256xf32, #tpu.memory_space<any>>
    %c119_i32_358 = arith.constant 119 : i32
    %c0_i32_359 = arith.constant 0 : i32
    %624 = tpu.memref_slice %arg6[%c119_i32_358, %c0_i32_359] : memref<128x256xf32, #tpu.memory_space<vmem>> -> memref<1x256xf32, #tpu.memory_space<vmem>>
    tpu.enqueue_dma source(%623 : memref<1x256xf32, #tpu.memory_space<any>>) target(%624 : memref<1x256xf32, #tpu.memory_space<vmem>>) target_semaphore(%arg7 : memref<!tpu.dma_semaphore, #tpu.memory_space<semaphore_mem>>)
    %c0_i32_360 = arith.constant 0 : i32
    %625 = tpu.memref_slice %arg2[%363, %c0_i32_360] : memref<10000x256xf32, #tpu.memory_space<any>> -> memref<1x256xf32, #tpu.memory_space<any>>
    %c120_i32_361 = arith.constant 120 : i32
    %c0_i32_362 = arith.constant 0 : i32
    %626 = tpu.memref_slice %arg6[%c120_i32_361, %c0_i32_362] : memref<128x256xf32, #tpu.memory_space<vmem>> -> memref<1x256xf32, #tpu.memory_space<vmem>>
    tpu.enqueue_dma source(%625 : memref<1x256xf32, #tpu.memory_space<any>>) target(%626 : memref<1x256xf32, #tpu.memory_space<vmem>>) target_semaphore(%arg7 : memref<!tpu.dma_semaphore, #tpu.memory_space<semaphore_mem>>)
    %c0_i32_363 = arith.constant 0 : i32
    %627 = tpu.memref_slice %arg2[%366, %c0_i32_363] : memref<10000x256xf32, #tpu.memory_space<any>> -> memref<1x256xf32, #tpu.memory_space<any>>
    %c121_i32_364 = arith.constant 121 : i32
    %c0_i32_365 = arith.constant 0 : i32
    %628 = tpu.memref_slice %arg6[%c121_i32_364, %c0_i32_365] : memref<128x256xf32, #tpu.memory_space<vmem>> -> memref<1x256xf32, #tpu.memory_space<vmem>>
    tpu.enqueue_dma source(%627 : memref<1x256xf32, #tpu.memory_space<any>>) target(%628 : memref<1x256xf32, #tpu.memory_space<vmem>>) target_semaphore(%arg7 : memref<!tpu.dma_semaphore, #tpu.memory_space<semaphore_mem>>)
    %c0_i32_366 = arith.constant 0 : i32
    %629 = tpu.memref_slice %arg2[%369, %c0_i32_366] : memref<10000x256xf32, #tpu.memory_space<any>> -> memref<1x256xf32, #tpu.memory_space<any>>
    %c122_i32_367 = arith.constant 122 : i32
    %c0_i32_368 = arith.constant 0 : i32
    %630 = tpu.memref_slice %arg6[%c122_i32_367, %c0_i32_368] : memref<128x256xf32, #tpu.memory_space<vmem>> -> memref<1x256xf32, #tpu.memory_space<vmem>>
    tpu.enqueue_dma source(%629 : memref<1x256xf32, #tpu.memory_space<any>>) target(%630 : memref<1x256xf32, #tpu.memory_space<vmem>>) target_semaphore(%arg7 : memref<!tpu.dma_semaphore, #tpu.memory_space<semaphore_mem>>)
    %c0_i32_369 = arith.constant 0 : i32
    %631 = tpu.memref_slice %arg2[%372, %c0_i32_369] : memref<10000x256xf32, #tpu.memory_space<any>> -> memref<1x256xf32, #tpu.memory_space<any>>
    %c123_i32_370 = arith.constant 123 : i32
    %c0_i32_371 = arith.constant 0 : i32
    %632 = tpu.memref_slice %arg6[%c123_i32_370, %c0_i32_371] : memref<128x256xf32, #tpu.memory_space<vmem>> -> memref<1x256xf32, #tpu.memory_space<vmem>>
    tpu.enqueue_dma source(%631 : memref<1x256xf32, #tpu.memory_space<any>>) target(%632 : memref<1x256xf32, #tpu.memory_space<vmem>>) target_semaphore(%arg7 : memref<!tpu.dma_semaphore, #tpu.memory_space<semaphore_mem>>)
    %c0_i32_372 = arith.constant 0 : i32
    %633 = tpu.memref_slice %arg2[%375, %c0_i32_372] : memref<10000x256xf32, #tpu.memory_space<any>> -> memref<1x256xf32, #tpu.memory_space<any>>
    %c124_i32_373 = arith.constant 124 : i32
    %c0_i32_374 = arith.constant 0 : i32
    %634 = tpu.memref_slice %arg6[%c124_i32_373, %c0_i32_374] : memref<128x256xf32, #tpu.memory_space<vmem>> -> memref<1x256xf32, #tpu.memory_space<vmem>>
    tpu.enqueue_dma source(%633 : memref<1x256xf32, #tpu.memory_space<any>>) target(%634 : memref<1x256xf32, #tpu.memory_space<vmem>>) target_semaphore(%arg7 : memref<!tpu.dma_semaphore, #tpu.memory_space<semaphore_mem>>)
    %c0_i32_375 = arith.constant 0 : i32
    %635 = tpu.memref_slice %arg2[%378, %c0_i32_375] : memref<10000x256xf32, #tpu.memory_space<any>> -> memref<1x256xf32, #tpu.memory_space<any>>
    %c125_i32_376 = arith.constant 125 : i32
    %c0_i32_377 = arith.constant 0 : i32
    %636 = tpu.memref_slice %arg6[%c125_i32_376, %c0_i32_377] : memref<128x256xf32, #tpu.memory_space<vmem>> -> memref<1x256xf32, #tpu.memory_space<vmem>>
    tpu.enqueue_dma source(%635 : memref<1x256xf32, #tpu.memory_space<any>>) target(%636 : memref<1x256xf32, #tpu.memory_space<vmem>>) target_semaphore(%arg7 : memref<!tpu.dma_semaphore, #tpu.memory_space<semaphore_mem>>)
    %c0_i32_378 = arith.constant 0 : i32
    %637 = tpu.memref_slice %arg2[%381, %c0_i32_378] : memref<10000x256xf32, #tpu.memory_space<any>> -> memref<1x256xf32, #tpu.memory_space<any>>
    %c126_i32_379 = arith.constant 126 : i32
    %c0_i32_380 = arith.constant 0 : i32
    %638 = tpu.memref_slice %arg6[%c126_i32_379, %c0_i32_380] : memref<128x256xf32, #tpu.memory_space<vmem>> -> memref<1x256xf32, #tpu.memory_space<vmem>>
    tpu.enqueue_dma source(%637 : memref<1x256xf32, #tpu.memory_space<any>>) target(%638 : memref<1x256xf32, #tpu.memory_space<vmem>>) target_semaphore(%arg7 : memref<!tpu.dma_semaphore, #tpu.memory_space<semaphore_mem>>)
    %c0_i32_381 = arith.constant 0 : i32
    %639 = tpu.memref_slice %arg2[%384, %c0_i32_381] : memref<10000x256xf32, #tpu.memory_space<any>> -> memref<1x256xf32, #tpu.memory_space<any>>
    %c127_i32_382 = arith.constant 127 : i32
    %c0_i32_383 = arith.constant 0 : i32
    %640 = tpu.memref_slice %arg6[%c127_i32_382, %c0_i32_383] : memref<128x256xf32, #tpu.memory_space<vmem>> -> memref<1x256xf32, #tpu.memory_space<vmem>>
    tpu.enqueue_dma source(%639 : memref<1x256xf32, #tpu.memory_space<any>>) target(%640 : memref<1x256xf32, #tpu.memory_space<vmem>>) target_semaphore(%arg7 : memref<!tpu.dma_semaphore, #tpu.memory_space<semaphore_mem>>)
    %c0_i32_384 = arith.constant 0 : i32
    %641 = tpu.memref_slice %arg2[%3, %c0_i32_384] : memref<10000x256xf32, #tpu.memory_space<any>> -> memref<1x256xf32, #tpu.memory_space<any>>
    %c0_i32_385 = arith.constant 0 : i32
    %c0_i32_386 = arith.constant 0 : i32
    %642 = tpu.memref_slice %arg6[%c0_i32_385, %c0_i32_386] : memref<128x256xf32, #tpu.memory_space<vmem>> -> memref<1x256xf32, #tpu.memory_space<vmem>>
    tpu.wait_dma2 semaphore(%arg7 : memref<!tpu.dma_semaphore, #tpu.memory_space<semaphore_mem>>) src(%641 : memref<1x256xf32, #tpu.memory_space<any>>) dst(%642 : memref<1x256xf32, #tpu.memory_space<vmem>>)
    %c0_i32_387 = arith.constant 0 : i32
    %643 = tpu.memref_slice %arg2[%6, %c0_i32_387] : memref<10000x256xf32, #tpu.memory_space<any>> -> memref<1x256xf32, #tpu.memory_space<any>>
    %c1_i32_388 = arith.constant 1 : i32
    %c0_i32_389 = arith.constant 0 : i32
    %644 = tpu.memref_slice %arg6[%c1_i32_388, %c0_i32_389] : memref<128x256xf32, #tpu.memory_space<vmem>> -> memref<1x256xf32, #tpu.memory_space<vmem>>
    tpu.wait_dma2 semaphore(%arg7 : memref<!tpu.dma_semaphore, #tpu.memory_space<semaphore_mem>>) src(%643 : memref<1x256xf32, #tpu.memory_space<any>>) dst(%644 : memref<1x256xf32, #tpu.memory_space<vmem>>)
    %c0_i32_390 = arith.constant 0 : i32
    %645 = tpu.memref_slice %arg2[%9, %c0_i32_390] : memref<10000x256xf32, #tpu.memory_space<any>> -> memref<1x256xf32, #tpu.memory_space<any>>
    %c2_i32_391 = arith.constant 2 : i32
    %c0_i32_392 = arith.constant 0 : i32
    %646 = tpu.memref_slice %arg6[%c2_i32_391, %c0_i32_392] : memref<128x256xf32, #tpu.memory_space<vmem>> -> memref<1x256xf32, #tpu.memory_space<vmem>>
    tpu.wait_dma2 semaphore(%arg7 : memref<!tpu.dma_semaphore, #tpu.memory_space<semaphore_mem>>) src(%645 : memref<1x256xf32, #tpu.memory_space<any>>) dst(%646 : memref<1x256xf32, #tpu.memory_space<vmem>>)
    %c0_i32_393 = arith.constant 0 : i32
    %647 = tpu.memref_slice %arg2[%12, %c0_i32_393] : memref<10000x256xf32, #tpu.memory_space<any>> -> memref<1x256xf32, #tpu.memory_space<any>>
    %c3_i32_394 = arith.constant 3 : i32
    %c0_i32_395 = arith.constant 0 : i32
    %648 = tpu.memref_slice %arg6[%c3_i32_394, %c0_i32_395] : memref<128x256xf32, #tpu.memory_space<vmem>> -> memref<1x256xf32, #tpu.memory_space<vmem>>
    tpu.wait_dma2 semaphore(%arg7 : memref<!tpu.dma_semaphore, #tpu.memory_space<semaphore_mem>>) src(%647 : memref<1x256xf32, #tpu.memory_space<any>>) dst(%648 : memref<1x256xf32, #tpu.memory_space<vmem>>)
    %c0_i32_396 = arith.constant 0 : i32
    %649 = tpu.memref_slice %arg2[%15, %c0_i32_396] : memref<10000x256xf32, #tpu.memory_space<any>> -> memref<1x256xf32, #tpu.memory_space<any>>
    %c4_i32_397 = arith.constant 4 : i32
    %c0_i32_398 = arith.constant 0 : i32
    %650 = tpu.memref_slice %arg6[%c4_i32_397, %c0_i32_398] : memref<128x256xf32, #tpu.memory_space<vmem>> -> memref<1x256xf32, #tpu.memory_space<vmem>>
    tpu.wait_dma2 semaphore(%arg7 : memref<!tpu.dma_semaphore, #tpu.memory_space<semaphore_mem>>) src(%649 : memref<1x256xf32, #tpu.memory_space<any>>) dst(%650 : memref<1x256xf32, #tpu.memory_space<vmem>>)
    %c0_i32_399 = arith.constant 0 : i32
    %651 = tpu.memref_slice %arg2[%18, %c0_i32_399] : memref<10000x256xf32, #tpu.memory_space<any>> -> memref<1x256xf32, #tpu.memory_space<any>>
    %c5_i32_400 = arith.constant 5 : i32
    %c0_i32_401 = arith.constant 0 : i32
    %652 = tpu.memref_slice %arg6[%c5_i32_400, %c0_i32_401] : memref<128x256xf32, #tpu.memory_space<vmem>> -> memref<1x256xf32, #tpu.memory_space<vmem>>
    tpu.wait_dma2 semaphore(%arg7 : memref<!tpu.dma_semaphore, #tpu.memory_space<semaphore_mem>>) src(%651 : memref<1x256xf32, #tpu.memory_space<any>>) dst(%652 : memref<1x256xf32, #tpu.memory_space<vmem>>)
    %c0_i32_402 = arith.constant 0 : i32
    %653 = tpu.memref_slice %arg2[%21, %c0_i32_402] : memref<10000x256xf32, #tpu.memory_space<any>> -> memref<1x256xf32, #tpu.memory_space<any>>
    %c6_i32_403 = arith.constant 6 : i32
    %c0_i32_404 = arith.constant 0 : i32
    %654 = tpu.memref_slice %arg6[%c6_i32_403, %c0_i32_404] : memref<128x256xf32, #tpu.memory_space<vmem>> -> memref<1x256xf32, #tpu.memory_space<vmem>>
    tpu.wait_dma2 semaphore(%arg7 : memref<!tpu.dma_semaphore, #tpu.memory_space<semaphore_mem>>) src(%653 : memref<1x256xf32, #tpu.memory_space<any>>) dst(%654 : memref<1x256xf32, #tpu.memory_space<vmem>>)
    %c0_i32_405 = arith.constant 0 : i32
    %655 = tpu.memref_slice %arg2[%24, %c0_i32_405] : memref<10000x256xf32, #tpu.memory_space<any>> -> memref<1x256xf32, #tpu.memory_space<any>>
    %c7_i32_406 = arith.constant 7 : i32
    %c0_i32_407 = arith.constant 0 : i32
    %656 = tpu.memref_slice %arg6[%c7_i32_406, %c0_i32_407] : memref<128x256xf32, #tpu.memory_space<vmem>> -> memref<1x256xf32, #tpu.memory_space<vmem>>
    tpu.wait_dma2 semaphore(%arg7 : memref<!tpu.dma_semaphore, #tpu.memory_space<semaphore_mem>>) src(%655 : memref<1x256xf32, #tpu.memory_space<any>>) dst(%656 : memref<1x256xf32, #tpu.memory_space<vmem>>)
    %c0_i32_408 = arith.constant 0 : i32
    %657 = tpu.memref_slice %arg2[%27, %c0_i32_408] : memref<10000x256xf32, #tpu.memory_space<any>> -> memref<1x256xf32, #tpu.memory_space<any>>
    %c8_i32_409 = arith.constant 8 : i32
    %c0_i32_410 = arith.constant 0 : i32
    %658 = tpu.memref_slice %arg6[%c8_i32_409, %c0_i32_410] : memref<128x256xf32, #tpu.memory_space<vmem>> -> memref<1x256xf32, #tpu.memory_space<vmem>>
    tpu.wait_dma2 semaphore(%arg7 : memref<!tpu.dma_semaphore, #tpu.memory_space<semaphore_mem>>) src(%657 : memref<1x256xf32, #tpu.memory_space<any>>) dst(%658 : memref<1x256xf32, #tpu.memory_space<vmem>>)
    %c0_i32_411 = arith.constant 0 : i32
    %659 = tpu.memref_slice %arg2[%30, %c0_i32_411] : memref<10000x256xf32, #tpu.memory_space<any>> -> memref<1x256xf32, #tpu.memory_space<any>>
    %c9_i32_412 = arith.constant 9 : i32
    %c0_i32_413 = arith.constant 0 : i32
    %660 = tpu.memref_slice %arg6[%c9_i32_412, %c0_i32_413] : memref<128x256xf32, #tpu.memory_space<vmem>> -> memref<1x256xf32, #tpu.memory_space<vmem>>
    tpu.wait_dma2 semaphore(%arg7 : memref<!tpu.dma_semaphore, #tpu.memory_space<semaphore_mem>>) src(%659 : memref<1x256xf32, #tpu.memory_space<any>>) dst(%660 : memref<1x256xf32, #tpu.memory_space<vmem>>)
    %c0_i32_414 = arith.constant 0 : i32
    %661 = tpu.memref_slice %arg2[%33, %c0_i32_414] : memref<10000x256xf32, #tpu.memory_space<any>> -> memref<1x256xf32, #tpu.memory_space<any>>
    %c10_i32_415 = arith.constant 10 : i32
    %c0_i32_416 = arith.constant 0 : i32
    %662 = tpu.memref_slice %arg6[%c10_i32_415, %c0_i32_416] : memref<128x256xf32, #tpu.memory_space<vmem>> -> memref<1x256xf32, #tpu.memory_space<vmem>>
    tpu.wait_dma2 semaphore(%arg7 : memref<!tpu.dma_semaphore, #tpu.memory_space<semaphore_mem>>) src(%661 : memref<1x256xf32, #tpu.memory_space<any>>) dst(%662 : memref<1x256xf32, #tpu.memory_space<vmem>>)
    %c0_i32_417 = arith.constant 0 : i32
    %663 = tpu.memref_slice %arg2[%36, %c0_i32_417] : memref<10000x256xf32, #tpu.memory_space<any>> -> memref<1x256xf32, #tpu.memory_space<any>>
    %c11_i32_418 = arith.constant 11 : i32
    %c0_i32_419 = arith.constant 0 : i32
    %664 = tpu.memref_slice %arg6[%c11_i32_418, %c0_i32_419] : memref<128x256xf32, #tpu.memory_space<vmem>> -> memref<1x256xf32, #tpu.memory_space<vmem>>
    tpu.wait_dma2 semaphore(%arg7 : memref<!tpu.dma_semaphore, #tpu.memory_space<semaphore_mem>>) src(%663 : memref<1x256xf32, #tpu.memory_space<any>>) dst(%664 : memref<1x256xf32, #tpu.memory_space<vmem>>)
    %c0_i32_420 = arith.constant 0 : i32
    %665 = tpu.memref_slice %arg2[%39, %c0_i32_420] : memref<10000x256xf32, #tpu.memory_space<any>> -> memref<1x256xf32, #tpu.memory_space<any>>
    %c12_i32_421 = arith.constant 12 : i32
    %c0_i32_422 = arith.constant 0 : i32
    %666 = tpu.memref_slice %arg6[%c12_i32_421, %c0_i32_422] : memref<128x256xf32, #tpu.memory_space<vmem>> -> memref<1x256xf32, #tpu.memory_space<vmem>>
    tpu.wait_dma2 semaphore(%arg7 : memref<!tpu.dma_semaphore, #tpu.memory_space<semaphore_mem>>) src(%665 : memref<1x256xf32, #tpu.memory_space<any>>) dst(%666 : memref<1x256xf32, #tpu.memory_space<vmem>>)
    %c0_i32_423 = arith.constant 0 : i32
    %667 = tpu.memref_slice %arg2[%42, %c0_i32_423] : memref<10000x256xf32, #tpu.memory_space<any>> -> memref<1x256xf32, #tpu.memory_space<any>>
    %c13_i32_424 = arith.constant 13 : i32
    %c0_i32_425 = arith.constant 0 : i32
    %668 = tpu.memref_slice %arg6[%c13_i32_424, %c0_i32_425] : memref<128x256xf32, #tpu.memory_space<vmem>> -> memref<1x256xf32, #tpu.memory_space<vmem>>
    tpu.wait_dma2 semaphore(%arg7 : memref<!tpu.dma_semaphore, #tpu.memory_space<semaphore_mem>>) src(%667 : memref<1x256xf32, #tpu.memory_space<any>>) dst(%668 : memref<1x256xf32, #tpu.memory_space<vmem>>)
    %c0_i32_426 = arith.constant 0 : i32
    %669 = tpu.memref_slice %arg2[%45, %c0_i32_426] : memref<10000x256xf32, #tpu.memory_space<any>> -> memref<1x256xf32, #tpu.memory_space<any>>
    %c14_i32_427 = arith.constant 14 : i32
    %c0_i32_428 = arith.constant 0 : i32
    %670 = tpu.memref_slice %arg6[%c14_i32_427, %c0_i32_428] : memref<128x256xf32, #tpu.memory_space<vmem>> -> memref<1x256xf32, #tpu.memory_space<vmem>>
    tpu.wait_dma2 semaphore(%arg7 : memref<!tpu.dma_semaphore, #tpu.memory_space<semaphore_mem>>) src(%669 : memref<1x256xf32, #tpu.memory_space<any>>) dst(%670 : memref<1x256xf32, #tpu.memory_space<vmem>>)
    %c0_i32_429 = arith.constant 0 : i32
    %671 = tpu.memref_slice %arg2[%48, %c0_i32_429] : memref<10000x256xf32, #tpu.memory_space<any>> -> memref<1x256xf32, #tpu.memory_space<any>>
    %c15_i32_430 = arith.constant 15 : i32
    %c0_i32_431 = arith.constant 0 : i32
    %672 = tpu.memref_slice %arg6[%c15_i32_430, %c0_i32_431] : memref<128x256xf32, #tpu.memory_space<vmem>> -> memref<1x256xf32, #tpu.memory_space<vmem>>
    tpu.wait_dma2 semaphore(%arg7 : memref<!tpu.dma_semaphore, #tpu.memory_space<semaphore_mem>>) src(%671 : memref<1x256xf32, #tpu.memory_space<any>>) dst(%672 : memref<1x256xf32, #tpu.memory_space<vmem>>)
    %c0_i32_432 = arith.constant 0 : i32
    %673 = tpu.memref_slice %arg2[%51, %c0_i32_432] : memref<10000x256xf32, #tpu.memory_space<any>> -> memref<1x256xf32, #tpu.memory_space<any>>
    %c16_i32_433 = arith.constant 16 : i32
    %c0_i32_434 = arith.constant 0 : i32
    %674 = tpu.memref_slice %arg6[%c16_i32_433, %c0_i32_434] : memref<128x256xf32, #tpu.memory_space<vmem>> -> memref<1x256xf32, #tpu.memory_space<vmem>>
    tpu.wait_dma2 semaphore(%arg7 : memref<!tpu.dma_semaphore, #tpu.memory_space<semaphore_mem>>) src(%673 : memref<1x256xf32, #tpu.memory_space<any>>) dst(%674 : memref<1x256xf32, #tpu.memory_space<vmem>>)
    %c0_i32_435 = arith.constant 0 : i32
    %675 = tpu.memref_slice %arg2[%54, %c0_i32_435] : memref<10000x256xf32, #tpu.memory_space<any>> -> memref<1x256xf32, #tpu.memory_space<any>>
    %c17_i32_436 = arith.constant 17 : i32
    %c0_i32_437 = arith.constant 0 : i32
    %676 = tpu.memref_slice %arg6[%c17_i32_436, %c0_i32_437] : memref<128x256xf32, #tpu.memory_space<vmem>> -> memref<1x256xf32, #tpu.memory_space<vmem>>
    tpu.wait_dma2 semaphore(%arg7 : memref<!tpu.dma_semaphore, #tpu.memory_space<semaphore_mem>>) src(%675 : memref<1x256xf32, #tpu.memory_space<any>>) dst(%676 : memref<1x256xf32, #tpu.memory_space<vmem>>)
    %c0_i32_438 = arith.constant 0 : i32
    %677 = tpu.memref_slice %arg2[%57, %c0_i32_438] : memref<10000x256xf32, #tpu.memory_space<any>> -> memref<1x256xf32, #tpu.memory_space<any>>
    %c18_i32_439 = arith.constant 18 : i32
    %c0_i32_440 = arith.constant 0 : i32
    %678 = tpu.memref_slice %arg6[%c18_i32_439, %c0_i32_440] : memref<128x256xf32, #tpu.memory_space<vmem>> -> memref<1x256xf32, #tpu.memory_space<vmem>>
    tpu.wait_dma2 semaphore(%arg7 : memref<!tpu.dma_semaphore, #tpu.memory_space<semaphore_mem>>) src(%677 : memref<1x256xf32, #tpu.memory_space<any>>) dst(%678 : memref<1x256xf32, #tpu.memory_space<vmem>>)
    %c0_i32_441 = arith.constant 0 : i32
    %679 = tpu.memref_slice %arg2[%60, %c0_i32_441] : memref<10000x256xf32, #tpu.memory_space<any>> -> memref<1x256xf32, #tpu.memory_space<any>>
    %c19_i32_442 = arith.constant 19 : i32
    %c0_i32_443 = arith.constant 0 : i32
    %680 = tpu.memref_slice %arg6[%c19_i32_442, %c0_i32_443] : memref<128x256xf32, #tpu.memory_space<vmem>> -> memref<1x256xf32, #tpu.memory_space<vmem>>
    tpu.wait_dma2 semaphore(%arg7 : memref<!tpu.dma_semaphore, #tpu.memory_space<semaphore_mem>>) src(%679 : memref<1x256xf32, #tpu.memory_space<any>>) dst(%680 : memref<1x256xf32, #tpu.memory_space<vmem>>)
    %c0_i32_444 = arith.constant 0 : i32
    %681 = tpu.memref_slice %arg2[%63, %c0_i32_444] : memref<10000x256xf32, #tpu.memory_space<any>> -> memref<1x256xf32, #tpu.memory_space<any>>
    %c20_i32_445 = arith.constant 20 : i32
    %c0_i32_446 = arith.constant 0 : i32
    %682 = tpu.memref_slice %arg6[%c20_i32_445, %c0_i32_446] : memref<128x256xf32, #tpu.memory_space<vmem>> -> memref<1x256xf32, #tpu.memory_space<vmem>>
    tpu.wait_dma2 semaphore(%arg7 : memref<!tpu.dma_semaphore, #tpu.memory_space<semaphore_mem>>) src(%681 : memref<1x256xf32, #tpu.memory_space<any>>) dst(%682 : memref<1x256xf32, #tpu.memory_space<vmem>>)
    %c0_i32_447 = arith.constant 0 : i32
    %683 = tpu.memref_slice %arg2[%66, %c0_i32_447] : memref<10000x256xf32, #tpu.memory_space<any>> -> memref<1x256xf32, #tpu.memory_space<any>>
    %c21_i32_448 = arith.constant 21 : i32
    %c0_i32_449 = arith.constant 0 : i32
    %684 = tpu.memref_slice %arg6[%c21_i32_448, %c0_i32_449] : memref<128x256xf32, #tpu.memory_space<vmem>> -> memref<1x256xf32, #tpu.memory_space<vmem>>
    tpu.wait_dma2 semaphore(%arg7 : memref<!tpu.dma_semaphore, #tpu.memory_space<semaphore_mem>>) src(%683 : memref<1x256xf32, #tpu.memory_space<any>>) dst(%684 : memref<1x256xf32, #tpu.memory_space<vmem>>)
    %c0_i32_450 = arith.constant 0 : i32
    %685 = tpu.memref_slice %arg2[%69, %c0_i32_450] : memref<10000x256xf32, #tpu.memory_space<any>> -> memref<1x256xf32, #tpu.memory_space<any>>
    %c22_i32_451 = arith.constant 22 : i32
    %c0_i32_452 = arith.constant 0 : i32
    %686 = tpu.memref_slice %arg6[%c22_i32_451, %c0_i32_452] : memref<128x256xf32, #tpu.memory_space<vmem>> -> memref<1x256xf32, #tpu.memory_space<vmem>>
    tpu.wait_dma2 semaphore(%arg7 : memref<!tpu.dma_semaphore, #tpu.memory_space<semaphore_mem>>) src(%685 : memref<1x256xf32, #tpu.memory_space<any>>) dst(%686 : memref<1x256xf32, #tpu.memory_space<vmem>>)
    %c0_i32_453 = arith.constant 0 : i32
    %687 = tpu.memref_slice %arg2[%72, %c0_i32_453] : memref<10000x256xf32, #tpu.memory_space<any>> -> memref<1x256xf32, #tpu.memory_space<any>>
    %c23_i32_454 = arith.constant 23 : i32
    %c0_i32_455 = arith.constant 0 : i32
    %688 = tpu.memref_slice %arg6[%c23_i32_454, %c0_i32_455] : memref<128x256xf32, #tpu.memory_space<vmem>> -> memref<1x256xf32, #tpu.memory_space<vmem>>
    tpu.wait_dma2 semaphore(%arg7 : memref<!tpu.dma_semaphore, #tpu.memory_space<semaphore_mem>>) src(%687 : memref<1x256xf32, #tpu.memory_space<any>>) dst(%688 : memref<1x256xf32, #tpu.memory_space<vmem>>)
    %c0_i32_456 = arith.constant 0 : i32
    %689 = tpu.memref_slice %arg2[%75, %c0_i32_456] : memref<10000x256xf32, #tpu.memory_space<any>> -> memref<1x256xf32, #tpu.memory_space<any>>
    %c24_i32_457 = arith.constant 24 : i32
    %c0_i32_458 = arith.constant 0 : i32
    %690 = tpu.memref_slice %arg6[%c24_i32_457, %c0_i32_458] : memref<128x256xf32, #tpu.memory_space<vmem>> -> memref<1x256xf32, #tpu.memory_space<vmem>>
    tpu.wait_dma2 semaphore(%arg7 : memref<!tpu.dma_semaphore, #tpu.memory_space<semaphore_mem>>) src(%689 : memref<1x256xf32, #tpu.memory_space<any>>) dst(%690 : memref<1x256xf32, #tpu.memory_space<vmem>>)
    %c0_i32_459 = arith.constant 0 : i32
    %691 = tpu.memref_slice %arg2[%78, %c0_i32_459] : memref<10000x256xf32, #tpu.memory_space<any>> -> memref<1x256xf32, #tpu.memory_space<any>>
    %c25_i32_460 = arith.constant 25 : i32
    %c0_i32_461 = arith.constant 0 : i32
    %692 = tpu.memref_slice %arg6[%c25_i32_460, %c0_i32_461] : memref<128x256xf32, #tpu.memory_space<vmem>> -> memref<1x256xf32, #tpu.memory_space<vmem>>
    tpu.wait_dma2 semaphore(%arg7 : memref<!tpu.dma_semaphore, #tpu.memory_space<semaphore_mem>>) src(%691 : memref<1x256xf32, #tpu.memory_space<any>>) dst(%692 : memref<1x256xf32, #tpu.memory_space<vmem>>)
    %c0_i32_462 = arith.constant 0 : i32
    %693 = tpu.memref_slice %arg2[%81, %c0_i32_462] : memref<10000x256xf32, #tpu.memory_space<any>> -> memref<1x256xf32, #tpu.memory_space<any>>
    %c26_i32_463 = arith.constant 26 : i32
    %c0_i32_464 = arith.constant 0 : i32
    %694 = tpu.memref_slice %arg6[%c26_i32_463, %c0_i32_464] : memref<128x256xf32, #tpu.memory_space<vmem>> -> memref<1x256xf32, #tpu.memory_space<vmem>>
    tpu.wait_dma2 semaphore(%arg7 : memref<!tpu.dma_semaphore, #tpu.memory_space<semaphore_mem>>) src(%693 : memref<1x256xf32, #tpu.memory_space<any>>) dst(%694 : memref<1x256xf32, #tpu.memory_space<vmem>>)
    %c0_i32_465 = arith.constant 0 : i32
    %695 = tpu.memref_slice %arg2[%84, %c0_i32_465] : memref<10000x256xf32, #tpu.memory_space<any>> -> memref<1x256xf32, #tpu.memory_space<any>>
    %c27_i32_466 = arith.constant 27 : i32
    %c0_i32_467 = arith.constant 0 : i32
    %696 = tpu.memref_slice %arg6[%c27_i32_466, %c0_i32_467] : memref<128x256xf32, #tpu.memory_space<vmem>> -> memref<1x256xf32, #tpu.memory_space<vmem>>
    tpu.wait_dma2 semaphore(%arg7 : memref<!tpu.dma_semaphore, #tpu.memory_space<semaphore_mem>>) src(%695 : memref<1x256xf32, #tpu.memory_space<any>>) dst(%696 : memref<1x256xf32, #tpu.memory_space<vmem>>)
    %c0_i32_468 = arith.constant 0 : i32
    %697 = tpu.memref_slice %arg2[%87, %c0_i32_468] : memref<10000x256xf32, #tpu.memory_space<any>> -> memref<1x256xf32, #tpu.memory_space<any>>
    %c28_i32_469 = arith.constant 28 : i32
    %c0_i32_470 = arith.constant 0 : i32
    %698 = tpu.memref_slice %arg6[%c28_i32_469, %c0_i32_470] : memref<128x256xf32, #tpu.memory_space<vmem>> -> memref<1x256xf32, #tpu.memory_space<vmem>>
    tpu.wait_dma2 semaphore(%arg7 : memref<!tpu.dma_semaphore, #tpu.memory_space<semaphore_mem>>) src(%697 : memref<1x256xf32, #tpu.memory_space<any>>) dst(%698 : memref<1x256xf32, #tpu.memory_space<vmem>>)
    %c0_i32_471 = arith.constant 0 : i32
    %699 = tpu.memref_slice %arg2[%90, %c0_i32_471] : memref<10000x256xf32, #tpu.memory_space<any>> -> memref<1x256xf32, #tpu.memory_space<any>>
    %c29_i32_472 = arith.constant 29 : i32
    %c0_i32_473 = arith.constant 0 : i32
    %700 = tpu.memref_slice %arg6[%c29_i32_472, %c0_i32_473] : memref<128x256xf32, #tpu.memory_space<vmem>> -> memref<1x256xf32, #tpu.memory_space<vmem>>
    tpu.wait_dma2 semaphore(%arg7 : memref<!tpu.dma_semaphore, #tpu.memory_space<semaphore_mem>>) src(%699 : memref<1x256xf32, #tpu.memory_space<any>>) dst(%700 : memref<1x256xf32, #tpu.memory_space<vmem>>)
    %c0_i32_474 = arith.constant 0 : i32
    %701 = tpu.memref_slice %arg2[%93, %c0_i32_474] : memref<10000x256xf32, #tpu.memory_space<any>> -> memref<1x256xf32, #tpu.memory_space<any>>
    %c30_i32_475 = arith.constant 30 : i32
    %c0_i32_476 = arith.constant 0 : i32
    %702 = tpu.memref_slice %arg6[%c30_i32_475, %c0_i32_476] : memref<128x256xf32, #tpu.memory_space<vmem>> -> memref<1x256xf32, #tpu.memory_space<vmem>>
    tpu.wait_dma2 semaphore(%arg7 : memref<!tpu.dma_semaphore, #tpu.memory_space<semaphore_mem>>) src(%701 : memref<1x256xf32, #tpu.memory_space<any>>) dst(%702 : memref<1x256xf32, #tpu.memory_space<vmem>>)
    %c0_i32_477 = arith.constant 0 : i32
    %703 = tpu.memref_slice %arg2[%96, %c0_i32_477] : memref<10000x256xf32, #tpu.memory_space<any>> -> memref<1x256xf32, #tpu.memory_space<any>>
    %c31_i32_478 = arith.constant 31 : i32
    %c0_i32_479 = arith.constant 0 : i32
    %704 = tpu.memref_slice %arg6[%c31_i32_478, %c0_i32_479] : memref<128x256xf32, #tpu.memory_space<vmem>> -> memref<1x256xf32, #tpu.memory_space<vmem>>
    tpu.wait_dma2 semaphore(%arg7 : memref<!tpu.dma_semaphore, #tpu.memory_space<semaphore_mem>>) src(%703 : memref<1x256xf32, #tpu.memory_space<any>>) dst(%704 : memref<1x256xf32, #tpu.memory_space<vmem>>)
    %c0_i32_480 = arith.constant 0 : i32
    %705 = tpu.memref_slice %arg2[%99, %c0_i32_480] : memref<10000x256xf32, #tpu.memory_space<any>> -> memref<1x256xf32, #tpu.memory_space<any>>
    %c32_i32_481 = arith.constant 32 : i32
    %c0_i32_482 = arith.constant 0 : i32
    %706 = tpu.memref_slice %arg6[%c32_i32_481, %c0_i32_482] : memref<128x256xf32, #tpu.memory_space<vmem>> -> memref<1x256xf32, #tpu.memory_space<vmem>>
    tpu.wait_dma2 semaphore(%arg7 : memref<!tpu.dma_semaphore, #tpu.memory_space<semaphore_mem>>) src(%705 : memref<1x256xf32, #tpu.memory_space<any>>) dst(%706 : memref<1x256xf32, #tpu.memory_space<vmem>>)
    %c0_i32_483 = arith.constant 0 : i32
    %707 = tpu.memref_slice %arg2[%102, %c0_i32_483] : memref<10000x256xf32, #tpu.memory_space<any>> -> memref<1x256xf32, #tpu.memory_space<any>>
    %c33_i32_484 = arith.constant 33 : i32
    %c0_i32_485 = arith.constant 0 : i32
    %708 = tpu.memref_slice %arg6[%c33_i32_484, %c0_i32_485] : memref<128x256xf32, #tpu.memory_space<vmem>> -> memref<1x256xf32, #tpu.memory_space<vmem>>
    tpu.wait_dma2 semaphore(%arg7 : memref<!tpu.dma_semaphore, #tpu.memory_space<semaphore_mem>>) src(%707 : memref<1x256xf32, #tpu.memory_space<any>>) dst(%708 : memref<1x256xf32, #tpu.memory_space<vmem>>)
    %c0_i32_486 = arith.constant 0 : i32
    %709 = tpu.memref_slice %arg2[%105, %c0_i32_486] : memref<10000x256xf32, #tpu.memory_space<any>> -> memref<1x256xf32, #tpu.memory_space<any>>
    %c34_i32_487 = arith.constant 34 : i32
    %c0_i32_488 = arith.constant 0 : i32
    %710 = tpu.memref_slice %arg6[%c34_i32_487, %c0_i32_488] : memref<128x256xf32, #tpu.memory_space<vmem>> -> memref<1x256xf32, #tpu.memory_space<vmem>>
    tpu.wait_dma2 semaphore(%arg7 : memref<!tpu.dma_semaphore, #tpu.memory_space<semaphore_mem>>) src(%709 : memref<1x256xf32, #tpu.memory_space<any>>) dst(%710 : memref<1x256xf32, #tpu.memory_space<vmem>>)
    %c0_i32_489 = arith.constant 0 : i32
    %711 = tpu.memref_slice %arg2[%108, %c0_i32_489] : memref<10000x256xf32, #tpu.memory_space<any>> -> memref<1x256xf32, #tpu.memory_space<any>>
    %c35_i32_490 = arith.constant 35 : i32
    %c0_i32_491 = arith.constant 0 : i32
    %712 = tpu.memref_slice %arg6[%c35_i32_490, %c0_i32_491] : memref<128x256xf32, #tpu.memory_space<vmem>> -> memref<1x256xf32, #tpu.memory_space<vmem>>
    tpu.wait_dma2 semaphore(%arg7 : memref<!tpu.dma_semaphore, #tpu.memory_space<semaphore_mem>>) src(%711 : memref<1x256xf32, #tpu.memory_space<any>>) dst(%712 : memref<1x256xf32, #tpu.memory_space<vmem>>)
    %c0_i32_492 = arith.constant 0 : i32
    %713 = tpu.memref_slice %arg2[%111, %c0_i32_492] : memref<10000x256xf32, #tpu.memory_space<any>> -> memref<1x256xf32, #tpu.memory_space<any>>
    %c36_i32_493 = arith.constant 36 : i32
    %c0_i32_494 = arith.constant 0 : i32
    %714 = tpu.memref_slice %arg6[%c36_i32_493, %c0_i32_494] : memref<128x256xf32, #tpu.memory_space<vmem>> -> memref<1x256xf32, #tpu.memory_space<vmem>>
    tpu.wait_dma2 semaphore(%arg7 : memref<!tpu.dma_semaphore, #tpu.memory_space<semaphore_mem>>) src(%713 : memref<1x256xf32, #tpu.memory_space<any>>) dst(%714 : memref<1x256xf32, #tpu.memory_space<vmem>>)
    %c0_i32_495 = arith.constant 0 : i32
    %715 = tpu.memref_slice %arg2[%114, %c0_i32_495] : memref<10000x256xf32, #tpu.memory_space<any>> -> memref<1x256xf32, #tpu.memory_space<any>>
    %c37_i32_496 = arith.constant 37 : i32
    %c0_i32_497 = arith.constant 0 : i32
    %716 = tpu.memref_slice %arg6[%c37_i32_496, %c0_i32_497] : memref<128x256xf32, #tpu.memory_space<vmem>> -> memref<1x256xf32, #tpu.memory_space<vmem>>
    tpu.wait_dma2 semaphore(%arg7 : memref<!tpu.dma_semaphore, #tpu.memory_space<semaphore_mem>>) src(%715 : memref<1x256xf32, #tpu.memory_space<any>>) dst(%716 : memref<1x256xf32, #tpu.memory_space<vmem>>)
    %c0_i32_498 = arith.constant 0 : i32
    %717 = tpu.memref_slice %arg2[%117, %c0_i32_498] : memref<10000x256xf32, #tpu.memory_space<any>> -> memref<1x256xf32, #tpu.memory_space<any>>
    %c38_i32_499 = arith.constant 38 : i32
    %c0_i32_500 = arith.constant 0 : i32
    %718 = tpu.memref_slice %arg6[%c38_i32_499, %c0_i32_500] : memref<128x256xf32, #tpu.memory_space<vmem>> -> memref<1x256xf32, #tpu.memory_space<vmem>>
    tpu.wait_dma2 semaphore(%arg7 : memref<!tpu.dma_semaphore, #tpu.memory_space<semaphore_mem>>) src(%717 : memref<1x256xf32, #tpu.memory_space<any>>) dst(%718 : memref<1x256xf32, #tpu.memory_space<vmem>>)
    %c0_i32_501 = arith.constant 0 : i32
    %719 = tpu.memref_slice %arg2[%120, %c0_i32_501] : memref<10000x256xf32, #tpu.memory_space<any>> -> memref<1x256xf32, #tpu.memory_space<any>>
    %c39_i32_502 = arith.constant 39 : i32
    %c0_i32_503 = arith.constant 0 : i32
    %720 = tpu.memref_slice %arg6[%c39_i32_502, %c0_i32_503] : memref<128x256xf32, #tpu.memory_space<vmem>> -> memref<1x256xf32, #tpu.memory_space<vmem>>
    tpu.wait_dma2 semaphore(%arg7 : memref<!tpu.dma_semaphore, #tpu.memory_space<semaphore_mem>>) src(%719 : memref<1x256xf32, #tpu.memory_space<any>>) dst(%720 : memref<1x256xf32, #tpu.memory_space<vmem>>)
    %c0_i32_504 = arith.constant 0 : i32
    %721 = tpu.memref_slice %arg2[%123, %c0_i32_504] : memref<10000x256xf32, #tpu.memory_space<any>> -> memref<1x256xf32, #tpu.memory_space<any>>
    %c40_i32_505 = arith.constant 40 : i32
    %c0_i32_506 = arith.constant 0 : i32
    %722 = tpu.memref_slice %arg6[%c40_i32_505, %c0_i32_506] : memref<128x256xf32, #tpu.memory_space<vmem>> -> memref<1x256xf32, #tpu.memory_space<vmem>>
    tpu.wait_dma2 semaphore(%arg7 : memref<!tpu.dma_semaphore, #tpu.memory_space<semaphore_mem>>) src(%721 : memref<1x256xf32, #tpu.memory_space<any>>) dst(%722 : memref<1x256xf32, #tpu.memory_space<vmem>>)
    %c0_i32_507 = arith.constant 0 : i32
    %723 = tpu.memref_slice %arg2[%126, %c0_i32_507] : memref<10000x256xf32, #tpu.memory_space<any>> -> memref<1x256xf32, #tpu.memory_space<any>>
    %c41_i32_508 = arith.constant 41 : i32
    %c0_i32_509 = arith.constant 0 : i32
    %724 = tpu.memref_slice %arg6[%c41_i32_508, %c0_i32_509] : memref<128x256xf32, #tpu.memory_space<vmem>> -> memref<1x256xf32, #tpu.memory_space<vmem>>
    tpu.wait_dma2 semaphore(%arg7 : memref<!tpu.dma_semaphore, #tpu.memory_space<semaphore_mem>>) src(%723 : memref<1x256xf32, #tpu.memory_space<any>>) dst(%724 : memref<1x256xf32, #tpu.memory_space<vmem>>)
    %c0_i32_510 = arith.constant 0 : i32
    %725 = tpu.memref_slice %arg2[%129, %c0_i32_510] : memref<10000x256xf32, #tpu.memory_space<any>> -> memref<1x256xf32, #tpu.memory_space<any>>
    %c42_i32_511 = arith.constant 42 : i32
    %c0_i32_512 = arith.constant 0 : i32
    %726 = tpu.memref_slice %arg6[%c42_i32_511, %c0_i32_512] : memref<128x256xf32, #tpu.memory_space<vmem>> -> memref<1x256xf32, #tpu.memory_space<vmem>>
    tpu.wait_dma2 semaphore(%arg7 : memref<!tpu.dma_semaphore, #tpu.memory_space<semaphore_mem>>) src(%725 : memref<1x256xf32, #tpu.memory_space<any>>) dst(%726 : memref<1x256xf32, #tpu.memory_space<vmem>>)
    %c0_i32_513 = arith.constant 0 : i32
    %727 = tpu.memref_slice %arg2[%132, %c0_i32_513] : memref<10000x256xf32, #tpu.memory_space<any>> -> memref<1x256xf32, #tpu.memory_space<any>>
    %c43_i32_514 = arith.constant 43 : i32
    %c0_i32_515 = arith.constant 0 : i32
    %728 = tpu.memref_slice %arg6[%c43_i32_514, %c0_i32_515] : memref<128x256xf32, #tpu.memory_space<vmem>> -> memref<1x256xf32, #tpu.memory_space<vmem>>
    tpu.wait_dma2 semaphore(%arg7 : memref<!tpu.dma_semaphore, #tpu.memory_space<semaphore_mem>>) src(%727 : memref<1x256xf32, #tpu.memory_space<any>>) dst(%728 : memref<1x256xf32, #tpu.memory_space<vmem>>)
    %c0_i32_516 = arith.constant 0 : i32
    %729 = tpu.memref_slice %arg2[%135, %c0_i32_516] : memref<10000x256xf32, #tpu.memory_space<any>> -> memref<1x256xf32, #tpu.memory_space<any>>
    %c44_i32_517 = arith.constant 44 : i32
    %c0_i32_518 = arith.constant 0 : i32
    %730 = tpu.memref_slice %arg6[%c44_i32_517, %c0_i32_518] : memref<128x256xf32, #tpu.memory_space<vmem>> -> memref<1x256xf32, #tpu.memory_space<vmem>>
    tpu.wait_dma2 semaphore(%arg7 : memref<!tpu.dma_semaphore, #tpu.memory_space<semaphore_mem>>) src(%729 : memref<1x256xf32, #tpu.memory_space<any>>) dst(%730 : memref<1x256xf32, #tpu.memory_space<vmem>>)
    %c0_i32_519 = arith.constant 0 : i32
    %731 = tpu.memref_slice %arg2[%138, %c0_i32_519] : memref<10000x256xf32, #tpu.memory_space<any>> -> memref<1x256xf32, #tpu.memory_space<any>>
    %c45_i32_520 = arith.constant 45 : i32
    %c0_i32_521 = arith.constant 0 : i32
    %732 = tpu.memref_slice %arg6[%c45_i32_520, %c0_i32_521] : memref<128x256xf32, #tpu.memory_space<vmem>> -> memref<1x256xf32, #tpu.memory_space<vmem>>
    tpu.wait_dma2 semaphore(%arg7 : memref<!tpu.dma_semaphore, #tpu.memory_space<semaphore_mem>>) src(%731 : memref<1x256xf32, #tpu.memory_space<any>>) dst(%732 : memref<1x256xf32, #tpu.memory_space<vmem>>)
    %c0_i32_522 = arith.constant 0 : i32
    %733 = tpu.memref_slice %arg2[%141, %c0_i32_522] : memref<10000x256xf32, #tpu.memory_space<any>> -> memref<1x256xf32, #tpu.memory_space<any>>
    %c46_i32_523 = arith.constant 46 : i32
    %c0_i32_524 = arith.constant 0 : i32
    %734 = tpu.memref_slice %arg6[%c46_i32_523, %c0_i32_524] : memref<128x256xf32, #tpu.memory_space<vmem>> -> memref<1x256xf32, #tpu.memory_space<vmem>>
    tpu.wait_dma2 semaphore(%arg7 : memref<!tpu.dma_semaphore, #tpu.memory_space<semaphore_mem>>) src(%733 : memref<1x256xf32, #tpu.memory_space<any>>) dst(%734 : memref<1x256xf32, #tpu.memory_space<vmem>>)
    %c0_i32_525 = arith.constant 0 : i32
    %735 = tpu.memref_slice %arg2[%144, %c0_i32_525] : memref<10000x256xf32, #tpu.memory_space<any>> -> memref<1x256xf32, #tpu.memory_space<any>>
    %c47_i32_526 = arith.constant 47 : i32
    %c0_i32_527 = arith.constant 0 : i32
    %736 = tpu.memref_slice %arg6[%c47_i32_526, %c0_i32_527] : memref<128x256xf32, #tpu.memory_space<vmem>> -> memref<1x256xf32, #tpu.memory_space<vmem>>
    tpu.wait_dma2 semaphore(%arg7 : memref<!tpu.dma_semaphore, #tpu.memory_space<semaphore_mem>>) src(%735 : memref<1x256xf32, #tpu.memory_space<any>>) dst(%736 : memref<1x256xf32, #tpu.memory_space<vmem>>)
    %c0_i32_528 = arith.constant 0 : i32
    %737 = tpu.memref_slice %arg2[%147, %c0_i32_528] : memref<10000x256xf32, #tpu.memory_space<any>> -> memref<1x256xf32, #tpu.memory_space<any>>
    %c48_i32_529 = arith.constant 48 : i32
    %c0_i32_530 = arith.constant 0 : i32
    %738 = tpu.memref_slice %arg6[%c48_i32_529, %c0_i32_530] : memref<128x256xf32, #tpu.memory_space<vmem>> -> memref<1x256xf32, #tpu.memory_space<vmem>>
    tpu.wait_dma2 semaphore(%arg7 : memref<!tpu.dma_semaphore, #tpu.memory_space<semaphore_mem>>) src(%737 : memref<1x256xf32, #tpu.memory_space<any>>) dst(%738 : memref<1x256xf32, #tpu.memory_space<vmem>>)
    %c0_i32_531 = arith.constant 0 : i32
    %739 = tpu.memref_slice %arg2[%150, %c0_i32_531] : memref<10000x256xf32, #tpu.memory_space<any>> -> memref<1x256xf32, #tpu.memory_space<any>>
    %c49_i32_532 = arith.constant 49 : i32
    %c0_i32_533 = arith.constant 0 : i32
    %740 = tpu.memref_slice %arg6[%c49_i32_532, %c0_i32_533] : memref<128x256xf32, #tpu.memory_space<vmem>> -> memref<1x256xf32, #tpu.memory_space<vmem>>
    tpu.wait_dma2 semaphore(%arg7 : memref<!tpu.dma_semaphore, #tpu.memory_space<semaphore_mem>>) src(%739 : memref<1x256xf32, #tpu.memory_space<any>>) dst(%740 : memref<1x256xf32, #tpu.memory_space<vmem>>)
    %c0_i32_534 = arith.constant 0 : i32
    %741 = tpu.memref_slice %arg2[%153, %c0_i32_534] : memref<10000x256xf32, #tpu.memory_space<any>> -> memref<1x256xf32, #tpu.memory_space<any>>
    %c50_i32_535 = arith.constant 50 : i32
    %c0_i32_536 = arith.constant 0 : i32
    %742 = tpu.memref_slice %arg6[%c50_i32_535, %c0_i32_536] : memref<128x256xf32, #tpu.memory_space<vmem>> -> memref<1x256xf32, #tpu.memory_space<vmem>>
    tpu.wait_dma2 semaphore(%arg7 : memref<!tpu.dma_semaphore, #tpu.memory_space<semaphore_mem>>) src(%741 : memref<1x256xf32, #tpu.memory_space<any>>) dst(%742 : memref<1x256xf32, #tpu.memory_space<vmem>>)
    %c0_i32_537 = arith.constant 0 : i32
    %743 = tpu.memref_slice %arg2[%156, %c0_i32_537] : memref<10000x256xf32, #tpu.memory_space<any>> -> memref<1x256xf32, #tpu.memory_space<any>>
    %c51_i32_538 = arith.constant 51 : i32
    %c0_i32_539 = arith.constant 0 : i32
    %744 = tpu.memref_slice %arg6[%c51_i32_538, %c0_i32_539] : memref<128x256xf32, #tpu.memory_space<vmem>> -> memref<1x256xf32, #tpu.memory_space<vmem>>
    tpu.wait_dma2 semaphore(%arg7 : memref<!tpu.dma_semaphore, #tpu.memory_space<semaphore_mem>>) src(%743 : memref<1x256xf32, #tpu.memory_space<any>>) dst(%744 : memref<1x256xf32, #tpu.memory_space<vmem>>)
    %c0_i32_540 = arith.constant 0 : i32
    %745 = tpu.memref_slice %arg2[%159, %c0_i32_540] : memref<10000x256xf32, #tpu.memory_space<any>> -> memref<1x256xf32, #tpu.memory_space<any>>
    %c52_i32_541 = arith.constant 52 : i32
    %c0_i32_542 = arith.constant 0 : i32
    %746 = tpu.memref_slice %arg6[%c52_i32_541, %c0_i32_542] : memref<128x256xf32, #tpu.memory_space<vmem>> -> memref<1x256xf32, #tpu.memory_space<vmem>>
    tpu.wait_dma2 semaphore(%arg7 : memref<!tpu.dma_semaphore, #tpu.memory_space<semaphore_mem>>) src(%745 : memref<1x256xf32, #tpu.memory_space<any>>) dst(%746 : memref<1x256xf32, #tpu.memory_space<vmem>>)
    %c0_i32_543 = arith.constant 0 : i32
    %747 = tpu.memref_slice %arg2[%162, %c0_i32_543] : memref<10000x256xf32, #tpu.memory_space<any>> -> memref<1x256xf32, #tpu.memory_space<any>>
    %c53_i32_544 = arith.constant 53 : i32
    %c0_i32_545 = arith.constant 0 : i32
    %748 = tpu.memref_slice %arg6[%c53_i32_544, %c0_i32_545] : memref<128x256xf32, #tpu.memory_space<vmem>> -> memref<1x256xf32, #tpu.memory_space<vmem>>
    tpu.wait_dma2 semaphore(%arg7 : memref<!tpu.dma_semaphore, #tpu.memory_space<semaphore_mem>>) src(%747 : memref<1x256xf32, #tpu.memory_space<any>>) dst(%748 : memref<1x256xf32, #tpu.memory_space<vmem>>)
    %c0_i32_546 = arith.constant 0 : i32
    %749 = tpu.memref_slice %arg2[%165, %c0_i32_546] : memref<10000x256xf32, #tpu.memory_space<any>> -> memref<1x256xf32, #tpu.memory_space<any>>
    %c54_i32_547 = arith.constant 54 : i32
    %c0_i32_548 = arith.constant 0 : i32
    %750 = tpu.memref_slice %arg6[%c54_i32_547, %c0_i32_548] : memref<128x256xf32, #tpu.memory_space<vmem>> -> memref<1x256xf32, #tpu.memory_space<vmem>>
    tpu.wait_dma2 semaphore(%arg7 : memref<!tpu.dma_semaphore, #tpu.memory_space<semaphore_mem>>) src(%749 : memref<1x256xf32, #tpu.memory_space<any>>) dst(%750 : memref<1x256xf32, #tpu.memory_space<vmem>>)
    %c0_i32_549 = arith.constant 0 : i32
    %751 = tpu.memref_slice %arg2[%168, %c0_i32_549] : memref<10000x256xf32, #tpu.memory_space<any>> -> memref<1x256xf32, #tpu.memory_space<any>>
    %c55_i32_550 = arith.constant 55 : i32
    %c0_i32_551 = arith.constant 0 : i32
    %752 = tpu.memref_slice %arg6[%c55_i32_550, %c0_i32_551] : memref<128x256xf32, #tpu.memory_space<vmem>> -> memref<1x256xf32, #tpu.memory_space<vmem>>
    tpu.wait_dma2 semaphore(%arg7 : memref<!tpu.dma_semaphore, #tpu.memory_space<semaphore_mem>>) src(%751 : memref<1x256xf32, #tpu.memory_space<any>>) dst(%752 : memref<1x256xf32, #tpu.memory_space<vmem>>)
    %c0_i32_552 = arith.constant 0 : i32
    %753 = tpu.memref_slice %arg2[%171, %c0_i32_552] : memref<10000x256xf32, #tpu.memory_space<any>> -> memref<1x256xf32, #tpu.memory_space<any>>
    %c56_i32_553 = arith.constant 56 : i32
    %c0_i32_554 = arith.constant 0 : i32
    %754 = tpu.memref_slice %arg6[%c56_i32_553, %c0_i32_554] : memref<128x256xf32, #tpu.memory_space<vmem>> -> memref<1x256xf32, #tpu.memory_space<vmem>>
    tpu.wait_dma2 semaphore(%arg7 : memref<!tpu.dma_semaphore, #tpu.memory_space<semaphore_mem>>) src(%753 : memref<1x256xf32, #tpu.memory_space<any>>) dst(%754 : memref<1x256xf32, #tpu.memory_space<vmem>>)
    %c0_i32_555 = arith.constant 0 : i32
    %755 = tpu.memref_slice %arg2[%174, %c0_i32_555] : memref<10000x256xf32, #tpu.memory_space<any>> -> memref<1x256xf32, #tpu.memory_space<any>>
    %c57_i32_556 = arith.constant 57 : i32
    %c0_i32_557 = arith.constant 0 : i32
    %756 = tpu.memref_slice %arg6[%c57_i32_556, %c0_i32_557] : memref<128x256xf32, #tpu.memory_space<vmem>> -> memref<1x256xf32, #tpu.memory_space<vmem>>
    tpu.wait_dma2 semaphore(%arg7 : memref<!tpu.dma_semaphore, #tpu.memory_space<semaphore_mem>>) src(%755 : memref<1x256xf32, #tpu.memory_space<any>>) dst(%756 : memref<1x256xf32, #tpu.memory_space<vmem>>)
    %c0_i32_558 = arith.constant 0 : i32
    %757 = tpu.memref_slice %arg2[%177, %c0_i32_558] : memref<10000x256xf32, #tpu.memory_space<any>> -> memref<1x256xf32, #tpu.memory_space<any>>
    %c58_i32_559 = arith.constant 58 : i32
    %c0_i32_560 = arith.constant 0 : i32
    %758 = tpu.memref_slice %arg6[%c58_i32_559, %c0_i32_560] : memref<128x256xf32, #tpu.memory_space<vmem>> -> memref<1x256xf32, #tpu.memory_space<vmem>>
    tpu.wait_dma2 semaphore(%arg7 : memref<!tpu.dma_semaphore, #tpu.memory_space<semaphore_mem>>) src(%757 : memref<1x256xf32, #tpu.memory_space<any>>) dst(%758 : memref<1x256xf32, #tpu.memory_space<vmem>>)
    %c0_i32_561 = arith.constant 0 : i32
    %759 = tpu.memref_slice %arg2[%180, %c0_i32_561] : memref<10000x256xf32, #tpu.memory_space<any>> -> memref<1x256xf32, #tpu.memory_space<any>>
    %c59_i32_562 = arith.constant 59 : i32
    %c0_i32_563 = arith.constant 0 : i32
    %760 = tpu.memref_slice %arg6[%c59_i32_562, %c0_i32_563] : memref<128x256xf32, #tpu.memory_space<vmem>> -> memref<1x256xf32, #tpu.memory_space<vmem>>
    tpu.wait_dma2 semaphore(%arg7 : memref<!tpu.dma_semaphore, #tpu.memory_space<semaphore_mem>>) src(%759 : memref<1x256xf32, #tpu.memory_space<any>>) dst(%760 : memref<1x256xf32, #tpu.memory_space<vmem>>)
    %c0_i32_564 = arith.constant 0 : i32
    %761 = tpu.memref_slice %arg2[%183, %c0_i32_564] : memref<10000x256xf32, #tpu.memory_space<any>> -> memref<1x256xf32, #tpu.memory_space<any>>
    %c60_i32_565 = arith.constant 60 : i32
    %c0_i32_566 = arith.constant 0 : i32
    %762 = tpu.memref_slice %arg6[%c60_i32_565, %c0_i32_566] : memref<128x256xf32, #tpu.memory_space<vmem>> -> memref<1x256xf32, #tpu.memory_space<vmem>>
    tpu.wait_dma2 semaphore(%arg7 : memref<!tpu.dma_semaphore, #tpu.memory_space<semaphore_mem>>) src(%761 : memref<1x256xf32, #tpu.memory_space<any>>) dst(%762 : memref<1x256xf32, #tpu.memory_space<vmem>>)
    %c0_i32_567 = arith.constant 0 : i32
    %763 = tpu.memref_slice %arg2[%186, %c0_i32_567] : memref<10000x256xf32, #tpu.memory_space<any>> -> memref<1x256xf32, #tpu.memory_space<any>>
    %c61_i32_568 = arith.constant 61 : i32
    %c0_i32_569 = arith.constant 0 : i32
    %764 = tpu.memref_slice %arg6[%c61_i32_568, %c0_i32_569] : memref<128x256xf32, #tpu.memory_space<vmem>> -> memref<1x256xf32, #tpu.memory_space<vmem>>
    tpu.wait_dma2 semaphore(%arg7 : memref<!tpu.dma_semaphore, #tpu.memory_space<semaphore_mem>>) src(%763 : memref<1x256xf32, #tpu.memory_space<any>>) dst(%764 : memref<1x256xf32, #tpu.memory_space<vmem>>)
    %c0_i32_570 = arith.constant 0 : i32
    %765 = tpu.memref_slice %arg2[%189, %c0_i32_570] : memref<10000x256xf32, #tpu.memory_space<any>> -> memref<1x256xf32, #tpu.memory_space<any>>
    %c62_i32_571 = arith.constant 62 : i32
    %c0_i32_572 = arith.constant 0 : i32
    %766 = tpu.memref_slice %arg6[%c62_i32_571, %c0_i32_572] : memref<128x256xf32, #tpu.memory_space<vmem>> -> memref<1x256xf32, #tpu.memory_space<vmem>>
    tpu.wait_dma2 semaphore(%arg7 : memref<!tpu.dma_semaphore, #tpu.memory_space<semaphore_mem>>) src(%765 : memref<1x256xf32, #tpu.memory_space<any>>) dst(%766 : memref<1x256xf32, #tpu.memory_space<vmem>>)
    %c0_i32_573 = arith.constant 0 : i32
    %767 = tpu.memref_slice %arg2[%192, %c0_i32_573] : memref<10000x256xf32, #tpu.memory_space<any>> -> memref<1x256xf32, #tpu.memory_space<any>>
    %c63_i32_574 = arith.constant 63 : i32
    %c0_i32_575 = arith.constant 0 : i32
    %768 = tpu.memref_slice %arg6[%c63_i32_574, %c0_i32_575] : memref<128x256xf32, #tpu.memory_space<vmem>> -> memref<1x256xf32, #tpu.memory_space<vmem>>
    tpu.wait_dma2 semaphore(%arg7 : memref<!tpu.dma_semaphore, #tpu.memory_space<semaphore_mem>>) src(%767 : memref<1x256xf32, #tpu.memory_space<any>>) dst(%768 : memref<1x256xf32, #tpu.memory_space<vmem>>)
    %c0_i32_576 = arith.constant 0 : i32
    %769 = tpu.memref_slice %arg2[%195, %c0_i32_576] : memref<10000x256xf32, #tpu.memory_space<any>> -> memref<1x256xf32, #tpu.memory_space<any>>
    %c64_i32_577 = arith.constant 64 : i32
    %c0_i32_578 = arith.constant 0 : i32
    %770 = tpu.memref_slice %arg6[%c64_i32_577, %c0_i32_578] : memref<128x256xf32, #tpu.memory_space<vmem>> -> memref<1x256xf32, #tpu.memory_space<vmem>>
    tpu.wait_dma2 semaphore(%arg7 : memref<!tpu.dma_semaphore, #tpu.memory_space<semaphore_mem>>) src(%769 : memref<1x256xf32, #tpu.memory_space<any>>) dst(%770 : memref<1x256xf32, #tpu.memory_space<vmem>>)
    %c0_i32_579 = arith.constant 0 : i32
    %771 = tpu.memref_slice %arg2[%198, %c0_i32_579] : memref<10000x256xf32, #tpu.memory_space<any>> -> memref<1x256xf32, #tpu.memory_space<any>>
    %c65_i32_580 = arith.constant 65 : i32
    %c0_i32_581 = arith.constant 0 : i32
    %772 = tpu.memref_slice %arg6[%c65_i32_580, %c0_i32_581] : memref<128x256xf32, #tpu.memory_space<vmem>> -> memref<1x256xf32, #tpu.memory_space<vmem>>
    tpu.wait_dma2 semaphore(%arg7 : memref<!tpu.dma_semaphore, #tpu.memory_space<semaphore_mem>>) src(%771 : memref<1x256xf32, #tpu.memory_space<any>>) dst(%772 : memref<1x256xf32, #tpu.memory_space<vmem>>)
    %c0_i32_582 = arith.constant 0 : i32
    %773 = tpu.memref_slice %arg2[%201, %c0_i32_582] : memref<10000x256xf32, #tpu.memory_space<any>> -> memref<1x256xf32, #tpu.memory_space<any>>
    %c66_i32_583 = arith.constant 66 : i32
    %c0_i32_584 = arith.constant 0 : i32
    %774 = tpu.memref_slice %arg6[%c66_i32_583, %c0_i32_584] : memref<128x256xf32, #tpu.memory_space<vmem>> -> memref<1x256xf32, #tpu.memory_space<vmem>>
    tpu.wait_dma2 semaphore(%arg7 : memref<!tpu.dma_semaphore, #tpu.memory_space<semaphore_mem>>) src(%773 : memref<1x256xf32, #tpu.memory_space<any>>) dst(%774 : memref<1x256xf32, #tpu.memory_space<vmem>>)
    %c0_i32_585 = arith.constant 0 : i32
    %775 = tpu.memref_slice %arg2[%204, %c0_i32_585] : memref<10000x256xf32, #tpu.memory_space<any>> -> memref<1x256xf32, #tpu.memory_space<any>>
    %c67_i32_586 = arith.constant 67 : i32
    %c0_i32_587 = arith.constant 0 : i32
    %776 = tpu.memref_slice %arg6[%c67_i32_586, %c0_i32_587] : memref<128x256xf32, #tpu.memory_space<vmem>> -> memref<1x256xf32, #tpu.memory_space<vmem>>
    tpu.wait_dma2 semaphore(%arg7 : memref<!tpu.dma_semaphore, #tpu.memory_space<semaphore_mem>>) src(%775 : memref<1x256xf32, #tpu.memory_space<any>>) dst(%776 : memref<1x256xf32, #tpu.memory_space<vmem>>)
    %c0_i32_588 = arith.constant 0 : i32
    %777 = tpu.memref_slice %arg2[%207, %c0_i32_588] : memref<10000x256xf32, #tpu.memory_space<any>> -> memref<1x256xf32, #tpu.memory_space<any>>
    %c68_i32_589 = arith.constant 68 : i32
    %c0_i32_590 = arith.constant 0 : i32
    %778 = tpu.memref_slice %arg6[%c68_i32_589, %c0_i32_590] : memref<128x256xf32, #tpu.memory_space<vmem>> -> memref<1x256xf32, #tpu.memory_space<vmem>>
    tpu.wait_dma2 semaphore(%arg7 : memref<!tpu.dma_semaphore, #tpu.memory_space<semaphore_mem>>) src(%777 : memref<1x256xf32, #tpu.memory_space<any>>) dst(%778 : memref<1x256xf32, #tpu.memory_space<vmem>>)
    %c0_i32_591 = arith.constant 0 : i32
    %779 = tpu.memref_slice %arg2[%210, %c0_i32_591] : memref<10000x256xf32, #tpu.memory_space<any>> -> memref<1x256xf32, #tpu.memory_space<any>>
    %c69_i32_592 = arith.constant 69 : i32
    %c0_i32_593 = arith.constant 0 : i32
    %780 = tpu.memref_slice %arg6[%c69_i32_592, %c0_i32_593] : memref<128x256xf32, #tpu.memory_space<vmem>> -> memref<1x256xf32, #tpu.memory_space<vmem>>
    tpu.wait_dma2 semaphore(%arg7 : memref<!tpu.dma_semaphore, #tpu.memory_space<semaphore_mem>>) src(%779 : memref<1x256xf32, #tpu.memory_space<any>>) dst(%780 : memref<1x256xf32, #tpu.memory_space<vmem>>)
    %c0_i32_594 = arith.constant 0 : i32
    %781 = tpu.memref_slice %arg2[%213, %c0_i32_594] : memref<10000x256xf32, #tpu.memory_space<any>> -> memref<1x256xf32, #tpu.memory_space<any>>
    %c70_i32_595 = arith.constant 70 : i32
    %c0_i32_596 = arith.constant 0 : i32
    %782 = tpu.memref_slice %arg6[%c70_i32_595, %c0_i32_596] : memref<128x256xf32, #tpu.memory_space<vmem>> -> memref<1x256xf32, #tpu.memory_space<vmem>>
    tpu.wait_dma2 semaphore(%arg7 : memref<!tpu.dma_semaphore, #tpu.memory_space<semaphore_mem>>) src(%781 : memref<1x256xf32, #tpu.memory_space<any>>) dst(%782 : memref<1x256xf32, #tpu.memory_space<vmem>>)
    %c0_i32_597 = arith.constant 0 : i32
    %783 = tpu.memref_slice %arg2[%216, %c0_i32_597] : memref<10000x256xf32, #tpu.memory_space<any>> -> memref<1x256xf32, #tpu.memory_space<any>>
    %c71_i32_598 = arith.constant 71 : i32
    %c0_i32_599 = arith.constant 0 : i32
    %784 = tpu.memref_slice %arg6[%c71_i32_598, %c0_i32_599] : memref<128x256xf32, #tpu.memory_space<vmem>> -> memref<1x256xf32, #tpu.memory_space<vmem>>
    tpu.wait_dma2 semaphore(%arg7 : memref<!tpu.dma_semaphore, #tpu.memory_space<semaphore_mem>>) src(%783 : memref<1x256xf32, #tpu.memory_space<any>>) dst(%784 : memref<1x256xf32, #tpu.memory_space<vmem>>)
    %c0_i32_600 = arith.constant 0 : i32
    %785 = tpu.memref_slice %arg2[%219, %c0_i32_600] : memref<10000x256xf32, #tpu.memory_space<any>> -> memref<1x256xf32, #tpu.memory_space<any>>
    %c72_i32_601 = arith.constant 72 : i32
    %c0_i32_602 = arith.constant 0 : i32
    %786 = tpu.memref_slice %arg6[%c72_i32_601, %c0_i32_602] : memref<128x256xf32, #tpu.memory_space<vmem>> -> memref<1x256xf32, #tpu.memory_space<vmem>>
    tpu.wait_dma2 semaphore(%arg7 : memref<!tpu.dma_semaphore, #tpu.memory_space<semaphore_mem>>) src(%785 : memref<1x256xf32, #tpu.memory_space<any>>) dst(%786 : memref<1x256xf32, #tpu.memory_space<vmem>>)
    %c0_i32_603 = arith.constant 0 : i32
    %787 = tpu.memref_slice %arg2[%222, %c0_i32_603] : memref<10000x256xf32, #tpu.memory_space<any>> -> memref<1x256xf32, #tpu.memory_space<any>>
    %c73_i32_604 = arith.constant 73 : i32
    %c0_i32_605 = arith.constant 0 : i32
    %788 = tpu.memref_slice %arg6[%c73_i32_604, %c0_i32_605] : memref<128x256xf32, #tpu.memory_space<vmem>> -> memref<1x256xf32, #tpu.memory_space<vmem>>
    tpu.wait_dma2 semaphore(%arg7 : memref<!tpu.dma_semaphore, #tpu.memory_space<semaphore_mem>>) src(%787 : memref<1x256xf32, #tpu.memory_space<any>>) dst(%788 : memref<1x256xf32, #tpu.memory_space<vmem>>)
    %c0_i32_606 = arith.constant 0 : i32
    %789 = tpu.memref_slice %arg2[%225, %c0_i32_606] : memref<10000x256xf32, #tpu.memory_space<any>> -> memref<1x256xf32, #tpu.memory_space<any>>
    %c74_i32_607 = arith.constant 74 : i32
    %c0_i32_608 = arith.constant 0 : i32
    %790 = tpu.memref_slice %arg6[%c74_i32_607, %c0_i32_608] : memref<128x256xf32, #tpu.memory_space<vmem>> -> memref<1x256xf32, #tpu.memory_space<vmem>>
    tpu.wait_dma2 semaphore(%arg7 : memref<!tpu.dma_semaphore, #tpu.memory_space<semaphore_mem>>) src(%789 : memref<1x256xf32, #tpu.memory_space<any>>) dst(%790 : memref<1x256xf32, #tpu.memory_space<vmem>>)
    %c0_i32_609 = arith.constant 0 : i32
    %791 = tpu.memref_slice %arg2[%228, %c0_i32_609] : memref<10000x256xf32, #tpu.memory_space<any>> -> memref<1x256xf32, #tpu.memory_space<any>>
    %c75_i32_610 = arith.constant 75 : i32
    %c0_i32_611 = arith.constant 0 : i32
    %792 = tpu.memref_slice %arg6[%c75_i32_610, %c0_i32_611] : memref<128x256xf32, #tpu.memory_space<vmem>> -> memref<1x256xf32, #tpu.memory_space<vmem>>
    tpu.wait_dma2 semaphore(%arg7 : memref<!tpu.dma_semaphore, #tpu.memory_space<semaphore_mem>>) src(%791 : memref<1x256xf32, #tpu.memory_space<any>>) dst(%792 : memref<1x256xf32, #tpu.memory_space<vmem>>)
    %c0_i32_612 = arith.constant 0 : i32
    %793 = tpu.memref_slice %arg2[%231, %c0_i32_612] : memref<10000x256xf32, #tpu.memory_space<any>> -> memref<1x256xf32, #tpu.memory_space<any>>
    %c76_i32_613 = arith.constant 76 : i32
    %c0_i32_614 = arith.constant 0 : i32
    %794 = tpu.memref_slice %arg6[%c76_i32_613, %c0_i32_614] : memref<128x256xf32, #tpu.memory_space<vmem>> -> memref<1x256xf32, #tpu.memory_space<vmem>>
    tpu.wait_dma2 semaphore(%arg7 : memref<!tpu.dma_semaphore, #tpu.memory_space<semaphore_mem>>) src(%793 : memref<1x256xf32, #tpu.memory_space<any>>) dst(%794 : memref<1x256xf32, #tpu.memory_space<vmem>>)
    %c0_i32_615 = arith.constant 0 : i32
    %795 = tpu.memref_slice %arg2[%234, %c0_i32_615] : memref<10000x256xf32, #tpu.memory_space<any>> -> memref<1x256xf32, #tpu.memory_space<any>>
    %c77_i32_616 = arith.constant 77 : i32
    %c0_i32_617 = arith.constant 0 : i32
    %796 = tpu.memref_slice %arg6[%c77_i32_616, %c0_i32_617] : memref<128x256xf32, #tpu.memory_space<vmem>> -> memref<1x256xf32, #tpu.memory_space<vmem>>
    tpu.wait_dma2 semaphore(%arg7 : memref<!tpu.dma_semaphore, #tpu.memory_space<semaphore_mem>>) src(%795 : memref<1x256xf32, #tpu.memory_space<any>>) dst(%796 : memref<1x256xf32, #tpu.memory_space<vmem>>)
    %c0_i32_618 = arith.constant 0 : i32
    %797 = tpu.memref_slice %arg2[%237, %c0_i32_618] : memref<10000x256xf32, #tpu.memory_space<any>> -> memref<1x256xf32, #tpu.memory_space<any>>
    %c78_i32_619 = arith.constant 78 : i32
    %c0_i32_620 = arith.constant 0 : i32
    %798 = tpu.memref_slice %arg6[%c78_i32_619, %c0_i32_620] : memref<128x256xf32, #tpu.memory_space<vmem>> -> memref<1x256xf32, #tpu.memory_space<vmem>>
    tpu.wait_dma2 semaphore(%arg7 : memref<!tpu.dma_semaphore, #tpu.memory_space<semaphore_mem>>) src(%797 : memref<1x256xf32, #tpu.memory_space<any>>) dst(%798 : memref<1x256xf32, #tpu.memory_space<vmem>>)
    %c0_i32_621 = arith.constant 0 : i32
    %799 = tpu.memref_slice %arg2[%240, %c0_i32_621] : memref<10000x256xf32, #tpu.memory_space<any>> -> memref<1x256xf32, #tpu.memory_space<any>>
    %c79_i32_622 = arith.constant 79 : i32
    %c0_i32_623 = arith.constant 0 : i32
    %800 = tpu.memref_slice %arg6[%c79_i32_622, %c0_i32_623] : memref<128x256xf32, #tpu.memory_space<vmem>> -> memref<1x256xf32, #tpu.memory_space<vmem>>
    tpu.wait_dma2 semaphore(%arg7 : memref<!tpu.dma_semaphore, #tpu.memory_space<semaphore_mem>>) src(%799 : memref<1x256xf32, #tpu.memory_space<any>>) dst(%800 : memref<1x256xf32, #tpu.memory_space<vmem>>)
    %c0_i32_624 = arith.constant 0 : i32
    %801 = tpu.memref_slice %arg2[%243, %c0_i32_624] : memref<10000x256xf32, #tpu.memory_space<any>> -> memref<1x256xf32, #tpu.memory_space<any>>
    %c80_i32_625 = arith.constant 80 : i32
    %c0_i32_626 = arith.constant 0 : i32
    %802 = tpu.memref_slice %arg6[%c80_i32_625, %c0_i32_626] : memref<128x256xf32, #tpu.memory_space<vmem>> -> memref<1x256xf32, #tpu.memory_space<vmem>>
    tpu.wait_dma2 semaphore(%arg7 : memref<!tpu.dma_semaphore, #tpu.memory_space<semaphore_mem>>) src(%801 : memref<1x256xf32, #tpu.memory_space<any>>) dst(%802 : memref<1x256xf32, #tpu.memory_space<vmem>>)
    %c0_i32_627 = arith.constant 0 : i32
    %803 = tpu.memref_slice %arg2[%246, %c0_i32_627] : memref<10000x256xf32, #tpu.memory_space<any>> -> memref<1x256xf32, #tpu.memory_space<any>>
    %c81_i32_628 = arith.constant 81 : i32
    %c0_i32_629 = arith.constant 0 : i32
    %804 = tpu.memref_slice %arg6[%c81_i32_628, %c0_i32_629] : memref<128x256xf32, #tpu.memory_space<vmem>> -> memref<1x256xf32, #tpu.memory_space<vmem>>
    tpu.wait_dma2 semaphore(%arg7 : memref<!tpu.dma_semaphore, #tpu.memory_space<semaphore_mem>>) src(%803 : memref<1x256xf32, #tpu.memory_space<any>>) dst(%804 : memref<1x256xf32, #tpu.memory_space<vmem>>)
    %c0_i32_630 = arith.constant 0 : i32
    %805 = tpu.memref_slice %arg2[%249, %c0_i32_630] : memref<10000x256xf32, #tpu.memory_space<any>> -> memref<1x256xf32, #tpu.memory_space<any>>
    %c82_i32_631 = arith.constant 82 : i32
    %c0_i32_632 = arith.constant 0 : i32
    %806 = tpu.memref_slice %arg6[%c82_i32_631, %c0_i32_632] : memref<128x256xf32, #tpu.memory_space<vmem>> -> memref<1x256xf32, #tpu.memory_space<vmem>>
    tpu.wait_dma2 semaphore(%arg7 : memref<!tpu.dma_semaphore, #tpu.memory_space<semaphore_mem>>) src(%805 : memref<1x256xf32, #tpu.memory_space<any>>) dst(%806 : memref<1x256xf32, #tpu.memory_space<vmem>>)
    %c0_i32_633 = arith.constant 0 : i32
    %807 = tpu.memref_slice %arg2[%252, %c0_i32_633] : memref<10000x256xf32, #tpu.memory_space<any>> -> memref<1x256xf32, #tpu.memory_space<any>>
    %c83_i32_634 = arith.constant 83 : i32
    %c0_i32_635 = arith.constant 0 : i32
    %808 = tpu.memref_slice %arg6[%c83_i32_634, %c0_i32_635] : memref<128x256xf32, #tpu.memory_space<vmem>> -> memref<1x256xf32, #tpu.memory_space<vmem>>
    tpu.wait_dma2 semaphore(%arg7 : memref<!tpu.dma_semaphore, #tpu.memory_space<semaphore_mem>>) src(%807 : memref<1x256xf32, #tpu.memory_space<any>>) dst(%808 : memref<1x256xf32, #tpu.memory_space<vmem>>)
    %c0_i32_636 = arith.constant 0 : i32
    %809 = tpu.memref_slice %arg2[%255, %c0_i32_636] : memref<10000x256xf32, #tpu.memory_space<any>> -> memref<1x256xf32, #tpu.memory_space<any>>
    %c84_i32_637 = arith.constant 84 : i32
    %c0_i32_638 = arith.constant 0 : i32
    %810 = tpu.memref_slice %arg6[%c84_i32_637, %c0_i32_638] : memref<128x256xf32, #tpu.memory_space<vmem>> -> memref<1x256xf32, #tpu.memory_space<vmem>>
    tpu.wait_dma2 semaphore(%arg7 : memref<!tpu.dma_semaphore, #tpu.memory_space<semaphore_mem>>) src(%809 : memref<1x256xf32, #tpu.memory_space<any>>) dst(%810 : memref<1x256xf32, #tpu.memory_space<vmem>>)
    %c0_i32_639 = arith.constant 0 : i32
    %811 = tpu.memref_slice %arg2[%258, %c0_i32_639] : memref<10000x256xf32, #tpu.memory_space<any>> -> memref<1x256xf32, #tpu.memory_space<any>>
    %c85_i32_640 = arith.constant 85 : i32
    %c0_i32_641 = arith.constant 0 : i32
    %812 = tpu.memref_slice %arg6[%c85_i32_640, %c0_i32_641] : memref<128x256xf32, #tpu.memory_space<vmem>> -> memref<1x256xf32, #tpu.memory_space<vmem>>
    tpu.wait_dma2 semaphore(%arg7 : memref<!tpu.dma_semaphore, #tpu.memory_space<semaphore_mem>>) src(%811 : memref<1x256xf32, #tpu.memory_space<any>>) dst(%812 : memref<1x256xf32, #tpu.memory_space<vmem>>)
    %c0_i32_642 = arith.constant 0 : i32
    %813 = tpu.memref_slice %arg2[%261, %c0_i32_642] : memref<10000x256xf32, #tpu.memory_space<any>> -> memref<1x256xf32, #tpu.memory_space<any>>
    %c86_i32_643 = arith.constant 86 : i32
    %c0_i32_644 = arith.constant 0 : i32
    %814 = tpu.memref_slice %arg6[%c86_i32_643, %c0_i32_644] : memref<128x256xf32, #tpu.memory_space<vmem>> -> memref<1x256xf32, #tpu.memory_space<vmem>>
    tpu.wait_dma2 semaphore(%arg7 : memref<!tpu.dma_semaphore, #tpu.memory_space<semaphore_mem>>) src(%813 : memref<1x256xf32, #tpu.memory_space<any>>) dst(%814 : memref<1x256xf32, #tpu.memory_space<vmem>>)
    %c0_i32_645 = arith.constant 0 : i32
    %815 = tpu.memref_slice %arg2[%264, %c0_i32_645] : memref<10000x256xf32, #tpu.memory_space<any>> -> memref<1x256xf32, #tpu.memory_space<any>>
    %c87_i32_646 = arith.constant 87 : i32
    %c0_i32_647 = arith.constant 0 : i32
    %816 = tpu.memref_slice %arg6[%c87_i32_646, %c0_i32_647] : memref<128x256xf32, #tpu.memory_space<vmem>> -> memref<1x256xf32, #tpu.memory_space<vmem>>
    tpu.wait_dma2 semaphore(%arg7 : memref<!tpu.dma_semaphore, #tpu.memory_space<semaphore_mem>>) src(%815 : memref<1x256xf32, #tpu.memory_space<any>>) dst(%816 : memref<1x256xf32, #tpu.memory_space<vmem>>)
    %c0_i32_648 = arith.constant 0 : i32
    %817 = tpu.memref_slice %arg2[%267, %c0_i32_648] : memref<10000x256xf32, #tpu.memory_space<any>> -> memref<1x256xf32, #tpu.memory_space<any>>
    %c88_i32_649 = arith.constant 88 : i32
    %c0_i32_650 = arith.constant 0 : i32
    %818 = tpu.memref_slice %arg6[%c88_i32_649, %c0_i32_650] : memref<128x256xf32, #tpu.memory_space<vmem>> -> memref<1x256xf32, #tpu.memory_space<vmem>>
    tpu.wait_dma2 semaphore(%arg7 : memref<!tpu.dma_semaphore, #tpu.memory_space<semaphore_mem>>) src(%817 : memref<1x256xf32, #tpu.memory_space<any>>) dst(%818 : memref<1x256xf32, #tpu.memory_space<vmem>>)
    %c0_i32_651 = arith.constant 0 : i32
    %819 = tpu.memref_slice %arg2[%270, %c0_i32_651] : memref<10000x256xf32, #tpu.memory_space<any>> -> memref<1x256xf32, #tpu.memory_space<any>>
    %c89_i32_652 = arith.constant 89 : i32
    %c0_i32_653 = arith.constant 0 : i32
    %820 = tpu.memref_slice %arg6[%c89_i32_652, %c0_i32_653] : memref<128x256xf32, #tpu.memory_space<vmem>> -> memref<1x256xf32, #tpu.memory_space<vmem>>
    tpu.wait_dma2 semaphore(%arg7 : memref<!tpu.dma_semaphore, #tpu.memory_space<semaphore_mem>>) src(%819 : memref<1x256xf32, #tpu.memory_space<any>>) dst(%820 : memref<1x256xf32, #tpu.memory_space<vmem>>)
    %c0_i32_654 = arith.constant 0 : i32
    %821 = tpu.memref_slice %arg2[%273, %c0_i32_654] : memref<10000x256xf32, #tpu.memory_space<any>> -> memref<1x256xf32, #tpu.memory_space<any>>
    %c90_i32_655 = arith.constant 90 : i32
    %c0_i32_656 = arith.constant 0 : i32
    %822 = tpu.memref_slice %arg6[%c90_i32_655, %c0_i32_656] : memref<128x256xf32, #tpu.memory_space<vmem>> -> memref<1x256xf32, #tpu.memory_space<vmem>>
    tpu.wait_dma2 semaphore(%arg7 : memref<!tpu.dma_semaphore, #tpu.memory_space<semaphore_mem>>) src(%821 : memref<1x256xf32, #tpu.memory_space<any>>) dst(%822 : memref<1x256xf32, #tpu.memory_space<vmem>>)
    %c0_i32_657 = arith.constant 0 : i32
    %823 = tpu.memref_slice %arg2[%276, %c0_i32_657] : memref<10000x256xf32, #tpu.memory_space<any>> -> memref<1x256xf32, #tpu.memory_space<any>>
    %c91_i32_658 = arith.constant 91 : i32
    %c0_i32_659 = arith.constant 0 : i32
    %824 = tpu.memref_slice %arg6[%c91_i32_658, %c0_i32_659] : memref<128x256xf32, #tpu.memory_space<vmem>> -> memref<1x256xf32, #tpu.memory_space<vmem>>
    tpu.wait_dma2 semaphore(%arg7 : memref<!tpu.dma_semaphore, #tpu.memory_space<semaphore_mem>>) src(%823 : memref<1x256xf32, #tpu.memory_space<any>>) dst(%824 : memref<1x256xf32, #tpu.memory_space<vmem>>)
    %c0_i32_660 = arith.constant 0 : i32
    %825 = tpu.memref_slice %arg2[%279, %c0_i32_660] : memref<10000x256xf32, #tpu.memory_space<any>> -> memref<1x256xf32, #tpu.memory_space<any>>
    %c92_i32_661 = arith.constant 92 : i32
    %c0_i32_662 = arith.constant 0 : i32
    %826 = tpu.memref_slice %arg6[%c92_i32_661, %c0_i32_662] : memref<128x256xf32, #tpu.memory_space<vmem>> -> memref<1x256xf32, #tpu.memory_space<vmem>>
    tpu.wait_dma2 semaphore(%arg7 : memref<!tpu.dma_semaphore, #tpu.memory_space<semaphore_mem>>) src(%825 : memref<1x256xf32, #tpu.memory_space<any>>) dst(%826 : memref<1x256xf32, #tpu.memory_space<vmem>>)
    %c0_i32_663 = arith.constant 0 : i32
    %827 = tpu.memref_slice %arg2[%282, %c0_i32_663] : memref<10000x256xf32, #tpu.memory_space<any>> -> memref<1x256xf32, #tpu.memory_space<any>>
    %c93_i32_664 = arith.constant 93 : i32
    %c0_i32_665 = arith.constant 0 : i32
    %828 = tpu.memref_slice %arg6[%c93_i32_664, %c0_i32_665] : memref<128x256xf32, #tpu.memory_space<vmem>> -> memref<1x256xf32, #tpu.memory_space<vmem>>
    tpu.wait_dma2 semaphore(%arg7 : memref<!tpu.dma_semaphore, #tpu.memory_space<semaphore_mem>>) src(%827 : memref<1x256xf32, #tpu.memory_space<any>>) dst(%828 : memref<1x256xf32, #tpu.memory_space<vmem>>)
    %c0_i32_666 = arith.constant 0 : i32
    %829 = tpu.memref_slice %arg2[%285, %c0_i32_666] : memref<10000x256xf32, #tpu.memory_space<any>> -> memref<1x256xf32, #tpu.memory_space<any>>
    %c94_i32_667 = arith.constant 94 : i32
    %c0_i32_668 = arith.constant 0 : i32
    %830 = tpu.memref_slice %arg6[%c94_i32_667, %c0_i32_668] : memref<128x256xf32, #tpu.memory_space<vmem>> -> memref<1x256xf32, #tpu.memory_space<vmem>>
    tpu.wait_dma2 semaphore(%arg7 : memref<!tpu.dma_semaphore, #tpu.memory_space<semaphore_mem>>) src(%829 : memref<1x256xf32, #tpu.memory_space<any>>) dst(%830 : memref<1x256xf32, #tpu.memory_space<vmem>>)
    %c0_i32_669 = arith.constant 0 : i32
    %831 = tpu.memref_slice %arg2[%288, %c0_i32_669] : memref<10000x256xf32, #tpu.memory_space<any>> -> memref<1x256xf32, #tpu.memory_space<any>>
    %c95_i32_670 = arith.constant 95 : i32
    %c0_i32_671 = arith.constant 0 : i32
    %832 = tpu.memref_slice %arg6[%c95_i32_670, %c0_i32_671] : memref<128x256xf32, #tpu.memory_space<vmem>> -> memref<1x256xf32, #tpu.memory_space<vmem>>
    tpu.wait_dma2 semaphore(%arg7 : memref<!tpu.dma_semaphore, #tpu.memory_space<semaphore_mem>>) src(%831 : memref<1x256xf32, #tpu.memory_space<any>>) dst(%832 : memref<1x256xf32, #tpu.memory_space<vmem>>)
    %c0_i32_672 = arith.constant 0 : i32
    %833 = tpu.memref_slice %arg2[%291, %c0_i32_672] : memref<10000x256xf32, #tpu.memory_space<any>> -> memref<1x256xf32, #tpu.memory_space<any>>
    %c96_i32_673 = arith.constant 96 : i32
    %c0_i32_674 = arith.constant 0 : i32
    %834 = tpu.memref_slice %arg6[%c96_i32_673, %c0_i32_674] : memref<128x256xf32, #tpu.memory_space<vmem>> -> memref<1x256xf32, #tpu.memory_space<vmem>>
    tpu.wait_dma2 semaphore(%arg7 : memref<!tpu.dma_semaphore, #tpu.memory_space<semaphore_mem>>) src(%833 : memref<1x256xf32, #tpu.memory_space<any>>) dst(%834 : memref<1x256xf32, #tpu.memory_space<vmem>>)
    %c0_i32_675 = arith.constant 0 : i32
    %835 = tpu.memref_slice %arg2[%294, %c0_i32_675] : memref<10000x256xf32, #tpu.memory_space<any>> -> memref<1x256xf32, #tpu.memory_space<any>>
    %c97_i32_676 = arith.constant 97 : i32
    %c0_i32_677 = arith.constant 0 : i32
    %836 = tpu.memref_slice %arg6[%c97_i32_676, %c0_i32_677] : memref<128x256xf32, #tpu.memory_space<vmem>> -> memref<1x256xf32, #tpu.memory_space<vmem>>
    tpu.wait_dma2 semaphore(%arg7 : memref<!tpu.dma_semaphore, #tpu.memory_space<semaphore_mem>>) src(%835 : memref<1x256xf32, #tpu.memory_space<any>>) dst(%836 : memref<1x256xf32, #tpu.memory_space<vmem>>)
    %c0_i32_678 = arith.constant 0 : i32
    %837 = tpu.memref_slice %arg2[%297, %c0_i32_678] : memref<10000x256xf32, #tpu.memory_space<any>> -> memref<1x256xf32, #tpu.memory_space<any>>
    %c98_i32_679 = arith.constant 98 : i32
    %c0_i32_680 = arith.constant 0 : i32
    %838 = tpu.memref_slice %arg6[%c98_i32_679, %c0_i32_680] : memref<128x256xf32, #tpu.memory_space<vmem>> -> memref<1x256xf32, #tpu.memory_space<vmem>>
    tpu.wait_dma2 semaphore(%arg7 : memref<!tpu.dma_semaphore, #tpu.memory_space<semaphore_mem>>) src(%837 : memref<1x256xf32, #tpu.memory_space<any>>) dst(%838 : memref<1x256xf32, #tpu.memory_space<vmem>>)
    %c0_i32_681 = arith.constant 0 : i32
    %839 = tpu.memref_slice %arg2[%300, %c0_i32_681] : memref<10000x256xf32, #tpu.memory_space<any>> -> memref<1x256xf32, #tpu.memory_space<any>>
    %c99_i32_682 = arith.constant 99 : i32
    %c0_i32_683 = arith.constant 0 : i32
    %840 = tpu.memref_slice %arg6[%c99_i32_682, %c0_i32_683] : memref<128x256xf32, #tpu.memory_space<vmem>> -> memref<1x256xf32, #tpu.memory_space<vmem>>
    tpu.wait_dma2 semaphore(%arg7 : memref<!tpu.dma_semaphore, #tpu.memory_space<semaphore_mem>>) src(%839 : memref<1x256xf32, #tpu.memory_space<any>>) dst(%840 : memref<1x256xf32, #tpu.memory_space<vmem>>)
    %c0_i32_684 = arith.constant 0 : i32
    %841 = tpu.memref_slice %arg2[%303, %c0_i32_684] : memref<10000x256xf32, #tpu.memory_space<any>> -> memref<1x256xf32, #tpu.memory_space<any>>
    %c100_i32_685 = arith.constant 100 : i32
    %c0_i32_686 = arith.constant 0 : i32
    %842 = tpu.memref_slice %arg6[%c100_i32_685, %c0_i32_686] : memref<128x256xf32, #tpu.memory_space<vmem>> -> memref<1x256xf32, #tpu.memory_space<vmem>>
    tpu.wait_dma2 semaphore(%arg7 : memref<!tpu.dma_semaphore, #tpu.memory_space<semaphore_mem>>) src(%841 : memref<1x256xf32, #tpu.memory_space<any>>) dst(%842 : memref<1x256xf32, #tpu.memory_space<vmem>>)
    %c0_i32_687 = arith.constant 0 : i32
    %843 = tpu.memref_slice %arg2[%306, %c0_i32_687] : memref<10000x256xf32, #tpu.memory_space<any>> -> memref<1x256xf32, #tpu.memory_space<any>>
    %c101_i32_688 = arith.constant 101 : i32
    %c0_i32_689 = arith.constant 0 : i32
    %844 = tpu.memref_slice %arg6[%c101_i32_688, %c0_i32_689] : memref<128x256xf32, #tpu.memory_space<vmem>> -> memref<1x256xf32, #tpu.memory_space<vmem>>
    tpu.wait_dma2 semaphore(%arg7 : memref<!tpu.dma_semaphore, #tpu.memory_space<semaphore_mem>>) src(%843 : memref<1x256xf32, #tpu.memory_space<any>>) dst(%844 : memref<1x256xf32, #tpu.memory_space<vmem>>)
    %c0_i32_690 = arith.constant 0 : i32
    %845 = tpu.memref_slice %arg2[%309, %c0_i32_690] : memref<10000x256xf32, #tpu.memory_space<any>> -> memref<1x256xf32, #tpu.memory_space<any>>
    %c102_i32_691 = arith.constant 102 : i32
    %c0_i32_692 = arith.constant 0 : i32
    %846 = tpu.memref_slice %arg6[%c102_i32_691, %c0_i32_692] : memref<128x256xf32, #tpu.memory_space<vmem>> -> memref<1x256xf32, #tpu.memory_space<vmem>>
    tpu.wait_dma2 semaphore(%arg7 : memref<!tpu.dma_semaphore, #tpu.memory_space<semaphore_mem>>) src(%845 : memref<1x256xf32, #tpu.memory_space<any>>) dst(%846 : memref<1x256xf32, #tpu.memory_space<vmem>>)
    %c0_i32_693 = arith.constant 0 : i32
    %847 = tpu.memref_slice %arg2[%312, %c0_i32_693] : memref<10000x256xf32, #tpu.memory_space<any>> -> memref<1x256xf32, #tpu.memory_space<any>>
    %c103_i32_694 = arith.constant 103 : i32
    %c0_i32_695 = arith.constant 0 : i32
    %848 = tpu.memref_slice %arg6[%c103_i32_694, %c0_i32_695] : memref<128x256xf32, #tpu.memory_space<vmem>> -> memref<1x256xf32, #tpu.memory_space<vmem>>
    tpu.wait_dma2 semaphore(%arg7 : memref<!tpu.dma_semaphore, #tpu.memory_space<semaphore_mem>>) src(%847 : memref<1x256xf32, #tpu.memory_space<any>>) dst(%848 : memref<1x256xf32, #tpu.memory_space<vmem>>)
    %c0_i32_696 = arith.constant 0 : i32
    %849 = tpu.memref_slice %arg2[%315, %c0_i32_696] : memref<10000x256xf32, #tpu.memory_space<any>> -> memref<1x256xf32, #tpu.memory_space<any>>
    %c104_i32_697 = arith.constant 104 : i32
    %c0_i32_698 = arith.constant 0 : i32
    %850 = tpu.memref_slice %arg6[%c104_i32_697, %c0_i32_698] : memref<128x256xf32, #tpu.memory_space<vmem>> -> memref<1x256xf32, #tpu.memory_space<vmem>>
    tpu.wait_dma2 semaphore(%arg7 : memref<!tpu.dma_semaphore, #tpu.memory_space<semaphore_mem>>) src(%849 : memref<1x256xf32, #tpu.memory_space<any>>) dst(%850 : memref<1x256xf32, #tpu.memory_space<vmem>>)
    %c0_i32_699 = arith.constant 0 : i32
    %851 = tpu.memref_slice %arg2[%318, %c0_i32_699] : memref<10000x256xf32, #tpu.memory_space<any>> -> memref<1x256xf32, #tpu.memory_space<any>>
    %c105_i32_700 = arith.constant 105 : i32
    %c0_i32_701 = arith.constant 0 : i32
    %852 = tpu.memref_slice %arg6[%c105_i32_700, %c0_i32_701] : memref<128x256xf32, #tpu.memory_space<vmem>> -> memref<1x256xf32, #tpu.memory_space<vmem>>
    tpu.wait_dma2 semaphore(%arg7 : memref<!tpu.dma_semaphore, #tpu.memory_space<semaphore_mem>>) src(%851 : memref<1x256xf32, #tpu.memory_space<any>>) dst(%852 : memref<1x256xf32, #tpu.memory_space<vmem>>)
    %c0_i32_702 = arith.constant 0 : i32
    %853 = tpu.memref_slice %arg2[%321, %c0_i32_702] : memref<10000x256xf32, #tpu.memory_space<any>> -> memref<1x256xf32, #tpu.memory_space<any>>
    %c106_i32_703 = arith.constant 106 : i32
    %c0_i32_704 = arith.constant 0 : i32
    %854 = tpu.memref_slice %arg6[%c106_i32_703, %c0_i32_704] : memref<128x256xf32, #tpu.memory_space<vmem>> -> memref<1x256xf32, #tpu.memory_space<vmem>>
    tpu.wait_dma2 semaphore(%arg7 : memref<!tpu.dma_semaphore, #tpu.memory_space<semaphore_mem>>) src(%853 : memref<1x256xf32, #tpu.memory_space<any>>) dst(%854 : memref<1x256xf32, #tpu.memory_space<vmem>>)
    %c0_i32_705 = arith.constant 0 : i32
    %855 = tpu.memref_slice %arg2[%324, %c0_i32_705] : memref<10000x256xf32, #tpu.memory_space<any>> -> memref<1x256xf32, #tpu.memory_space<any>>
    %c107_i32_706 = arith.constant 107 : i32
    %c0_i32_707 = arith.constant 0 : i32
    %856 = tpu.memref_slice %arg6[%c107_i32_706, %c0_i32_707] : memref<128x256xf32, #tpu.memory_space<vmem>> -> memref<1x256xf32, #tpu.memory_space<vmem>>
    tpu.wait_dma2 semaphore(%arg7 : memref<!tpu.dma_semaphore, #tpu.memory_space<semaphore_mem>>) src(%855 : memref<1x256xf32, #tpu.memory_space<any>>) dst(%856 : memref<1x256xf32, #tpu.memory_space<vmem>>)
    %c0_i32_708 = arith.constant 0 : i32
    %857 = tpu.memref_slice %arg2[%327, %c0_i32_708] : memref<10000x256xf32, #tpu.memory_space<any>> -> memref<1x256xf32, #tpu.memory_space<any>>
    %c108_i32_709 = arith.constant 108 : i32
    %c0_i32_710 = arith.constant 0 : i32
    %858 = tpu.memref_slice %arg6[%c108_i32_709, %c0_i32_710] : memref<128x256xf32, #tpu.memory_space<vmem>> -> memref<1x256xf32, #tpu.memory_space<vmem>>
    tpu.wait_dma2 semaphore(%arg7 : memref<!tpu.dma_semaphore, #tpu.memory_space<semaphore_mem>>) src(%857 : memref<1x256xf32, #tpu.memory_space<any>>) dst(%858 : memref<1x256xf32, #tpu.memory_space<vmem>>)
    %c0_i32_711 = arith.constant 0 : i32
    %859 = tpu.memref_slice %arg2[%330, %c0_i32_711] : memref<10000x256xf32, #tpu.memory_space<any>> -> memref<1x256xf32, #tpu.memory_space<any>>
    %c109_i32_712 = arith.constant 109 : i32
    %c0_i32_713 = arith.constant 0 : i32
    %860 = tpu.memref_slice %arg6[%c109_i32_712, %c0_i32_713] : memref<128x256xf32, #tpu.memory_space<vmem>> -> memref<1x256xf32, #tpu.memory_space<vmem>>
    tpu.wait_dma2 semaphore(%arg7 : memref<!tpu.dma_semaphore, #tpu.memory_space<semaphore_mem>>) src(%859 : memref<1x256xf32, #tpu.memory_space<any>>) dst(%860 : memref<1x256xf32, #tpu.memory_space<vmem>>)
    %c0_i32_714 = arith.constant 0 : i32
    %861 = tpu.memref_slice %arg2[%333, %c0_i32_714] : memref<10000x256xf32, #tpu.memory_space<any>> -> memref<1x256xf32, #tpu.memory_space<any>>
    %c110_i32_715 = arith.constant 110 : i32
    %c0_i32_716 = arith.constant 0 : i32
    %862 = tpu.memref_slice %arg6[%c110_i32_715, %c0_i32_716] : memref<128x256xf32, #tpu.memory_space<vmem>> -> memref<1x256xf32, #tpu.memory_space<vmem>>
    tpu.wait_dma2 semaphore(%arg7 : memref<!tpu.dma_semaphore, #tpu.memory_space<semaphore_mem>>) src(%861 : memref<1x256xf32, #tpu.memory_space<any>>) dst(%862 : memref<1x256xf32, #tpu.memory_space<vmem>>)
    %c0_i32_717 = arith.constant 0 : i32
    %863 = tpu.memref_slice %arg2[%336, %c0_i32_717] : memref<10000x256xf32, #tpu.memory_space<any>> -> memref<1x256xf32, #tpu.memory_space<any>>
    %c111_i32_718 = arith.constant 111 : i32
    %c0_i32_719 = arith.constant 0 : i32
    %864 = tpu.memref_slice %arg6[%c111_i32_718, %c0_i32_719] : memref<128x256xf32, #tpu.memory_space<vmem>> -> memref<1x256xf32, #tpu.memory_space<vmem>>
    tpu.wait_dma2 semaphore(%arg7 : memref<!tpu.dma_semaphore, #tpu.memory_space<semaphore_mem>>) src(%863 : memref<1x256xf32, #tpu.memory_space<any>>) dst(%864 : memref<1x256xf32, #tpu.memory_space<vmem>>)
    %c0_i32_720 = arith.constant 0 : i32
    %865 = tpu.memref_slice %arg2[%339, %c0_i32_720] : memref<10000x256xf32, #tpu.memory_space<any>> -> memref<1x256xf32, #tpu.memory_space<any>>
    %c112_i32_721 = arith.constant 112 : i32
    %c0_i32_722 = arith.constant 0 : i32
    %866 = tpu.memref_slice %arg6[%c112_i32_721, %c0_i32_722] : memref<128x256xf32, #tpu.memory_space<vmem>> -> memref<1x256xf32, #tpu.memory_space<vmem>>
    tpu.wait_dma2 semaphore(%arg7 : memref<!tpu.dma_semaphore, #tpu.memory_space<semaphore_mem>>) src(%865 : memref<1x256xf32, #tpu.memory_space<any>>) dst(%866 : memref<1x256xf32, #tpu.memory_space<vmem>>)
    %c0_i32_723 = arith.constant 0 : i32
    %867 = tpu.memref_slice %arg2[%342, %c0_i32_723] : memref<10000x256xf32, #tpu.memory_space<any>> -> memref<1x256xf32, #tpu.memory_space<any>>
    %c113_i32_724 = arith.constant 113 : i32
    %c0_i32_725 = arith.constant 0 : i32
    %868 = tpu.memref_slice %arg6[%c113_i32_724, %c0_i32_725] : memref<128x256xf32, #tpu.memory_space<vmem>> -> memref<1x256xf32, #tpu.memory_space<vmem>>
    tpu.wait_dma2 semaphore(%arg7 : memref<!tpu.dma_semaphore, #tpu.memory_space<semaphore_mem>>) src(%867 : memref<1x256xf32, #tpu.memory_space<any>>) dst(%868 : memref<1x256xf32, #tpu.memory_space<vmem>>)
    %c0_i32_726 = arith.constant 0 : i32
    %869 = tpu.memref_slice %arg2[%345, %c0_i32_726] : memref<10000x256xf32, #tpu.memory_space<any>> -> memref<1x256xf32, #tpu.memory_space<any>>
    %c114_i32_727 = arith.constant 114 : i32
    %c0_i32_728 = arith.constant 0 : i32
    %870 = tpu.memref_slice %arg6[%c114_i32_727, %c0_i32_728] : memref<128x256xf32, #tpu.memory_space<vmem>> -> memref<1x256xf32, #tpu.memory_space<vmem>>
    tpu.wait_dma2 semaphore(%arg7 : memref<!tpu.dma_semaphore, #tpu.memory_space<semaphore_mem>>) src(%869 : memref<1x256xf32, #tpu.memory_space<any>>) dst(%870 : memref<1x256xf32, #tpu.memory_space<vmem>>)
    %c0_i32_729 = arith.constant 0 : i32
    %871 = tpu.memref_slice %arg2[%348, %c0_i32_729] : memref<10000x256xf32, #tpu.memory_space<any>> -> memref<1x256xf32, #tpu.memory_space<any>>
    %c115_i32_730 = arith.constant 115 : i32
    %c0_i32_731 = arith.constant 0 : i32
    %872 = tpu.memref_slice %arg6[%c115_i32_730, %c0_i32_731] : memref<128x256xf32, #tpu.memory_space<vmem>> -> memref<1x256xf32, #tpu.memory_space<vmem>>
    tpu.wait_dma2 semaphore(%arg7 : memref<!tpu.dma_semaphore, #tpu.memory_space<semaphore_mem>>) src(%871 : memref<1x256xf32, #tpu.memory_space<any>>) dst(%872 : memref<1x256xf32, #tpu.memory_space<vmem>>)
    %c0_i32_732 = arith.constant 0 : i32
    %873 = tpu.memref_slice %arg2[%351, %c0_i32_732] : memref<10000x256xf32, #tpu.memory_space<any>> -> memref<1x256xf32, #tpu.memory_space<any>>
    %c116_i32_733 = arith.constant 116 : i32
    %c0_i32_734 = arith.constant 0 : i32
    %874 = tpu.memref_slice %arg6[%c116_i32_733, %c0_i32_734] : memref<128x256xf32, #tpu.memory_space<vmem>> -> memref<1x256xf32, #tpu.memory_space<vmem>>
    tpu.wait_dma2 semaphore(%arg7 : memref<!tpu.dma_semaphore, #tpu.memory_space<semaphore_mem>>) src(%873 : memref<1x256xf32, #tpu.memory_space<any>>) dst(%874 : memref<1x256xf32, #tpu.memory_space<vmem>>)
    %c0_i32_735 = arith.constant 0 : i32
    %875 = tpu.memref_slice %arg2[%354, %c0_i32_735] : memref<10000x256xf32, #tpu.memory_space<any>> -> memref<1x256xf32, #tpu.memory_space<any>>
    %c117_i32_736 = arith.constant 117 : i32
    %c0_i32_737 = arith.constant 0 : i32
    %876 = tpu.memref_slice %arg6[%c117_i32_736, %c0_i32_737] : memref<128x256xf32, #tpu.memory_space<vmem>> -> memref<1x256xf32, #tpu.memory_space<vmem>>
    tpu.wait_dma2 semaphore(%arg7 : memref<!tpu.dma_semaphore, #tpu.memory_space<semaphore_mem>>) src(%875 : memref<1x256xf32, #tpu.memory_space<any>>) dst(%876 : memref<1x256xf32, #tpu.memory_space<vmem>>)
    %c0_i32_738 = arith.constant 0 : i32
    %877 = tpu.memref_slice %arg2[%357, %c0_i32_738] : memref<10000x256xf32, #tpu.memory_space<any>> -> memref<1x256xf32, #tpu.memory_space<any>>
    %c118_i32_739 = arith.constant 118 : i32
    %c0_i32_740 = arith.constant 0 : i32
    %878 = tpu.memref_slice %arg6[%c118_i32_739, %c0_i32_740] : memref<128x256xf32, #tpu.memory_space<vmem>> -> memref<1x256xf32, #tpu.memory_space<vmem>>
    tpu.wait_dma2 semaphore(%arg7 : memref<!tpu.dma_semaphore, #tpu.memory_space<semaphore_mem>>) src(%877 : memref<1x256xf32, #tpu.memory_space<any>>) dst(%878 : memref<1x256xf32, #tpu.memory_space<vmem>>)
    %c0_i32_741 = arith.constant 0 : i32
    %879 = tpu.memref_slice %arg2[%360, %c0_i32_741] : memref<10000x256xf32, #tpu.memory_space<any>> -> memref<1x256xf32, #tpu.memory_space<any>>
    %c119_i32_742 = arith.constant 119 : i32
    %c0_i32_743 = arith.constant 0 : i32
    %880 = tpu.memref_slice %arg6[%c119_i32_742, %c0_i32_743] : memref<128x256xf32, #tpu.memory_space<vmem>> -> memref<1x256xf32, #tpu.memory_space<vmem>>
    tpu.wait_dma2 semaphore(%arg7 : memref<!tpu.dma_semaphore, #tpu.memory_space<semaphore_mem>>) src(%879 : memref<1x256xf32, #tpu.memory_space<any>>) dst(%880 : memref<1x256xf32, #tpu.memory_space<vmem>>)
    %c0_i32_744 = arith.constant 0 : i32
    %881 = tpu.memref_slice %arg2[%363, %c0_i32_744] : memref<10000x256xf32, #tpu.memory_space<any>> -> memref<1x256xf32, #tpu.memory_space<any>>
    %c120_i32_745 = arith.constant 120 : i32
    %c0_i32_746 = arith.constant 0 : i32
    %882 = tpu.memref_slice %arg6[%c120_i32_745, %c0_i32_746] : memref<128x256xf32, #tpu.memory_space<vmem>> -> memref<1x256xf32, #tpu.memory_space<vmem>>
    tpu.wait_dma2 semaphore(%arg7 : memref<!tpu.dma_semaphore, #tpu.memory_space<semaphore_mem>>) src(%881 : memref<1x256xf32, #tpu.memory_space<any>>) dst(%882 : memref<1x256xf32, #tpu.memory_space<vmem>>)
    %c0_i32_747 = arith.constant 0 : i32
    %883 = tpu.memref_slice %arg2[%366, %c0_i32_747] : memref<10000x256xf32, #tpu.memory_space<any>> -> memref<1x256xf32, #tpu.memory_space<any>>
    %c121_i32_748 = arith.constant 121 : i32
    %c0_i32_749 = arith.constant 0 : i32
    %884 = tpu.memref_slice %arg6[%c121_i32_748, %c0_i32_749] : memref<128x256xf32, #tpu.memory_space<vmem>> -> memref<1x256xf32, #tpu.memory_space<vmem>>
    tpu.wait_dma2 semaphore(%arg7 : memref<!tpu.dma_semaphore, #tpu.memory_space<semaphore_mem>>) src(%883 : memref<1x256xf32, #tpu.memory_space<any>>) dst(%884 : memref<1x256xf32, #tpu.memory_space<vmem>>)
    %c0_i32_750 = arith.constant 0 : i32
    %885 = tpu.memref_slice %arg2[%369, %c0_i32_750] : memref<10000x256xf32, #tpu.memory_space<any>> -> memref<1x256xf32, #tpu.memory_space<any>>
    %c122_i32_751 = arith.constant 122 : i32
    %c0_i32_752 = arith.constant 0 : i32
    %886 = tpu.memref_slice %arg6[%c122_i32_751, %c0_i32_752] : memref<128x256xf32, #tpu.memory_space<vmem>> -> memref<1x256xf32, #tpu.memory_space<vmem>>
    tpu.wait_dma2 semaphore(%arg7 : memref<!tpu.dma_semaphore, #tpu.memory_space<semaphore_mem>>) src(%885 : memref<1x256xf32, #tpu.memory_space<any>>) dst(%886 : memref<1x256xf32, #tpu.memory_space<vmem>>)
    %c0_i32_753 = arith.constant 0 : i32
    %887 = tpu.memref_slice %arg2[%372, %c0_i32_753] : memref<10000x256xf32, #tpu.memory_space<any>> -> memref<1x256xf32, #tpu.memory_space<any>>
    %c123_i32_754 = arith.constant 123 : i32
    %c0_i32_755 = arith.constant 0 : i32
    %888 = tpu.memref_slice %arg6[%c123_i32_754, %c0_i32_755] : memref<128x256xf32, #tpu.memory_space<vmem>> -> memref<1x256xf32, #tpu.memory_space<vmem>>
    tpu.wait_dma2 semaphore(%arg7 : memref<!tpu.dma_semaphore, #tpu.memory_space<semaphore_mem>>) src(%887 : memref<1x256xf32, #tpu.memory_space<any>>) dst(%888 : memref<1x256xf32, #tpu.memory_space<vmem>>)
    %c0_i32_756 = arith.constant 0 : i32
    %889 = tpu.memref_slice %arg2[%375, %c0_i32_756] : memref<10000x256xf32, #tpu.memory_space<any>> -> memref<1x256xf32, #tpu.memory_space<any>>
    %c124_i32_757 = arith.constant 124 : i32
    %c0_i32_758 = arith.constant 0 : i32
    %890 = tpu.memref_slice %arg6[%c124_i32_757, %c0_i32_758] : memref<128x256xf32, #tpu.memory_space<vmem>> -> memref<1x256xf32, #tpu.memory_space<vmem>>
    tpu.wait_dma2 semaphore(%arg7 : memref<!tpu.dma_semaphore, #tpu.memory_space<semaphore_mem>>) src(%889 : memref<1x256xf32, #tpu.memory_space<any>>) dst(%890 : memref<1x256xf32, #tpu.memory_space<vmem>>)
    %c0_i32_759 = arith.constant 0 : i32
    %891 = tpu.memref_slice %arg2[%378, %c0_i32_759] : memref<10000x256xf32, #tpu.memory_space<any>> -> memref<1x256xf32, #tpu.memory_space<any>>
    %c125_i32_760 = arith.constant 125 : i32
    %c0_i32_761 = arith.constant 0 : i32
    %892 = tpu.memref_slice %arg6[%c125_i32_760, %c0_i32_761] : memref<128x256xf32, #tpu.memory_space<vmem>> -> memref<1x256xf32, #tpu.memory_space<vmem>>
    tpu.wait_dma2 semaphore(%arg7 : memref<!tpu.dma_semaphore, #tpu.memory_space<semaphore_mem>>) src(%891 : memref<1x256xf32, #tpu.memory_space<any>>) dst(%892 : memref<1x256xf32, #tpu.memory_space<vmem>>)
    %c0_i32_762 = arith.constant 0 : i32
    %893 = tpu.memref_slice %arg2[%381, %c0_i32_762] : memref<10000x256xf32, #tpu.memory_space<any>> -> memref<1x256xf32, #tpu.memory_space<any>>
    %c126_i32_763 = arith.constant 126 : i32
    %c0_i32_764 = arith.constant 0 : i32
    %894 = tpu.memref_slice %arg6[%c126_i32_763, %c0_i32_764] : memref<128x256xf32, #tpu.memory_space<vmem>> -> memref<1x256xf32, #tpu.memory_space<vmem>>
    tpu.wait_dma2 semaphore(%arg7 : memref<!tpu.dma_semaphore, #tpu.memory_space<semaphore_mem>>) src(%893 : memref<1x256xf32, #tpu.memory_space<any>>) dst(%894 : memref<1x256xf32, #tpu.memory_space<vmem>>)
    %c0_i32_765 = arith.constant 0 : i32
    %895 = tpu.memref_slice %arg2[%384, %c0_i32_765] : memref<10000x256xf32, #tpu.memory_space<any>> -> memref<1x256xf32, #tpu.memory_space<any>>
    %c127_i32_766 = arith.constant 127 : i32
    %c0_i32_767 = arith.constant 0 : i32
    %896 = tpu.memref_slice %arg6[%c127_i32_766, %c0_i32_767] : memref<128x256xf32, #tpu.memory_space<vmem>> -> memref<1x256xf32, #tpu.memory_space<vmem>>
    tpu.wait_dma2 semaphore(%arg7 : memref<!tpu.dma_semaphore, #tpu.memory_space<semaphore_mem>>) src(%895 : memref<1x256xf32, #tpu.memory_space<any>>) dst(%896 : memref<1x256xf32, #tpu.memory_space<vmem>>)
    %c0 = arith.constant 0 : index
    %c0_768 = arith.constant 0 : index
    %897 = vector.load %arg6[%c0, %c0_768] : memref<128x256xf32, #tpu.memory_space<vmem>>, vector<128x256xf32>
    %c0_769 = arith.constant 0 : index
    %c0_770 = arith.constant 0 : index
    %898 = vector.load %arg3[%c0_769, %c0_770] : memref<256x256xbf16, #tpu.memory_space<vmem>>, vector<256x256xbf16>
    %899 = arith.extf %898 : vector<256x256xbf16> to vector<256x256xf32>
    %cst = arith.constant dense<0.000000e+00> : vector<128x256xf32>
    %900 = tpu.matmul %897, %899, %cst {dimension_numbers = #tpu.dot_dimension_numbers<[1], [0], [0], [1], [0, 0, 1, 1], [], []>} : vector<128x256xf32>, vector<256x256xf32>, vector<128x256xf32> -> vector<128x256xf32>
    %c0_771 = arith.constant 0 : index
    %c0_772 = arith.constant 0 : index
    %901 = vector.load %arg4[%c0_771, %c0_772] : memref<1x256xf32, #tpu.memory_space<vmem>>, vector<1x256xf32>
    %902 = vector.broadcast %901 : vector<1x256xf32> to vector<128x256xf32>
    %903 = arith.addf %900, %902 : vector<128x256xf32>
    %904 = vector.shape_cast %903 : vector<128x256xf32> to vector<16x8x256xf32>
    %905 = vector.shape_cast %897 : vector<128x256xf32> to vector<16x8x256xf32>
    "tpu.trace_start"() <{level = 10 : i32, message = "bqd,bkd->bqk"}> : () -> ()
    %cst_773 = arith.constant dense<0.000000e+00> : vector<16x8x8xf32>
    %906 = tpu.matmul %904, %905, %cst_773 {dimension_numbers = #tpu.dot_dimension_numbers<[2], [2], [1], [1], [0, 0, 0, 1, 1, 1], [0], [0]>} : vector<16x8x256xf32>, vector<16x8x256xf32>, vector<16x8x8xf32> -> vector<16x8x8xf32>
    "tpu.trace_stop"() : () -> ()
    %cst_774 = arith.constant dense<0xFF800000> : vector<16x8xf32>
    %907 = vector.multi_reduction <maximumf>, %906, %cst_774 [2] : vector<16x8x8xf32> to vector<16x8xf32>
    %908 = vector.shape_cast %907 : vector<16x8xf32> to vector<16x8x1xf32>
    %909 = vector.broadcast %908 : vector<16x8x1xf32> to vector<16x8x8xf32>
    %910 = arith.subf %906, %909 : vector<16x8x8xf32>
    %911 = math.exp %910 : vector<16x8x8xf32>
    %cst_775 = arith.constant dense<0.000000e+00> : vector<16x8xf32>
    %912 = vector.multi_reduction <add>, %911, %cst_775 [2] : vector<16x8x8xf32> to vector<16x8xf32>
    %913 = vector.shape_cast %912 : vector<16x8xf32> to vector<16x8x1xf32>
    %914 = tpu.reciprocal %913 {approx = true} : vector<16x8x1xf32> -> vector<16x8x1xf32>
    %915 = vector.broadcast %914 : vector<16x8x1xf32> to vector<16x8x8xf32>
    %916 = arith.mulf %911, %915 : vector<16x8x8xf32>
    "tpu.trace_start"() <{level = 10 : i32, message = "bqk,bkd->bqd"}> : () -> ()
    %cst_776 = arith.constant dense<0.000000e+00> : vector<16x8x256xf32>
    %917 = tpu.matmul %916, %905, %cst_776 {dimension_numbers = #tpu.dot_dimension_numbers<[2], [1], [1], [2], [0, 0, 0, 1, 1, 2], [0], [0]>} : vector<16x8x8xf32>, vector<16x8x256xf32>, vector<16x8x256xf32> -> vector<16x8x256xf32>
    "tpu.trace_stop"() : () -> ()
    %c0_777 = arith.constant 0 : index
    %c0_778 = arith.constant 0 : index
    %c0_779 = arith.constant 0 : index
    %918 = vector.load %arg5[%c0_777, %c0_778, %c0_779] : memref<16x8x256xf32, #tpu.memory_space<vmem>>, vector<16x8x256xf32>
    tpu.vector_store %arg5[%c0_777, %c0_778, %c0_779], %917 {strides = array<i32>} : memref<16x8x256xf32, #tpu.memory_space<vmem>>, vector<16x8x256xf32>,
    return
  }
  func.func @transform_1(%arg0: i32, %arg1: memref<256xi32, #tpu.memory_space<smem>>) -> (i32, i32) {
    %c0_i32 = arith.constant 0 : i32
    %c0_i32_0 = arith.constant 0 : i32
    %c0_i32_1 = arith.constant 0 : i32
    return %c0_i32, %c0_i32_0 : i32, i32
  }
  func.func @transform_2(%arg0: i32, %arg1: memref<256xi32, #tpu.memory_space<smem>>) -> (i32, i32) {
    %c0_i32 = arith.constant 0 : i32
    %c0_i32_0 = arith.constant 0 : i32
    %c0_i32_1 = arith.constant 0 : i32
    return %c0_i32, %c0_i32_0 : i32, i32
  }
  func.func @transform_3(%arg0: i32, %arg1: memref<256xi32, #tpu.memory_space<smem>>) -> (i32, i32, i32) {
    %c0_i32 = arith.constant 0 : i32
    %c0_i32_0 = arith.constant 0 : i32
    %c0_i32_1 = arith.constant 0 : i32
    return %arg0, %c0_i32, %c0_i32_0 : i32, i32, i32
  }
}

</mosaic_0001>

<bundles_post_ra>
// kernel: tpu_custom_call.1
= control target key start
LH: loop header
LB: loop body
LE: loop exit
PB: predicated region body
PF: predicated region fallthrough
CT: control target
= control target key end

     0   :  { %s9124_s15 = smov [#allocation5]   ;;  %s12554_s0 = inlined_call_operand.hbm [shape: s32[256], index: 0, kind: input, shape index: {}]   ;;  %s12555_s1 = inlined_call_operand.hbm [shape: f32[10000,256], index: 1, kind: input, shape index: {}]   ;;  %s12556_s2 = inlined_call_operand.hbm [shape: bf16[256,256], index: 2, kind: input, shape index: {}]   ;;  %s12557_s3 = inlined_call_operand.hbm [shape: f32[1,256], index: 3, kind: input, shape index: {}]   ;;  %s12558_s4 = inlined_call_operand.hbm [shape: f32[32,8,256], index: 4, kind: output, shape index: {}]  }
   0x1   :  { %12567 = sst [smem:[#allocation151_spill]] %s12556_s2 }
   0x2   :  { %12568 = sst [smem:[#allocation152_spill]] %s12557_s3 }
   0x3   :  { %10 = dma.hbm_to_smem %s12554_s0, 32, %s9124_s15, [#allocation4] }
   0x4   :  { %9092 = dma.done.wait [#allocation4], 32 }
   0x5   :  { %9093 = vsyncadd [#allocation4], 4294967264 }
   0x6   :  { %12 = sfence }
   0x7   :  { %13 = vsyncpa [#allocation7], 0 }
   0x8   :  { %14 = vsyncpa [#allocation10], 0 }
   0x9   :  { %15 = vsyncpa [#allocation8], 0 }
   0xa   :  { %17 = vsyncpa [#allocation8 + $0x1], 0  ;;  %s9291_s18 = smov 0   ;;  %s9293_s19 = smov 0  }
   0xb   :  { %s9295_s20 = smov 0   ;;  %s9297_s21 = smov 0  }
   0xc LB: > { %12569 = sst [smem:[#allocation145_spill]] %s9110_s18  ;;  %s9312_s0 = sadd.s32 4294967295, %s9122_s21   ;;  %s9122_s21 = sphi %s9297_s21, %s12590_s21   ;;  %s9118_s20 = sphi %s9295_s20, %s12592_s20   ;;  %s9114_s19 = sphi %s9293_s19, %s12594_s19   ;;  %s9110_s18 = sphi %s9291_s18, %s12593_s18  }
   0xd   : > { %12570 = sst [smem:[#allocation146_spill]] %s9118_s20  ;;  %s5624_s22 = sadd.s32 4294967294, %s9122_s21  }
   0xe   : > { %12571 = sst [smem:[#allocation147_spill]] %s9122_s21  ;;  %s9316_s23 = sadd.s32 1, %s9122_s21  }
   0xf   : > { %12572 = sst [smem:[#allocation148_spill]] %s9316_s23  ;;  %s72_s24 = sadd.s32 1, %s9118_s20 }
  0x10   : > { %s69_s25 = ssub.s32 %s9122_s21, %s9316_s23  ;;  %p82_p0 = scmp.ne.s32.totalorder %s9118_s20, %s9114_s19 }
  0x11   : > { %p70_p1 = scmp.eq.s32.totalorder %s69_s25, 0  ;;  %p83_p2 = scmp.eq.s32.totalorder %s9312_s0, 1 }
  0x12   : > { %p88_p3 = scmp.ne.s32.totalorder %s9114_s19, %s9110_s18  ;;  %p89_p4 = scmp.eq.s32.totalorder %s5624_s22, 1 }
  0x13   : > { %s9327_s26 = scalar_select %p70_p1, %s9118_s20, %s72_s24  }
  0x14   : > { %p9329_p5 = por %p83_p2, %p82_p0  ;;  %p9333_p6 = por %p89_p4, %p88_p3 }
  0x15   : > { %12573 = sst [smem:[#allocation149_spill]] %s9327_s26  ;;  %p5625_p7 = scmp.ge.s32.totalorder %s9122_s21, 1 }
  0x16   : > { %s12575_s28 = scalar_select %p9333_p6, 1, 0 }
  0x17   : > { %p96_p8 = scmp.lt.s32.totalorder %s9122_s21, 3  ;;  %p12559_p9 = scmp.eq.s32.totalorder %s9312_s0, 0 }
  0x18   : > { %12576 = sst [smem:[#allocation150_spill]] %s12575_s28  ;;  %s9125_s30 = smov [#allocation6]  }
  0x19   : > { %p9340_p10 = pnand %p5625_p7, %p96_p8  ;;  %s108_s5 = sshll.u32 %s9125_s30, 4  ;;  %s109_s5 = int_to_ptr.vmem [resolvable:$true] %s108_s5 }
  0x1a   : > { %s9126_s7 = smov [#allocation9]   ;;  %s6193_s9 = scalar_lea.vmem %s109_s5, 4096 }
  0x1b   : > { %p5924_p11 = pneg %p9340_p10  ;;  %s122_s8 = sshll.u32 %s9126_s7, 4  ;;  %s123_s8 = int_to_ptr.vmem [resolvable:$true] %s122_s8 }
  0x1c   : > { %p6194_p0 = scmp.ne.s32.totalorder %s109_s5, %s6193_s9  ;;  %p6201_p3 = scmp.lt.s32.totalorder %s109_s5, %s109_s5 }
  0x1d   : > { %p9348_p12 = pnand %p12559_p9, %p5924_p11  ;;  %p6202_p4 = scmp.lt.s32.totalorder %s6193_s9, %s6193_s9 }
  0x1f   : > { %p6184_p13 = pneg %p9348_p12  ;;  %p6203_p7 = por %p6202_p4, %p6201_p3 }
  0x21   : > { %p6196_p1 = pnand %p6194_p0, %p6184_p13 }
  0x23   : > { %p6197_p2 = pneg %p6196_p1 }
  0x25   : > { %p6204_p8 = pnand %p6203_p7, %p6197_p2 }
  0x27   : > { %6207 = shalt.err (!%p6204_p8)
}
  0x28   : > { %s9127_s10 = smov 128   ;;  %s9128_s11 = smov 8  }
  0x29   : > { %s12579_s2 = sld [smem:[#allocation151_spill]]  ;;  %s6219_s14 = scalar_lea.vmem %s123_s8, 32 }
  0x2a   : > { %p6220_p11 = scmp.ne.s32.totalorder %s123_s8, %s6219_s14  ;;  %p6227_p9 = scmp.lt.s32.totalorder %s123_s8, %s123_s8 }
  0x2b   : > { %p6228_p6 = scmp.lt.s32.totalorder %s6219_s14, %s6219_s14 }
  0x2c   : > { %p6222_p0 = pnand %p6220_p11, %p6184_p13 }
  0x2d   : > { %p6229_p3 = por %p6228_p6, %p6227_p9 }
  0x2e   : > { %p6223_p1 = pneg %p6222_p0 }
  0x2f   : > { %5927 = dma.hbm_to_vmem [thread:$0]  (!%p9348_p12), %s12579_s2, 4096, %s109_s5, [#allocation7], %s9127_s10, %s9127_s10, %s9128_s11  }
  0x30   : > { %p6230_p2 = pnand %p6229_p3, %p6223_p1 }
  0x32   : > { %6233 = shalt.err (!%p6230_p2)
}
  0x33   : > { %s12580_s3 = sld [smem:[#allocation152_spill]]  ;;  %p12581_p4 = scmp.eq.s32.totalorder (!%p9340_p10), %s9312_s0, 0 }
  0x35   : > { %135 = sbr.rel (%p9340_p10) target bundleno = 3989 (0xf95), region = 28 }
  0x39   : > { %5930 = dma.hbm_to_vmem [thread:$0]  (!%p9348_p12), %s12580_s3, 32, %s123_s8, [#allocation10]  }
  0x3a   : > { %9095 = dma.done.wait (%p12581_p4), [#allocation7], 4096   ;;  %p12582_p13 = pmov %p12581_p4 }
  0x3b   : > { %p12583_p7 = pmov %p12581_p4 }
  0x3c   : > { %9097 = vsyncadd (%p12582_p13), [#allocation7], 4294963200 }
  0x3d   : > { %9099 = dma.done.wait (%p12583_p7), [#allocation10], 32   ;;  %p12584_p6 = pmov %p12581_p4 }
  0x3e   : > { %s12560_s17 = sand.u32 1, %s9114_s19   ;;  %s9382_s22 = sshll.u32 %s9312_s0, 7 }
  0x3f   : > { %9101 = vsyncadd (%p12584_p6), [#allocation10], 4294967264  ;;  %s9386_s24 = sshll.u32 %s12560_s17, 8  ;;  %s158_s25 = sld [smem:[#allocation5 + %s9382_s22]] }
  0x40   : > { %s9129_s29 = smov [#allocation2]   ;;  %s159_s5 = sadd.s32 1, %s9382_s22 }
  0x41   : > { %s420_s30 = sshll.u32 %s9129_s29, 4  ;;  %s9392_s6 = sld [smem:[#allocation5 + %s159_s5]]  ;;  %s9389_s30 = int_to_ptr.vmem [resolvable:$true] %s420_s30 }
  0x42   : > { %s9130_s7 = smov [#allocation2 + $0x1]   ;;  %s161_s13 = sadd.s32 2, %s9382_s22 }
  0x43   : > { %s432_s8 = sshll.u32 %s9130_s7, 4  ;;  %s9397_s15 = sld [smem:[#allocation5 + %s161_s13]]  ;;  %s9394_s8 = int_to_ptr.vmem [resolvable:$true] %s432_s8 }
  0x44   : > { %s9405_s7 = scalar_lea.hbm %s12555_s1, 320000 }
  0x45   : > { %s413_s9 = sshrl.u32 %s158_s25, 3  ;;  %s414_s10 = sand.u32 7, %s158_s25  }
  0x46   : > { %s5633_s11 = sshll.u32 %s413_s9, 4 }
  0x47   : > { %s416_s12 = sadd.s32 %s5633_s11, %s414_s10 }
  0x48   : > { %s5634_s14 = sshll.u32 %s416_s12, 4 }
  0x49   : > { %s418_s29 = scalar_lea.hbm %s12555_s1, %s5634_s14 }
  0x4a   : > { %s6234_s2 = scalar_lea.hbm %s418_s29, 32  ;;  %p6237_p10 = scmp.lt.s32.totalorder %s418_s29, %s12555_s1 }
  0x4b   : > { %p6235_p9 = scmp.ne.s32.totalorder %s418_s29, %s6234_s2  ;;  %p6238_p12 = scmp.lt.s32.totalorder %s9405_s7, %s6234_s2 }
  0x4d   : > { %p6239_p8 = por %p6238_p12, %p6237_p10 }
  0x4f   : > { %p6240_p11 = pnand %p6239_p8, %p6235_p9 }
  0x51   : > { %6243 = shalt.err (!%p6240_p11)  }
  0x52   : > { %s6244_s17 = scalar_lea.vmem %s9389_s30, 32  ;;  %s9414_s10 = scalar_lea.vmem %s9389_s30, 4096 }
  0x53   : > { %p6245_p0 = scmp.ne.s32.totalorder %s9389_s30, %s6244_s17  ;;  %p6249_p1 = scmp.lt.s32.totalorder %s9389_s30, %s9389_s30 }
  0x54   : > { %p6250_p3 = scmp.lt.s32.totalorder %s9414_s10, %s6244_s17 }
  0x56   : > { %p6251_p2 = por %p6250_p3, %p6249_p1 }
  0x58   : > { %p6252_p4 = pnand %p6251_p2, %p6245_p0 }
  0x5a   : > { %6255 = shalt.err (!%p6252_p4)  }
  0x5b   : > { %s9131_s3 = smov 128   ;;  %s9132_s2 = smov 1  }
  0x5c   : > { %423 = dma.hbm_to_vmem [thread:$0]  %s418_s29, 32, %s9389_s30, [#allocation3], %s9131_s3, %s9131_s3, %s9132_s2 }
  0x5d   : > { %s424_s11 = sshrl.u32 %s9392_s6, 3  ;;  %s425_s12 = sand.u32 7, %s9392_s6  }
  0x5e   : > { %s5635_s13 = sshll.u32 %s424_s11, 4  ;;  %s9133_s14 = smov [#allocation2 + $0x2]  }
  0x5f   : > { %s444_s16 = sshll.u32 %s9133_s14, 4  ;;  %s427_s5 = sadd.s32 %s5635_s13, %s425_s12  ;;  %s9425_s16 = int_to_ptr.vmem [resolvable:$true] %s444_s16 }
  0x60   : > { %s5636_s25 = sshll.u32 %s427_s5, 4  ;;  %s436_s9 = sshrl.u32 %s9397_s15, 3 }
  0x61   : > { %s429_s20 = scalar_lea.hbm %s12555_s1, %s5636_s25  ;;  %s437_s23 = sand.u32 7, %s9397_s15  }
  0x62   : > { %s6256_s28 = scalar_lea.hbm %s429_s20, 32  ;;  %p6259_p7 = scmp.lt.s32.totalorder %s429_s20, %s12555_s1 }
  0x63   : > { %p6257_p13 = scmp.ne.s32.totalorder %s429_s20, %s6256_s28  ;;  %p6260_p6 = scmp.lt.s32.totalorder %s9405_s7, %s6256_s28 }
  0x65   : > { %p6261_p9 = por %p6260_p6, %p6259_p7 }
  0x67   : > { %p6262_p10 = pnand %p6261_p9, %p6257_p13 }
  0x69   : > { %6265 = shalt.err (!%p6262_p10)  }
  0x6a   : > { %s6266_s6 = scalar_lea.vmem %s9394_s8, 32  ;;  %p6271_p8 = scmp.lt.s32.totalorder %s9394_s8, %s9389_s30 }
  0x6b   : > { %p6267_p12 = scmp.ne.s32.totalorder %s9394_s8, %s6266_s6  ;;  %p6272_p11 = scmp.lt.s32.totalorder %s9414_s10, %s6266_s6 }
  0x6d   : > { %p6273_p0 = por %p6272_p11, %p6271_p8 }
  0x6f   : > { %p6274_p1 = pnand %p6273_p0, %p6267_p12 }
  0x71   : > { %6277 = shalt.err (!%p6274_p1)  }
  0x72   : > { %435 = dma.hbm_to_vmem [thread:$0]  %s429_s20, 32, %s9394_s8, [#allocation3], %s9131_s3, %s9131_s3, %s9132_s2 }
  0x73   : > { %s5637_s18 = sshll.u32 %s436_s9, 4  ;;  %s163_s21 = sadd.s32 3, %s9382_s22 }
  0x74   : > { %s439_s26 = sadd.s32 %s5637_s18, %s437_s23  ;;  %s9446_s28 = sld [smem:[#allocation5 + %s163_s21]] }
  0x75   : > { %s5638_s15 = sshll.u32 %s439_s26, 4  ;;  %s9134_s13 = smov [#allocation2 + $0x3]  }
  0x76   : > { %s441_s12 = scalar_lea.hbm %s12555_s1, %s5638_s15  ;;  %s456_s14 = sshll.u32 %s9134_s13, 4  ;;  %s9464_s14 = int_to_ptr.vmem [resolvable:$true] %s456_s14 }
  0x77   : > { %s6278_s5 = scalar_lea.hbm %s441_s12, 32  ;;  %p6281_p2 = scmp.lt.s32.totalorder %s441_s12, %s12555_s1 }
  0x78   : > { %p6279_p3 = scmp.ne.s32.totalorder %s441_s12, %s6278_s5  ;;  %p6282_p4 = scmp.lt.s32.totalorder %s9405_s7, %s6278_s5 }
  0x7a   : > { %p6283_p13 = por %p6282_p4, %p6281_p2 }
  0x7c   : > { %p6284_p7 = pnand %p6283_p13, %p6279_p3 }
  0x7e   : > { %6287 = shalt.err (!%p6284_p7)  }
  0x7f   : > { %s6288_s20 = scalar_lea.vmem %s9425_s16, 32  ;;  %p6293_p9 = scmp.lt.s32.totalorder %s9425_s16, %s9389_s30 }
  0x80   : > { %p6289_p6 = scmp.ne.s32.totalorder %s9425_s16, %s6288_s20  ;;  %p6294_p10 = scmp.lt.s32.totalorder %s9414_s10, %s6288_s20 }
  0x82   : > { %p6295_p12 = por %p6294_p10, %p6293_p9 }
  0x84   : > { %p6296_p8 = pnand %p6295_p12, %p6289_p6 }
  0x86   : > { %6299 = shalt.err (!%p6296_p8)  }
  0x87   : > { %447 = dma.hbm_to_vmem [thread:$0]  %s441_s12, 32, %s9425_s16, [#allocation3], %s9131_s3, %s9131_s3, %s9132_s2 }
  0x88   : > { %s165_s23 = sadd.s32 4, %s9382_s22  ;;  %s448_s9 = sshrl.u32 %s9446_s28, 3 }
  0x89   : > { %s9467_s8 = sld [smem:[#allocation5 + %s165_s23]]  ;;  %s449_s6 = sand.u32 7, %s9446_s28  }
  0x8a   : > { %s5639_s18 = sshll.u32 %s448_s9, 4  ;;  %s9135_s21 = smov [#allocation2 + $0x4]  }
  0x8b   : > { %s468_s26 = sshll.u32 %s9135_s21, 4  ;;  %s451_s15 = sadd.s32 %s5639_s18, %s449_s6  ;;  %s9471_s26 = int_to_ptr.vmem [resolvable:$true] %s468_s26 }
  0x8c   : > { %s5640_s29 = sshll.u32 %s451_s15, 4  ;;  %s167_s11 = sadd.s32 5, %s9382_s22 }
  0x8d   : > { %s453_s16 = scalar_lea.hbm %s12555_s1, %s5640_s29  ;;  %s9477_s12 = sld [smem:[#allocation5 + %s167_s11]] }
  0x8e   : > { %s6300_s25 = scalar_lea.hbm %s453_s16, 32  ;;  %p6303_p0 = scmp.lt.s32.totalorder %s453_s16, %s12555_s1 }
  0x8f   : > { %p6301_p11 = scmp.ne.s32.totalorder %s453_s16, %s6300_s25  ;;  %p6304_p1 = scmp.lt.s32.totalorder %s9405_s7, %s6300_s25 }
  0x91   : > { %p6305_p3 = por %p6304_p1, %p6303_p0 }
  0x93   : > { %p6306_p2 = pnand %p6305_p3, %p6301_p11 }
  0x95   : > { %6309 = shalt.err (!%p6306_p2)  }
  0x96   : > { %s6310_s28 = scalar_lea.vmem %s9464_s14, 32  ;;  %p6315_p13 = scmp.lt.s32.totalorder %s9464_s14, %s9389_s30 }
  0x97   : > { %p6311_p4 = scmp.ne.s32.totalorder %s9464_s14, %s6310_s28  ;;  %p6316_p7 = scmp.lt.s32.totalorder %s9414_s10, %s6310_s28 }
  0x99   : > { %p6317_p6 = por %p6316_p7, %p6315_p13 }
  0x9b   : > { %p6318_p9 = pnand %p6317_p6, %p6311_p4 }
  0x9d   : > { %6321 = shalt.err (!%p6318_p9)  }
  0x9e   : > { %459 = dma.hbm_to_vmem [thread:$0]  %s453_s16, 32, %s9464_s14, [#allocation3], %s9131_s3, %s9131_s3, %s9132_s2 }
  0x9f   : > { %s460_s23 = sshrl.u32 %s9467_s8, 3  ;;  %s461_s9 = sand.u32 7, %s9467_s8  }
  0xa0   : > { %s5641_s6 = sshll.u32 %s460_s23, 4  ;;  %s9136_s21 = smov [#allocation2 + $0x5]  }
  0xa1   : > { %s463_s18 = sadd.s32 %s5641_s6, %s461_s9  ;;  %s480_s15 = sshll.u32 %s9136_s21, 4  ;;  %s9494_s15 = int_to_ptr.vmem [resolvable:$true] %s480_s15 }
  0xa2   : > { %s5642_s29 = sshll.u32 %s463_s18, 4  ;;  %s472_s25 = sshrl.u32 %s9477_s12, 3 }
  0xa3   : > { %s465_s5 = scalar_lea.hbm %s12555_s1, %s5642_s29 }
  0xa4   : > { %s6322_s17 = scalar_lea.hbm %s465_s5, 32  ;;  %p6325_p12 = scmp.lt.s32.totalorder %s465_s5, %s12555_s1 }
  0xa5   : > { %p6323_p10 = scmp.ne.s32.totalorder %s465_s5, %s6322_s17  ;;  %p6326_p8 = scmp.lt.s32.totalorder %s9405_s7, %s6322_s17 }
  0xa7   : > { %p6327_p11 = por %p6326_p8, %p6325_p12 }
  0xa9   : > { %p6328_p0 = pnand %p6327_p11, %p6323_p10 }
  0xab   : > { %6331 = shalt.err (!%p6328_p0)  }
  0xac   : > { %s6332_s14 = scalar_lea.vmem %s9471_s26, 32  ;;  %p6337_p3 = scmp.lt.s32.totalorder %s9471_s26, %s9389_s30 }
  0xad   : > { %p6333_p1 = scmp.ne.s32.totalorder %s9471_s26, %s6332_s14  ;;  %p6338_p2 = scmp.lt.s32.totalorder %s9414_s10, %s6332_s14 }
  0xaf   : > { %p6339_p4 = por %p6338_p2, %p6337_p3 }
  0xb1   : > { %p6340_p13 = pnand %p6339_p4, %p6333_p1 }
  0xb3   : > { %6343 = shalt.err (!%p6340_p13)  }
  0xb4   : > { %471 = dma.hbm_to_vmem [thread:$0]  %s465_s5, 32, %s9471_s26, [#allocation3], %s9131_s3, %s9131_s3, %s9132_s2 }
  0xb5   : > { %s473_s8 = sand.u32 7, %s9477_s12   ;;  %s5643_s16 = sshll.u32 %s472_s25, 4 }
  0xb6   : > { %s475_s23 = sadd.s32 %s5643_s16, %s473_s8  ;;  %s169_s9 = sadd.s32 6, %s9382_s22 }
  0xb7   : > { %s5644_s6 = sshll.u32 %s475_s23, 4  ;;  %s9515_s18 = sld [smem:[#allocation5 + %s169_s9]] }
  0xb8   : > { %s477_s11 = scalar_lea.hbm %s12555_s1, %s5644_s6 }
  0xb9   : > { %s6344_s13 = scalar_lea.hbm %s477_s11, 32  ;;  %p6347_p6 = scmp.lt.s32.totalorder %s477_s11, %s12555_s1 }
  0xba   : > { %p6345_p7 = scmp.ne.s32.totalorder %s477_s11, %s6344_s13  ;;  %p6348_p9 = scmp.lt.s32.totalorder %s9405_s7, %s6344_s13 }
  0xbc   : > { %p6349_p10 = por %p6348_p9, %p6347_p6 }
  0xbe   : > { %p6350_p12 = pnand %p6349_p10, %p6345_p7 }
  0xc0   : > { %6353 = shalt.err (!%p6350_p12)  }
  0xc1   : > { %s6354_s26 = scalar_lea.vmem %s9494_s15, 32  ;;  %p6359_p11 = scmp.lt.s32.totalorder %s9494_s15, %s9389_s30 }
  0xc2   : > { %p6355_p8 = scmp.ne.s32.totalorder %s9494_s15, %s6354_s26  ;;  %p6360_p0 = scmp.lt.s32.totalorder %s9414_s10, %s6354_s26 }
  0xc4   : > { %p6361_p1 = por %p6360_p0, %p6359_p11 }
  0xc6   : > { %p6362_p3 = pnand %p6361_p1, %p6355_p8 }
  0xc8   : > { %6365 = shalt.err (!%p6362_p3)  }
  0xc9   : > { %483 = dma.hbm_to_vmem [thread:$0]  %s477_s11, 32, %s9494_s15, [#allocation3], %s9131_s3, %s9131_s3, %s9132_s2 }
  0xca   : > { %s9137_s12 = smov [#allocation2 + $0x6]   ;;  %s171_s25 = sadd.s32 7, %s9382_s22 }
  0xcb   : > { %s492_s5 = sshll.u32 %s9137_s12, 4  ;;  %s9536_s28 = sld [smem:[#allocation5 + %s171_s25]]  ;;  %s9534_s5 = int_to_ptr.vmem [resolvable:$true] %s492_s5 }
  0xcc   : > { %s173_s14 = sadd.s32 8, %s9382_s22  ;;  %s484_s8 = sshrl.u32 %s9515_s18, 3 }
  0xcd   : > { %s485_s16 = sand.u32 7, %s9515_s18   ;;  %s5645_s23 = sshll.u32 %s484_s8, 4 }
  0xce   : > { %s9138_s9 = smov [#allocation2 + $0x7]   ;;  %s487_s21 = sadd.s32 %s5645_s23, %s485_s16 }
  0xcf   : > { %s504_s6 = sshll.u32 %s9138_s9, 4  ;;  %s5646_s29 = sshll.u32 %s487_s21, 4  ;;  %s9541_s6 = int_to_ptr.vmem [resolvable:$true] %s504_s6 }
  0xd0   : > { %s9543_s15 = sld [smem:[#allocation5 + %s173_s14]]  ;;  %s489_s17 = scalar_lea.hbm %s12555_s1, %s5646_s29 }
  0xd1   : > { %s496_s20 = sshrl.u32 %s9536_s28, 3  ;;  %s6366_s26 = scalar_lea.hbm %s489_s17, 32 }
  0xd2   : > { %p6367_p2 = scmp.ne.s32.totalorder %s489_s17, %s6366_s26  ;;  %p6369_p4 = scmp.lt.s32.totalorder %s489_s17, %s12555_s1 }
  0xd3   : > { %p6370_p13 = scmp.lt.s32.totalorder %s9405_s7, %s6366_s26 }
  0xd5   : > { %p6371_p7 = por %p6370_p13, %p6369_p4 }
  0xd7   : > { %p6372_p6 = pnand %p6371_p7, %p6367_p2 }
  0xd9   : > { %6375 = shalt.err (!%p6372_p6)  }
  0xda   : > { %s6376_s18 = scalar_lea.vmem %s9534_s5, 32  ;;  %p6381_p10 = scmp.lt.s32.totalorder %s9534_s5, %s9389_s30 }
  0xdb   : > { %p6377_p9 = scmp.ne.s32.totalorder %s9534_s5, %s6376_s18  ;;  %p6382_p12 = scmp.lt.s32.totalorder %s9414_s10, %s6376_s18 }
  0xdd   : > { %p6383_p8 = por %p6382_p12, %p6381_p10 }
  0xdf   : > { %p6384_p11 = pnand %p6383_p8, %p6377_p9 }
  0xe1   : > { %6387 = shalt.err (!%p6384_p11)  }
  0xe2   : > { %495 = dma.hbm_to_vmem [thread:$0]  %s489_s17, 32, %s9534_s5, [#allocation3], %s9131_s3, %s9131_s3, %s9132_s2 }
  0xe3   : > { %s497_s14 = sand.u32 7, %s9536_s28   ;;  %s5647_s8 = sshll.u32 %s496_s20, 4 }
  0xe4   : > { %s499_s16 = sadd.s32 %s5647_s8, %s497_s14  ;;  %s9139_s9 = smov [#allocation2 + $0x10]  }
  0xe5   : > { %s5648_s23 = sshll.u32 %s499_s16, 4  ;;  %s516_s21 = sshll.u32 %s9139_s9, 4  ;;  %s517_s21 = int_to_ptr.vmem [resolvable:$true] %s516_s21 }
  0xe6   : > { %s501_s13 = scalar_lea.hbm %s12555_s1, %s5648_s23  ;;  %s508_s26 = sshrl.u32 %s9543_s15, 3 }
  0xe7   : > { %s6388_s12 = scalar_lea.hbm %s501_s13, 32  ;;  %p6391_p1 = scmp.lt.s32.totalorder %s501_s13, %s12555_s1 }
  0xe8   : > { %p6389_p0 = scmp.ne.s32.totalorder %s501_s13, %s6388_s12  ;;  %p6392_p3 = scmp.lt.s32.totalorder %s9405_s7, %s6388_s12 }
  0xea   : > { %p6393_p2 = por %p6392_p3, %p6391_p1 }
  0xec   : > { %p6394_p4 = pnand %p6393_p2, %p6389_p0 }
  0xee   : > { %6397 = shalt.err (!%p6394_p4)  }
  0xef   : > { %s6398_s5 = scalar_lea.vmem %s9541_s6, 32  ;;  %p6403_p7 = scmp.lt.s32.totalorder %s9541_s6, %s9389_s30 }
  0xf0   : > { %p6399_p13 = scmp.ne.s32.totalorder %s9541_s6, %s6398_s5  ;;  %p6404_p6 = scmp.lt.s32.totalorder %s9414_s10, %s6398_s5 }
  0xf2   : > { %p6405_p9 = por %p6404_p6, %p6403_p7 }
  0xf4   : > { %p6406_p10 = pnand %p6405_p9, %p6399_p13 }
  0xf6   : > { %6409 = shalt.err (!%p6406_p10)  }
  0xf7   : > { %507 = dma.hbm_to_vmem [thread:$0]  %s501_s13, 32, %s9541_s6, [#allocation3], %s9131_s3, %s9131_s3, %s9132_s2 }
  0xf8   : > { %s509_s28 = sand.u32 7, %s9543_s15   ;;  %s5649_s17 = sshll.u32 %s508_s26, 4 }
  0xf9   : > { %s511_s20 = sadd.s32 %s5649_s17, %s509_s28  ;;  %s175_s8 = sadd.s32 9, %s9382_s22 }
  0xfa   : > { %s5650_s14 = sshll.u32 %s511_s20, 4  ;;  %s9585_s29 = sld [smem:[#allocation5 + %s175_s8]] }
  0xfb   : > { %s513_s9 = scalar_lea.hbm %s12555_s1, %s5650_s14 }
  0xfc   : > { %s6410_s11 = scalar_lea.hbm %s513_s9, 32  ;;  %p6413_p8 = scmp.lt.s32.totalorder %s513_s9, %s12555_s1 }
  0xfd   : > { %p6411_p12 = scmp.ne.s32.totalorder %s513_s9, %s6410_s11  ;;  %p6414_p11 = scmp.lt.s32.totalorder %s9405_s7, %s6410_s11 }
  0xff   : > { %p6415_p0 = por %p6414_p11, %p6413_p8 }
 0x101   : > { %p6416_p1 = pnand %p6415_p0, %p6411_p12 }
 0x103   : > { %6419 = shalt.err (!%p6416_p1)  }
 0x104   : > { %s6420_s6 = scalar_lea.vmem %s517_s21, 32  ;;  %p6425_p2 = scmp.lt.s32.totalorder %s517_s21, %s9389_s30 }
 0x105   : > { %p6421_p3 = scmp.ne.s32.totalorder %s517_s21, %s6420_s6  ;;  %p6426_p4 = scmp.lt.s32.totalorder %s9414_s10, %s6420_s6 }
 0x107   : > { %p6427_p13 = por %p6426_p4, %p6425_p2 }
 0x109   : > { %p6428_p7 = pnand %p6427_p13, %p6421_p3 }
 0x10b   : > { %6431 = shalt.err (!%p6428_p7)  }
 0x10c   : > { %519 = dma.hbm_to_vmem [thread:$0]  %s513_s9, 32, %s517_s21, [#allocation3], %s9131_s3, %s9131_s3, %s9132_s2 }
 0x10d   : > { %s177_s15 = sadd.s32 10, %s9382_s22  ;;  %s9140_s13 = smov [#allocation2 + $0x11]  }
 0x10e   : > { %s528_s26 = sshll.u32 %s9140_s13, 4  ;;  %s9597_s18 = sld [smem:[#allocation5 + %s177_s15]]  ;;  %s9599_s26 = int_to_ptr.vmem [resolvable:$true] %s528_s26 }
 0x10f   : > { %s9141_s5 = smov [#allocation2 + $0x12]   ;;  %s179_s17 = sadd.s32 11, %s9382_s22 }
 0x110   : > { %s540_s28 = sshll.u32 %s9141_s5, 4  ;;  %s520_s20 = sshrl.u32 %s9585_s29, 3  ;;  %s9604_s28 = int_to_ptr.vmem [resolvable:$true] %s540_s28 }
 0x111   : > { %s521_s14 = sand.u32 7, %s9585_s29   ;;  %s5651_s8 = sshll.u32 %s520_s20, 4 }
 0x112   : > { %s523_s16 = sadd.s32 %s5651_s8, %s521_s14  ;;  %s9606_s21 = sld [smem:[#allocation5 + %s179_s17]] }
 0x113   : > { %s5652_s23 = sshll.u32 %s523_s16, 4 }
 0x114   : > { %s532_s9 = sshrl.u32 %s9597_s18, 3  ;;  %s525_s25 = scalar_lea.hbm %s12555_s1, %s5652_s23 }
 0x115   : > { %s533_s6 = sand.u32 7, %s9597_s18   ;;  %s6432_s15 = scalar_lea.hbm %s525_s25, 32 }
 0x116   : > { %p6433_p6 = scmp.ne.s32.totalorder %s525_s25, %s6432_s15  ;;  %p6435_p9 = scmp.lt.s32.totalorder %s525_s25, %s12555_s1 }
 0x117   : > { %p6436_p10 = scmp.lt.s32.totalorder %s9405_s7, %s6432_s15 }
 0x119   : > { %p6437_p12 = por %p6436_p10, %p6435_p9 }
 0x11b   : > { %p6438_p8 = pnand %p6437_p12, %p6433_p6 }
 0x11d   : > { %6441 = shalt.err (!%p6438_p8)  }
 0x11e   : > { %s6442_s29 = scalar_lea.vmem %s9599_s26, 32  ;;  %p6447_p0 = scmp.lt.s32.totalorder %s9599_s26, %s9389_s30 }
 0x11f   : > { %p6443_p11 = scmp.ne.s32.totalorder %s9599_s26, %s6442_s29  ;;  %p6448_p1 = scmp.lt.s32.totalorder %s9414_s10, %s6442_s29 }
 0x121   : > { %p6449_p3 = por %p6448_p1, %p6447_p0 }
 0x123   : > { %p6450_p2 = pnand %p6449_p3, %p6443_p11 }
 0x125   : > { %6453 = shalt.err (!%p6450_p2)  }
 0x126   : > { %531 = dma.hbm_to_vmem [thread:$0]  %s525_s25, 32, %s9599_s26, [#allocation3], %s9131_s3, %s9131_s3, %s9132_s2 }
 0x127   : > { %s5653_s18 = sshll.u32 %s532_s9, 4  ;;  %s9142_s20 = smov [#allocation2 + $0x13]  }
 0x128   : > { %s535_s17 = sadd.s32 %s5653_s18, %s533_s6  ;;  %s552_s14 = sshll.u32 %s9142_s20, 4  ;;  %s553_s14 = int_to_ptr.vmem [resolvable:$true] %s552_s14 }
 0x129   : > { %s5654_s8 = sshll.u32 %s535_s17, 4  ;;  %s544_s16 = sshrl.u32 %s9606_s21, 3 }
 0x12a   : > { %s537_s12 = scalar_lea.hbm %s12555_s1, %s5654_s8  ;;  %s545_s15 = sand.u32 7, %s9606_s21  }
 0x12b   : > { %s6454_s13 = scalar_lea.hbm %s537_s12, 32  ;;  %p6457_p13 = scmp.lt.s32.totalorder %s537_s12, %s12555_s1 }
 0x12c   : > { %p6455_p4 = scmp.ne.s32.totalorder %s537_s12, %s6454_s13  ;;  %p6458_p7 = scmp.lt.s32.totalorder %s9405_s7, %s6454_s13 }
 0x12e   : > { %p6459_p6 = por %p6458_p7, %p6457_p13 }
 0x130   : > { %p6460_p9 = pnand %p6459_p6, %p6455_p4 }
 0x132   : > { %6463 = shalt.err (!%p6460_p9)  }
 0x133   : > { %s6464_s26 = scalar_lea.vmem %s9604_s28, 32  ;;  %p6469_p12 = scmp.lt.s32.totalorder %s9604_s28, %s9389_s30 }
 0x134   : > { %p6465_p10 = scmp.ne.s32.totalorder %s9604_s28, %s6464_s26  ;;  %p6470_p8 = scmp.lt.s32.totalorder %s9414_s10, %s6464_s26 }
 0x136   : > { %p6471_p11 = por %p6470_p8, %p6469_p12 }
 0x138   : > { %p6472_p0 = pnand %p6471_p11, %p6465_p10 }
 0x13a   : > { %6475 = shalt.err (!%p6472_p0)  }
 0x13b   : > { %543 = dma.hbm_to_vmem [thread:$0]  %s537_s12, 32, %s9604_s28, [#allocation3], %s9131_s3, %s9131_s3, %s9132_s2 }
 0x13c   : > { %s5655_s21 = sshll.u32 %s544_s16, 4  ;;  %s181_s25 = sadd.s32 12, %s9382_s22 }
 0x13d   : > { %s547_s9 = sadd.s32 %s5655_s21, %s545_s15  ;;  %s9645_s18 = sld [smem:[#allocation5 + %s181_s25]] }
 0x13e   : > { %s5656_s6 = sshll.u32 %s547_s9, 4 }
 0x13f   : > { %s549_s8 = scalar_lea.hbm %s12555_s1, %s5656_s6 }
 0x140   : > { %s6476_s23 = scalar_lea.hbm %s549_s8, 32  ;;  %p6479_p3 = scmp.lt.s32.totalorder %s549_s8, %s12555_s1 }
 0x141   : > { %p6477_p1 = scmp.ne.s32.totalorder %s549_s8, %s6476_s23  ;;  %p6480_p2 = scmp.lt.s32.totalorder %s9405_s7, %s6476_s23 }
 0x143   : > { %p6481_p4 = por %p6480_p2, %p6479_p3 }
 0x145   : > { %p6482_p13 = pnand %p6481_p4, %p6477_p1 }
 0x147   : > { %6485 = shalt.err (!%p6482_p13)  }
 0x148   : > { %s6486_s28 = scalar_lea.vmem %s553_s14, 32  ;;  %p6491_p6 = scmp.lt.s32.totalorder %s553_s14, %s9389_s30 }
 0x149   : > { %p6487_p7 = scmp.ne.s32.totalorder %s553_s14, %s6486_s28  ;;  %p6492_p9 = scmp.lt.s32.totalorder %s9414_s10, %s6486_s28 }
 0x14b   : > { %p6493_p10 = por %p6492_p9, %p6491_p6 }
 0x14d   : > { %p6494_p12 = pnand %p6493_p10, %p6487_p7 }
 0x14f   : > { %6497 = shalt.err (!%p6494_p12)  }
 0x150   : > { %555 = dma.hbm_to_vmem [thread:$0]  %s549_s8, 32, %s553_s14, [#allocation3], %s9131_s3, %s9131_s3, %s9132_s2 }
 0x151   : > { %s9143_s16 = smov [#allocation2 + $0x14]   ;;  %s183_s15 = sadd.s32 13, %s9382_s22 }
 0x152   : > { %s564_s12 = sshll.u32 %s9143_s16, 4  ;;  %s9662_s5 = sld [smem:[#allocation5 + %s183_s15]]  ;;  %s9660_s12 = int_to_ptr.vmem [resolvable:$true] %s564_s12 }
 0x153   : > { %s185_s29 = sadd.s32 14, %s9382_s22  ;;  %s556_s26 = sshrl.u32 %s9645_s18, 3 }
 0x154   : > { %s557_s21 = sand.u32 7, %s9645_s18   ;;  %s5657_s9 = sshll.u32 %s556_s26, 4 }
 0x155   : > { %s9144_s25 = smov [#allocation2 + $0x15]   ;;  %s559_s17 = sadd.s32 %s5657_s9, %s557_s21 }
 0x156   : > { %s576_s6 = sshll.u32 %s9144_s25, 4  ;;  %s5658_s20 = sshll.u32 %s559_s17, 4  ;;  %s9667_s6 = int_to_ptr.vmem [resolvable:$true] %s576_s6 }
 0x157   : > { %s9669_s14 = sld [smem:[#allocation5 + %s185_s29]]  ;;  %s561_s11 = scalar_lea.hbm %s12555_s1, %s5658_s20 }
 0x158   : > { %s568_s13 = sshrl.u32 %s9662_s5, 3  ;;  %s6498_s28 = scalar_lea.hbm %s561_s11, 32 }
 0x159   : > { %p6499_p8 = scmp.ne.s32.totalorder %s561_s11, %s6498_s28  ;;  %p6501_p11 = scmp.lt.s32.totalorder %s561_s11, %s12555_s1 }
 0x15a   : > { %p6502_p0 = scmp.lt.s32.totalorder %s9405_s7, %s6498_s28 }
 0x15c   : > { %p6503_p1 = por %p6502_p0, %p6501_p11 }
 0x15e   : > { %p6504_p3 = pnand %p6503_p1, %p6499_p8 }
 0x160   : > { %6507 = shalt.err (!%p6504_p3)  }
 0x161   : > { %s6508_s18 = scalar_lea.vmem %s9660_s12, 32  ;;  %p6513_p4 = scmp.lt.s32.totalorder %s9660_s12, %s9389_s30 }
 0x162   : > { %p6509_p2 = scmp.ne.s32.totalorder %s9660_s12, %s6508_s18  ;;  %p6514_p13 = scmp.lt.s32.totalorder %s9414_s10, %s6508_s18 }
 0x164   : > { %p6515_p7 = por %p6514_p13, %p6513_p4 }
 0x166   : > { %p6516_p6 = pnand %p6515_p7, %p6509_p2 }
 0x168   : > { %6519 = shalt.err (!%p6516_p6)  }
 0x169   : > { %567 = dma.hbm_to_vmem [thread:$0]  %s561_s11, 32, %s9660_s12, [#allocation3], %s9131_s3, %s9131_s3, %s9132_s2 }
 0x16a   : > { %s569_s29 = sand.u32 7, %s9662_s5   ;;  %s5659_s26 = sshll.u32 %s568_s13, 4 }
 0x16b   : > { %s571_s21 = sadd.s32 %s5659_s26, %s569_s29  ;;  %s9145_s25 = smov [#allocation2 + $0x16]  }
 0x16c   : > { %s5660_s9 = sshll.u32 %s571_s21, 4  ;;  %s588_s17 = sshll.u32 %s9145_s25, 4  ;;  %s589_s17 = int_to_ptr.vmem [resolvable:$true] %s588_s17 }
 0x16d   : > { %s573_s23 = scalar_lea.hbm %s12555_s1, %s5660_s9  ;;  %s580_s28 = sshrl.u32 %s9669_s14, 3 }
 0x16e   : > { %s6520_s16 = scalar_lea.hbm %s573_s23, 32  ;;  %p6523_p10 = scmp.lt.s32.totalorder %s573_s23, %s12555_s1 }
 0x16f   : > { %p6521_p9 = scmp.ne.s32.totalorder %s573_s23, %s6520_s16  ;;  %p6524_p12 = scmp.lt.s32.totalorder %s9405_s7, %s6520_s16 }
 0x171   : > { %p6525_p8 = por %p6524_p12, %p6523_p10 }
 0x173   : > { %p6526_p11 = pnand %p6525_p8, %p6521_p9 }
 0x175   : > { %6529 = shalt.err (!%p6526_p11)  }
 0x176   : > { %s6530_s12 = scalar_lea.vmem %s9667_s6, 32  ;;  %p6535_p1 = scmp.lt.s32.totalorder %s9667_s6, %s9389_s30 }
 0x177   : > { %p6531_p0 = scmp.ne.s32.totalorder %s9667_s6, %s6530_s12  ;;  %p6536_p3 = scmp.lt.s32.totalorder %s9414_s10, %s6530_s12 }
 0x179   : > { %p6537_p2 = por %p6536_p3, %p6535_p1 }
 0x17b   : > { %p6538_p4 = pnand %p6537_p2, %p6531_p0 }
 0x17d   : > { %6541 = shalt.err (!%p6538_p4)  }
 0x17e   : > { %579 = dma.hbm_to_vmem [thread:$0]  %s573_s23, 32, %s9667_s6, [#allocation3], %s9131_s3, %s9131_s3, %s9132_s2 }
 0x17f   : > { %s581_s5 = sand.u32 7, %s9669_s14   ;;  %s5661_s11 = sshll.u32 %s580_s28, 4 }
 0x180   : > { %s583_s13 = sadd.s32 %s5661_s11, %s581_s5  ;;  %s187_s26 = sadd.s32 15, %s9382_s22 }
 0x181   : > { %s5662_s29 = sshll.u32 %s583_s13, 4  ;;  %s9711_s20 = sld [smem:[#allocation5 + %s187_s26]] }
 0x182   : > { %s585_s25 = scalar_lea.hbm %s12555_s1, %s5662_s29 }
 0x183   : > { %s6542_s8 = scalar_lea.hbm %s585_s25, 32  ;;  %p6545_p7 = scmp.lt.s32.totalorder %s585_s25, %s12555_s1 }
 0x184   : > { %p6543_p13 = scmp.ne.s32.totalorder %s585_s25, %s6542_s8  ;;  %p6546_p6 = scmp.lt.s32.totalorder %s9405_s7, %s6542_s8 }
 0x186   : > { %p6547_p9 = por %p6546_p6, %p6545_p7 }
 0x188   : > { %p6548_p10 = pnand %p6547_p9, %p6543_p13 }
 0x18a   : > { %6551 = shalt.err (!%p6548_p10)  }
 0x18b   : > { %s6552_s6 = scalar_lea.vmem %s589_s17, 32  ;;  %p6557_p8 = scmp.lt.s32.totalorder %s589_s17, %s9389_s30 }
 0x18c   : > { %p6553_p12 = scmp.ne.s32.totalorder %s589_s17, %s6552_s6  ;;  %p6558_p11 = scmp.lt.s32.totalorder %s9414_s10, %s6552_s6 }
 0x18e   : > { %p6559_p0 = por %p6558_p11, %p6557_p8 }
 0x190   : > { %p6560_p1 = pnand %p6559_p0, %p6553_p12 }
 0x192   : > { %6563 = shalt.err (!%p6560_p1)  }
 0x193   : > { %591 = dma.hbm_to_vmem [thread:$0]  %s585_s25, 32, %s589_s17, [#allocation3], %s9131_s3, %s9131_s3, %s9132_s2 }
 0x194   : > { %s189_s14 = sadd.s32 16, %s9382_s22  ;;  %s9146_s23 = smov [#allocation2 + $0x17]  }
 0x195   : > { %s600_s28 = sshll.u32 %s9146_s23, 4  ;;  %s9723_s18 = sld [smem:[#allocation5 + %s189_s14]]  ;;  %s9725_s28 = int_to_ptr.vmem [resolvable:$true] %s600_s28 }
 0x196   : > { %s9147_s12 = smov [#allocation2 + $0x20]   ;;  %s191_s11 = sadd.s32 17, %s9382_s22 }
 0x197   : > { %s612_s5 = sshll.u32 %s9147_s12, 4  ;;  %s592_s13 = sshrl.u32 %s9711_s20, 3  ;;  %s9730_s5 = int_to_ptr.vmem [resolvable:$true] %s612_s5 }
 0x198   : > { %s593_s29 = sand.u32 7, %s9711_s20   ;;  %s5663_s26 = sshll.u32 %s592_s13, 4 }
 0x199   : > { %s595_s21 = sadd.s32 %s5663_s26, %s593_s29  ;;  %s9732_s17 = sld [smem:[#allocation5 + %s191_s11]] }
 0x19a   : > { %s5664_s9 = sshll.u32 %s595_s21, 4 }
 0x19b   : > { %s604_s25 = sshrl.u32 %s9723_s18, 3  ;;  %s597_s15 = scalar_lea.hbm %s12555_s1, %s5664_s9 }
 0x19c   : > { %s605_s6 = sand.u32 7, %s9723_s18   ;;  %s6564_s14 = scalar_lea.hbm %s597_s15, 32 }
 0x19d   : > { %p6565_p3 = scmp.ne.s32.totalorder %s597_s15, %s6564_s14  ;;  %p6567_p2 = scmp.lt.s32.totalorder %s597_s15, %s12555_s1 }
 0x19e   : > { %p6568_p4 = scmp.lt.s32.totalorder %s9405_s7, %s6564_s14 }
 0x1a0   : > { %p6569_p13 = por %p6568_p4, %p6567_p2 }
 0x1a2   : > { %p6570_p7 = pnand %p6569_p13, %p6565_p3 }
 0x1a4   : > { %6573 = shalt.err (!%p6570_p7)  }
 0x1a5   : > { %s6574_s20 = scalar_lea.vmem %s9725_s28, 32  ;;  %p6579_p9 = scmp.lt.s32.totalorder %s9725_s28, %s9389_s30 }
 0x1a6   : > { %p6575_p6 = scmp.ne.s32.totalorder %s9725_s28, %s6574_s20  ;;  %p6580_p10 = scmp.lt.s32.totalorder %s9414_s10, %s6574_s20 }
 0x1a8   : > { %p6581_p12 = por %p6580_p10, %p6579_p9 }
 0x1aa   : > { %p6582_p8 = pnand %p6581_p12, %p6575_p6 }
 0x1ac   : > { %6585 = shalt.err (!%p6582_p8)  }
 0x1ad   : > { %603 = dma.hbm_to_vmem [thread:$0]  %s597_s15, 32, %s9725_s28, [#allocation3], %s9131_s3, %s9131_s3, %s9132_s2 }
 0x1ae   : > { %s5665_s18 = sshll.u32 %s604_s25, 4  ;;  %s9148_s13 = smov [#allocation2 + $0x21]  }
 0x1af   : > { %s607_s11 = sadd.s32 %s5665_s18, %s605_s6  ;;  %s624_s29 = sshll.u32 %s9148_s13, 4  ;;  %s625_s29 = int_to_ptr.vmem [resolvable:$true] %s624_s29 }
 0x1b0   : > { %s5666_s26 = sshll.u32 %s607_s11, 4  ;;  %s616_s21 = sshrl.u32 %s9732_s17, 3 }
 0x1b1   : > { %s609_s16 = scalar_lea.hbm %s12555_s1, %s5666_s26  ;;  %s617_s14 = sand.u32 7, %s9732_s17  }
 0x1b2   : > { %s6586_s23 = scalar_lea.hbm %s609_s16, 32  ;;  %p6589_p0 = scmp.lt.s32.totalorder %s609_s16, %s12555_s1 }
 0x1b3   : > { %p6587_p11 = scmp.ne.s32.totalorder %s609_s16, %s6586_s23  ;;  %p6590_p1 = scmp.lt.s32.totalorder %s9405_s7, %s6586_s23 }
 0x1b5   : > { %p6591_p3 = por %p6590_p1, %p6589_p0 }
 0x1b7   : > { %p6592_p2 = pnand %p6591_p3, %p6587_p11 }
 0x1b9   : > { %6595 = shalt.err (!%p6592_p2)  }
 0x1ba   : > { %s6596_s28 = scalar_lea.vmem %s9730_s5, 32  ;;  %p6601_p13 = scmp.lt.s32.totalorder %s9730_s5, %s9389_s30 }
 0x1bb   : > { %p6597_p4 = scmp.ne.s32.totalorder %s9730_s5, %s6596_s28  ;;  %p6602_p7 = scmp.lt.s32.totalorder %s9414_s10, %s6596_s28 }
 0x1bd   : > { %p6603_p6 = por %p6602_p7, %p6601_p13 }
 0x1bf   : > { %p6604_p9 = pnand %p6603_p6, %p6597_p4 }
 0x1c1   : > { %6607 = shalt.err (!%p6604_p9)  }
 0x1c2   : > { %615 = dma.hbm_to_vmem [thread:$0]  %s609_s16, 32, %s9730_s5, [#allocation3], %s9131_s3, %s9131_s3, %s9132_s2 }
 0x1c3   : > { %s5667_s17 = sshll.u32 %s616_s21, 4  ;;  %s193_s15 = sadd.s32 18, %s9382_s22 }
 0x1c4   : > { %s619_s25 = sadd.s32 %s5667_s17, %s617_s14  ;;  %s9771_s18 = sld [smem:[#allocation5 + %s193_s15]] }
 0x1c5   : > { %s5668_s6 = sshll.u32 %s619_s25, 4 }
 0x1c6   : > { %s621_s26 = scalar_lea.hbm %s12555_s1, %s5668_s6 }
 0x1c7   : > { %s6608_s9 = scalar_lea.hbm %s621_s26, 32  ;;  %p6611_p12 = scmp.lt.s32.totalorder %s621_s26, %s12555_s1 }
 0x1c8   : > { %p6609_p10 = scmp.ne.s32.totalorder %s621_s26, %s6608_s9  ;;  %p6612_p8 = scmp.lt.s32.totalorder %s9405_s7, %s6608_s9 }
 0x1ca   : > { %p6613_p11 = por %p6612_p8, %p6611_p12 }
 0x1cc   : > { %p6614_p0 = pnand %p6613_p11, %p6609_p10 }
 0x1ce   : > { %6617 = shalt.err (!%p6614_p0)  }
 0x1cf   : > { %s6618_s5 = scalar_lea.vmem %s625_s29, 32  ;;  %p6623_p3 = scmp.lt.s32.totalorder %s625_s29, %s9389_s30 }
 0x1d0   : > { %p6619_p1 = scmp.ne.s32.totalorder %s625_s29, %s6618_s5  ;;  %p6624_p2 = scmp.lt.s32.totalorder %s9414_s10, %s6618_s5 }
 0x1d2   : > { %p6625_p4 = por %p6624_p2, %p6623_p3 }
 0x1d4   : > { %p6626_p13 = pnand %p6625_p4, %p6619_p1 }
 0x1d6   : > { %6629 = shalt.err (!%p6626_p13)  }
 0x1d7   : > { %627 = dma.hbm_to_vmem [thread:$0]  %s621_s26, 32, %s625_s29, [#allocation3], %s9131_s3, %s9131_s3, %s9132_s2 }
 0x1d8   : > { %s9149_s21 = smov [#allocation2 + $0x22]   ;;  %s195_s14 = sadd.s32 19, %s9382_s22 }
 0x1d9   : > { %s636_s16 = sshll.u32 %s9149_s21, 4  ;;  %s9788_s12 = sld [smem:[#allocation5 + %s195_s14]]  ;;  %s9786_s16 = int_to_ptr.vmem [resolvable:$true] %s636_s16 }
 0x1da   : > { %s197_s20 = sadd.s32 20, %s9382_s22  ;;  %s628_s28 = sshrl.u32 %s9771_s18, 3 }
 0x1db   : > { %s629_s17 = sand.u32 7, %s9771_s18   ;;  %s5669_s25 = sshll.u32 %s628_s28, 4 }
 0x1dc   : > { %s9150_s15 = smov [#allocation2 + $0x23]   ;;  %s631_s11 = sadd.s32 %s5669_s25, %s629_s17 }
 0x1dd   : > { %s648_s6 = sshll.u32 %s9150_s15, 4  ;;  %s5670_s13 = sshll.u32 %s631_s11, 4  ;;  %s9793_s6 = int_to_ptr.vmem [resolvable:$true] %s648_s6 }
 0x1de   : > { %s9795_s29 = sld [smem:[#allocation5 + %s197_s20]]  ;;  %s633_s8 = scalar_lea.hbm %s12555_s1, %s5670_s13 }
 0x1df   : > { %s640_s23 = sshrl.u32 %s9788_s12, 3  ;;  %s6630_s5 = scalar_lea.hbm %s633_s8, 32 }
 0x1e0   : > { %p6631_p7 = scmp.ne.s32.totalorder %s633_s8, %s6630_s5  ;;  %p6633_p6 = scmp.lt.s32.totalorder %s633_s8, %s12555_s1 }
 0x1e1   : > { %p6634_p9 = scmp.lt.s32.totalorder %s9405_s7, %s6630_s5 }
 0x1e3   : > { %p6635_p10 = por %p6634_p9, %p6633_p6 }
 0x1e5   : > { %p6636_p12 = pnand %p6635_p10, %p6631_p7 }
 0x1e7   : > { %6639 = shalt.err (!%p6636_p12)  }
 0x1e8   : > { %s6640_s18 = scalar_lea.vmem %s9786_s16, 32  ;;  %p6645_p11 = scmp.lt.s32.totalorder %s9786_s16, %s9389_s30 }
 0x1e9   : > { %p6641_p8 = scmp.ne.s32.totalorder %s9786_s16, %s6640_s18  ;;  %p6646_p0 = scmp.lt.s32.totalorder %s9414_s10, %s6640_s18 }
 0x1eb   : > { %p6647_p1 = por %p6646_p0, %p6645_p11 }
 0x1ed   : > { %p6648_p3 = pnand %p6647_p1, %p6641_p8 }
 0x1ef   : > { %6651 = shalt.err (!%p6648_p3)  }
 0x1f0   : > { %639 = dma.hbm_to_vmem [thread:$0]  %s633_s8, 32, %s9786_s16, [#allocation3], %s9131_s3, %s9131_s3, %s9132_s2 }
 0x1f1   : > { %s641_s20 = sand.u32 7, %s9788_s12   ;;  %s5671_s28 = sshll.u32 %s640_s23, 4 }
 0x1f2   : > { %s643_s17 = sadd.s32 %s5671_s28, %s641_s20  ;;  %s9151_s15 = smov [#allocation2 + $0x24]  }
 0x1f3   : > { %s5672_s25 = sshll.u32 %s643_s17, 4  ;;  %s660_s11 = sshll.u32 %s9151_s15, 4  ;;  %s661_s11 = int_to_ptr.vmem [resolvable:$true] %s660_s11 }
 0x1f4   : > { %s645_s9 = scalar_lea.hbm %s12555_s1, %s5672_s25  ;;  %s652_s5 = sshrl.u32 %s9795_s29, 3 }
 0x1f5   : > { %s6652_s21 = scalar_lea.hbm %s645_s9, 32  ;;  %p6655_p4 = scmp.lt.s32.totalorder %s645_s9, %s12555_s1 }
 0x1f6   : > { %p6653_p2 = scmp.ne.s32.totalorder %s645_s9, %s6652_s21  ;;  %p6656_p13 = scmp.lt.s32.totalorder %s9405_s7, %s6652_s21 }
 0x1f8   : > { %p6657_p7 = por %p6656_p13, %p6655_p4 }
 0x1fa   : > { %p6658_p6 = pnand %p6657_p7, %p6653_p2 }
 0x1fc   : > { %6661 = shalt.err (!%p6658_p6)  }
 0x1fd   : > { %s6662_s16 = scalar_lea.vmem %s9793_s6, 32  ;;  %p6667_p10 = scmp.lt.s32.totalorder %s9793_s6, %s9389_s30 }
 0x1fe   : > { %p6663_p9 = scmp.ne.s32.totalorder %s9793_s6, %s6662_s16  ;;  %p6668_p12 = scmp.lt.s32.totalorder %s9414_s10, %s6662_s16 }
 0x200   : > { %p6669_p8 = por %p6668_p12, %p6667_p10 }
 0x202   : > { %p6670_p11 = pnand %p6669_p8, %p6663_p9 }
 0x204   : > { %6673 = shalt.err (!%p6670_p11)  }
 0x205   : > { %651 = dma.hbm_to_vmem [thread:$0]  %s645_s9, 32, %s9793_s6, [#allocation3], %s9131_s3, %s9131_s3, %s9132_s2 }
 0x206   : > { %s653_s12 = sand.u32 7, %s9795_s29   ;;  %s5673_s8 = sshll.u32 %s652_s5, 4 }
 0x207   : > { %s655_s23 = sadd.s32 %s5673_s8, %s653_s12  ;;  %s199_s28 = sadd.s32 21, %s9382_s22 }
 0x208   : > { %s5674_s20 = sshll.u32 %s655_s23, 4  ;;  %s9837_s13 = sld [smem:[#allocation5 + %s199_s28]] }
 0x209   : > { %s657_s15 = scalar_lea.hbm %s12555_s1, %s5674_s20 }
 0x20a   : > { %s6674_s26 = scalar_lea.hbm %s657_s15, 32  ;;  %p6677_p1 = scmp.lt.s32.totalorder %s657_s15, %s12555_s1 }
 0x20b   : > { %p6675_p0 = scmp.ne.s32.totalorder %s657_s15, %s6674_s26  ;;  %p6678_p3 = scmp.lt.s32.totalorder %s9405_s7, %s6674_s26 }
 0x20d   : > { %p6679_p2 = por %p6678_p3, %p6677_p1 }
 0x20f   : > { %p6680_p4 = pnand %p6679_p2, %p6675_p0 }
 0x211   : > { %6683 = shalt.err (!%p6680_p4)  }
 0x212   : > { %s6684_s6 = scalar_lea.vmem %s661_s11, 32  ;;  %p6689_p7 = scmp.lt.s32.totalorder %s661_s11, %s9389_s30 }
 0x213   : > { %p6685_p13 = scmp.ne.s32.totalorder %s661_s11, %s6684_s6  ;;  %p6690_p6 = scmp.lt.s32.totalorder %s9414_s10, %s6684_s6 }
 0x215   : > { %p6691_p9 = por %p6690_p6, %p6689_p7 }
 0x217   : > { %p6692_p10 = pnand %p6691_p9, %p6685_p13 }
 0x219   : > { %6695 = shalt.err (!%p6692_p10)  }
 0x21a   : > { %663 = dma.hbm_to_vmem [thread:$0]  %s657_s15, 32, %s661_s11, [#allocation3], %s9131_s3, %s9131_s3, %s9132_s2 }
 0x21b   : > { %s201_s29 = sadd.s32 22, %s9382_s22  ;;  %s9152_s9 = smov [#allocation2 + $0x25]  }
 0x21c   : > { %s672_s5 = sshll.u32 %s9152_s9, 4  ;;  %s9849_s18 = sld [smem:[#allocation5 + %s201_s29]]  ;;  %s9851_s5 = int_to_ptr.vmem [resolvable:$true] %s672_s5 }
 0x21d   : > { %s9153_s16 = smov [#allocation2 + $0x26]   ;;  %s203_s8 = sadd.s32 23, %s9382_s22 }
 0x21e   : > { %s684_s12 = sshll.u32 %s9153_s16, 4  ;;  %s664_s23 = sshrl.u32 %s9837_s13, 3  ;;  %s9856_s12 = int_to_ptr.vmem [resolvable:$true] %s684_s12 }
 0x21f   : > { %s665_s20 = sand.u32 7, %s9837_s13   ;;  %s5675_s28 = sshll.u32 %s664_s23, 4 }
 0x220   : > { %s667_s17 = sadd.s32 %s5675_s28, %s665_s20  ;;  %s9858_s11 = sld [smem:[#allocation5 + %s203_s8]] }
 0x221   : > { %s5676_s25 = sshll.u32 %s667_s17, 4 }
 0x222   : > { %s676_s15 = sshrl.u32 %s9849_s18, 3  ;;  %s669_s14 = scalar_lea.hbm %s12555_s1, %s5676_s25 }
 0x223   : > { %s677_s6 = sand.u32 7, %s9849_s18   ;;  %s6696_s29 = scalar_lea.hbm %s669_s14, 32 }
 0x224   : > { %p6697_p12 = scmp.ne.s32.totalorder %s669_s14, %s6696_s29  ;;  %p6699_p8 = scmp.lt.s32.totalorder %s669_s14, %s12555_s1 }
 0x225   : > { %p6700_p11 = scmp.lt.s32.totalorder %s9405_s7, %s6696_s29 }
 0x227   : > { %p6701_p0 = por %p6700_p11, %p6699_p8 }
 0x229   : > { %p6702_p1 = pnand %p6701_p0, %p6697_p12 }
 0x22b   : > { %6705 = shalt.err (!%p6702_p1)  }
 0x22c   : > { %s6706_s13 = scalar_lea.vmem %s9851_s5, 32  ;;  %p6711_p2 = scmp.lt.s32.totalorder %s9851_s5, %s9389_s30 }
 0x22d   : > { %p6707_p3 = scmp.ne.s32.totalorder %s9851_s5, %s6706_s13  ;;  %p6712_p4 = scmp.lt.s32.totalorder %s9414_s10, %s6706_s13 }
 0x22f   : > { %p6713_p13 = por %p6712_p4, %p6711_p2 }
 0x231   : > { %p6714_p7 = pnand %p6713_p13, %p6707_p3 }
 0x233   : > { %6717 = shalt.err (!%p6714_p7)  }
 0x234   : > { %675 = dma.hbm_to_vmem [thread:$0]  %s669_s14, 32, %s9851_s5, [#allocation3], %s9131_s3, %s9131_s3, %s9132_s2 }
 0x235   : > { %s5677_s18 = sshll.u32 %s676_s15, 4  ;;  %s9154_s23 = smov [#allocation2 + $0x27]  }
 0x236   : > { %s679_s8 = sadd.s32 %s5677_s18, %s677_s6  ;;  %s696_s20 = sshll.u32 %s9154_s23, 4  ;;  %s697_s20 = int_to_ptr.vmem [resolvable:$true] %s696_s20 }
 0x237   : > { %s5678_s28 = sshll.u32 %s679_s8, 4  ;;  %s688_s17 = sshrl.u32 %s9858_s11, 3 }
 0x238   : > { %s681_s21 = scalar_lea.hbm %s12555_s1, %s5678_s28  ;;  %s689_s29 = sand.u32 7, %s9858_s11  }
 0x239   : > { %s6718_s9 = scalar_lea.hbm %s681_s21, 32  ;;  %p6721_p9 = scmp.lt.s32.totalorder %s681_s21, %s12555_s1 }
 0x23a   : > { %p6719_p6 = scmp.ne.s32.totalorder %s681_s21, %s6718_s9  ;;  %p6722_p10 = scmp.lt.s32.totalorder %s9405_s7, %s6718_s9 }
 0x23c   : > { %p6723_p12 = por %p6722_p10, %p6721_p9 }
 0x23e   : > { %p6724_p8 = pnand %p6723_p12, %p6719_p6 }
 0x240   : > { %6727 = shalt.err (!%p6724_p8)  }
 0x241   : > { %s6728_s5 = scalar_lea.vmem %s9856_s12, 32  ;;  %p6733_p0 = scmp.lt.s32.totalorder %s9856_s12, %s9389_s30 }
 0x242   : > { %p6729_p11 = scmp.ne.s32.totalorder %s9856_s12, %s6728_s5  ;;  %p6734_p1 = scmp.lt.s32.totalorder %s9414_s10, %s6728_s5 }
 0x244   : > { %p6735_p3 = por %p6734_p1, %p6733_p0 }
 0x246   : > { %p6736_p2 = pnand %p6735_p3, %p6729_p11 }
 0x248   : > { %6739 = shalt.err (!%p6736_p2)  }
 0x249   : > { %687 = dma.hbm_to_vmem [thread:$0]  %s681_s21, 32, %s9856_s12, [#allocation3], %s9131_s3, %s9131_s3, %s9132_s2 }
 0x24a   : > { %s5679_s11 = sshll.u32 %s688_s17, 4  ;;  %s205_s14 = sadd.s32 24, %s9382_s22 }
 0x24b   : > { %s691_s15 = sadd.s32 %s5679_s11, %s689_s29  ;;  %s9897_s18 = sld [smem:[#allocation5 + %s205_s14]] }
 0x24c   : > { %s5680_s6 = sshll.u32 %s691_s15, 4 }
 0x24d   : > { %s693_s28 = scalar_lea.hbm %s12555_s1, %s5680_s6 }
 0x24e   : > { %s6740_s25 = scalar_lea.hbm %s693_s28, 32  ;;  %p6743_p13 = scmp.lt.s32.totalorder %s693_s28, %s12555_s1 }
 0x24f   : > { %p6741_p4 = scmp.ne.s32.totalorder %s693_s28, %s6740_s25  ;;  %p6744_p7 = scmp.lt.s32.totalorder %s9405_s7, %s6740_s25 }
 0x251   : > { %p6745_p6 = por %p6744_p7, %p6743_p13 }
 0x253   : > { %p6746_p9 = pnand %p6745_p6, %p6741_p4 }
 0x255   : > { %6749 = shalt.err (!%p6746_p9)  }
 0x256   : > { %s6750_s12 = scalar_lea.vmem %s697_s20, 32  ;;  %p6755_p12 = scmp.lt.s32.totalorder %s697_s20, %s9389_s30 }
 0x257   : > { %p6751_p10 = scmp.ne.s32.totalorder %s697_s20, %s6750_s12  ;;  %p6756_p8 = scmp.lt.s32.totalorder %s9414_s10, %s6750_s12 }
 0x259   : > { %p6757_p11 = por %p6756_p8, %p6755_p12 }
 0x25b   : > { %p6758_p0 = pnand %p6757_p11, %p6751_p10 }
 0x25d   : > { %6761 = shalt.err (!%p6758_p0)  }
 0x25e   : > { %699 = dma.hbm_to_vmem [thread:$0]  %s693_s28, 32, %s697_s20, [#allocation3], %s9131_s3, %s9131_s3, %s9132_s2 }
 0x25f   : > { %s9155_s17 = smov [#allocation2 + $0x30]   ;;  %s207_s29 = sadd.s32 25, %s9382_s22 }
 0x260   : > { %s708_s21 = sshll.u32 %s9155_s17, 4  ;;  %s9914_s16 = sld [smem:[#allocation5 + %s207_s29]]  ;;  %s9912_s21 = int_to_ptr.vmem [resolvable:$true] %s708_s21 }
 0x261   : > { %s209_s13 = sadd.s32 26, %s9382_s22  ;;  %s700_s5 = sshrl.u32 %s9897_s18, 3 }
 0x262   : > { %s701_s11 = sand.u32 7, %s9897_s18   ;;  %s5681_s15 = sshll.u32 %s700_s5, 4 }
 0x263   : > { %s9156_s14 = smov [#allocation2 + $0x31]   ;;  %s703_s8 = sadd.s32 %s5681_s15, %s701_s11 }
 0x264   : > { %s720_s6 = sshll.u32 %s9156_s14, 4  ;;  %s5682_s23 = sshll.u32 %s703_s8, 4  ;;  %s9919_s6 = int_to_ptr.vmem [resolvable:$true] %s720_s6 }
 0x265   : > { %s9921_s20 = sld [smem:[#allocation5 + %s209_s13]]  ;;  %s705_s26 = scalar_lea.hbm %s12555_s1, %s5682_s23 }
 0x266   : > { %s712_s9 = sshrl.u32 %s9914_s16, 3  ;;  %s6762_s12 = scalar_lea.hbm %s705_s26, 32 }
 0x267   : > { %p6763_p1 = scmp.ne.s32.totalorder %s705_s26, %s6762_s12  ;;  %p6765_p3 = scmp.lt.s32.totalorder %s705_s26, %s12555_s1 }
 0x268   : > { %p6766_p2 = scmp.lt.s32.totalorder %s9405_s7, %s6762_s12 }
 0x26a   : > { %p6767_p4 = por %p6766_p2, %p6765_p3 }
 0x26c   : > { %p6768_p13 = pnand %p6767_p4, %p6763_p1 }
 0x26e   : > { %6771 = shalt.err (!%p6768_p13)  }
 0x26f   : > { %s6772_s18 = scalar_lea.vmem %s9912_s21, 32  ;;  %p6777_p6 = scmp.lt.s32.totalorder %s9912_s21, %s9389_s30 }
 0x270   : > { %p6773_p7 = scmp.ne.s32.totalorder %s9912_s21, %s6772_s18  ;;  %p6778_p9 = scmp.lt.s32.totalorder %s9414_s10, %s6772_s18 }
 0x272   : > { %p6779_p10 = por %p6778_p9, %p6777_p6 }
 0x274   : > { %p6780_p12 = pnand %p6779_p10, %p6773_p7 }
 0x276   : > { %6783 = shalt.err (!%p6780_p12)  }
 0x277   : > { %711 = dma.hbm_to_vmem [thread:$0]  %s705_s26, 32, %s9912_s21, [#allocation3], %s9131_s3, %s9131_s3, %s9132_s2 }
 0x278   : > { %s713_s13 = sand.u32 7, %s9914_s16   ;;  %s5683_s5 = sshll.u32 %s712_s9, 4 }
 0x279   : > { %s715_s11 = sadd.s32 %s5683_s5, %s713_s13  ;;  %s9157_s14 = smov [#allocation2 + $0x32]  }
 0x27a   : > { %s5684_s15 = sshll.u32 %s715_s11, 4  ;;  %s732_s8 = sshll.u32 %s9157_s14, 4  ;;  %s733_s8 = int_to_ptr.vmem [resolvable:$true] %s732_s8 }
 0x27b   : > { %s717_s25 = scalar_lea.hbm %s12555_s1, %s5684_s15  ;;  %s724_s12 = sshrl.u32 %s9921_s20, 3 }
 0x27c   : > { %s6784_s17 = scalar_lea.hbm %s717_s25, 32  ;;  %p6787_p11 = scmp.lt.s32.totalorder %s717_s25, %s12555_s1 }
 0x27d   : > { %p6785_p8 = scmp.ne.s32.totalorder %s717_s25, %s6784_s17  ;;  %p6788_p0 = scmp.lt.s32.totalorder %s9405_s7, %s6784_s17 }
 0x27f   : > { %p6789_p1 = por %p6788_p0, %p6787_p11 }
 0x281   : > { %p6790_p3 = pnand %p6789_p1, %p6785_p8 }
 0x283   : > { %6793 = shalt.err (!%p6790_p3)  }
 0x284   : > { %s6794_s21 = scalar_lea.vmem %s9919_s6, 32  ;;  %p6799_p4 = scmp.lt.s32.totalorder %s9919_s6, %s9389_s30 }
 0x285   : > { %p6795_p2 = scmp.ne.s32.totalorder %s9919_s6, %s6794_s21  ;;  %p6800_p13 = scmp.lt.s32.totalorder %s9414_s10, %s6794_s21 }
 0x287   : > { %p6801_p7 = por %p6800_p13, %p6799_p4 }
 0x289   : > { %p6802_p6 = pnand %p6801_p7, %p6795_p2 }
 0x28b   : > { %6805 = shalt.err (!%p6802_p6)  }
 0x28c   : > { %723 = dma.hbm_to_vmem [thread:$0]  %s717_s25, 32, %s9919_s6, [#allocation3], %s9131_s3, %s9131_s3, %s9132_s2 }
 0x28d   : > { %s725_s16 = sand.u32 7, %s9921_s20   ;;  %s5685_s26 = sshll.u32 %s724_s12, 4 }
 0x28e   : > { %s727_s9 = sadd.s32 %s5685_s26, %s725_s16  ;;  %s211_s5 = sadd.s32 27, %s9382_s22 }
 0x28f   : > { %s5686_s13 = sshll.u32 %s727_s9, 4  ;;  %s9963_s23 = sld [smem:[#allocation5 + %s211_s5]] }
 0x290   : > { %s729_s14 = scalar_lea.hbm %s12555_s1, %s5686_s13 }
 0x291   : > { %s6806_s28 = scalar_lea.hbm %s729_s14, 32  ;;  %p6809_p10 = scmp.lt.s32.totalorder %s729_s14, %s12555_s1 }
 0x292   : > { %p6807_p9 = scmp.ne.s32.totalorder %s729_s14, %s6806_s28  ;;  %p6810_p12 = scmp.lt.s32.totalorder %s9405_s7, %s6806_s28 }
 0x294   : > { %p6811_p8 = por %p6810_p12, %p6809_p10 }
 0x296   : > { %p6812_p11 = pnand %p6811_p8, %p6807_p9 }
 0x298   : > { %6815 = shalt.err (!%p6812_p11)  }
 0x299   : > { %s6816_s6 = scalar_lea.vmem %s733_s8, 32  ;;  %p6821_p1 = scmp.lt.s32.totalorder %s733_s8, %s9389_s30 }
 0x29a   : > { %p6817_p0 = scmp.ne.s32.totalorder %s733_s8, %s6816_s6  ;;  %p6822_p3 = scmp.lt.s32.totalorder %s9414_s10, %s6816_s6 }
 0x29c   : > { %p6823_p2 = por %p6822_p3, %p6821_p1 }
 0x29e   : > { %p6824_p4 = pnand %p6823_p2, %p6817_p0 }
 0x2a0   : > { %6827 = shalt.err (!%p6824_p4)  }
 0x2a1   : > { %735 = dma.hbm_to_vmem [thread:$0]  %s729_s14, 32, %s733_s8, [#allocation3], %s9131_s3, %s9131_s3, %s9132_s2 }
 0x2a2   : > { %s213_s20 = sadd.s32 28, %s9382_s22  ;;  %s9158_s25 = smov [#allocation2 + $0x33]  }
 0x2a3   : > { %s744_s12 = sshll.u32 %s9158_s25, 4  ;;  %s9975_s18 = sld [smem:[#allocation5 + %s213_s20]]  ;;  %s9977_s12 = int_to_ptr.vmem [resolvable:$true] %s744_s12 }
 0x2a4   : > { %s9159_s21 = smov [#allocation2 + $0x34]   ;;  %s215_s26 = sadd.s32 29, %s9382_s22 }
 0x2a5   : > { %s756_s16 = sshll.u32 %s9159_s21, 4  ;;  %s736_s9 = sshrl.u32 %s9963_s23, 3  ;;  %s9982_s16 = int_to_ptr.vmem [resolvable:$true] %s756_s16 }
 0x2a6   : > { %s737_s13 = sand.u32 7, %s9963_s23   ;;  %s5687_s5 = sshll.u32 %s736_s9, 4 }
 0x2a7   : > { %s739_s11 = sadd.s32 %s5687_s5, %s737_s13  ;;  %s9984_s8 = sld [smem:[#allocation5 + %s215_s26]] }
 0x2a8   : > { %s5688_s15 = sshll.u32 %s739_s11, 4 }
 0x2a9   : > { %s748_s14 = sshrl.u32 %s9975_s18, 3  ;;  %s741_s29 = scalar_lea.hbm %s12555_s1, %s5688_s15 }
 0x2aa   : > { %s749_s6 = sand.u32 7, %s9975_s18   ;;  %s6828_s20 = scalar_lea.hbm %s741_s29, 32 }
 0x2ab   : > { %p6829_p13 = scmp.ne.s32.totalorder %s741_s29, %s6828_s20  ;;  %p6831_p7 = scmp.lt.s32.totalorder %s741_s29, %s12555_s1 }
 0x2ac   : > { %p6832_p6 = scmp.lt.s32.totalorder %s9405_s7, %s6828_s20 }
 0x2ae   : > { %p6833_p9 = por %p6832_p6, %p6831_p7 }
 0x2b0   : > { %p6834_p10 = pnand %p6833_p9, %p6829_p13 }
 0x2b2   : > { %6837 = shalt.err (!%p6834_p10)  }
 0x2b3   : > { %s6838_s23 = scalar_lea.vmem %s9977_s12, 32  ;;  %p6843_p8 = scmp.lt.s32.totalorder %s9977_s12, %s9389_s30 }
 0x2b4   : > { %p6839_p12 = scmp.ne.s32.totalorder %s9977_s12, %s6838_s23  ;;  %p6844_p11 = scmp.lt.s32.totalorder %s9414_s10, %s6838_s23 }
 0x2b6   : > { %p6845_p0 = por %p6844_p11, %p6843_p8 }
 0x2b8   : > { %p6846_p1 = pnand %p6845_p0, %p6839_p12 }
 0x2ba   : > { %6849 = shalt.err (!%p6846_p1)  }
 0x2bb   : > { %747 = dma.hbm_to_vmem [thread:$0]  %s741_s29, 32, %s9977_s12, [#allocation3], %s9131_s3, %s9131_s3, %s9132_s2 }
 0x2bc   : > { %s5689_s18 = sshll.u32 %s748_s14, 4  ;;  %s9160_s9 = smov [#allocation2 + $0x35]  }
 0x2bd   : > { %s751_s26 = sadd.s32 %s5689_s18, %s749_s6  ;;  %s768_s13 = sshll.u32 %s9160_s9, 4  ;;  %s769_s13 = int_to_ptr.vmem [resolvable:$true] %s768_s13 }
 0x2be   : > { %s5690_s5 = sshll.u32 %s751_s26, 4  ;;  %s760_s11 = sshrl.u32 %s9984_s8, 3 }
 0x2bf   : > { %s753_s17 = scalar_lea.hbm %s12555_s1, %s5690_s5  ;;  %s761_s20 = sand.u32 7, %s9984_s8  }
 0x2c0   : > { %s6850_s25 = scalar_lea.hbm %s753_s17, 32  ;;  %p6853_p2 = scmp.lt.s32.totalorder %s753_s17, %s12555_s1 }
 0x2c1   : > { %p6851_p3 = scmp.ne.s32.totalorder %s753_s17, %s6850_s25  ;;  %p6854_p4 = scmp.lt.s32.totalorder %s9405_s7, %s6850_s25 }
 0x2c3   : > { %p6855_p13 = por %p6854_p4, %p6853_p2 }
 0x2c5   : > { %p6856_p7 = pnand %p6855_p13, %p6851_p3 }
 0x2c7   : > { %6859 = shalt.err (!%p6856_p7)  }
 0x2c8   : > { %s6860_s12 = scalar_lea.vmem %s9982_s16, 32  ;;  %p6865_p9 = scmp.lt.s32.totalorder %s9982_s16, %s9389_s30 }
 0x2c9   : > { %p6861_p6 = scmp.ne.s32.totalorder %s9982_s16, %s6860_s12  ;;  %p6866_p10 = scmp.lt.s32.totalorder %s9414_s10, %s6860_s12 }
 0x2cb   : > { %p6867_p12 = por %p6866_p10, %p6865_p9 }
 0x2cd   : > { %p6868_p8 = pnand %p6867_p12, %p6861_p6 }
 0x2cf   : > { %6871 = shalt.err (!%p6868_p8)  }
 0x2d0   : > { %759 = dma.hbm_to_vmem [thread:$0]  %s753_s17, 32, %s9982_s16, [#allocation3], %s9131_s3, %s9131_s3, %s9132_s2 }
 0x2d1   : > { %s5691_s8 = sshll.u32 %s760_s11, 4  ;;  %s217_s29 = sadd.s32 30, %s9382_s22 }
 0x2d2   : > { %s763_s14 = sadd.s32 %s5691_s8, %s761_s20  ;;  %s10023_s18 = sld [smem:[#allocation5 + %s217_s29]] }
 0x2d3   : > { %s5692_s6 = sshll.u32 %s763_s14, 4 }
 0x2d4   : > { %s765_s5 = scalar_lea.hbm %s12555_s1, %s5692_s6 }
 0x2d5   : > { %s6872_s15 = scalar_lea.hbm %s765_s5, 32  ;;  %p6875_p0 = scmp.lt.s32.totalorder %s765_s5, %s12555_s1 }
 0x2d6   : > { %p6873_p11 = scmp.ne.s32.totalorder %s765_s5, %s6872_s15  ;;  %p6876_p1 = scmp.lt.s32.totalorder %s9405_s7, %s6872_s15 }
 0x2d8   : > { %p6877_p3 = por %p6876_p1, %p6875_p0 }
 0x2da   : > { %p6878_p2 = pnand %p6877_p3, %p6873_p11 }
 0x2dc   : > { %6881 = shalt.err (!%p6878_p2)  }
 0x2dd   : > { %s6882_s16 = scalar_lea.vmem %s769_s13, 32  ;;  %p6887_p13 = scmp.lt.s32.totalorder %s769_s13, %s9389_s30 }
 0x2de   : > { %p6883_p4 = scmp.ne.s32.totalorder %s769_s13, %s6882_s16  ;;  %p6888_p7 = scmp.lt.s32.totalorder %s9414_s10, %s6882_s16 }
 0x2e0   : > { %p6889_p6 = por %p6888_p7, %p6887_p13 }
 0x2e2   : > { %p6890_p9 = pnand %p6889_p6, %p6883_p4 }
 0x2e4   : > { %6893 = shalt.err (!%p6890_p9)  }
 0x2e5   : > { %771 = dma.hbm_to_vmem [thread:$0]  %s765_s5, 32, %s769_s13, [#allocation3], %s9131_s3, %s9131_s3, %s9132_s2 }
 0x2e6   : > { %s9161_s11 = smov [#allocation2 + $0x36]   ;;  %s219_s20 = sadd.s32 31, %s9382_s22 }
 0x2e7   : > { %s780_s17 = sshll.u32 %s9161_s11, 4  ;;  %s10040_s21 = sld [smem:[#allocation5 + %s219_s20]]  ;;  %s10038_s17 = int_to_ptr.vmem [resolvable:$true] %s780_s17 }
 0x2e8   : > { %s221_s23 = sadd.s32 32, %s9382_s22  ;;  %s772_s12 = sshrl.u32 %s10023_s18, 3 }
 0x2e9   : > { %s773_s8 = sand.u32 7, %s10023_s18   ;;  %s5693_s14 = sshll.u32 %s772_s12, 4 }
 0x2ea   : > { %s9162_s29 = smov [#allocation2 + $0x37]   ;;  %s775_s26 = sadd.s32 %s5693_s14, %s773_s8 }
 0x2eb   : > { %s792_s6 = sshll.u32 %s9162_s29, 4  ;;  %s5694_s9 = sshll.u32 %s775_s26, 4  ;;  %s10045_s6 = int_to_ptr.vmem [resolvable:$true] %s792_s6 }
 0x2ec   : > { %s10047_s13 = sld [smem:[#allocation5 + %s221_s23]]  ;;  %s777_s28 = scalar_lea.hbm %s12555_s1, %s5694_s9 }
 0x2ed   : > { %s784_s25 = sshrl.u32 %s10040_s21, 3  ;;  %s6894_s16 = scalar_lea.hbm %s777_s28, 32 }
 0x2ee   : > { %p6895_p10 = scmp.ne.s32.totalorder %s777_s28, %s6894_s16  ;;  %p6897_p12 = scmp.lt.s32.totalorder %s777_s28, %s12555_s1 }
 0x2ef   : > { %p6898_p8 = scmp.lt.s32.totalorder %s9405_s7, %s6894_s16 }
 0x2f1   : > { %p6899_p11 = por %p6898_p8, %p6897_p12 }
 0x2f3   : > { %p6900_p0 = pnand %p6899_p11, %p6895_p10 }
 0x2f5   : > { %6903 = shalt.err (!%p6900_p0)  }
 0x2f6   : > { %s6904_s18 = scalar_lea.vmem %s10038_s17, 32  ;;  %p6909_p3 = scmp.lt.s32.totalorder %s10038_s17, %s9389_s30 }
 0x2f7   : > { %p6905_p1 = scmp.ne.s32.totalorder %s10038_s17, %s6904_s18  ;;  %p6910_p2 = scmp.lt.s32.totalorder %s9414_s10, %s6904_s18 }
 0x2f9   : > { %p6911_p4 = por %p6910_p2, %p6909_p3 }
 0x2fb   : > { %p6912_p13 = pnand %p6911_p4, %p6905_p1 }
 0x2fd   : > { %6915 = shalt.err (!%p6912_p13)  }
 0x2fe   : > { %783 = dma.hbm_to_vmem [thread:$0]  %s777_s28, 32, %s10038_s17, [#allocation3], %s9131_s3, %s9131_s3, %s9132_s2 }
 0x2ff   : > { %s785_s23 = sand.u32 7, %s10040_s21   ;;  %s5695_s12 = sshll.u32 %s784_s25, 4 }
 0x300   : > { %s787_s8 = sadd.s32 %s5695_s12, %s785_s23  ;;  %s9163_s29 = smov [#allocation2 + $0x40]  }
 0x301   : > { %s5696_s14 = sshll.u32 %s787_s8, 4  ;;  %s804_s26 = sshll.u32 %s9163_s29, 4  ;;  %s805_s26 = int_to_ptr.vmem [resolvable:$true] %s804_s26 }
 0x302   : > { %s789_s15 = scalar_lea.hbm %s12555_s1, %s5696_s14  ;;  %s796_s16 = sshrl.u32 %s10047_s13, 3 }
 0x303   : > { %s6916_s11 = scalar_lea.hbm %s789_s15, 32  ;;  %p6919_p6 = scmp.lt.s32.totalorder %s789_s15, %s12555_s1 }
 0x304   : > { %p6917_p7 = scmp.ne.s32.totalorder %s789_s15, %s6916_s11  ;;  %p6920_p9 = scmp.lt.s32.totalorder %s9405_s7, %s6916_s11 }
 0x306   : > { %p6921_p10 = por %p6920_p9, %p6919_p6 }
 0x308   : > { %p6922_p12 = pnand %p6921_p10, %p6917_p7 }
 0x30a   : > { %6925 = shalt.err (!%p6922_p12)  }
 0x30b   : > { %s6926_s17 = scalar_lea.vmem %s10045_s6, 32  ;;  %p6931_p11 = scmp.lt.s32.totalorder %s10045_s6, %s9389_s30 }
 0x30c   : > { %p6927_p8 = scmp.ne.s32.totalorder %s10045_s6, %s6926_s17  ;;  %p6932_p0 = scmp.lt.s32.totalorder %s9414_s10, %s6926_s17 }
 0x30e   : > { %p6933_p1 = por %p6932_p0, %p6931_p11 }
 0x310   : > { %p6934_p3 = pnand %p6933_p1, %p6927_p8 }
 0x312   : > { %6937 = shalt.err (!%p6934_p3)  }
 0x313   : > { %795 = dma.hbm_to_vmem [thread:$0]  %s789_s15, 32, %s10045_s6, [#allocation3], %s9131_s3, %s9131_s3, %s9132_s2 }
 0x314   : > { %s797_s21 = sand.u32 7, %s10047_s13   ;;  %s5697_s28 = sshll.u32 %s796_s16, 4 }
 0x315   : > { %s799_s25 = sadd.s32 %s5697_s28, %s797_s21  ;;  %s223_s12 = sadd.s32 33, %s9382_s22 }
 0x316   : > { %s5698_s23 = sshll.u32 %s799_s25, 4  ;;  %s10089_s9 = sld [smem:[#allocation5 + %s223_s12]] }
 0x317   : > { %s801_s29 = scalar_lea.hbm %s12555_s1, %s5698_s23 }
 0x318   : > { %s6938_s5 = scalar_lea.hbm %s801_s29, 32  ;;  %p6941_p4 = scmp.lt.s32.totalorder %s801_s29, %s12555_s1 }
 0x319   : > { %p6939_p2 = scmp.ne.s32.totalorder %s801_s29, %s6938_s5  ;;  %p6942_p13 = scmp.lt.s32.totalorder %s9405_s7, %s6938_s5 }
 0x31b   : > { %p6943_p7 = por %p6942_p13, %p6941_p4 }
 0x31d   : > { %p6944_p6 = pnand %p6943_p7, %p6939_p2 }
 0x31f   : > { %6947 = shalt.err (!%p6944_p6)  }
 0x320   : > { %s6948_s6 = scalar_lea.vmem %s805_s26, 32  ;;  %p6953_p10 = scmp.lt.s32.totalorder %s805_s26, %s9389_s30 }
 0x321   : > { %p6949_p9 = scmp.ne.s32.totalorder %s805_s26, %s6948_s6  ;;  %p6954_p12 = scmp.lt.s32.totalorder %s9414_s10, %s6948_s6 }
 0x323   : > { %p6955_p8 = por %p6954_p12, %p6953_p10 }
 0x325   : > { %p6956_p11 = pnand %p6955_p8, %p6949_p9 }
 0x327   : > { %6959 = shalt.err (!%p6956_p11)  }
 0x328   : > { %807 = dma.hbm_to_vmem [thread:$0]  %s801_s29, 32, %s805_s26, [#allocation3], %s9131_s3, %s9131_s3, %s9132_s2 }
 0x329   : > { %s225_s13 = sadd.s32 34, %s9382_s22  ;;  %s9164_s15 = smov [#allocation2 + $0x41]  }
 0x32a   : > { %s816_s16 = sshll.u32 %s9164_s15, 4  ;;  %s10101_s18 = sld [smem:[#allocation5 + %s225_s13]]  ;;  %s10103_s16 = int_to_ptr.vmem [resolvable:$true] %s816_s16 }
 0x32b   : > { %s9165_s17 = smov [#allocation2 + $0x42]   ;;  %s227_s28 = sadd.s32 35, %s9382_s22 }
 0x32c   : > { %s828_s21 = sshll.u32 %s9165_s17, 4  ;;  %s808_s25 = sshrl.u32 %s10089_s9, 3  ;;  %s10108_s21 = int_to_ptr.vmem [resolvable:$true] %s828_s21 }
 0x32d   : > { %s809_s23 = sand.u32 7, %s10089_s9   ;;  %s5699_s12 = sshll.u32 %s808_s25, 4 }
 0x32e   : > { %s811_s8 = sadd.s32 %s5699_s12, %s809_s23  ;;  %s10110_s26 = sld [smem:[#allocation5 + %s227_s28]] }
 0x32f   : > { %s5700_s14 = sshll.u32 %s811_s8, 4 }
 0x330   : > { %s820_s29 = sshrl.u32 %s10101_s18, 3  ;;  %s813_s20 = scalar_lea.hbm %s12555_s1, %s5700_s14 }
 0x331   : > { %s821_s6 = sand.u32 7, %s10101_s18   ;;  %s6960_s13 = scalar_lea.hbm %s813_s20, 32 }
 0x332   : > { %p6961_p0 = scmp.ne.s32.totalorder %s813_s20, %s6960_s13  ;;  %p6963_p1 = scmp.lt.s32.totalorder %s813_s20, %s12555_s1 }
 0x333   : > { %p6964_p3 = scmp.lt.s32.totalorder %s9405_s7, %s6960_s13 }
 0x335   : > { %p6965_p2 = por %p6964_p3, %p6963_p1 }
 0x337   : > { %p6966_p4 = pnand %p6965_p2, %p6961_p0 }
 0x339   : > { %6969 = shalt.err (!%p6966_p4)  }
 0x33a   : > { %s6970_s9 = scalar_lea.vmem %s10103_s16, 32  ;;  %p6975_p7 = scmp.lt.s32.totalorder %s10103_s16, %s9389_s30 }
 0x33b   : > { %p6971_p13 = scmp.ne.s32.totalorder %s10103_s16, %s6970_s9  ;;  %p6976_p6 = scmp.lt.s32.totalorder %s9414_s10, %s6970_s9 }
 0x33d   : > { %p6977_p9 = por %p6976_p6, %p6975_p7 }
 0x33f   : > { %p6978_p10 = pnand %p6977_p9, %p6971_p13 }
 0x341   : > { %6981 = shalt.err (!%p6978_p10)  }
 0x342   : > { %819 = dma.hbm_to_vmem [thread:$0]  %s813_s20, 32, %s10103_s16, [#allocation3], %s9131_s3, %s9131_s3, %s9132_s2 }
 0x343   : > { %s5701_s18 = sshll.u32 %s820_s29, 4  ;;  %s9166_s25 = smov [#allocation2 + $0x43]  }
 0x344   : > { %s823_s28 = sadd.s32 %s5701_s18, %s821_s6  ;;  %s840_s23 = sshll.u32 %s9166_s25, 4  ;;  %s841_s23 = int_to_ptr.vmem [resolvable:$true] %s840_s23 }
 0x345   : > { %s5702_s12 = sshll.u32 %s823_s28, 4  ;;  %s832_s8 = sshrl.u32 %s10110_s26, 3 }
 0x346   : > { %s825_s11 = scalar_lea.hbm %s12555_s1, %s5702_s12  ;;  %s833_s13 = sand.u32 7, %s10110_s26  }
 0x347   : > { %s6982_s15 = scalar_lea.hbm %s825_s11, 32  ;;  %p6985_p8 = scmp.lt.s32.totalorder %s825_s11, %s12555_s1 }
 0x348   : > { %p6983_p12 = scmp.ne.s32.totalorder %s825_s11, %s6982_s15  ;;  %p6986_p11 = scmp.lt.s32.totalorder %s9405_s7, %s6982_s15 }
 0x34a   : > { %p6987_p0 = por %p6986_p11, %p6985_p8 }
 0x34c   : > { %p6988_p1 = pnand %p6987_p0, %p6983_p12 }
 0x34e   : > { %6991 = shalt.err (!%p6988_p1)  }
 0x34f   : > { %s6992_s16 = scalar_lea.vmem %s10108_s21, 32  ;;  %p6997_p2 = scmp.lt.s32.totalorder %s10108_s21, %s9389_s30 }
 0x350   : > { %p6993_p3 = scmp.ne.s32.totalorder %s10108_s21, %s6992_s16  ;;  %p6998_p4 = scmp.lt.s32.totalorder %s9414_s10, %s6992_s16 }
 0x352   : > { %p6999_p13 = por %p6998_p4, %p6997_p2 }
 0x354   : > { %p7000_p7 = pnand %p6999_p13, %p6993_p3 }
 0x356   : > { %7003 = shalt.err (!%p7000_p7)  }
 0x357   : > { %831 = dma.hbm_to_vmem [thread:$0]  %s825_s11, 32, %s10108_s21, [#allocation3], %s9131_s3, %s9131_s3, %s9132_s2 }
 0x358   : > { %s5703_s26 = sshll.u32 %s832_s8, 4  ;;  %s229_s20 = sadd.s32 36, %s9382_s22 }
 0x359   : > { %s835_s29 = sadd.s32 %s5703_s26, %s833_s13  ;;  %s10149_s18 = sld [smem:[#allocation5 + %s229_s20]] }
 0x35a   : > { %s5704_s6 = sshll.u32 %s835_s29, 4 }
 0x35b   : > { %s837_s12 = scalar_lea.hbm %s12555_s1, %s5704_s6 }
 0x35c   : > { %s7004_s14 = scalar_lea.hbm %s837_s12, 32  ;;  %p7007_p9 = scmp.lt.s32.totalorder %s837_s12, %s12555_s1 }
 0x35d   : > { %p7005_p6 = scmp.ne.s32.totalorder %s837_s12, %s7004_s14  ;;  %p7008_p10 = scmp.lt.s32.totalorder %s9405_s7, %s7004_s14 }
 0x35f   : > { %p7009_p12 = por %p7008_p10, %p7007_p9 }
 0x361   : > { %p7010_p8 = pnand %p7009_p12, %p7005_p6 }
 0x363   : > { %7013 = shalt.err (!%p7010_p8)  }
 0x364   : > { %s7014_s21 = scalar_lea.vmem %s841_s23, 32  ;;  %p7019_p0 = scmp.lt.s32.totalorder %s841_s23, %s9389_s30 }
 0x365   : > { %p7015_p11 = scmp.ne.s32.totalorder %s841_s23, %s7014_s21  ;;  %p7020_p1 = scmp.lt.s32.totalorder %s9414_s10, %s7014_s21 }
 0x367   : > { %p7021_p3 = por %p7020_p1, %p7019_p0 }
 0x369   : > { %p7022_p2 = pnand %p7021_p3, %p7015_p11 }
 0x36b   : > { %7025 = shalt.err (!%p7022_p2)  }
 0x36c   : > { %843 = dma.hbm_to_vmem [thread:$0]  %s837_s12, 32, %s841_s23, [#allocation3], %s9131_s3, %s9131_s3, %s9132_s2 }
 0x36d   : > { %s9167_s8 = smov [#allocation2 + $0x44]   ;;  %s231_s13 = sadd.s32 37, %s9382_s22 }
 0x36e   : > { %s852_s11 = sshll.u32 %s9167_s8, 4  ;;  %s10166_s17 = sld [smem:[#allocation5 + %s231_s13]]  ;;  %s10164_s11 = int_to_ptr.vmem [resolvable:$true] %s852_s11 }
 0x36f   : > { %s233_s9 = sadd.s32 38, %s9382_s22  ;;  %s844_s16 = sshrl.u32 %s10149_s18, 3 }
 0x370   : > { %s845_s26 = sand.u32 7, %s10149_s18   ;;  %s5705_s29 = sshll.u32 %s844_s16, 4 }
 0x371   : > { %s9168_s20 = smov [#allocation2 + $0x45]   ;;  %s847_s28 = sadd.s32 %s5705_s29, %s845_s26 }
 0x372   : > { %s864_s6 = sshll.u32 %s9168_s20, 4  ;;  %s5706_s25 = sshll.u32 %s847_s28, 4  ;;  %s10171_s6 = int_to_ptr.vmem [resolvable:$true] %s864_s6 }
 0x373   : > { %s10173_s23 = sld [smem:[#allocation5 + %s233_s9]]  ;;  %s849_s5 = scalar_lea.hbm %s12555_s1, %s5706_s25 }
 0x374   : > { %s856_s15 = sshrl.u32 %s10166_s17, 3  ;;  %s7026_s21 = scalar_lea.hbm %s849_s5, 32 }
 0x375   : > { %p7027_p4 = scmp.ne.s32.totalorder %s849_s5, %s7026_s21  ;;  %p7029_p13 = scmp.lt.s32.totalorder %s849_s5, %s12555_s1 }
 0x376   : > { %p7030_p7 = scmp.lt.s32.totalorder %s9405_s7, %s7026_s21 }
 0x378   : > { %p7031_p6 = por %p7030_p7, %p7029_p13 }
 0x37a   : > { %p7032_p9 = pnand %p7031_p6, %p7027_p4 }
 0x37c   : > { %7035 = shalt.err (!%p7032_p9)  }
 0x37d   : > { %s7036_s18 = scalar_lea.vmem %s10164_s11, 32  ;;  %p7041_p12 = scmp.lt.s32.totalorder %s10164_s11, %s9389_s30 }
 0x37e   : > { %p7037_p10 = scmp.ne.s32.totalorder %s10164_s11, %s7036_s18  ;;  %p7042_p8 = scmp.lt.s32.totalorder %s9414_s10, %s7036_s18 }
 0x380   : > { %p7043_p11 = por %p7042_p8, %p7041_p12 }
 0x382   : > { %p7044_p0 = pnand %p7043_p11, %p7037_p10 }
 0x384   : > { %7047 = shalt.err (!%p7044_p0)  }
 0x385   : > { %855 = dma.hbm_to_vmem [thread:$0]  %s849_s5, 32, %s10164_s11, [#allocation3], %s9131_s3, %s9131_s3, %s9132_s2 }
 0x386   : > { %s857_s9 = sand.u32 7, %s10166_s17   ;;  %s5707_s16 = sshll.u32 %s856_s15, 4 }
 0x387   : > { %s859_s26 = sadd.s32 %s5707_s16, %s857_s9  ;;  %s9169_s20 = smov [#allocation2 + $0x46]  }
 0x388   : > { %s5708_s29 = sshll.u32 %s859_s26, 4  ;;  %s876_s28 = sshll.u32 %s9169_s20, 4  ;;  %s877_s28 = int_to_ptr.vmem [resolvable:$true] %s876_s28 }
 0x389   : > { %s861_s14 = scalar_lea.hbm %s12555_s1, %s5708_s29  ;;  %s868_s21 = sshrl.u32 %s10173_s23, 3 }
 0x38a   : > { %s7048_s8 = scalar_lea.hbm %s861_s14, 32  ;;  %p7051_p3 = scmp.lt.s32.totalorder %s861_s14, %s12555_s1 }
 0x38b   : > { %p7049_p1 = scmp.ne.s32.totalorder %s861_s14, %s7048_s8  ;;  %p7052_p2 = scmp.lt.s32.totalorder %s9405_s7, %s7048_s8 }
 0x38d   : > { %p7053_p4 = por %p7052_p2, %p7051_p3 }
 0x38f   : > { %p7054_p13 = pnand %p7053_p4, %p7049_p1 }
 0x391   : > { %7057 = shalt.err (!%p7054_p13)  }
 0x392   : > { %s7058_s11 = scalar_lea.vmem %s10171_s6, 32  ;;  %p7063_p6 = scmp.lt.s32.totalorder %s10171_s6, %s9389_s30 }
 0x393   : > { %p7059_p7 = scmp.ne.s32.totalorder %s10171_s6, %s7058_s11  ;;  %p7064_p9 = scmp.lt.s32.totalorder %s9414_s10, %s7058_s11 }
 0x395   : > { %p7065_p10 = por %p7064_p9, %p7063_p6 }
 0x397   : > { %p7066_p12 = pnand %p7065_p10, %p7059_p7 }
 0x399   : > { %7069 = shalt.err (!%p7066_p12)  }
 0x39a   : > { %867 = dma.hbm_to_vmem [thread:$0]  %s861_s14, 32, %s10171_s6, [#allocation3], %s9131_s3, %s9131_s3, %s9132_s2 }
 0x39b   : > { %s869_s17 = sand.u32 7, %s10173_s23   ;;  %s5709_s5 = sshll.u32 %s868_s21, 4 }
 0x39c   : > { %s871_s15 = sadd.s32 %s5709_s5, %s869_s17  ;;  %s235_s16 = sadd.s32 39, %s9382_s22 }
 0x39d   : > { %s5710_s9 = sshll.u32 %s871_s15, 4  ;;  %s10215_s25 = sld [smem:[#allocation5 + %s235_s16]] }
 0x39e   : > { %s873_s20 = scalar_lea.hbm %s12555_s1, %s5710_s9 }
 0x39f   : > { %s7070_s12 = scalar_lea.hbm %s873_s20, 32  ;;  %p7073_p11 = scmp.lt.s32.totalorder %s873_s20, %s12555_s1 }
 0x3a0   : > { %p7071_p8 = scmp.ne.s32.totalorder %s873_s20, %s7070_s12  ;;  %p7074_p0 = scmp.lt.s32.totalorder %s9405_s7, %s7070_s12 }
 0x3a2   : > { %p7075_p1 = por %p7074_p0, %p7073_p11 }
 0x3a4   : > { %p7076_p3 = pnand %p7075_p1, %p7071_p8 }
 0x3a6   : > { %7079 = shalt.err (!%p7076_p3)  }
 0x3a7   : > { %s7080_s6 = scalar_lea.vmem %s877_s28, 32  ;;  %p7085_p4 = scmp.lt.s32.totalorder %s877_s28, %s9389_s30 }
 0x3a8   : > { %p7081_p2 = scmp.ne.s32.totalorder %s877_s28, %s7080_s6  ;;  %p7086_p13 = scmp.lt.s32.totalorder %s9414_s10, %s7080_s6 }
 0x3aa   : > { %p7087_p7 = por %p7086_p13, %p7085_p4 }
 0x3ac   : > { %p7088_p6 = pnand %p7087_p7, %p7081_p2 }
 0x3ae   : > { %7091 = shalt.err (!%p7088_p6)  }
 0x3af   : > { %879 = dma.hbm_to_vmem [thread:$0]  %s873_s20, 32, %s877_s28, [#allocation3], %s9131_s3, %s9131_s3, %s9132_s2 }
 0x3b0   : > { %s237_s23 = sadd.s32 40, %s9382_s22  ;;  %s9170_s14 = smov [#allocation2 + $0x47]  }
 0x3b1   : > { %s888_s21 = sshll.u32 %s9170_s14, 4  ;;  %s10227_s18 = sld [smem:[#allocation5 + %s237_s23]]  ;;  %s10229_s21 = int_to_ptr.vmem [resolvable:$true] %s888_s21 }
 0x3b2   : > { %s9171_s11 = smov [#allocation2 + $0x50]   ;;  %s239_s5 = sadd.s32 41, %s9382_s22 }
 0x3b3   : > { %s900_s17 = sshll.u32 %s9171_s11, 4  ;;  %s880_s15 = sshrl.u32 %s10215_s25, 3  ;;  %s10234_s17 = int_to_ptr.vmem [resolvable:$true] %s900_s17 }
 0x3b4   : > { %s881_s9 = sand.u32 7, %s10215_s25   ;;  %s5711_s16 = sshll.u32 %s880_s15, 4 }
 0x3b5   : > { %s883_s26 = sadd.s32 %s5711_s16, %s881_s9  ;;  %s10236_s28 = sld [smem:[#allocation5 + %s239_s5]] }
 0x3b6   : > { %s5712_s29 = sshll.u32 %s883_s26, 4 }
 0x3b7   : > { %s892_s20 = sshrl.u32 %s10227_s18, 3  ;;  %s885_s13 = scalar_lea.hbm %s12555_s1, %s5712_s29 }
 0x3b8   : > { %s893_s6 = sand.u32 7, %s10227_s18   ;;  %s7092_s23 = scalar_lea.hbm %s885_s13, 32 }
 0x3b9   : > { %p7093_p9 = scmp.ne.s32.totalorder %s885_s13, %s7092_s23  ;;  %p7095_p10 = scmp.lt.s32.totalorder %s885_s13, %s12555_s1 }
 0x3ba   : > { %p7096_p12 = scmp.lt.s32.totalorder %s9405_s7, %s7092_s23 }
 0x3bc   : > { %p7097_p8 = por %p7096_p12, %p7095_p10 }
 0x3be   : > { %p7098_p11 = pnand %p7097_p8, %p7093_p9 }
 0x3c0   : > { %7101 = shalt.err (!%p7098_p11)  }
 0x3c1   : > { %s7102_s25 = scalar_lea.vmem %s10229_s21, 32  ;;  %p7107_p1 = scmp.lt.s32.totalorder %s10229_s21, %s9389_s30 }
 0x3c2   : > { %p7103_p0 = scmp.ne.s32.totalorder %s10229_s21, %s7102_s25  ;;  %p7108_p3 = scmp.lt.s32.totalorder %s9414_s10, %s7102_s25 }
 0x3c4   : > { %p7109_p2 = por %p7108_p3, %p7107_p1 }
 0x3c6   : > { %p7110_p4 = pnand %p7109_p2, %p7103_p0 }
 0x3c8   : > { %7113 = shalt.err (!%p7110_p4)  }
 0x3c9   : > { %891 = dma.hbm_to_vmem [thread:$0]  %s885_s13, 32, %s10229_s21, [#allocation3], %s9131_s3, %s9131_s3, %s9132_s2 }
 0x3ca   : > { %s5713_s18 = sshll.u32 %s892_s20, 4  ;;  %s9172_s15 = smov [#allocation2 + $0x51]  }
 0x3cb   : > { %s895_s5 = sadd.s32 %s5713_s18, %s893_s6  ;;  %s912_s9 = sshll.u32 %s9172_s15, 4  ;;  %s913_s9 = int_to_ptr.vmem [resolvable:$true] %s912_s9 }
 0x3cc   : > { %s5714_s16 = sshll.u32 %s895_s5, 4  ;;  %s904_s26 = sshrl.u32 %s10236_s28, 3 }
 0x3cd   : > { %s897_s8 = scalar_lea.hbm %s12555_s1, %s5714_s16  ;;  %s905_s23 = sand.u32 7, %s10236_s28  }
 0x3ce   : > { %s7114_s14 = scalar_lea.hbm %s897_s8, 32  ;;  %p7117_p7 = scmp.lt.s32.totalorder %s897_s8, %s12555_s1 }
 0x3cf   : > { %p7115_p13 = scmp.ne.s32.totalorder %s897_s8, %s7114_s14  ;;  %p7118_p6 = scmp.lt.s32.totalorder %s9405_s7, %s7114_s14 }
 0x3d1   : > { %p7119_p9 = por %p7118_p6, %p7117_p7 }
 0x3d3   : > { %p7120_p10 = pnand %p7119_p9, %p7115_p13 }
 0x3d5   : > { %7123 = shalt.err (!%p7120_p10)  }
 0x3d6   : > { %s7124_s21 = scalar_lea.vmem %s10234_s17, 32  ;;  %p7129_p8 = scmp.lt.s32.totalorder %s10234_s17, %s9389_s30 }
 0x3d7   : > { %p7125_p12 = scmp.ne.s32.totalorder %s10234_s17, %s7124_s21  ;;  %p7130_p11 = scmp.lt.s32.totalorder %s9414_s10, %s7124_s21 }
 0x3d9   : > { %p7131_p0 = por %p7130_p11, %p7129_p8 }
 0x3db   : > { %p7132_p1 = pnand %p7131_p0, %p7125_p12 }
 0x3dd   : > { %7135 = shalt.err (!%p7132_p1)  }
 0x3de   : > { %903 = dma.hbm_to_vmem [thread:$0]  %s897_s8, 32, %s10234_s17, [#allocation3], %s9131_s3, %s9131_s3, %s9132_s2 }
 0x3df   : > { %s5715_s28 = sshll.u32 %s904_s26, 4  ;;  %s241_s13 = sadd.s32 42, %s9382_s22 }
 0x3e0   : > { %s907_s20 = sadd.s32 %s5715_s28, %s905_s23  ;;  %s10275_s18 = sld [smem:[#allocation5 + %s241_s13]] }
 0x3e1   : > { %s5716_s6 = sshll.u32 %s907_s20, 4 }
 0x3e2   : > { %s909_s16 = scalar_lea.hbm %s12555_s1, %s5716_s6 }
 0x3e3   : > { %s7136_s29 = scalar_lea.hbm %s909_s16, 32  ;;  %p7139_p2 = scmp.lt.s32.totalorder %s909_s16, %s12555_s1 }
 0x3e4   : > { %p7137_p3 = scmp.ne.s32.totalorder %s909_s16, %s7136_s29  ;;  %p7140_p4 = scmp.lt.s32.totalorder %s9405_s7, %s7136_s29 }
 0x3e6   : > { %p7141_p13 = por %p7140_p4, %p7139_p2 }
 0x3e8   : > { %p7142_p7 = pnand %p7141_p13, %p7137_p3 }
 0x3ea   : > { %7145 = shalt.err (!%p7142_p7)  }
 0x3eb   : > { %s7146_s17 = scalar_lea.vmem %s913_s9, 32  ;;  %p7151_p9 = scmp.lt.s32.totalorder %s913_s9, %s9389_s30 }
 0x3ec   : > { %p7147_p6 = scmp.ne.s32.totalorder %s913_s9, %s7146_s17  ;;  %p7152_p10 = scmp.lt.s32.totalorder %s9414_s10, %s7146_s17 }
 0x3ee   : > { %p7153_p12 = por %p7152_p10, %p7151_p9 }
 0x3f0   : > { %p7154_p8 = pnand %p7153_p12, %p7147_p6 }
 0x3f2   : > { %7157 = shalt.err (!%p7154_p8)  }
 0x3f3   : > { %915 = dma.hbm_to_vmem [thread:$0]  %s909_s16, 32, %s913_s9, [#allocation3], %s9131_s3, %s9131_s3, %s9132_s2 }
 0x3f4   : > { %s9173_s26 = smov [#allocation2 + $0x52]   ;;  %s243_s23 = sadd.s32 43, %s9382_s22 }
 0x3f5   : > { %s924_s8 = sshll.u32 %s9173_s26, 4  ;;  %s10292_s11 = sld [smem:[#allocation5 + %s243_s23]]  ;;  %s10290_s8 = int_to_ptr.vmem [resolvable:$true] %s924_s8 }
 0x3f6   : > { %s245_s25 = sadd.s32 44, %s9382_s22  ;;  %s916_s21 = sshrl.u32 %s10275_s18, 3 }
 0x3f7   : > { %s917_s28 = sand.u32 7, %s10275_s18   ;;  %s5717_s20 = sshll.u32 %s916_s21, 4 }
 0x3f8   : > { %s9174_s13 = smov [#allocation2 + $0x53]   ;;  %s919_s5 = sadd.s32 %s5717_s20, %s917_s28 }
 0x3f9   : > { %s936_s6 = sshll.u32 %s9174_s13, 4  ;;  %s5718_s15 = sshll.u32 %s919_s5, 4  ;;  %s10297_s6 = int_to_ptr.vmem [resolvable:$true] %s936_s6 }
 0x3fa   : > { %s10299_s9 = sld [smem:[#allocation5 + %s245_s25]]  ;;  %s921_s12 = scalar_lea.hbm %s12555_s1, %s5718_s15 }
 0x3fb   : > { %s928_s14 = sshrl.u32 %s10292_s11, 3  ;;  %s7158_s17 = scalar_lea.hbm %s921_s12, 32 }
 0x3fc   : > { %p7159_p11 = scmp.ne.s32.totalorder %s921_s12, %s7158_s17  ;;  %p7161_p0 = scmp.lt.s32.totalorder %s921_s12, %s12555_s1 }
 0x3fd   : > { %p7162_p1 = scmp.lt.s32.totalorder %s9405_s7, %s7158_s17 }
 0x3ff   : > { %p7163_p3 = por %p7162_p1, %p7161_p0 }
 0x401   : > { %p7164_p2 = pnand %p7163_p3, %p7159_p11 }
 0x403   : > { %7167 = shalt.err (!%p7164_p2)  }
 0x404   : > { %s7168_s18 = scalar_lea.vmem %s10290_s8, 32  ;;  %p7173_p13 = scmp.lt.s32.totalorder %s10290_s8, %s9389_s30 }
 0x405   : > { %p7169_p4 = scmp.ne.s32.totalorder %s10290_s8, %s7168_s18  ;;  %p7174_p7 = scmp.lt.s32.totalorder %s9414_s10, %s7168_s18 }
 0x407   : > { %p7175_p6 = por %p7174_p7, %p7173_p13 }
 0x409   : > { %p7176_p9 = pnand %p7175_p6, %p7169_p4 }
 0x40b   : > { %7179 = shalt.err (!%p7176_p9)  }
 0x40c   : > { %927 = dma.hbm_to_vmem [thread:$0]  %s921_s12, 32, %s10290_s8, [#allocation3], %s9131_s3, %s9131_s3, %s9132_s2 }
 0x40d   : > { %s929_s25 = sand.u32 7, %s10292_s11   ;;  %s5719_s21 = sshll.u32 %s928_s14, 4 }
 0x40e   : > { %s931_s28 = sadd.s32 %s5719_s21, %s929_s25  ;;  %s9175_s13 = smov [#allocation2 + $0x54]  }
 0x40f   : > { %s5720_s20 = sshll.u32 %s931_s28, 4  ;;  %s948_s5 = sshll.u32 %s9175_s13, 4  ;;  %s949_s5 = int_to_ptr.vmem [resolvable:$true] %s948_s5 }
 0x410   : > { %s933_s29 = scalar_lea.hbm %s12555_s1, %s5720_s20  ;;  %s940_s17 = sshrl.u32 %s10299_s9, 3 }
 0x411   : > { %s7180_s26 = scalar_lea.hbm %s933_s29, 32  ;;  %p7183_p12 = scmp.lt.s32.totalorder %s933_s29, %s12555_s1 }
 0x412   : > { %p7181_p10 = scmp.ne.s32.totalorder %s933_s29, %s7180_s26  ;;  %p7184_p8 = scmp.lt.s32.totalorder %s9405_s7, %s7180_s26 }
 0x414   : > { %p7185_p11 = por %p7184_p8, %p7183_p12 }
 0x416   : > { %p7186_p0 = pnand %p7185_p11, %p7181_p10 }
 0x418   : > { %7189 = shalt.err (!%p7186_p0)  }
 0x419   : > { %s7190_s8 = scalar_lea.vmem %s10297_s6, 32  ;;  %p7195_p3 = scmp.lt.s32.totalorder %s10297_s6, %s9389_s30 }
 0x41a   : > { %p7191_p1 = scmp.ne.s32.totalorder %s10297_s6, %s7190_s8  ;;  %p7196_p2 = scmp.lt.s32.totalorder %s9414_s10, %s7190_s8 }
 0x41c   : > { %p7197_p4 = por %p7196_p2, %p7195_p3 }
 0x41e   : > { %p7198_p13 = pnand %p7197_p4, %p7191_p1 }
 0x420   : > { %7201 = shalt.err (!%p7198_p13)  }
 0x421   : > { %939 = dma.hbm_to_vmem [thread:$0]  %s933_s29, 32, %s10297_s6, [#allocation3], %s9131_s3, %s9131_s3, %s9132_s2 }
 0x422   : > { %s941_s11 = sand.u32 7, %s10299_s9   ;;  %s5721_s12 = sshll.u32 %s940_s17, 4 }
 0x423   : > { %s943_s14 = sadd.s32 %s5721_s12, %s941_s11  ;;  %s247_s21 = sadd.s32 45, %s9382_s22 }
 0x424   : > { %s5722_s25 = sshll.u32 %s943_s14, 4  ;;  %s10341_s15 = sld [smem:[#allocation5 + %s247_s21]] }
 0x425   : > { %s945_s13 = scalar_lea.hbm %s12555_s1, %s5722_s25 }
 0x426   : > { %s7202_s16 = scalar_lea.hbm %s945_s13, 32  ;;  %p7205_p6 = scmp.lt.s32.totalorder %s945_s13, %s12555_s1 }
 0x427   : > { %p7203_p7 = scmp.ne.s32.totalorder %s945_s13, %s7202_s16  ;;  %p7206_p9 = scmp.lt.s32.totalorder %s9405_s7, %s7202_s16 }
 0x429   : > { %p7207_p10 = por %p7206_p9, %p7205_p6 }
 0x42b   : > { %p7208_p12 = pnand %p7207_p10, %p7203_p7 }
 0x42d   : > { %7211 = shalt.err (!%p7208_p12)  }
 0x42e   : > { %s7212_s6 = scalar_lea.vmem %s949_s5, 32  ;;  %p7217_p11 = scmp.lt.s32.totalorder %s949_s5, %s9389_s30 }
 0x42f   : > { %p7213_p8 = scmp.ne.s32.totalorder %s949_s5, %s7212_s6  ;;  %p7218_p0 = scmp.lt.s32.totalorder %s9414_s10, %s7212_s6 }
 0x431   : > { %p7219_p1 = por %p7218_p0, %p7217_p11 }
 0x433   : > { %p7220_p3 = pnand %p7219_p1, %p7213_p8 }
 0x435   : > { %7223 = shalt.err (!%p7220_p3)  }
 0x436   : > { %951 = dma.hbm_to_vmem [thread:$0]  %s945_s13, 32, %s949_s5, [#allocation3], %s9131_s3, %s9131_s3, %s9132_s2 }
 0x437   : > { %s249_s9 = sadd.s32 46, %s9382_s22  ;;  %s9176_s29 = smov [#allocation2 + $0x55]  }
 0x438   : > { %s960_s17 = sshll.u32 %s9176_s29, 4  ;;  %s10353_s18 = sld [smem:[#allocation5 + %s249_s9]]  ;;  %s10355_s17 = int_to_ptr.vmem [resolvable:$true] %s960_s17 }
 0x439   : > { %s9177_s8 = smov [#allocation2 + $0x56]   ;;  %s251_s12 = sadd.s32 47, %s9382_s22 }
 0x43a   : > { %s972_s11 = sshll.u32 %s9177_s8, 4  ;;  %s952_s14 = sshrl.u32 %s10341_s15, 3  ;;  %s10360_s11 = int_to_ptr.vmem [resolvable:$true] %s972_s11 }
 0x43b   : > { %s953_s25 = sand.u32 7, %s10341_s15   ;;  %s5723_s21 = sshll.u32 %s952_s14, 4 }
 0x43c   : > { %s955_s28 = sadd.s32 %s5723_s21, %s953_s25  ;;  %s10362_s5 = sld [smem:[#allocation5 + %s251_s12]] }
 0x43d   : > { %s5724_s20 = sshll.u32 %s955_s28, 4 }
 0x43e   : > { %s964_s13 = sshrl.u32 %s10353_s18, 3  ;;  %s957_s23 = scalar_lea.hbm %s12555_s1, %s5724_s20 }
 0x43f   : > { %s965_s6 = sand.u32 7, %s10353_s18   ;;  %s7224_s9 = scalar_lea.hbm %s957_s23, 32 }
 0x440   : > { %p7225_p2 = scmp.ne.s32.totalorder %s957_s23, %s7224_s9  ;;  %p7227_p4 = scmp.lt.s32.totalorder %s957_s23, %s12555_s1 }
 0x441   : > { %p7228_p13 = scmp.lt.s32.totalorder %s9405_s7, %s7224_s9 }
 0x443   : > { %p7229_p7 = por %p7228_p13, %p7227_p4 }
 0x445   : > { %p7230_p6 = pnand %p7229_p7, %p7225_p2 }
 0x447   : > { %7233 = shalt.err (!%p7230_p6)  }
 0x448   : > { %s7234_s15 = scalar_lea.vmem %s10355_s17, 32  ;;  %p7239_p10 = scmp.lt.s32.totalorder %s10355_s17, %s9389_s30 }
 0x449   : > { %p7235_p9 = scmp.ne.s32.totalorder %s10355_s17, %s7234_s15  ;;  %p7240_p12 = scmp.lt.s32.totalorder %s9414_s10, %s7234_s15 }
 0x44b   : > { %p7241_p8 = por %p7240_p12, %p7239_p10 }
 0x44d   : > { %p7242_p11 = pnand %p7241_p8, %p7235_p9 }
 0x44f   : > { %7245 = shalt.err (!%p7242_p11)  }
 0x450   : > { %963 = dma.hbm_to_vmem [thread:$0]  %s957_s23, 32, %s10355_s17, [#allocation3], %s9131_s3, %s9131_s3, %s9132_s2 }
 0x451   : > { %s5725_s18 = sshll.u32 %s964_s13, 4  ;;  %s9178_s14 = smov [#allocation2 + $0x57]  }
 0x452   : > { %s967_s12 = sadd.s32 %s5725_s18, %s965_s6  ;;  %s984_s25 = sshll.u32 %s9178_s14, 4  ;;  %s985_s25 = int_to_ptr.vmem [resolvable:$true] %s984_s25 }
 0x453   : > { %s5726_s21 = sshll.u32 %s967_s12, 4  ;;  %s976_s28 = sshrl.u32 %s10362_s5, 3 }
 0x454   : > { %s969_s26 = scalar_lea.hbm %s12555_s1, %s5726_s21  ;;  %s977_s9 = sand.u32 7, %s10362_s5  }
 0x455   : > { %s7246_s29 = scalar_lea.hbm %s969_s26, 32  ;;  %p7249_p1 = scmp.lt.s32.totalorder %s969_s26, %s12555_s1 }
 0x456   : > { %p7247_p0 = scmp.ne.s32.totalorder %s969_s26, %s7246_s29  ;;  %p7250_p3 = scmp.lt.s32.totalorder %s9405_s7, %s7246_s29 }
 0x458   : > { %p7251_p2 = por %p7250_p3, %p7249_p1 }
 0x45a   : > { %p7252_p4 = pnand %p7251_p2, %p7247_p0 }
 0x45c   : > { %7255 = shalt.err (!%p7252_p4)  }
 0x45d   : > { %s7256_s17 = scalar_lea.vmem %s10360_s11, 32  ;;  %p7261_p7 = scmp.lt.s32.totalorder %s10360_s11, %s9389_s30 }
 0x45e   : > { %p7257_p13 = scmp.ne.s32.totalorder %s10360_s11, %s7256_s17  ;;  %p7262_p6 = scmp.lt.s32.totalorder %s9414_s10, %s7256_s17 }
 0x460   : > { %p7263_p9 = por %p7262_p6, %p7261_p7 }
 0x462   : > { %p7264_p10 = pnand %p7263_p9, %p7257_p13 }
 0x464   : > { %7267 = shalt.err (!%p7264_p10)  }
 0x465   : > { %975 = dma.hbm_to_vmem [thread:$0]  %s969_s26, 32, %s10360_s11, [#allocation3], %s9131_s3, %s9131_s3, %s9132_s2 }
 0x466   : > { %s5727_s5 = sshll.u32 %s976_s28, 4  ;;  %s253_s23 = sadd.s32 48, %s9382_s22 }
 0x467   : > { %s979_s13 = sadd.s32 %s5727_s5, %s977_s9  ;;  %s10401_s18 = sld [smem:[#allocation5 + %s253_s23]] }
 0x468   : > { %s5728_s6 = sshll.u32 %s979_s13, 4 }
 0x469   : > { %s981_s21 = scalar_lea.hbm %s12555_s1, %s5728_s6 }
 0x46a   : > { %s7268_s20 = scalar_lea.hbm %s981_s21, 32  ;;  %p7271_p8 = scmp.lt.s32.totalorder %s981_s21, %s12555_s1 }
 0x46b   : > { %p7269_p12 = scmp.ne.s32.totalorder %s981_s21, %s7268_s20  ;;  %p7272_p11 = scmp.lt.s32.totalorder %s9405_s7, %s7268_s20 }
 0x46d   : > { %p7273_p0 = por %p7272_p11, %p7271_p8 }
 0x46f   : > { %p7274_p1 = pnand %p7273_p0, %p7269_p12 }
 0x471   : > { %7277 = shalt.err (!%p7274_p1)  }
 0x472   : > { %s7278_s11 = scalar_lea.vmem %s985_s25, 32  ;;  %p7283_p2 = scmp.lt.s32.totalorder %s985_s25, %s9389_s30 }
 0x473   : > { %p7279_p3 = scmp.ne.s32.totalorder %s985_s25, %s7278_s11  ;;  %p7284_p4 = scmp.lt.s32.totalorder %s9414_s10, %s7278_s11 }
 0x475   : > { %p7285_p13 = por %p7284_p4, %p7283_p2 }
 0x477   : > { %p7286_p7 = pnand %p7285_p13, %p7279_p3 }
 0x479   : > { %7289 = shalt.err (!%p7286_p7)  }
 0x47a   : > { %987 = dma.hbm_to_vmem [thread:$0]  %s981_s21, 32, %s985_s25, [#allocation3], %s9131_s3, %s9131_s3, %s9132_s2 }
 0x47b   : > { %s9179_s28 = smov [#allocation2 + $0x60]   ;;  %s255_s9 = sadd.s32 49, %s9382_s22 }
 0x47c   : > { %s996_s26 = sshll.u32 %s9179_s28, 4  ;;  %s10418_s8 = sld [smem:[#allocation5 + %s255_s9]]  ;;  %s10416_s26 = int_to_ptr.vmem [resolvable:$true] %s996_s26 }
 0x47d   : > { %s257_s15 = sadd.s32 50, %s9382_s22  ;;  %s988_s17 = sshrl.u32 %s10401_s18, 3 }
 0x47e   : > { %s989_s5 = sand.u32 7, %s10401_s18   ;;  %s5729_s13 = sshll.u32 %s988_s17, 4 }
 0x47f   : > { %s9180_s23 = smov [#allocation2 + $0x61]   ;;  %s991_s12 = sadd.s32 %s5729_s13, %s989_s5 }
 0x480   : > { %s1008_s6 = sshll.u32 %s9180_s23, 4  ;;  %s5730_s14 = sshll.u32 %s991_s12, 4  ;;  %s10423_s6 = int_to_ptr.vmem [resolvable:$true] %s1008_s6 }
 0x481   : > { %s10425_s25 = sld [smem:[#allocation5 + %s257_s15]]  ;;  %s993_s16 = scalar_lea.hbm %s12555_s1, %s5730_s14 }
 0x482   : > { %s1000_s29 = sshrl.u32 %s10418_s8, 3  ;;  %s7290_s11 = scalar_lea.hbm %s993_s16, 32 }
 0x483   : > { %p7291_p6 = scmp.ne.s32.totalorder %s993_s16, %s7290_s11  ;;  %p7293_p9 = scmp.lt.s32.totalorder %s993_s16, %s12555_s1 }
 0x484   : > { %p7294_p10 = scmp.lt.s32.totalorder %s9405_s7, %s7290_s11 }
 0x486   : > { %p7295_p12 = por %p7294_p10, %p7293_p9 }
 0x488   : > { %p7296_p8 = pnand %p7295_p12, %p7291_p6 }
 0x48a   : > { %7299 = shalt.err (!%p7296_p8)  }
 0x48b   : > { %s7300_s18 = scalar_lea.vmem %s10416_s26, 32  ;;  %p7305_p0 = scmp.lt.s32.totalorder %s10416_s26, %s9389_s30 }
 0x48c   : > { %p7301_p11 = scmp.ne.s32.totalorder %s10416_s26, %s7300_s18  ;;  %p7306_p1 = scmp.lt.s32.totalorder %s9414_s10, %s7300_s18 }
 0x48e   : > { %p7307_p3 = por %p7306_p1, %p7305_p0 }
 0x490   : > { %p7308_p2 = pnand %p7307_p3, %p7301_p11 }
 0x492   : > { %7311 = shalt.err (!%p7308_p2)  }
 0x493   : > { %999 = dma.hbm_to_vmem [thread:$0]  %s993_s16, 32, %s10416_s26, [#allocation3], %s9131_s3, %s9131_s3, %s9132_s2 }
 0x494   : > { %s1001_s15 = sand.u32 7, %s10418_s8   ;;  %s5731_s17 = sshll.u32 %s1000_s29, 4 }
 0x495   : > { %s1003_s5 = sadd.s32 %s5731_s17, %s1001_s15  ;;  %s9181_s23 = smov [#allocation2 + $0x62]  }
 0x496   : > { %s5732_s13 = sshll.u32 %s1003_s5, 4  ;;  %s1020_s12 = sshll.u32 %s9181_s23, 4  ;;  %s1021_s12 = int_to_ptr.vmem [resolvable:$true] %s1020_s12 }
 0x497   : > { %s1005_s20 = scalar_lea.hbm %s12555_s1, %s5732_s13  ;;  %s1012_s11 = sshrl.u32 %s10425_s25, 3 }
 0x498   : > { %s7312_s28 = scalar_lea.hbm %s1005_s20, 32  ;;  %p7315_p13 = scmp.lt.s32.totalorder %s1005_s20, %s12555_s1 }
 0x499   : > { %p7313_p4 = scmp.ne.s32.totalorder %s1005_s20, %s7312_s28  ;;  %p7316_p7 = scmp.lt.s32.totalorder %s9405_s7, %s7312_s28 }
 0x49b   : > { %p7317_p6 = por %p7316_p7, %p7315_p13 }
 0x49d   : > { %p7318_p9 = pnand %p7317_p6, %p7313_p4 }
 0x49f   : > { %7321 = shalt.err (!%p7318_p9)  }
 0x4a0   : > { %s7322_s26 = scalar_lea.vmem %s10423_s6, 32  ;;  %p7327_p12 = scmp.lt.s32.totalorder %s10423_s6, %s9389_s30 }
 0x4a1   : > { %p7323_p10 = scmp.ne.s32.totalorder %s10423_s6, %s7322_s26  ;;  %p7328_p8 = scmp.lt.s32.totalorder %s9414_s10, %s7322_s26 }
 0x4a3   : > { %p7329_p11 = por %p7328_p8, %p7327_p12 }
 0x4a5   : > { %p7330_p0 = pnand %p7329_p11, %p7323_p10 }
 0x4a7   : > { %7333 = shalt.err (!%p7330_p0)  }
 0x4a8   : > { %1011 = dma.hbm_to_vmem [thread:$0]  %s1005_s20, 32, %s10423_s6, [#allocation3], %s9131_s3, %s9131_s3, %s9132_s2 }
 0x4a9   : > { %s1013_s8 = sand.u32 7, %s10425_s25   ;;  %s5733_s16 = sshll.u32 %s1012_s11, 4 }
 0x4aa   : > { %s1015_s29 = sadd.s32 %s5733_s16, %s1013_s8  ;;  %s259_s17 = sadd.s32 51, %s9382_s22 }
 0x4ab   : > { %s5734_s15 = sshll.u32 %s1015_s29, 4  ;;  %s10467_s14 = sld [smem:[#allocation5 + %s259_s17]] }
 0x4ac   : > { %s1017_s23 = scalar_lea.hbm %s12555_s1, %s5734_s15 }
 0x4ad   : > { %s7334_s21 = scalar_lea.hbm %s1017_s23, 32  ;;  %p7337_p3 = scmp.lt.s32.totalorder %s1017_s23, %s12555_s1 }
 0x4ae   : > { %p7335_p1 = scmp.ne.s32.totalorder %s1017_s23, %s7334_s21  ;;  %p7338_p2 = scmp.lt.s32.totalorder %s9405_s7, %s7334_s21 }
 0x4b0   : > { %p7339_p4 = por %p7338_p2, %p7337_p3 }
 0x4b2   : > { %p7340_p13 = pnand %p7339_p4, %p7335_p1 }
 0x4b4   : > { %7343 = shalt.err (!%p7340_p13)  }
 0x4b5   : > { %s7344_s6 = scalar_lea.vmem %s1021_s12, 32  ;;  %p7349_p6 = scmp.lt.s32.totalorder %s1021_s12, %s9389_s30 }
 0x4b6   : > { %p7345_p7 = scmp.ne.s32.totalorder %s1021_s12, %s7344_s6  ;;  %p7350_p9 = scmp.lt.s32.totalorder %s9414_s10, %s7344_s6 }
 0x4b8   : > { %p7351_p10 = por %p7350_p9, %p7349_p6 }
 0x4ba   : > { %p7352_p12 = pnand %p7351_p10, %p7345_p7 }
 0x4bc   : > { %7355 = shalt.err (!%p7352_p12)  }
 0x4bd   : > { %1023 = dma.hbm_to_vmem [thread:$0]  %s1017_s23, 32, %s1021_s12, [#allocation3], %s9131_s3, %s9131_s3, %s9132_s2 }
 0x4be   : > { %s261_s25 = sadd.s32 52, %s9382_s22  ;;  %s9182_s20 = smov [#allocation2 + $0x63]  }
 0x4bf   : > { %s1032_s11 = sshll.u32 %s9182_s20, 4  ;;  %s10479_s18 = sld [smem:[#allocation5 + %s261_s25]]  ;;  %s10481_s11 = int_to_ptr.vmem [resolvable:$true] %s1032_s11 }
 0x4c0   : > { %s9183_s26 = smov [#allocation2 + $0x64]   ;;  %s263_s16 = sadd.s32 53, %s9382_s22 }
 0x4c1   : > { %s1044_s8 = sshll.u32 %s9183_s26, 4  ;;  %s1024_s29 = sshrl.u32 %s10467_s14, 3  ;;  %s10486_s8 = int_to_ptr.vmem [resolvable:$true] %s1044_s8 }
 0x4c2   : > { %s1025_s15 = sand.u32 7, %s10467_s14   ;;  %s5735_s17 = sshll.u32 %s1024_s29, 4 }
 0x4c3   : > { %s1027_s5 = sadd.s32 %s5735_s17, %s1025_s15  ;;  %s10488_s12 = sld [smem:[#allocation5 + %s263_s16]] }
 0x4c4   : > { %s5736_s13 = sshll.u32 %s1027_s5, 4 }
 0x4c5   : > { %s1036_s23 = sshrl.u32 %s10479_s18, 3  ;;  %s1029_s9 = scalar_lea.hbm %s12555_s1, %s5736_s13 }
 0x4c6   : > { %s1037_s6 = sand.u32 7, %s10479_s18   ;;  %s7356_s25 = scalar_lea.hbm %s1029_s9, 32 }
 0x4c7   : > { %p7357_p8 = scmp.ne.s32.totalorder %s1029_s9, %s7356_s25  ;;  %p7359_p11 = scmp.lt.s32.totalorder %s1029_s9, %s12555_s1 }
 0x4c8   : > { %p7360_p0 = scmp.lt.s32.totalorder %s9405_s7, %s7356_s25 }
 0x4ca   : > { %p7361_p1 = por %p7360_p0, %p7359_p11 }
 0x4cc   : > { %p7362_p3 = pnand %p7361_p1, %p7357_p8 }
 0x4ce   : > { %7365 = shalt.err (!%p7362_p3)  }
 0x4cf   : > { %s7366_s14 = scalar_lea.vmem %s10481_s11, 32  ;;  %p7371_p4 = scmp.lt.s32.totalorder %s10481_s11, %s9389_s30 }
 0x4d0   : > { %p7367_p2 = scmp.ne.s32.totalorder %s10481_s11, %s7366_s14  ;;  %p7372_p13 = scmp.lt.s32.totalorder %s9414_s10, %s7366_s14 }
 0x4d2   : > { %p7373_p7 = por %p7372_p13, %p7371_p4 }
 0x4d4   : > { %p7374_p6 = pnand %p7373_p7, %p7367_p2 }
 0x4d6   : > { %7377 = shalt.err (!%p7374_p6)  }
 0x4d7   : > { %1035 = dma.hbm_to_vmem [thread:$0]  %s1029_s9, 32, %s10481_s11, [#allocation3], %s9131_s3, %s9131_s3, %s9132_s2 }
 0x4d8   : > { %s5737_s18 = sshll.u32 %s1036_s23, 4  ;;  %s9184_s29 = smov [#allocation2 + $0x65]  }
 0x4d9   : > { %s1039_s16 = sadd.s32 %s5737_s18, %s1037_s6  ;;  %s1056_s15 = sshll.u32 %s9184_s29, 4  ;;  %s1057_s15 = int_to_ptr.vmem [resolvable:$true] %s1056_s15 }
 0x4da   : > { %s5738_s17 = sshll.u32 %s1039_s16, 4  ;;  %s1048_s5 = sshrl.u32 %s10488_s12, 3 }
 0x4db   : > { %s1041_s28 = scalar_lea.hbm %s12555_s1, %s5738_s17  ;;  %s1049_s25 = sand.u32 7, %s10488_s12  }
 0x4dc   : > { %s7378_s20 = scalar_lea.hbm %s1041_s28, 32  ;;  %p7381_p10 = scmp.lt.s32.totalorder %s1041_s28, %s12555_s1 }
 0x4dd   : > { %p7379_p9 = scmp.ne.s32.totalorder %s1041_s28, %s7378_s20  ;;  %p7382_p12 = scmp.lt.s32.totalorder %s9405_s7, %s7378_s20 }
 0x4df   : > { %p7383_p8 = por %p7382_p12, %p7381_p10 }
 0x4e1   : > { %p7384_p11 = pnand %p7383_p8, %p7379_p9 }
 0x4e3   : > { %7387 = shalt.err (!%p7384_p11)  }
 0x4e4   : > { %s7388_s11 = scalar_lea.vmem %s10486_s8, 32  ;;  %p7393_p1 = scmp.lt.s32.totalorder %s10486_s8, %s9389_s30 }
 0x4e5   : > { %p7389_p0 = scmp.ne.s32.totalorder %s10486_s8, %s7388_s11  ;;  %p7394_p3 = scmp.lt.s32.totalorder %s9414_s10, %s7388_s11 }
 0x4e7   : > { %p7395_p2 = por %p7394_p3, %p7393_p1 }
 0x4e9   : > { %p7396_p4 = pnand %p7395_p2, %p7389_p0 }
 0x4eb   : > { %7399 = shalt.err (!%p7396_p4)  }
 0x4ec   : > { %1047 = dma.hbm_to_vmem [thread:$0]  %s1041_s28, 32, %s10486_s8, [#allocation3], %s9131_s3, %s9131_s3, %s9132_s2 }
 0x4ed   : > { %s5739_s12 = sshll.u32 %s1048_s5, 4  ;;  %s265_s9 = sadd.s32 54, %s9382_s22 }
 0x4ee   : > { %s1051_s23 = sadd.s32 %s5739_s12, %s1049_s25  ;;  %s10527_s18 = sld [smem:[#allocation5 + %s265_s9]] }
 0x4ef   : > { %s5740_s6 = sshll.u32 %s1051_s23, 4 }
 0x4f0   : > { %s1053_s17 = scalar_lea.hbm %s12555_s1, %s5740_s6 }
 0x4f1   : > { %s7400_s13 = scalar_lea.hbm %s1053_s17, 32  ;;  %p7403_p7 = scmp.lt.s32.totalorder %s1053_s17, %s12555_s1 }
 0x4f2   : > { %p7401_p13 = scmp.ne.s32.totalorder %s1053_s17, %s7400_s13  ;;  %p7404_p6 = scmp.lt.s32.totalorder %s9405_s7, %s7400_s13 }
 0x4f4   : > { %p7405_p9 = por %p7404_p6, %p7403_p7 }
 0x4f6   : > { %p7406_p10 = pnand %p7405_p9, %p7401_p13 }
 0x4f8   : > { %7409 = shalt.err (!%p7406_p10)  }
 0x4f9   : > { %s7410_s8 = scalar_lea.vmem %s1057_s15, 32  ;;  %p7415_p8 = scmp.lt.s32.totalorder %s1057_s15, %s9389_s30 }
 0x4fa   : > { %p7411_p12 = scmp.ne.s32.totalorder %s1057_s15, %s7410_s8  ;;  %p7416_p11 = scmp.lt.s32.totalorder %s9414_s10, %s7410_s8 }
 0x4fc   : > { %p7417_p0 = por %p7416_p11, %p7415_p8 }
 0x4fe   : > { %p7418_p1 = pnand %p7417_p0, %p7411_p12 }
 0x500   : > { %7421 = shalt.err (!%p7418_p1)  }
 0x501   : > { %1059 = dma.hbm_to_vmem [thread:$0]  %s1053_s17, 32, %s1057_s15, [#allocation3], %s9131_s3, %s9131_s3, %s9132_s2 }
 0x502   : > { %s9185_s5 = smov [#allocation2 + $0x66]   ;;  %s267_s25 = sadd.s32 55, %s9382_s22 }
 0x503   : > { %s1068_s28 = sshll.u32 %s9185_s5, 4  ;;  %s10544_s26 = sld [smem:[#allocation5 + %s267_s25]]  ;;  %s10542_s28 = int_to_ptr.vmem [resolvable:$true] %s1068_s28 }
 0x504   : > { %s269_s14 = sadd.s32 56, %s9382_s22  ;;  %s1060_s11 = sshrl.u32 %s10527_s18, 3 }
 0x505   : > { %s1061_s12 = sand.u32 7, %s10527_s18   ;;  %s5741_s23 = sshll.u32 %s1060_s11, 4 }
 0x506   : > { %s9186_s9 = smov [#allocation2 + $0x67]   ;;  %s1063_s16 = sadd.s32 %s5741_s23, %s1061_s12 }
 0x507   : > { %s1080_s6 = sshll.u32 %s9186_s9, 4  ;;  %s5742_s29 = sshll.u32 %s1063_s16, 4  ;;  %s10549_s6 = int_to_ptr.vmem [resolvable:$true] %s1080_s6 }
 0x508   : > { %s10551_s15 = sld [smem:[#allocation5 + %s269_s14]]  ;;  %s1065_s21 = scalar_lea.hbm %s12555_s1, %s5742_s29 }
 0x509   : > { %s1072_s20 = sshrl.u32 %s10544_s26, 3  ;;  %s7422_s8 = scalar_lea.hbm %s1065_s21, 32 }
 0x50a   : > { %p7423_p3 = scmp.ne.s32.totalorder %s1065_s21, %s7422_s8  ;;  %p7425_p2 = scmp.lt.s32.totalorder %s1065_s21, %s12555_s1 }
 0x50b   : > { %p7426_p4 = scmp.lt.s32.totalorder %s9405_s7, %s7422_s8 }
 0x50d   : > { %p7427_p13 = por %p7426_p4, %p7425_p2 }
 0x50f   : > { %p7428_p7 = pnand %p7427_p13, %p7423_p3 }
 0x511   : > { %7431 = shalt.err (!%p7428_p7)  }
 0x512   : > { %s7432_s18 = scalar_lea.vmem %s10542_s28, 32  ;;  %p7437_p9 = scmp.lt.s32.totalorder %s10542_s28, %s9389_s30 }
 0x513   : > { %p7433_p6 = scmp.ne.s32.totalorder %s10542_s28, %s7432_s18  ;;  %p7438_p10 = scmp.lt.s32.totalorder %s9414_s10, %s7432_s18 }
 0x515   : > { %p7439_p12 = por %p7438_p10, %p7437_p9 }
 0x517   : > { %p7440_p8 = pnand %p7439_p12, %p7433_p6 }
 0x519   : > { %7443 = shalt.err (!%p7440_p8)  }
 0x51a   : > { %1071 = dma.hbm_to_vmem [thread:$0]  %s1065_s21, 32, %s10542_s28, [#allocation3], %s9131_s3, %s9131_s3, %s9132_s2 }
 0x51b   : > { %s1073_s14 = sand.u32 7, %s10544_s26   ;;  %s5743_s11 = sshll.u32 %s1072_s20, 4 }
 0x51c   : > { %s1075_s12 = sadd.s32 %s5743_s11, %s1073_s14  ;;  %s9187_s9 = smov [#allocation2 + $0x70]  }
 0x51d   : > { %s5744_s23 = sshll.u32 %s1075_s12, 4  ;;  %s1092_s16 = sshll.u32 %s9187_s9, 4  ;;  %s1093_s16 = int_to_ptr.vmem [resolvable:$true] %s1092_s16 }
 0x51e   : > { %s1077_s13 = scalar_lea.hbm %s12555_s1, %s5744_s23  ;;  %s1084_s8 = sshrl.u32 %s10551_s15, 3 }
 0x51f   : > { %s7444_s5 = scalar_lea.hbm %s1077_s13, 32  ;;  %p7447_p0 = scmp.lt.s32.totalorder %s1077_s13, %s12555_s1 }
 0x520   : > { %p7445_p11 = scmp.ne.s32.totalorder %s1077_s13, %s7444_s5  ;;  %p7448_p1 = scmp.lt.s32.totalorder %s9405_s7, %s7444_s5 }
 0x522   : > { %p7449_p3 = por %p7448_p1, %p7447_p0 }
 0x524   : > { %p7450_p2 = pnand %p7449_p3, %p7445_p11 }
 0x526   : > { %7453 = shalt.err (!%p7450_p2)  }
 0x527   : > { %s7454_s28 = scalar_lea.vmem %s10549_s6, 32  ;;  %p7459_p13 = scmp.lt.s32.totalorder %s10549_s6, %s9389_s30 }
 0x528   : > { %p7455_p4 = scmp.ne.s32.totalorder %s10549_s6, %s7454_s28  ;;  %p7460_p7 = scmp.lt.s32.totalorder %s9414_s10, %s7454_s28 }
 0x52a   : > { %p7461_p6 = por %p7460_p7, %p7459_p13 }
 0x52c   : > { %p7462_p9 = pnand %p7461_p6, %p7455_p4 }
 0x52e   : > { %7465 = shalt.err (!%p7462_p9)  }
 0x52f   : > { %1083 = dma.hbm_to_vmem [thread:$0]  %s1077_s13, 32, %s10549_s6, [#allocation3], %s9131_s3, %s9131_s3, %s9132_s2 }
 0x530   : > { %s1085_s26 = sand.u32 7, %s10551_s15   ;;  %s5745_s21 = sshll.u32 %s1084_s8, 4 }
 0x531   : > { %s1087_s20 = sadd.s32 %s5745_s21, %s1085_s26  ;;  %s271_s11 = sadd.s32 57, %s9382_s22 }
 0x532   : > { %s5746_s14 = sshll.u32 %s1087_s20, 4  ;;  %s10593_s29 = sld [smem:[#allocation5 + %s271_s11]] }
 0x533   : > { %s1089_s9 = scalar_lea.hbm %s12555_s1, %s5746_s14 }
 0x534   : > { %s7466_s17 = scalar_lea.hbm %s1089_s9, 32  ;;  %p7469_p12 = scmp.lt.s32.totalorder %s1089_s9, %s12555_s1 }
 0x535   : > { %p7467_p10 = scmp.ne.s32.totalorder %s1089_s9, %s7466_s17  ;;  %p7470_p8 = scmp.lt.s32.totalorder %s9405_s7, %s7466_s17 }
 0x537   : > { %p7471_p11 = por %p7470_p8, %p7469_p12 }
 0x539   : > { %p7472_p0 = pnand %p7471_p11, %p7467_p10 }
 0x53b   : > { %7475 = shalt.err (!%p7472_p0)  }
 0x53c   : > { %s7476_s6 = scalar_lea.vmem %s1093_s16, 32  ;;  %p7481_p3 = scmp.lt.s32.totalorder %s1093_s16, %s9389_s30 }
 0x53d   : > { %p7477_p1 = scmp.ne.s32.totalorder %s1093_s16, %s7476_s6  ;;  %p7482_p2 = scmp.lt.s32.totalorder %s9414_s10, %s7476_s6 }
 0x53f   : > { %p7483_p4 = por %p7482_p2, %p7481_p3 }
 0x541   : > { %p7484_p13 = pnand %p7483_p4, %p7477_p1 }
 0x543   : > { %7487 = shalt.err (!%p7484_p13)  }
 0x544   : > { %1095 = dma.hbm_to_vmem [thread:$0]  %s1089_s9, 32, %s1093_s16, [#allocation3], %s9131_s3, %s9131_s3, %s9132_s2 }
 0x545   : > { %s273_s15 = sadd.s32 58, %s9382_s22  ;;  %s9188_s13 = smov [#allocation2 + $0x71]  }
 0x546   : > { %s1104_s8 = sshll.u32 %s9188_s13, 4  ;;  %s10605_s18 = sld [smem:[#allocation5 + %s273_s15]]  ;;  %s10607_s8 = int_to_ptr.vmem [resolvable:$true] %s1104_s8 }
 0x547   : > { %s9189_s28 = smov [#allocation2 + $0x72]   ;;  %s275_s21 = sadd.s32 59, %s9382_s22 }
 0x548   : > { %s1116_s26 = sshll.u32 %s9189_s28, 4  ;;  %s1096_s20 = sshrl.u32 %s10593_s29, 3  ;;  %s10612_s26 = int_to_ptr.vmem [resolvable:$true] %s1116_s26 }
 0x549   : > { %s1097_s14 = sand.u32 7, %s10593_s29   ;;  %s5747_s11 = sshll.u32 %s1096_s20, 4 }
 0x54a   : > { %s1099_s12 = sadd.s32 %s5747_s11, %s1097_s14  ;;  %s10614_s16 = sld [smem:[#allocation5 + %s275_s21]] }
 0x54b   : > { %s5748_s23 = sshll.u32 %s1099_s12, 4 }
 0x54c   : > { %s1108_s9 = sshrl.u32 %s10605_s18, 3  ;;  %s1101_s25 = scalar_lea.hbm %s12555_s1, %s5748_s23 }
 0x54d   : > { %s1109_s6 = sand.u32 7, %s10605_s18   ;;  %s7488_s15 = scalar_lea.hbm %s1101_s25, 32 }
 0x54e   : > { %p7489_p7 = scmp.ne.s32.totalorder %s1101_s25, %s7488_s15  ;;  %p7491_p6 = scmp.lt.s32.totalorder %s1101_s25, %s12555_s1 }
 0x54f   : > { %p7492_p9 = scmp.lt.s32.totalorder %s9405_s7, %s7488_s15 }
 0x551   : > { %p7493_p10 = por %p7492_p9, %p7491_p6 }
 0x553   : > { %p7494_p12 = pnand %p7493_p10, %p7489_p7 }
 0x555   : > { %7497 = shalt.err (!%p7494_p12)  }
 0x556   : > { %s7498_s29 = scalar_lea.vmem %s10607_s8, 32  ;;  %p7503_p11 = scmp.lt.s32.totalorder %s10607_s8, %s9389_s30 }
 0x557   : > { %p7499_p8 = scmp.ne.s32.totalorder %s10607_s8, %s7498_s29  ;;  %p7504_p0 = scmp.lt.s32.totalorder %s9414_s10, %s7498_s29 }
 0x559   : > { %p7505_p1 = por %p7504_p0, %p7503_p11 }
 0x55b   : > { %p7506_p3 = pnand %p7505_p1, %p7499_p8 }
 0x55d   : > { %7509 = shalt.err (!%p7506_p3)  }
 0x55e   : > { %1107 = dma.hbm_to_vmem [thread:$0]  %s1101_s25, 32, %s10607_s8, [#allocation3], %s9131_s3, %s9131_s3, %s9132_s2 }
 0x55f   : > { %s5749_s18 = sshll.u32 %s1108_s9, 4  ;;  %s9190_s20 = smov [#allocation2 + $0x73]  }
 0x560   : > { %s1111_s21 = sadd.s32 %s5749_s18, %s1109_s6  ;;  %s1128_s14 = sshll.u32 %s9190_s20, 4  ;;  %s1129_s14 = int_to_ptr.vmem [resolvable:$true] %s1128_s14 }
 0x561   : > { %s5750_s11 = sshll.u32 %s1111_s21, 4  ;;  %s1120_s12 = sshrl.u32 %s10614_s16, 3 }
 0x562   : > { %s1113_s5 = scalar_lea.hbm %s12555_s1, %s5750_s11  ;;  %s1121_s15 = sand.u32 7, %s10614_s16  }
 0x563   : > { %s7510_s13 = scalar_lea.hbm %s1113_s5, 32  ;;  %p7513_p4 = scmp.lt.s32.totalorder %s1113_s5, %s12555_s1 }
 0x564   : > { %p7511_p2 = scmp.ne.s32.totalorder %s1113_s5, %s7510_s13  ;;  %p7514_p13 = scmp.lt.s32.totalorder %s9405_s7, %s7510_s13 }
 0x566   : > { %p7515_p7 = por %p7514_p13, %p7513_p4 }
 0x568   : > { %p7516_p6 = pnand %p7515_p7, %p7511_p2 }
 0x56a   : > { %7519 = shalt.err (!%p7516_p6)  }
 0x56b   : > { %s7520_s8 = scalar_lea.vmem %s10612_s26, 32  ;;  %p7525_p10 = scmp.lt.s32.totalorder %s10612_s26, %s9389_s30 }
 0x56c   : > { %p7521_p9 = scmp.ne.s32.totalorder %s10612_s26, %s7520_s8  ;;  %p7526_p12 = scmp.lt.s32.totalorder %s9414_s10, %s7520_s8 }
 0x56e   : > { %p7527_p8 = por %p7526_p12, %p7525_p10 }
 0x570   : > { %p7528_p11 = pnand %p7527_p8, %p7521_p9 }
 0x572   : > { %7531 = shalt.err (!%p7528_p11)  }
 0x573   : > { %1119 = dma.hbm_to_vmem [thread:$0]  %s1113_s5, 32, %s10612_s26, [#allocation3], %s9131_s3, %s9131_s3, %s9132_s2 }
 0x574   : > { %s5751_s16 = sshll.u32 %s1120_s12, 4  ;;  %s277_s25 = sadd.s32 60, %s9382_s22 }
 0x575   : > { %s1123_s9 = sadd.s32 %s5751_s16, %s1121_s15  ;;  %s10653_s18 = sld [smem:[#allocation5 + %s277_s25]] }
 0x576   : > { %s5752_s6 = sshll.u32 %s1123_s9, 4 }
 0x577   : > { %s1125_s11 = scalar_lea.hbm %s12555_s1, %s5752_s6 }
 0x578   : > { %s7532_s23 = scalar_lea.hbm %s1125_s11, 32  ;;  %p7535_p1 = scmp.lt.s32.totalorder %s1125_s11, %s12555_s1 }
 0x579   : > { %p7533_p0 = scmp.ne.s32.totalorder %s1125_s11, %s7532_s23  ;;  %p7536_p3 = scmp.lt.s32.totalorder %s9405_s7, %s7532_s23 }
 0x57b   : > { %p7537_p2 = por %p7536_p3, %p7535_p1 }
 0x57d   : > { %p7538_p4 = pnand %p7537_p2, %p7533_p0 }
 0x57f   : > { %7541 = shalt.err (!%p7538_p4)  }
 0x580   : > { %s7542_s26 = scalar_lea.vmem %s1129_s14, 32  ;;  %p7547_p7 = scmp.lt.s32.totalorder %s1129_s14, %s9389_s30 }
 0x581   : > { %p7543_p13 = scmp.ne.s32.totalorder %s1129_s14, %s7542_s26  ;;  %p7548_p6 = scmp.lt.s32.totalorder %s9414_s10, %s7542_s26 }
 0x583   : > { %p7549_p9 = por %p7548_p6, %p7547_p7 }
 0x585   : > { %p7550_p10 = pnand %p7549_p9, %p7543_p13 }
 0x587   : > { %7553 = shalt.err (!%p7550_p10)  }
 0x588   : > { %1131 = dma.hbm_to_vmem [thread:$0]  %s1125_s11, 32, %s1129_s14, [#allocation3], %s9131_s3, %s9131_s3, %s9132_s2 }
 0x589   : > { %s9191_s12 = smov [#allocation2 + $0x74]   ;;  %s279_s15 = sadd.s32 61, %s9382_s22 }
 0x58a   : > { %s1140_s5 = sshll.u32 %s9191_s12, 4  ;;  %s10670_s28 = sld [smem:[#allocation5 + %s279_s15]]  ;;  %s10668_s5 = int_to_ptr.vmem [resolvable:$true] %s1140_s5 }
 0x58b   : > { %s281_s29 = sadd.s32 62, %s9382_s22  ;;  %s1132_s8 = sshrl.u32 %s10653_s18, 3 }
 0x58c   : > { %s1133_s16 = sand.u32 7, %s10653_s18   ;;  %s5753_s9 = sshll.u32 %s1132_s8, 4 }
 0x58d   : > { %s9192_s25 = smov [#allocation2 + $0x75]   ;;  %s1135_s21 = sadd.s32 %s5753_s9, %s1133_s16 }
 0x58e   : > { %s1152_s6 = sshll.u32 %s9192_s25, 4  ;;  %s5754_s20 = sshll.u32 %s1135_s21, 4  ;;  %s10675_s6 = int_to_ptr.vmem [resolvable:$true] %s1152_s6 }
 0x58f   : > { %s10677_s14 = sld [smem:[#allocation5 + %s281_s29]]  ;;  %s1137_s17 = scalar_lea.hbm %s12555_s1, %s5754_s20 }
 0x590   : > { %s1144_s13 = sshrl.u32 %s10670_s28, 3  ;;  %s7554_s26 = scalar_lea.hbm %s1137_s17, 32 }
 0x591   : > { %p7555_p12 = scmp.ne.s32.totalorder %s1137_s17, %s7554_s26  ;;  %p7557_p8 = scmp.lt.s32.totalorder %s1137_s17, %s12555_s1 }
 0x592   : > { %p7558_p11 = scmp.lt.s32.totalorder %s9405_s7, %s7554_s26 }
 0x594   : > { %p7559_p0 = por %p7558_p11, %p7557_p8 }
 0x596   : > { %p7560_p1 = pnand %p7559_p0, %p7555_p12 }
 0x598   : > { %7563 = shalt.err (!%p7560_p1)  }
 0x599   : > { %s7564_s18 = scalar_lea.vmem %s10668_s5, 32  ;;  %p7569_p2 = scmp.lt.s32.totalorder %s10668_s5, %s9389_s30 }
 0x59a   : > { %p7565_p3 = scmp.ne.s32.totalorder %s10668_s5, %s7564_s18  ;;  %p7570_p4 = scmp.lt.s32.totalorder %s9414_s10, %s7564_s18 }
 0x59c   : > { %p7571_p13 = por %p7570_p4, %p7569_p2 }
 0x59e   : > { %p7572_p7 = pnand %p7571_p13, %p7565_p3 }
 0x5a0   : > { %7575 = shalt.err (!%p7572_p7)  }
 0x5a1   : > { %1143 = dma.hbm_to_vmem [thread:$0]  %s1137_s17, 32, %s10668_s5, [#allocation3], %s9131_s3, %s9131_s3, %s9132_s2 }
 0x5a2   : > { %s1145_s29 = sand.u32 7, %s10670_s28   ;;  %s5755_s8 = sshll.u32 %s1144_s13, 4 }
 0x5a3   : > { %s1147_s16 = sadd.s32 %s5755_s8, %s1145_s29  ;;  %s9193_s25 = smov [#allocation2 + $0x76]  }
 0x5a4   : > { %s5756_s9 = sshll.u32 %s1147_s16, 4  ;;  %s1164_s21 = sshll.u32 %s9193_s25, 4  ;;  %s1165_s21 = int_to_ptr.vmem [resolvable:$true] %s1164_s21 }
 0x5a5   : > { %s1149_s23 = scalar_lea.hbm %s12555_s1, %s5756_s9  ;;  %s1156_s26 = sshrl.u32 %s10677_s14, 3 }
 0x5a6   : > { %s7576_s12 = scalar_lea.hbm %s1149_s23, 32  ;;  %p7579_p9 = scmp.lt.s32.totalorder %s1149_s23, %s12555_s1 }
 0x5a7   : > { %p7577_p6 = scmp.ne.s32.totalorder %s1149_s23, %s7576_s12  ;;  %p7580_p10 = scmp.lt.s32.totalorder %s9405_s7, %s7576_s12 }
 0x5a9   : > { %p7581_p12 = por %p7580_p10, %p7579_p9 }
 0x5ab   : > { %p7582_p8 = pnand %p7581_p12, %p7577_p6 }
 0x5ad   : > { %7585 = shalt.err (!%p7582_p8)  }
 0x5ae   : > { %s7586_s5 = scalar_lea.vmem %s10675_s6, 32  ;;  %p7591_p0 = scmp.lt.s32.totalorder %s10675_s6, %s9389_s30 }
 0x5af   : > { %p7587_p11 = scmp.ne.s32.totalorder %s10675_s6, %s7586_s5  ;;  %p7592_p1 = scmp.lt.s32.totalorder %s9414_s10, %s7586_s5 }
 0x5b1   : > { %p7593_p3 = por %p7592_p1, %p7591_p0 }
 0x5b3   : > { %p7594_p2 = pnand %p7593_p3, %p7587_p11 }
 0x5b5   : > { %7597 = shalt.err (!%p7594_p2)  }
 0x5b6   : > { %1155 = dma.hbm_to_vmem [thread:$0]  %s1149_s23, 32, %s10675_s6, [#allocation3], %s9131_s3, %s9131_s3, %s9132_s2 }
 0x5b7   : > { %s1157_s28 = sand.u32 7, %s10677_s14   ;;  %s5757_s17 = sshll.u32 %s1156_s26, 4 }
 0x5b8   : > { %s1159_s13 = sadd.s32 %s5757_s17, %s1157_s28  ;;  %s283_s8 = sadd.s32 63, %s9382_s22 }
 0x5b9   : > { %s5758_s29 = sshll.u32 %s1159_s13, 4  ;;  %s10719_s20 = sld [smem:[#allocation5 + %s283_s8]] }
 0x5ba   : > { %s1161_s25 = scalar_lea.hbm %s12555_s1, %s5758_s29 }
 0x5bb   : > { %s7598_s11 = scalar_lea.hbm %s1161_s25, 32  ;;  %p7601_p13 = scmp.lt.s32.totalorder %s1161_s25, %s12555_s1 }
 0x5bc   : > { %p7599_p4 = scmp.ne.s32.totalorder %s1161_s25, %s7598_s11  ;;  %p7602_p7 = scmp.lt.s32.totalorder %s9405_s7, %s7598_s11 }
 0x5be   : > { %p7603_p6 = por %p7602_p7, %p7601_p13 }
 0x5c0   : > { %p7604_p9 = pnand %p7603_p6, %p7599_p4 }
 0x5c2   : > { %7607 = shalt.err (!%p7604_p9)  }
 0x5c3   : > { %s7608_s6 = scalar_lea.vmem %s1165_s21, 32  ;;  %p7613_p12 = scmp.lt.s32.totalorder %s1165_s21, %s9389_s30 }
 0x5c4   : > { %p7609_p10 = scmp.ne.s32.totalorder %s1165_s21, %s7608_s6  ;;  %p7614_p8 = scmp.lt.s32.totalorder %s9414_s10, %s7608_s6 }
 0x5c6   : > { %p7615_p11 = por %p7614_p8, %p7613_p12 }
 0x5c8   : > { %p7616_p0 = pnand %p7615_p11, %p7609_p10 }
 0x5ca   : > { %7619 = shalt.err (!%p7616_p0)  }
 0x5cb   : > { %1167 = dma.hbm_to_vmem [thread:$0]  %s1161_s25, 32, %s1165_s21, [#allocation3], %s9131_s3, %s9131_s3, %s9132_s2 }
 0x5cc   : > { %s285_s14 = sadd.s32 64, %s9382_s22  ;;  %s9194_s23 = smov [#allocation2 + $0x77]  }
 0x5cd   : > { %s1176_s26 = sshll.u32 %s9194_s23, 4  ;;  %s10731_s18 = sld [smem:[#allocation5 + %s285_s14]]  ;;  %s10733_s26 = int_to_ptr.vmem [resolvable:$true] %s1176_s26 }
 0x5ce   : > { %s9195_s5 = smov [#allocation2 + $0x80]   ;;  %s287_s17 = sadd.s32 65, %s9382_s22 }
 0x5cf   : > { %s1188_s28 = sshll.u32 %s9195_s5, 4  ;;  %s1168_s13 = sshrl.u32 %s10719_s20, 3  ;;  %s10738_s28 = int_to_ptr.vmem [resolvable:$true] %s1188_s28 }
 0x5d0   : > { %s1169_s29 = sand.u32 7, %s10719_s20   ;;  %s5759_s8 = sshll.u32 %s1168_s13, 4 }
 0x5d1   : > { %s1171_s16 = sadd.s32 %s5759_s8, %s1169_s29  ;;  %s10740_s21 = sld [smem:[#allocation5 + %s287_s17]] }
 0x5d2   : > { %s5760_s9 = sshll.u32 %s1171_s16, 4 }
 0x5d3   : > { %s1180_s25 = sshrl.u32 %s10731_s18, 3  ;;  %s1173_s15 = scalar_lea.hbm %s12555_s1, %s5760_s9 }
 0x5d4   : > { %s1181_s6 = sand.u32 7, %s10731_s18   ;;  %s7620_s14 = scalar_lea.hbm %s1173_s15, 32 }
 0x5d5   : > { %p7621_p1 = scmp.ne.s32.totalorder %s1173_s15, %s7620_s14  ;;  %p7623_p3 = scmp.lt.s32.totalorder %s1173_s15, %s12555_s1 }
 0x5d6   : > { %p7624_p2 = scmp.lt.s32.totalorder %s9405_s7, %s7620_s14 }
 0x5d8   : > { %p7625_p4 = por %p7624_p2, %p7623_p3 }
 0x5da   : > { %p7626_p13 = pnand %p7625_p4, %p7621_p1 }
 0x5dc   : > { %7629 = shalt.err (!%p7626_p13)  }
 0x5dd   : > { %s7630_s20 = scalar_lea.vmem %s10733_s26, 32  ;;  %p7635_p6 = scmp.lt.s32.totalorder %s10733_s26, %s9389_s30 }
 0x5de   : > { %p7631_p7 = scmp.ne.s32.totalorder %s10733_s26, %s7630_s20  ;;  %p7636_p9 = scmp.lt.s32.totalorder %s9414_s10, %s7630_s20 }
 0x5e0   : > { %p7637_p10 = por %p7636_p9, %p7635_p6 }
 0x5e2   : > { %p7638_p12 = pnand %p7637_p10, %p7631_p7 }
 0x5e4   : > { %7641 = shalt.err (!%p7638_p12)  }
 0x5e5   : > { %1179 = dma.hbm_to_vmem [thread:$0]  %s1173_s15, 32, %s10733_s26, [#allocation3], %s9131_s3, %s9131_s3, %s9132_s2 }
 0x5e6   : > { %s5761_s18 = sshll.u32 %s1180_s25, 4  ;;  %s9196_s13 = smov [#allocation2 + $0x81]  }
 0x5e7   : > { %s1183_s17 = sadd.s32 %s5761_s18, %s1181_s6  ;;  %s1200_s29 = sshll.u32 %s9196_s13, 4  ;;  %s1201_s29 = int_to_ptr.vmem [resolvable:$true] %s1200_s29 }
 0x5e8   : > { %s5762_s8 = sshll.u32 %s1183_s17, 4  ;;  %s1192_s16 = sshrl.u32 %s10740_s21, 3 }
 0x5e9   : > { %s1185_s12 = scalar_lea.hbm %s12555_s1, %s5762_s8  ;;  %s1193_s14 = sand.u32 7, %s10740_s21  }
 0x5ea   : > { %s7642_s23 = scalar_lea.hbm %s1185_s12, 32  ;;  %p7645_p11 = scmp.lt.s32.totalorder %s1185_s12, %s12555_s1 }
 0x5eb   : > { %p7643_p8 = scmp.ne.s32.totalorder %s1185_s12, %s7642_s23  ;;  %p7646_p0 = scmp.lt.s32.totalorder %s9405_s7, %s7642_s23 }
 0x5ed   : > { %p7647_p1 = por %p7646_p0, %p7645_p11 }
 0x5ef   : > { %p7648_p3 = pnand %p7647_p1, %p7643_p8 }
 0x5f1   : > { %7651 = shalt.err (!%p7648_p3)  }
 0x5f2   : > { %s7652_s26 = scalar_lea.vmem %s10738_s28, 32  ;;  %p7657_p4 = scmp.lt.s32.totalorder %s10738_s28, %s9389_s30 }
 0x5f3   : > { %p7653_p2 = scmp.ne.s32.totalorder %s10738_s28, %s7652_s26  ;;  %p7658_p13 = scmp.lt.s32.totalorder %s9414_s10, %s7652_s26 }
 0x5f5   : > { %p7659_p7 = por %p7658_p13, %p7657_p4 }
 0x5f7   : > { %p7660_p6 = pnand %p7659_p7, %p7653_p2 }
 0x5f9   : > { %7663 = shalt.err (!%p7660_p6)  }
 0x5fa   : > { %1191 = dma.hbm_to_vmem [thread:$0]  %s1185_s12, 32, %s10738_s28, [#allocation3], %s9131_s3, %s9131_s3, %s9132_s2 }
 0x5fb   : > { %s5763_s21 = sshll.u32 %s1192_s16, 4  ;;  %s289_s15 = sadd.s32 66, %s9382_s22 }
 0x5fc   : > { %s1195_s25 = sadd.s32 %s5763_s21, %s1193_s14  ;;  %s10779_s18 = sld [smem:[#allocation5 + %s289_s15]] }
 0x5fd   : > { %s5764_s6 = sshll.u32 %s1195_s25, 4 }
 0x5fe   : > { %s1197_s8 = scalar_lea.hbm %s12555_s1, %s5764_s6 }
 0x5ff   : > { %s7664_s9 = scalar_lea.hbm %s1197_s8, 32  ;;  %p7667_p10 = scmp.lt.s32.totalorder %s1197_s8, %s12555_s1 }
 0x600   : > { %p7665_p9 = scmp.ne.s32.totalorder %s1197_s8, %s7664_s9  ;;  %p7668_p12 = scmp.lt.s32.totalorder %s9405_s7, %s7664_s9 }
 0x602   : > { %p7669_p8 = por %p7668_p12, %p7667_p10 }
 0x604   : > { %p7670_p11 = pnand %p7669_p8, %p7665_p9 }
 0x606   : > { %7673 = shalt.err (!%p7670_p11)  }
 0x607   : > { %s7674_s28 = scalar_lea.vmem %s1201_s29, 32  ;;  %p7679_p1 = scmp.lt.s32.totalorder %s1201_s29, %s9389_s30 }
 0x608   : > { %p7675_p0 = scmp.ne.s32.totalorder %s1201_s29, %s7674_s28  ;;  %p7680_p3 = scmp.lt.s32.totalorder %s9414_s10, %s7674_s28 }
 0x60a   : > { %p7681_p2 = por %p7680_p3, %p7679_p1 }
 0x60c   : > { %p7682_p4 = pnand %p7681_p2, %p7675_p0 }
 0x60e   : > { %7685 = shalt.err (!%p7682_p4)  }
 0x60f   : > { %1203 = dma.hbm_to_vmem [thread:$0]  %s1197_s8, 32, %s1201_s29, [#allocation3], %s9131_s3, %s9131_s3, %s9132_s2 }
 0x610   : > { %s9197_s16 = smov [#allocation2 + $0x82]   ;;  %s291_s14 = sadd.s32 67, %s9382_s22 }
 0x611   : > { %s1212_s12 = sshll.u32 %s9197_s16, 4  ;;  %s10796_s5 = sld [smem:[#allocation5 + %s291_s14]]  ;;  %s10794_s12 = int_to_ptr.vmem [resolvable:$true] %s1212_s12 }
 0x612   : > { %s293_s20 = sadd.s32 68, %s9382_s22  ;;  %s1204_s26 = sshrl.u32 %s10779_s18, 3 }
 0x613   : > { %s1205_s21 = sand.u32 7, %s10779_s18   ;;  %s5765_s25 = sshll.u32 %s1204_s26, 4 }
 0x614   : > { %s9198_s15 = smov [#allocation2 + $0x83]   ;;  %s1207_s17 = sadd.s32 %s5765_s25, %s1205_s21 }
 0x615   : > { %s1224_s6 = sshll.u32 %s9198_s15, 4  ;;  %s5766_s13 = sshll.u32 %s1207_s17, 4  ;;  %s10801_s6 = int_to_ptr.vmem [resolvable:$true] %s1224_s6 }
 0x616   : > { %s10803_s29 = sld [smem:[#allocation5 + %s293_s20]]  ;;  %s1209_s11 = scalar_lea.hbm %s12555_s1, %s5766_s13 }
 0x617   : > { %s1216_s23 = sshrl.u32 %s10796_s5, 3  ;;  %s7686_s28 = scalar_lea.hbm %s1209_s11, 32 }
 0x618   : > { %p7687_p13 = scmp.ne.s32.totalorder %s1209_s11, %s7686_s28  ;;  %p7689_p7 = scmp.lt.s32.totalorder %s1209_s11, %s12555_s1 }
 0x619   : > { %p7690_p6 = scmp.lt.s32.totalorder %s9405_s7, %s7686_s28 }
 0x61b   : > { %p7691_p9 = por %p7690_p6, %p7689_p7 }
 0x61d   : > { %p7692_p10 = pnand %p7691_p9, %p7687_p13 }
 0x61f   : > { %7695 = shalt.err (!%p7692_p10)  }
 0x620   : > { %s7696_s18 = scalar_lea.vmem %s10794_s12, 32  ;;  %p7701_p8 = scmp.lt.s32.totalorder %s10794_s12, %s9389_s30 }
 0x621   : > { %p7697_p12 = scmp.ne.s32.totalorder %s10794_s12, %s7696_s18  ;;  %p7702_p11 = scmp.lt.s32.totalorder %s9414_s10, %s7696_s18 }
 0x623   : > { %p7703_p0 = por %p7702_p11, %p7701_p8 }
 0x625   : > { %p7704_p1 = pnand %p7703_p0, %p7697_p12 }
 0x627   : > { %7707 = shalt.err (!%p7704_p1)  }
 0x628   : > { %1215 = dma.hbm_to_vmem [thread:$0]  %s1209_s11, 32, %s10794_s12, [#allocation3], %s9131_s3, %s9131_s3, %s9132_s2 }
 0x629   : > { %s1217_s20 = sand.u32 7, %s10796_s5   ;;  %s5767_s26 = sshll.u32 %s1216_s23, 4 }
 0x62a   : > { %s1219_s21 = sadd.s32 %s5767_s26, %s1217_s20  ;;  %s9199_s15 = smov [#allocation2 + $0x84]  }
 0x62b   : > { %s5768_s25 = sshll.u32 %s1219_s21, 4  ;;  %s1236_s17 = sshll.u32 %s9199_s15, 4  ;;  %s1237_s17 = int_to_ptr.vmem [resolvable:$true] %s1236_s17 }
 0x62c   : > { %s1221_s9 = scalar_lea.hbm %s12555_s1, %s5768_s25  ;;  %s1228_s28 = sshrl.u32 %s10803_s29, 3 }
 0x62d   : > { %s7708_s16 = scalar_lea.hbm %s1221_s9, 32  ;;  %p7711_p2 = scmp.lt.s32.totalorder %s1221_s9, %s12555_s1 }
 0x62e   : > { %p7709_p3 = scmp.ne.s32.totalorder %s1221_s9, %s7708_s16  ;;  %p7712_p4 = scmp.lt.s32.totalorder %s9405_s7, %s7708_s16 }
 0x630   : > { %p7713_p13 = por %p7712_p4, %p7711_p2 }
 0x632   : > { %p7714_p7 = pnand %p7713_p13, %p7709_p3 }
 0x634   : > { %7717 = shalt.err (!%p7714_p7)  }
 0x635   : > { %s7718_s12 = scalar_lea.vmem %s10801_s6, 32  ;;  %p7723_p9 = scmp.lt.s32.totalorder %s10801_s6, %s9389_s30 }
 0x636   : > { %p7719_p6 = scmp.ne.s32.totalorder %s10801_s6, %s7718_s12  ;;  %p7724_p10 = scmp.lt.s32.totalorder %s9414_s10, %s7718_s12 }
 0x638   : > { %p7725_p12 = por %p7724_p10, %p7723_p9 }
 0x63a   : > { %p7726_p8 = pnand %p7725_p12, %p7719_p6 }
 0x63c   : > { %7729 = shalt.err (!%p7726_p8)  }
 0x63d   : > { %1227 = dma.hbm_to_vmem [thread:$0]  %s1221_s9, 32, %s10801_s6, [#allocation3], %s9131_s3, %s9131_s3, %s9132_s2 }
 0x63e   : > { %s1229_s5 = sand.u32 7, %s10803_s29   ;;  %s5769_s11 = sshll.u32 %s1228_s28, 4 }
 0x63f   : > { %s1231_s23 = sadd.s32 %s5769_s11, %s1229_s5  ;;  %s295_s26 = sadd.s32 69, %s9382_s22 }
 0x640   : > { %s5770_s20 = sshll.u32 %s1231_s23, 4  ;;  %s10845_s13 = sld [smem:[#allocation5 + %s295_s26]] }
 0x641   : > { %s1233_s15 = scalar_lea.hbm %s12555_s1, %s5770_s20 }
 0x642   : > { %s7730_s8 = scalar_lea.hbm %s1233_s15, 32  ;;  %p7733_p0 = scmp.lt.s32.totalorder %s1233_s15, %s12555_s1 }
 0x643   : > { %p7731_p11 = scmp.ne.s32.totalorder %s1233_s15, %s7730_s8  ;;  %p7734_p1 = scmp.lt.s32.totalorder %s9405_s7, %s7730_s8 }
 0x645   : > { %p7735_p3 = por %p7734_p1, %p7733_p0 }
 0x647   : > { %p7736_p2 = pnand %p7735_p3, %p7731_p11 }
 0x649   : > { %7739 = shalt.err (!%p7736_p2)  }
 0x64a   : > { %s7740_s6 = scalar_lea.vmem %s1237_s17, 32  ;;  %p7745_p13 = scmp.lt.s32.totalorder %s1237_s17, %s9389_s30 }
 0x64b   : > { %p7741_p4 = scmp.ne.s32.totalorder %s1237_s17, %s7740_s6  ;;  %p7746_p7 = scmp.lt.s32.totalorder %s9414_s10, %s7740_s6 }
 0x64d   : > { %p7747_p6 = por %p7746_p7, %p7745_p13 }
 0x64f   : > { %p7748_p9 = pnand %p7747_p6, %p7741_p4 }
 0x651   : > { %7751 = shalt.err (!%p7748_p9)  }
 0x652   : > { %1239 = dma.hbm_to_vmem [thread:$0]  %s1233_s15, 32, %s1237_s17, [#allocation3], %s9131_s3, %s9131_s3, %s9132_s2 }
 0x653   : > { %s297_s29 = sadd.s32 70, %s9382_s22  ;;  %s9200_s9 = smov [#allocation2 + $0x85]  }
 0x654   : > { %s1248_s28 = sshll.u32 %s9200_s9, 4  ;;  %s10857_s18 = sld [smem:[#allocation5 + %s297_s29]]  ;;  %s10859_s28 = int_to_ptr.vmem [resolvable:$true] %s1248_s28 }
 0x655   : > { %s9201_s12 = smov [#allocation2 + $0x86]   ;;  %s299_s11 = sadd.s32 71, %s9382_s22 }
 0x656   : > { %s1260_s5 = sshll.u32 %s9201_s12, 4  ;;  %s1240_s23 = sshrl.u32 %s10845_s13, 3  ;;  %s10864_s5 = int_to_ptr.vmem [resolvable:$true] %s1260_s5 }
 0x657   : > { %s1241_s20 = sand.u32 7, %s10845_s13   ;;  %s5771_s26 = sshll.u32 %s1240_s23, 4 }
 0x658   : > { %s1243_s21 = sadd.s32 %s5771_s26, %s1241_s20  ;;  %s10866_s17 = sld [smem:[#allocation5 + %s299_s11]] }
 0x659   : > { %s5772_s25 = sshll.u32 %s1243_s21, 4 }
 0x65a   : > { %s1252_s15 = sshrl.u32 %s10857_s18, 3  ;;  %s1245_s14 = scalar_lea.hbm %s12555_s1, %s5772_s25 }
 0x65b   : > { %s1253_s6 = sand.u32 7, %s10857_s18   ;;  %s7752_s29 = scalar_lea.hbm %s1245_s14, 32 }
 0x65c   : > { %p7753_p10 = scmp.ne.s32.totalorder %s1245_s14, %s7752_s29  ;;  %p7755_p12 = scmp.lt.s32.totalorder %s1245_s14, %s12555_s1 }
 0x65d   : > { %p7756_p8 = scmp.lt.s32.totalorder %s9405_s7, %s7752_s29 }
 0x65f   : > { %p7757_p11 = por %p7756_p8, %p7755_p12 }
 0x661   : > { %p7758_p0 = pnand %p7757_p11, %p7753_p10 }
 0x663   : > { %7761 = shalt.err (!%p7758_p0)  }
 0x664   : > { %s7762_s13 = scalar_lea.vmem %s10859_s28, 32  ;;  %p7767_p3 = scmp.lt.s32.totalorder %s10859_s28, %s9389_s30 }
 0x665   : > { %p7763_p1 = scmp.ne.s32.totalorder %s10859_s28, %s7762_s13  ;;  %p7768_p2 = scmp.lt.s32.totalorder %s9414_s10, %s7762_s13 }
 0x667   : > { %p7769_p4 = por %p7768_p2, %p7767_p3 }
 0x669   : > { %p7770_p13 = pnand %p7769_p4, %p7763_p1 }
 0x66b   : > { %7773 = shalt.err (!%p7770_p13)  }
 0x66c   : > { %1251 = dma.hbm_to_vmem [thread:$0]  %s1245_s14, 32, %s10859_s28, [#allocation3], %s9131_s3, %s9131_s3, %s9132_s2 }
 0x66d   : > { %s5773_s18 = sshll.u32 %s1252_s15, 4  ;;  %s9202_s23 = smov [#allocation2 + $0x87]  }
 0x66e   : > { %s1255_s11 = sadd.s32 %s5773_s18, %s1253_s6  ;;  %s1272_s20 = sshll.u32 %s9202_s23, 4  ;;  %s1273_s20 = int_to_ptr.vmem [resolvable:$true] %s1272_s20 }
 0x66f   : > { %s5774_s26 = sshll.u32 %s1255_s11, 4  ;;  %s1264_s21 = sshrl.u32 %s10866_s17, 3 }
 0x670   : > { %s1257_s16 = scalar_lea.hbm %s12555_s1, %s5774_s26  ;;  %s1265_s29 = sand.u32 7, %s10866_s17  }
 0x671   : > { %s7774_s9 = scalar_lea.hbm %s1257_s16, 32  ;;  %p7777_p6 = scmp.lt.s32.totalorder %s1257_s16, %s12555_s1 }
 0x672   : > { %p7775_p7 = scmp.ne.s32.totalorder %s1257_s16, %s7774_s9  ;;  %p7778_p9 = scmp.lt.s32.totalorder %s9405_s7, %s7774_s9 }
 0x674   : > { %p7779_p10 = por %p7778_p9, %p7777_p6 }
 0x676   : > { %p7780_p12 = pnand %p7779_p10, %p7775_p7 }
 0x678   : > { %7783 = shalt.err (!%p7780_p12)  }
 0x679   : > { %s7784_s28 = scalar_lea.vmem %s10864_s5, 32  ;;  %p7789_p11 = scmp.lt.s32.totalorder %s10864_s5, %s9389_s30 }
 0x67a   : > { %p7785_p8 = scmp.ne.s32.totalorder %s10864_s5, %s7784_s28  ;;  %p7790_p0 = scmp.lt.s32.totalorder %s9414_s10, %s7784_s28 }
 0x67c   : > { %p7791_p1 = por %p7790_p0, %p7789_p11 }
 0x67e   : > { %p7792_p3 = pnand %p7791_p1, %p7785_p8 }
 0x680   : > { %7795 = shalt.err (!%p7792_p3)  }
 0x681   : > { %1263 = dma.hbm_to_vmem [thread:$0]  %s1257_s16, 32, %s10864_s5, [#allocation3], %s9131_s3, %s9131_s3, %s9132_s2 }
 0x682   : > { %s5775_s17 = sshll.u32 %s1264_s21, 4  ;;  %s301_s14 = sadd.s32 72, %s9382_s22 }
 0x683   : > { %s1267_s15 = sadd.s32 %s5775_s17, %s1265_s29  ;;  %s10905_s18 = sld [smem:[#allocation5 + %s301_s14]] }
 0x684   : > { %s5776_s6 = sshll.u32 %s1267_s15, 4 }
 0x685   : > { %s1269_s26 = scalar_lea.hbm %s12555_s1, %s5776_s6 }
 0x686   : > { %s7796_s25 = scalar_lea.hbm %s1269_s26, 32  ;;  %p7799_p4 = scmp.lt.s32.totalorder %s1269_s26, %s12555_s1 }
 0x687   : > { %p7797_p2 = scmp.ne.s32.totalorder %s1269_s26, %s7796_s25  ;;  %p7800_p13 = scmp.lt.s32.totalorder %s9405_s7, %s7796_s25 }
 0x689   : > { %p7801_p7 = por %p7800_p13, %p7799_p4 }
 0x68b   : > { %p7802_p6 = pnand %p7801_p7, %p7797_p2 }
 0x68d   : > { %7805 = shalt.err (!%p7802_p6)  }
 0x68e   : > { %s7806_s5 = scalar_lea.vmem %s1273_s20, 32  ;;  %p7811_p10 = scmp.lt.s32.totalorder %s1273_s20, %s9389_s30 }
 0x68f   : > { %p7807_p9 = scmp.ne.s32.totalorder %s1273_s20, %s7806_s5  ;;  %p7812_p12 = scmp.lt.s32.totalorder %s9414_s10, %s7806_s5 }
 0x691   : > { %p7813_p8 = por %p7812_p12, %p7811_p10 }
 0x693   : > { %p7814_p11 = pnand %p7813_p8, %p7807_p9 }
 0x695   : > { %7817 = shalt.err (!%p7814_p11)  }
 0x696   : > { %1275 = dma.hbm_to_vmem [thread:$0]  %s1269_s26, 32, %s1273_s20, [#allocation3], %s9131_s3, %s9131_s3, %s9132_s2 }
 0x697   : > { %s9203_s21 = smov [#allocation2 + $0x90]   ;;  %s303_s29 = sadd.s32 73, %s9382_s22 }
 0x698   : > { %s1284_s16 = sshll.u32 %s9203_s21, 4  ;;  %s10922_s12 = sld [smem:[#allocation5 + %s303_s29]]  ;;  %s10920_s16 = int_to_ptr.vmem [resolvable:$true] %s1284_s16 }
 0x699   : > { %s305_s13 = sadd.s32 74, %s9382_s22  ;;  %s1276_s28 = sshrl.u32 %s10905_s18, 3 }
 0x69a   : > { %s1277_s17 = sand.u32 7, %s10905_s18   ;;  %s5777_s15 = sshll.u32 %s1276_s28, 4 }
 0x69b   : > { %s9204_s14 = smov [#allocation2 + $0x91]   ;;  %s1279_s11 = sadd.s32 %s5777_s15, %s1277_s17 }
 0x69c   : > { %s1296_s6 = sshll.u32 %s9204_s14, 4  ;;  %s5778_s23 = sshll.u32 %s1279_s11, 4  ;;  %s10927_s6 = int_to_ptr.vmem [resolvable:$true] %s1296_s6 }
 0x69d   : > { %s10929_s20 = sld [smem:[#allocation5 + %s305_s13]]  ;;  %s1281_s8 = scalar_lea.hbm %s12555_s1, %s5778_s23 }
 0x69e   : > { %s1288_s9 = sshrl.u32 %s10922_s12, 3  ;;  %s7818_s5 = scalar_lea.hbm %s1281_s8, 32 }
 0x69f   : > { %p7819_p0 = scmp.ne.s32.totalorder %s1281_s8, %s7818_s5  ;;  %p7821_p1 = scmp.lt.s32.totalorder %s1281_s8, %s12555_s1 }
 0x6a0   : > { %p7822_p3 = scmp.lt.s32.totalorder %s9405_s7, %s7818_s5 }
 0x6a2   : > { %p7823_p2 = por %p7822_p3, %p7821_p1 }
 0x6a4   : > { %p7824_p4 = pnand %p7823_p2, %p7819_p0 }
 0x6a6   : > { %7827 = shalt.err (!%p7824_p4)  }
 0x6a7   : > { %s7828_s18 = scalar_lea.vmem %s10920_s16, 32  ;;  %p7833_p7 = scmp.lt.s32.totalorder %s10920_s16, %s9389_s30 }
 0x6a8   : > { %p7829_p13 = scmp.ne.s32.totalorder %s10920_s16, %s7828_s18  ;;  %p7834_p6 = scmp.lt.s32.totalorder %s9414_s10, %s7828_s18 }
 0x6aa   : > { %p7835_p9 = por %p7834_p6, %p7833_p7 }
 0x6ac   : > { %p7836_p10 = pnand %p7835_p9, %p7829_p13 }
 0x6ae   : > { %7839 = shalt.err (!%p7836_p10)  }
 0x6af   : > { %1287 = dma.hbm_to_vmem [thread:$0]  %s1281_s8, 32, %s10920_s16, [#allocation3], %s9131_s3, %s9131_s3, %s9132_s2 }
 0x6b0   : > { %s1289_s13 = sand.u32 7, %s10922_s12   ;;  %s5779_s28 = sshll.u32 %s1288_s9, 4 }
 0x6b1   : > { %s1291_s17 = sadd.s32 %s5779_s28, %s1289_s13  ;;  %s9205_s14 = smov [#allocation2 + $0x92]  }
 0x6b2   : > { %s5780_s15 = sshll.u32 %s1291_s17, 4  ;;  %s1308_s11 = sshll.u32 %s9205_s14, 4  ;;  %s1309_s11 = int_to_ptr.vmem [resolvable:$true] %s1308_s11 }
 0x6b3   : > { %s1293_s25 = scalar_lea.hbm %s12555_s1, %s5780_s15  ;;  %s1300_s5 = sshrl.u32 %s10929_s20, 3 }
 0x6b4   : > { %s7840_s21 = scalar_lea.hbm %s1293_s25, 32  ;;  %p7843_p8 = scmp.lt.s32.totalorder %s1293_s25, %s12555_s1 }
 0x6b5   : > { %p7841_p12 = scmp.ne.s32.totalorder %s1293_s25, %s7840_s21  ;;  %p7844_p11 = scmp.lt.s32.totalorder %s9405_s7, %s7840_s21 }
 0x6b7   : > { %p7845_p0 = por %p7844_p11, %p7843_p8 }
 0x6b9   : > { %p7846_p1 = pnand %p7845_p0, %p7841_p12 }
 0x6bb   : > { %7849 = shalt.err (!%p7846_p1)  }
 0x6bc   : > { %s7850_s16 = scalar_lea.vmem %s10927_s6, 32  ;;  %p7855_p2 = scmp.lt.s32.totalorder %s10927_s6, %s9389_s30 }
 0x6bd   : > { %p7851_p3 = scmp.ne.s32.totalorder %s10927_s6, %s7850_s16  ;;  %p7856_p4 = scmp.lt.s32.totalorder %s9414_s10, %s7850_s16 }
 0x6bf   : > { %p7857_p13 = por %p7856_p4, %p7855_p2 }
 0x6c1   : > { %p7858_p7 = pnand %p7857_p13, %p7851_p3 }
 0x6c3   : > { %7861 = shalt.err (!%p7858_p7)  }
 0x6c4   : > { %1299 = dma.hbm_to_vmem [thread:$0]  %s1293_s25, 32, %s10927_s6, [#allocation3], %s9131_s3, %s9131_s3, %s9132_s2 }
 0x6c5   : > { %s1301_s12 = sand.u32 7, %s10929_s20   ;;  %s5781_s8 = sshll.u32 %s1300_s5, 4 }
 0x6c6   : > { %s1303_s9 = sadd.s32 %s5781_s8, %s1301_s12  ;;  %s307_s28 = sadd.s32 75, %s9382_s22 }
 0x6c7   : > { %s5782_s13 = sshll.u32 %s1303_s9, 4  ;;  %s10971_s23 = sld [smem:[#allocation5 + %s307_s28]] }
 0x6c8   : > { %s1305_s14 = scalar_lea.hbm %s12555_s1, %s5782_s13 }
 0x6c9   : > { %s7862_s26 = scalar_lea.hbm %s1305_s14, 32  ;;  %p7865_p9 = scmp.lt.s32.totalorder %s1305_s14, %s12555_s1 }
 0x6ca   : > { %p7863_p6 = scmp.ne.s32.totalorder %s1305_s14, %s7862_s26  ;;  %p7866_p10 = scmp.lt.s32.totalorder %s9405_s7, %s7862_s26 }
 0x6cc   : > { %p7867_p12 = por %p7866_p10, %p7865_p9 }
 0x6ce   : > { %p7868_p8 = pnand %p7867_p12, %p7863_p6 }
 0x6d0   : > { %7871 = shalt.err (!%p7868_p8)  }
 0x6d1   : > { %s7872_s6 = scalar_lea.vmem %s1309_s11, 32  ;;  %p7877_p0 = scmp.lt.s32.totalorder %s1309_s11, %s9389_s30 }
 0x6d2   : > { %p7873_p11 = scmp.ne.s32.totalorder %s1309_s11, %s7872_s6  ;;  %p7878_p1 = scmp.lt.s32.totalorder %s9414_s10, %s7872_s6 }
 0x6d4   : > { %p7879_p3 = por %p7878_p1, %p7877_p0 }
 0x6d6   : > { %p7880_p2 = pnand %p7879_p3, %p7873_p11 }
 0x6d8   : > { %7883 = shalt.err (!%p7880_p2)  }
 0x6d9   : > { %1311 = dma.hbm_to_vmem [thread:$0]  %s1305_s14, 32, %s1309_s11, [#allocation3], %s9131_s3, %s9131_s3, %s9132_s2 }
 0x6da   : > { %s309_s20 = sadd.s32 76, %s9382_s22  ;;  %s9206_s25 = smov [#allocation2 + $0x93]  }
 0x6db   : > { %s1320_s5 = sshll.u32 %s9206_s25, 4  ;;  %s10983_s18 = sld [smem:[#allocation5 + %s309_s20]]  ;;  %s10985_s5 = int_to_ptr.vmem [resolvable:$true] %s1320_s5 }
 0x6dc   : > { %s9207_s16 = smov [#allocation2 + $0x94]   ;;  %s311_s8 = sadd.s32 77, %s9382_s22 }
 0x6dd   : > { %s1332_s12 = sshll.u32 %s9207_s16, 4  ;;  %s1312_s9 = sshrl.u32 %s10971_s23, 3  ;;  %s10990_s12 = int_to_ptr.vmem [resolvable:$true] %s1332_s12 }
 0x6de   : > { %s1313_s13 = sand.u32 7, %s10971_s23   ;;  %s5783_s28 = sshll.u32 %s1312_s9, 4 }
 0x6df   : > { %s1315_s17 = sadd.s32 %s5783_s28, %s1313_s13  ;;  %s10992_s11 = sld [smem:[#allocation5 + %s311_s8]] }
 0x6e0   : > { %s5784_s15 = sshll.u32 %s1315_s17, 4 }
 0x6e1   : > { %s1324_s14 = sshrl.u32 %s10983_s18, 3  ;;  %s1317_s29 = scalar_lea.hbm %s12555_s1, %s5784_s15 }
 0x6e2   : > { %s1325_s6 = sand.u32 7, %s10983_s18   ;;  %s7884_s20 = scalar_lea.hbm %s1317_s29, 32 }
 0x6e3   : > { %p7885_p4 = scmp.ne.s32.totalorder %s1317_s29, %s7884_s20  ;;  %p7887_p13 = scmp.lt.s32.totalorder %s1317_s29, %s12555_s1 }
 0x6e4   : > { %p7888_p7 = scmp.lt.s32.totalorder %s9405_s7, %s7884_s20 }
 0x6e6   : > { %p7889_p6 = por %p7888_p7, %p7887_p13 }
 0x6e8   : > { %p7890_p9 = pnand %p7889_p6, %p7885_p4 }
 0x6ea   : > { %7893 = shalt.err (!%p7890_p9)  }
 0x6eb   : > { %s7894_s23 = scalar_lea.vmem %s10985_s5, 32  ;;  %p7899_p12 = scmp.lt.s32.totalorder %s10985_s5, %s9389_s30 }
 0x6ec   : > { %p7895_p10 = scmp.ne.s32.totalorder %s10985_s5, %s7894_s23  ;;  %p7900_p8 = scmp.lt.s32.totalorder %s9414_s10, %s7894_s23 }
 0x6ee   : > { %p7901_p11 = por %p7900_p8, %p7899_p12 }
 0x6f0   : > { %p7902_p0 = pnand %p7901_p11, %p7895_p10 }
 0x6f2   : > { %7905 = shalt.err (!%p7902_p0)  }
 0x6f3   : > { %1323 = dma.hbm_to_vmem [thread:$0]  %s1317_s29, 32, %s10985_s5, [#allocation3], %s9131_s3, %s9131_s3, %s9132_s2 }
 0x6f4   : > { %s5785_s18 = sshll.u32 %s1324_s14, 4  ;;  %s9208_s9 = smov [#allocation2 + $0x95]  }
 0x6f5   : > { %s1327_s8 = sadd.s32 %s5785_s18, %s1325_s6  ;;  %s1344_s13 = sshll.u32 %s9208_s9, 4  ;;  %s1345_s13 = int_to_ptr.vmem [resolvable:$true] %s1344_s13 }
 0x6f6   : > { %s5786_s28 = sshll.u32 %s1327_s8, 4  ;;  %s1336_s17 = sshrl.u32 %s10992_s11, 3 }
 0x6f7   : > { %s1329_s21 = scalar_lea.hbm %s12555_s1, %s5786_s28  ;;  %s1337_s20 = sand.u32 7, %s10992_s11  }
 0x6f8   : > { %s7906_s25 = scalar_lea.hbm %s1329_s21, 32  ;;  %p7909_p3 = scmp.lt.s32.totalorder %s1329_s21, %s12555_s1 }
 0x6f9   : > { %p7907_p1 = scmp.ne.s32.totalorder %s1329_s21, %s7906_s25  ;;  %p7910_p2 = scmp.lt.s32.totalorder %s9405_s7, %s7906_s25 }
 0x6fb   : > { %p7911_p4 = por %p7910_p2, %p7909_p3 }
 0x6fd   : > { %p7912_p13 = pnand %p7911_p4, %p7907_p1 }
 0x6ff   : > { %7915 = shalt.err (!%p7912_p13)  }
 0x700   : > { %s7916_s5 = scalar_lea.vmem %s10990_s12, 32  ;;  %p7921_p6 = scmp.lt.s32.totalorder %s10990_s12, %s9389_s30 }
 0x701   : > { %p7917_p7 = scmp.ne.s32.totalorder %s10990_s12, %s7916_s5  ;;  %p7922_p9 = scmp.lt.s32.totalorder %s9414_s10, %s7916_s5 }
 0x703   : > { %p7923_p10 = por %p7922_p9, %p7921_p6 }
 0x705   : > { %p7924_p12 = pnand %p7923_p10, %p7917_p7 }
 0x707   : > { %7927 = shalt.err (!%p7924_p12)  }
 0x708   : > { %1335 = dma.hbm_to_vmem [thread:$0]  %s1329_s21, 32, %s10990_s12, [#allocation3], %s9131_s3, %s9131_s3, %s9132_s2 }
 0x709   : > { %s5787_s11 = sshll.u32 %s1336_s17, 4  ;;  %s313_s29 = sadd.s32 78, %s9382_s22 }
 0x70a   : > { %s1339_s14 = sadd.s32 %s5787_s11, %s1337_s20  ;;  %s11031_s18 = sld [smem:[#allocation5 + %s313_s29]] }
 0x70b   : > { %s5788_s6 = sshll.u32 %s1339_s14, 4 }
 0x70c   : > { %s1341_s28 = scalar_lea.hbm %s12555_s1, %s5788_s6 }
 0x70d   : > { %s7928_s15 = scalar_lea.hbm %s1341_s28, 32  ;;  %p7931_p11 = scmp.lt.s32.totalorder %s1341_s28, %s12555_s1 }
 0x70e   : > { %p7929_p8 = scmp.ne.s32.totalorder %s1341_s28, %s7928_s15  ;;  %p7932_p0 = scmp.lt.s32.totalorder %s9405_s7, %s7928_s15 }
 0x710   : > { %p7933_p1 = por %p7932_p0, %p7931_p11 }
 0x712   : > { %p7934_p3 = pnand %p7933_p1, %p7929_p8 }
 0x714   : > { %7937 = shalt.err (!%p7934_p3)  }
 0x715   : > { %s7938_s12 = scalar_lea.vmem %s1345_s13, 32  ;;  %p7943_p4 = scmp.lt.s32.totalorder %s1345_s13, %s9389_s30 }
 0x716   : > { %p7939_p2 = scmp.ne.s32.totalorder %s1345_s13, %s7938_s12  ;;  %p7944_p13 = scmp.lt.s32.totalorder %s9414_s10, %s7938_s12 }
 0x718   : > { %p7945_p7 = por %p7944_p13, %p7943_p4 }
 0x71a   : > { %p7946_p6 = pnand %p7945_p7, %p7939_p2 }
 0x71c   : > { %7949 = shalt.err (!%p7946_p6)  }
 0x71d   : > { %1347 = dma.hbm_to_vmem [thread:$0]  %s1341_s28, 32, %s1345_s13, [#allocation3], %s9131_s3, %s9131_s3, %s9132_s2 }
 0x71e   : > { %s9209_s17 = smov [#allocation2 + $0x96]   ;;  %s315_s20 = sadd.s32 79, %s9382_s22 }
 0x71f   : > { %s1356_s21 = sshll.u32 %s9209_s17, 4  ;;  %s11048_s16 = sld [smem:[#allocation5 + %s315_s20]]  ;;  %s11046_s21 = int_to_ptr.vmem [resolvable:$true] %s1356_s21 }
 0x720   : > { %s317_s23 = sadd.s32 80, %s9382_s22  ;;  %s1348_s5 = sshrl.u32 %s11031_s18, 3 }
 0x721   : > { %s1349_s11 = sand.u32 7, %s11031_s18   ;;  %s5789_s14 = sshll.u32 %s1348_s5, 4 }
 0x722   : > { %s9210_s29 = smov [#allocation2 + $0x97]   ;;  %s1351_s8 = sadd.s32 %s5789_s14, %s1349_s11 }
 0x723   : > { %s1368_s6 = sshll.u32 %s9210_s29, 4  ;;  %s5790_s9 = sshll.u32 %s1351_s8, 4  ;;  %s11053_s6 = int_to_ptr.vmem [resolvable:$true] %s1368_s6 }
 0x724   : > { %s11055_s13 = sld [smem:[#allocation5 + %s317_s23]]  ;;  %s1353_s26 = scalar_lea.hbm %s12555_s1, %s5790_s9 }
 0x725   : > { %s1360_s25 = sshrl.u32 %s11048_s16, 3  ;;  %s7950_s12 = scalar_lea.hbm %s1353_s26, 32 }
 0x726   : > { %p7951_p9 = scmp.ne.s32.totalorder %s1353_s26, %s7950_s12  ;;  %p7953_p10 = scmp.lt.s32.totalorder %s1353_s26, %s12555_s1 }
 0x727   : > { %p7954_p12 = scmp.lt.s32.totalorder %s9405_s7, %s7950_s12 }
 0x729   : > { %p7955_p8 = por %p7954_p12, %p7953_p10 }
 0x72b   : > { %p7956_p11 = pnand %p7955_p8, %p7951_p9 }
 0x72d   : > { %7959 = shalt.err (!%p7956_p11)  }
 0x72e   : > { %s7960_s18 = scalar_lea.vmem %s11046_s21, 32  ;;  %p7965_p1 = scmp.lt.s32.totalorder %s11046_s21, %s9389_s30 }
 0x72f   : > { %p7961_p0 = scmp.ne.s32.totalorder %s11046_s21, %s7960_s18  ;;  %p7966_p3 = scmp.lt.s32.totalorder %s9414_s10, %s7960_s18 }
 0x731   : > { %p7967_p2 = por %p7966_p3, %p7965_p1 }
 0x733   : > { %p7968_p4 = pnand %p7967_p2, %p7961_p0 }
 0x735   : > { %7971 = shalt.err (!%p7968_p4)  }
 0x736   : > { %1359 = dma.hbm_to_vmem [thread:$0]  %s1353_s26, 32, %s11046_s21, [#allocation3], %s9131_s3, %s9131_s3, %s9132_s2 }
 0x737   : > { %s1361_s23 = sand.u32 7, %s11048_s16   ;;  %s5791_s5 = sshll.u32 %s1360_s25, 4 }
 0x738   : > { %s1363_s11 = sadd.s32 %s5791_s5, %s1361_s23  ;;  %s9211_s29 = smov [#allocation2 + $0xa0]  }
 0x739   : > { %s5792_s14 = sshll.u32 %s1363_s11, 4  ;;  %s1380_s8 = sshll.u32 %s9211_s29, 4  ;;  %s1381_s8 = int_to_ptr.vmem [resolvable:$true] %s1380_s8 }
 0x73a   : > { %s1365_s15 = scalar_lea.hbm %s12555_s1, %s5792_s14  ;;  %s1372_s12 = sshrl.u32 %s11055_s13, 3 }
 0x73b   : > { %s7972_s17 = scalar_lea.hbm %s1365_s15, 32  ;;  %p7975_p7 = scmp.lt.s32.totalorder %s1365_s15, %s12555_s1 }
 0x73c   : > { %p7973_p13 = scmp.ne.s32.totalorder %s1365_s15, %s7972_s17  ;;  %p7976_p6 = scmp.lt.s32.totalorder %s9405_s7, %s7972_s17 }
 0x73e   : > { %p7977_p9 = por %p7976_p6, %p7975_p7 }
 0x740   : > { %p7978_p10 = pnand %p7977_p9, %p7973_p13 }
 0x742   : > { %7981 = shalt.err (!%p7978_p10)  }
 0x743   : > { %s7982_s21 = scalar_lea.vmem %s11053_s6, 32  ;;  %p7987_p8 = scmp.lt.s32.totalorder %s11053_s6, %s9389_s30 }
 0x744   : > { %p7983_p12 = scmp.ne.s32.totalorder %s11053_s6, %s7982_s21  ;;  %p7988_p11 = scmp.lt.s32.totalorder %s9414_s10, %s7982_s21 }
 0x746   : > { %p7989_p0 = por %p7988_p11, %p7987_p8 }
 0x748   : > { %p7990_p1 = pnand %p7989_p0, %p7983_p12 }
 0x74a   : > { %7993 = shalt.err (!%p7990_p1)  }
 0x74b   : > { %1371 = dma.hbm_to_vmem [thread:$0]  %s1365_s15, 32, %s11053_s6, [#allocation3], %s9131_s3, %s9131_s3, %s9132_s2 }
 0x74c   : > { %s1373_s16 = sand.u32 7, %s11055_s13   ;;  %s5793_s26 = sshll.u32 %s1372_s12, 4 }
 0x74d   : > { %s1375_s25 = sadd.s32 %s5793_s26, %s1373_s16  ;;  %s319_s5 = sadd.s32 81, %s9382_s22 }
 0x74e   : > { %s5794_s23 = sshll.u32 %s1375_s25, 4  ;;  %s11097_s9 = sld [smem:[#allocation5 + %s319_s5]] }
 0x74f   : > { %s1377_s29 = scalar_lea.hbm %s12555_s1, %s5794_s23 }
 0x750   : > { %s7994_s28 = scalar_lea.hbm %s1377_s29, 32  ;;  %p7997_p2 = scmp.lt.s32.totalorder %s1377_s29, %s12555_s1 }
 0x751   : > { %p7995_p3 = scmp.ne.s32.totalorder %s1377_s29, %s7994_s28  ;;  %p7998_p4 = scmp.lt.s32.totalorder %s9405_s7, %s7994_s28 }
 0x753   : > { %p7999_p13 = por %p7998_p4, %p7997_p2 }
 0x755   : > { %p8000_p7 = pnand %p7999_p13, %p7995_p3 }
 0x757   : > { %8003 = shalt.err (!%p8000_p7)  }
 0x758   : > { %s8004_s6 = scalar_lea.vmem %s1381_s8, 32  ;;  %p8009_p9 = scmp.lt.s32.totalorder %s1381_s8, %s9389_s30 }
 0x759   : > { %p8005_p6 = scmp.ne.s32.totalorder %s1381_s8, %s8004_s6  ;;  %p8010_p10 = scmp.lt.s32.totalorder %s9414_s10, %s8004_s6 }
 0x75b   : > { %p8011_p12 = por %p8010_p10, %p8009_p9 }
 0x75d   : > { %p8012_p8 = pnand %p8011_p12, %p8005_p6 }
 0x75f   : > { %8015 = shalt.err (!%p8012_p8)  }
 0x760   : > { %1383 = dma.hbm_to_vmem [thread:$0]  %s1377_s29, 32, %s1381_s8, [#allocation3], %s9131_s3, %s9131_s3, %s9132_s2 }
 0x761   : > { %s321_s13 = sadd.s32 82, %s9382_s22  ;;  %s9212_s15 = smov [#allocation2 + $0xa1]  }
 0x762   : > { %s1392_s12 = sshll.u32 %s9212_s15, 4  ;;  %s11109_s18 = sld [smem:[#allocation5 + %s321_s13]]  ;;  %s11111_s12 = int_to_ptr.vmem [resolvable:$true] %s1392_s12 }
 0x763   : > { %s9213_s21 = smov [#allocation2 + $0xa2]   ;;  %s323_s26 = sadd.s32 83, %s9382_s22 }
 0x764   : > { %s1404_s16 = sshll.u32 %s9213_s21, 4  ;;  %s1384_s25 = sshrl.u32 %s11097_s9, 3  ;;  %s11116_s16 = int_to_ptr.vmem [resolvable:$true] %s1404_s16 }
 0x765   : > { %s1385_s23 = sand.u32 7, %s11097_s9   ;;  %s5795_s5 = sshll.u32 %s1384_s25, 4 }
 0x766   : > { %s1387_s11 = sadd.s32 %s5795_s5, %s1385_s23  ;;  %s11118_s8 = sld [smem:[#allocation5 + %s323_s26]] }
 0x767   : > { %s5796_s14 = sshll.u32 %s1387_s11, 4 }
 0x768   : > { %s1396_s29 = sshrl.u32 %s11109_s18, 3  ;;  %s1389_s20 = scalar_lea.hbm %s12555_s1, %s5796_s14 }
 0x769   : > { %s1397_s6 = sand.u32 7, %s11109_s18   ;;  %s8016_s13 = scalar_lea.hbm %s1389_s20, 32 }
 0x76a   : > { %p8017_p11 = scmp.ne.s32.totalorder %s1389_s20, %s8016_s13  ;;  %p8019_p0 = scmp.lt.s32.totalorder %s1389_s20, %s12555_s1 }
 0x76b   : > { %p8020_p1 = scmp.lt.s32.totalorder %s9405_s7, %s8016_s13 }
 0x76d   : > { %p8021_p3 = por %p8020_p1, %p8019_p0 }
 0x76f   : > { %p8022_p2 = pnand %p8021_p3, %p8017_p11 }
 0x771   : > { %8025 = shalt.err (!%p8022_p2)  }
 0x772   : > { %s8026_s9 = scalar_lea.vmem %s11111_s12, 32  ;;  %p8031_p13 = scmp.lt.s32.totalorder %s11111_s12, %s9389_s30 }
 0x773   : > { %p8027_p4 = scmp.ne.s32.totalorder %s11111_s12, %s8026_s9  ;;  %p8032_p7 = scmp.lt.s32.totalorder %s9414_s10, %s8026_s9 }
 0x775   : > { %p8033_p6 = por %p8032_p7, %p8031_p13 }
 0x777   : > { %p8034_p9 = pnand %p8033_p6, %p8027_p4 }
 0x779   : > { %8037 = shalt.err (!%p8034_p9)  }
 0x77a   : > { %1395 = dma.hbm_to_vmem [thread:$0]  %s1389_s20, 32, %s11111_s12, [#allocation3], %s9131_s3, %s9131_s3, %s9132_s2 }
 0x77b   : > { %s5797_s18 = sshll.u32 %s1396_s29, 4  ;;  %s9214_s25 = smov [#allocation2 + $0xa3]  }
 0x77c   : > { %s1399_s26 = sadd.s32 %s5797_s18, %s1397_s6  ;;  %s1416_s23 = sshll.u32 %s9214_s25, 4  ;;  %s1417_s23 = int_to_ptr.vmem [resolvable:$true] %s1416_s23 }
 0x77d   : > { %s5798_s5 = sshll.u32 %s1399_s26, 4  ;;  %s1408_s11 = sshrl.u32 %s11118_s8, 3 }
 0x77e   : > { %s1401_s17 = scalar_lea.hbm %s12555_s1, %s5798_s5  ;;  %s1409_s13 = sand.u32 7, %s11118_s8  }
 0x77f   : > { %s8038_s15 = scalar_lea.hbm %s1401_s17, 32  ;;  %p8041_p12 = scmp.lt.s32.totalorder %s1401_s17, %s12555_s1 }
 0x780   : > { %p8039_p10 = scmp.ne.s32.totalorder %s1401_s17, %s8038_s15  ;;  %p8042_p8 = scmp.lt.s32.totalorder %s9405_s7, %s8038_s15 }
 0x782   : > { %p8043_p11 = por %p8042_p8, %p8041_p12 }
 0x784   : > { %p8044_p0 = pnand %p8043_p11, %p8039_p10 }
 0x786   : > { %8047 = shalt.err (!%p8044_p0)  }
 0x787   : > { %s8048_s12 = scalar_lea.vmem %s11116_s16, 32  ;;  %p8053_p3 = scmp.lt.s32.totalorder %s11116_s16, %s9389_s30 }
 0x788   : > { %p8049_p1 = scmp.ne.s32.totalorder %s11116_s16, %s8048_s12  ;;  %p8054_p2 = scmp.lt.s32.totalorder %s9414_s10, %s8048_s12 }
 0x78a   : > { %p8055_p4 = por %p8054_p2, %p8053_p3 }
 0x78c   : > { %p8056_p13 = pnand %p8055_p4, %p8049_p1 }
 0x78e   : > { %8059 = shalt.err (!%p8056_p13)  }
 0x78f   : > { %1407 = dma.hbm_to_vmem [thread:$0]  %s1401_s17, 32, %s11116_s16, [#allocation3], %s9131_s3, %s9131_s3, %s9132_s2 }
 0x790   : > { %s5799_s8 = sshll.u32 %s1408_s11, 4  ;;  %s325_s20 = sadd.s32 84, %s9382_s22 }
 0x791   : > { %s1411_s29 = sadd.s32 %s5799_s8, %s1409_s13  ;;  %s11157_s18 = sld [smem:[#allocation5 + %s325_s20]] }
 0x792   : > { %s5800_s6 = sshll.u32 %s1411_s29, 4 }
 0x793   : > { %s1413_s5 = scalar_lea.hbm %s12555_s1, %s5800_s6 }
 0x794   : > { %s8060_s14 = scalar_lea.hbm %s1413_s5, 32  ;;  %p8063_p6 = scmp.lt.s32.totalorder %s1413_s5, %s12555_s1 }
 0x795   : > { %p8061_p7 = scmp.ne.s32.totalorder %s1413_s5, %s8060_s14  ;;  %p8064_p9 = scmp.lt.s32.totalorder %s9405_s7, %s8060_s14 }
 0x797   : > { %p8065_p10 = por %p8064_p9, %p8063_p6 }
 0x799   : > { %p8066_p12 = pnand %p8065_p10, %p8061_p7 }
 0x79b   : > { %8069 = shalt.err (!%p8066_p12)  }
 0x79c   : > { %s8070_s16 = scalar_lea.vmem %s1417_s23, 32  ;;  %p8075_p11 = scmp.lt.s32.totalorder %s1417_s23, %s9389_s30 }
 0x79d   : > { %p8071_p8 = scmp.ne.s32.totalorder %s1417_s23, %s8070_s16  ;;  %p8076_p0 = scmp.lt.s32.totalorder %s9414_s10, %s8070_s16 }
 0x79f   : > { %p8077_p1 = por %p8076_p0, %p8075_p11 }
 0x7a1   : > { %p8078_p3 = pnand %p8077_p1, %p8071_p8 }
 0x7a3   : > { %8081 = shalt.err (!%p8078_p3)  }
 0x7a4   : > { %1419 = dma.hbm_to_vmem [thread:$0]  %s1413_s5, 32, %s1417_s23, [#allocation3], %s9131_s3, %s9131_s3, %s9132_s2 }
 0x7a5   : > { %s9215_s11 = smov [#allocation2 + $0xa4]   ;;  %s327_s13 = sadd.s32 85, %s9382_s22 }
 0x7a6   : > { %s1428_s17 = sshll.u32 %s9215_s11, 4  ;;  %s11174_s21 = sld [smem:[#allocation5 + %s327_s13]]  ;;  %s11172_s17 = int_to_ptr.vmem [resolvable:$true] %s1428_s17 }
 0x7a7   : > { %s329_s9 = sadd.s32 86, %s9382_s22  ;;  %s1420_s12 = sshrl.u32 %s11157_s18, 3 }
 0x7a8   : > { %s1421_s8 = sand.u32 7, %s11157_s18   ;;  %s5801_s29 = sshll.u32 %s1420_s12, 4 }
 0x7a9   : > { %s9216_s20 = smov [#allocation2 + $0xa5]   ;;  %s1423_s26 = sadd.s32 %s5801_s29, %s1421_s8 }
 0x7aa   : > { %s1440_s6 = sshll.u32 %s9216_s20, 4  ;;  %s5802_s25 = sshll.u32 %s1423_s26, 4  ;;  %s11179_s6 = int_to_ptr.vmem [resolvable:$true] %s1440_s6 }
 0x7ab   : > { %s11181_s23 = sld [smem:[#allocation5 + %s329_s9]]  ;;  %s1425_s28 = scalar_lea.hbm %s12555_s1, %s5802_s25 }
 0x7ac   : > { %s1432_s15 = sshrl.u32 %s11174_s21, 3  ;;  %s8082_s16 = scalar_lea.hbm %s1425_s28, 32 }
 0x7ad   : > { %p8083_p2 = scmp.ne.s32.totalorder %s1425_s28, %s8082_s16  ;;  %p8085_p4 = scmp.lt.s32.totalorder %s1425_s28, %s12555_s1 }
 0x7ae   : > { %p8086_p13 = scmp.lt.s32.totalorder %s9405_s7, %s8082_s16 }
 0x7b0   : > { %p8087_p7 = por %p8086_p13, %p8085_p4 }
 0x7b2   : > { %p8088_p6 = pnand %p8087_p7, %p8083_p2 }
 0x7b4   : > { %8091 = shalt.err (!%p8088_p6)  }
 0x7b5   : > { %s8092_s18 = scalar_lea.vmem %s11172_s17, 32  ;;  %p8097_p10 = scmp.lt.s32.totalorder %s11172_s17, %s9389_s30 }
 0x7b6   : > { %p8093_p9 = scmp.ne.s32.totalorder %s11172_s17, %s8092_s18  ;;  %p8098_p12 = scmp.lt.s32.totalorder %s9414_s10, %s8092_s18 }
 0x7b8   : > { %p8099_p8 = por %p8098_p12, %p8097_p10 }
 0x7ba   : > { %p8100_p11 = pnand %p8099_p8, %p8093_p9 }
 0x7bc   : > { %8103 = shalt.err (!%p8100_p11)  }
 0x7bd   : > { %1431 = dma.hbm_to_vmem [thread:$0]  %s1425_s28, 32, %s11172_s17, [#allocation3], %s9131_s3, %s9131_s3, %s9132_s2 }
 0x7be   : > { %s1433_s9 = sand.u32 7, %s11174_s21   ;;  %s5803_s12 = sshll.u32 %s1432_s15, 4 }
 0x7bf   : > { %s1435_s8 = sadd.s32 %s5803_s12, %s1433_s9  ;;  %s9217_s20 = smov [#allocation2 + $0xa6]  }
 0x7c0   : > { %s5804_s29 = sshll.u32 %s1435_s8, 4  ;;  %s1452_s26 = sshll.u32 %s9217_s20, 4  ;;  %s1453_s26 = int_to_ptr.vmem [resolvable:$true] %s1452_s26 }
 0x7c1   : > { %s1437_s14 = scalar_lea.hbm %s12555_s1, %s5804_s29  ;;  %s1444_s16 = sshrl.u32 %s11181_s23, 3 }
 0x7c2   : > { %s8104_s11 = scalar_lea.hbm %s1437_s14, 32  ;;  %p8107_p1 = scmp.lt.s32.totalorder %s1437_s14, %s12555_s1 }
 0x7c3   : > { %p8105_p0 = scmp.ne.s32.totalorder %s1437_s14, %s8104_s11  ;;  %p8108_p3 = scmp.lt.s32.totalorder %s9405_s7, %s8104_s11 }
 0x7c5   : > { %p8109_p2 = por %p8108_p3, %p8107_p1 }
 0x7c7   : > { %p8110_p4 = pnand %p8109_p2, %p8105_p0 }
 0x7c9   : > { %8113 = shalt.err (!%p8110_p4)  }
 0x7ca   : > { %s8114_s17 = scalar_lea.vmem %s11179_s6, 32  ;;  %p8119_p7 = scmp.lt.s32.totalorder %s11179_s6, %s9389_s30 }
 0x7cb   : > { %p8115_p13 = scmp.ne.s32.totalorder %s11179_s6, %s8114_s17  ;;  %p8120_p6 = scmp.lt.s32.totalorder %s9414_s10, %s8114_s17 }
 0x7cd   : > { %p8121_p9 = por %p8120_p6, %p8119_p7 }
 0x7cf   : > { %p8122_p10 = pnand %p8121_p9, %p8115_p13 }
 0x7d1   : > { %8125 = shalt.err (!%p8122_p10)  }
 0x7d2   : > { %1443 = dma.hbm_to_vmem [thread:$0]  %s1437_s14, 32, %s11179_s6, [#allocation3], %s9131_s3, %s9131_s3, %s9132_s2 }
 0x7d3   : > { %s1445_s21 = sand.u32 7, %s11181_s23   ;;  %s5805_s28 = sshll.u32 %s1444_s16, 4 }
 0x7d4   : > { %s1447_s15 = sadd.s32 %s5805_s28, %s1445_s21  ;;  %s331_s12 = sadd.s32 87, %s9382_s22 }
 0x7d5   : > { %s5806_s9 = sshll.u32 %s1447_s15, 4  ;;  %s11223_s25 = sld [smem:[#allocation5 + %s331_s12]] }
 0x7d6   : > { %s1449_s20 = scalar_lea.hbm %s12555_s1, %s5806_s9 }
 0x7d7   : > { %s8126_s5 = scalar_lea.hbm %s1449_s20, 32  ;;  %p8129_p8 = scmp.lt.s32.totalorder %s1449_s20, %s12555_s1 }
 0x7d8   : > { %p8127_p12 = scmp.ne.s32.totalorder %s1449_s20, %s8126_s5  ;;  %p8130_p11 = scmp.lt.s32.totalorder %s9405_s7, %s8126_s5 }
 0x7da   : > { %p8131_p0 = por %p8130_p11, %p8129_p8 }
 0x7dc   : > { %p8132_p1 = pnand %p8131_p0, %p8127_p12 }
 0x7de   : > { %8135 = shalt.err (!%p8132_p1)  }
 0x7df   : > { %s8136_s6 = scalar_lea.vmem %s1453_s26, 32  ;;  %p8141_p2 = scmp.lt.s32.totalorder %s1453_s26, %s9389_s30 }
 0x7e0   : > { %p8137_p3 = scmp.ne.s32.totalorder %s1453_s26, %s8136_s6  ;;  %p8142_p4 = scmp.lt.s32.totalorder %s9414_s10, %s8136_s6 }
 0x7e2   : > { %p8143_p13 = por %p8142_p4, %p8141_p2 }
 0x7e4   : > { %p8144_p7 = pnand %p8143_p13, %p8137_p3 }
 0x7e6   : > { %8147 = shalt.err (!%p8144_p7)  }
 0x7e7   : > { %1455 = dma.hbm_to_vmem [thread:$0]  %s1449_s20, 32, %s1453_s26, [#allocation3], %s9131_s3, %s9131_s3, %s9132_s2 }
 0x7e8   : > { %s333_s23 = sadd.s32 88, %s9382_s22  ;;  %s9218_s14 = smov [#allocation2 + $0xa7]  }
 0x7e9   : > { %s1464_s16 = sshll.u32 %s9218_s14, 4  ;;  %s11235_s18 = sld [smem:[#allocation5 + %s333_s23]]  ;;  %s11237_s16 = int_to_ptr.vmem [resolvable:$true] %s1464_s16 }
 0x7ea   : > { %s9219_s17 = smov [#allocation2 + $0xb0]   ;;  %s335_s28 = sadd.s32 89, %s9382_s22 }
 0x7eb   : > { %s1476_s21 = sshll.u32 %s9219_s17, 4  ;;  %s1456_s15 = sshrl.u32 %s11223_s25, 3  ;;  %s11242_s21 = int_to_ptr.vmem [resolvable:$true] %s1476_s21 }
 0x7ec   : > { %s1457_s9 = sand.u32 7, %s11223_s25   ;;  %s5807_s12 = sshll.u32 %s1456_s15, 4 }
 0x7ed   : > { %s1459_s8 = sadd.s32 %s5807_s12, %s1457_s9  ;;  %s11244_s26 = sld [smem:[#allocation5 + %s335_s28]] }
 0x7ee   : > { %s5808_s29 = sshll.u32 %s1459_s8, 4 }
 0x7ef   : > { %s1468_s20 = sshrl.u32 %s11235_s18, 3  ;;  %s1461_s13 = scalar_lea.hbm %s12555_s1, %s5808_s29 }
 0x7f0   : > { %s1469_s6 = sand.u32 7, %s11235_s18   ;;  %s8148_s23 = scalar_lea.hbm %s1461_s13, 32 }
 0x7f1   : > { %p8149_p6 = scmp.ne.s32.totalorder %s1461_s13, %s8148_s23  ;;  %p8151_p9 = scmp.lt.s32.totalorder %s1461_s13, %s12555_s1 }
 0x7f2   : > { %p8152_p10 = scmp.lt.s32.totalorder %s9405_s7, %s8148_s23 }
 0x7f4   : > { %p8153_p12 = por %p8152_p10, %p8151_p9 }
 0x7f6   : > { %p8154_p8 = pnand %p8153_p12, %p8149_p6 }
 0x7f8   : > { %8157 = shalt.err (!%p8154_p8)  }
 0x7f9   : > { %s8158_s25 = scalar_lea.vmem %s11237_s16, 32  ;;  %p8163_p0 = scmp.lt.s32.totalorder %s11237_s16, %s9389_s30 }
 0x7fa   : > { %p8159_p11 = scmp.ne.s32.totalorder %s11237_s16, %s8158_s25  ;;  %p8164_p1 = scmp.lt.s32.totalorder %s9414_s10, %s8158_s25 }
 0x7fc   : > { %p8165_p3 = por %p8164_p1, %p8163_p0 }
 0x7fe   : > { %p8166_p2 = pnand %p8165_p3, %p8159_p11 }
 0x800   : > { %8169 = shalt.err (!%p8166_p2)  }
 0x801   : > { %1467 = dma.hbm_to_vmem [thread:$0]  %s1461_s13, 32, %s11237_s16, [#allocation3], %s9131_s3, %s9131_s3, %s9132_s2 }
 0x802   : > { %s5809_s18 = sshll.u32 %s1468_s20, 4  ;;  %s9220_s15 = smov [#allocation2 + $0xb1]  }
 0x803   : > { %s1471_s28 = sadd.s32 %s5809_s18, %s1469_s6  ;;  %s1488_s9 = sshll.u32 %s9220_s15, 4  ;;  %s1489_s9 = int_to_ptr.vmem [resolvable:$true] %s1488_s9 }
 0x804   : > { %s5810_s12 = sshll.u32 %s1471_s28, 4  ;;  %s1480_s8 = sshrl.u32 %s11244_s26, 3 }
 0x805   : > { %s1473_s11 = scalar_lea.hbm %s12555_s1, %s5810_s12  ;;  %s1481_s23 = sand.u32 7, %s11244_s26  }
 0x806   : > { %s8170_s14 = scalar_lea.hbm %s1473_s11, 32  ;;  %p8173_p13 = scmp.lt.s32.totalorder %s1473_s11, %s12555_s1 }
 0x807   : > { %p8171_p4 = scmp.ne.s32.totalorder %s1473_s11, %s8170_s14  ;;  %p8174_p7 = scmp.lt.s32.totalorder %s9405_s7, %s8170_s14 }
 0x809   : > { %p8175_p6 = por %p8174_p7, %p8173_p13 }
 0x80b   : > { %p8176_p9 = pnand %p8175_p6, %p8171_p4 }
 0x80d   : > { %8179 = shalt.err (!%p8176_p9)  }
 0x80e   : > { %s8180_s16 = scalar_lea.vmem %s11242_s21, 32  ;;  %p8185_p12 = scmp.lt.s32.totalorder %s11242_s21, %s9389_s30 }
 0x80f   : > { %p8181_p10 = scmp.ne.s32.totalorder %s11242_s21, %s8180_s16  ;;  %p8186_p8 = scmp.lt.s32.totalorder %s9414_s10, %s8180_s16 }
 0x811   : > { %p8187_p11 = por %p8186_p8, %p8185_p12 }
 0x813   : > { %p8188_p0 = pnand %p8187_p11, %p8181_p10 }
 0x815   : > { %8191 = shalt.err (!%p8188_p0)  }
 0x816   : > { %1479 = dma.hbm_to_vmem [thread:$0]  %s1473_s11, 32, %s11242_s21, [#allocation3], %s9131_s3, %s9131_s3, %s9132_s2 }
 0x817   : > { %s5811_s26 = sshll.u32 %s1480_s8, 4  ;;  %s337_s13 = sadd.s32 90, %s9382_s22 }
 0x818   : > { %s1483_s20 = sadd.s32 %s5811_s26, %s1481_s23  ;;  %s11283_s18 = sld [smem:[#allocation5 + %s337_s13]] }
 0x819   : > { %s5812_s6 = sshll.u32 %s1483_s20, 4 }
 0x81a   : > { %s1485_s12 = scalar_lea.hbm %s12555_s1, %s5812_s6 }
 0x81b   : > { %s8192_s29 = scalar_lea.hbm %s1485_s12, 32  ;;  %p8195_p3 = scmp.lt.s32.totalorder %s1485_s12, %s12555_s1 }
 0x81c   : > { %p8193_p1 = scmp.ne.s32.totalorder %s1485_s12, %s8192_s29  ;;  %p8196_p2 = scmp.lt.s32.totalorder %s9405_s7, %s8192_s29 }
 0x81e   : > { %p8197_p4 = por %p8196_p2, %p8195_p3 }
 0x820   : > { %p8198_p13 = pnand %p8197_p4, %p8193_p1 }
 0x822   : > { %8201 = shalt.err (!%p8198_p13)  }
 0x823   : > { %s8202_s21 = scalar_lea.vmem %s1489_s9, 32  ;;  %p8207_p6 = scmp.lt.s32.totalorder %s1489_s9, %s9389_s30 }
 0x824   : > { %p8203_p7 = scmp.ne.s32.totalorder %s1489_s9, %s8202_s21  ;;  %p8208_p9 = scmp.lt.s32.totalorder %s9414_s10, %s8202_s21 }
 0x826   : > { %p8209_p10 = por %p8208_p9, %p8207_p6 }
 0x828   : > { %p8210_p12 = pnand %p8209_p10, %p8203_p7 }
 0x82a   : > { %8213 = shalt.err (!%p8210_p12)  }
 0x82b   : > { %1491 = dma.hbm_to_vmem [thread:$0]  %s1485_s12, 32, %s1489_s9, [#allocation3], %s9131_s3, %s9131_s3, %s9132_s2 }
 0x82c   : > { %s9221_s8 = smov [#allocation2 + $0xb2]   ;;  %s339_s23 = sadd.s32 91, %s9382_s22 }
 0x82d   : > { %s1500_s11 = sshll.u32 %s9221_s8, 4  ;;  %s11300_s17 = sld [smem:[#allocation5 + %s339_s23]]  ;;  %s11298_s11 = int_to_ptr.vmem [resolvable:$true] %s1500_s11 }
 0x82e   : > { %s341_s25 = sadd.s32 92, %s9382_s22  ;;  %s1492_s16 = sshrl.u32 %s11283_s18, 3 }
 0x82f   : > { %s1493_s26 = sand.u32 7, %s11283_s18   ;;  %s5813_s20 = sshll.u32 %s1492_s16, 4 }
 0x830   : > { %s9222_s13 = smov [#allocation2 + $0xb3]   ;;  %s1495_s28 = sadd.s32 %s5813_s20, %s1493_s26 }
 0x831   : > { %s1512_s6 = sshll.u32 %s9222_s13, 4  ;;  %s5814_s15 = sshll.u32 %s1495_s28, 4  ;;  %s11305_s6 = int_to_ptr.vmem [resolvable:$true] %s1512_s6 }
 0x832   : > { %s11307_s9 = sld [smem:[#allocation5 + %s341_s25]]  ;;  %s1497_s5 = scalar_lea.hbm %s12555_s1, %s5814_s15 }
 0x833   : > { %s1504_s14 = sshrl.u32 %s11300_s17, 3  ;;  %s8214_s21 = scalar_lea.hbm %s1497_s5, 32 }
 0x834   : > { %p8215_p8 = scmp.ne.s32.totalorder %s1497_s5, %s8214_s21  ;;  %p8217_p11 = scmp.lt.s32.totalorder %s1497_s5, %s12555_s1 }
 0x835   : > { %p8218_p0 = scmp.lt.s32.totalorder %s9405_s7, %s8214_s21 }
 0x837   : > { %p8219_p1 = por %p8218_p0, %p8217_p11 }
 0x839   : > { %p8220_p3 = pnand %p8219_p1, %p8215_p8 }
 0x83b   : > { %8223 = shalt.err (!%p8220_p3)  }
 0x83c   : > { %s8224_s18 = scalar_lea.vmem %s11298_s11, 32  ;;  %p8229_p4 = scmp.lt.s32.totalorder %s11298_s11, %s9389_s30 }
 0x83d   : > { %p8225_p2 = scmp.ne.s32.totalorder %s11298_s11, %s8224_s18  ;;  %p8230_p13 = scmp.lt.s32.totalorder %s9414_s10, %s8224_s18 }
 0x83f   : > { %p8231_p7 = por %p8230_p13, %p8229_p4 }
 0x841   : > { %p8232_p6 = pnand %p8231_p7, %p8225_p2 }
 0x843   : > { %8235 = shalt.err (!%p8232_p6)  }
 0x844   : > { %1503 = dma.hbm_to_vmem [thread:$0]  %s1497_s5, 32, %s11298_s11, [#allocation3], %s9131_s3, %s9131_s3, %s9132_s2 }
 0x845   : > { %s1505_s25 = sand.u32 7, %s11300_s17   ;;  %s5815_s16 = sshll.u32 %s1504_s14, 4 }
 0x846   : > { %s1507_s26 = sadd.s32 %s5815_s16, %s1505_s25  ;;  %s9223_s13 = smov [#allocation2 + $0xb4]  }
 0x847   : > { %s5816_s20 = sshll.u32 %s1507_s26, 4  ;;  %s1524_s28 = sshll.u32 %s9223_s13, 4  ;;  %s1525_s28 = int_to_ptr.vmem [resolvable:$true] %s1524_s28 }
 0x848   : > { %s1509_s29 = scalar_lea.hbm %s12555_s1, %s5816_s20  ;;  %s1516_s21 = sshrl.u32 %s11307_s9, 3 }
 0x849   : > { %s8236_s8 = scalar_lea.hbm %s1509_s29, 32  ;;  %p8239_p10 = scmp.lt.s32.totalorder %s1509_s29, %s12555_s1 }
 0x84a   : > { %p8237_p9 = scmp.ne.s32.totalorder %s1509_s29, %s8236_s8  ;;  %p8240_p12 = scmp.lt.s32.totalorder %s9405_s7, %s8236_s8 }
 0x84c   : > { %p8241_p8 = por %p8240_p12, %p8239_p10 }
 0x84e   : > { %p8242_p11 = pnand %p8241_p8, %p8237_p9 }
 0x850   : > { %8245 = shalt.err (!%p8242_p11)  }
 0x851   : > { %s8246_s11 = scalar_lea.vmem %s11305_s6, 32  ;;  %p8251_p1 = scmp.lt.s32.totalorder %s11305_s6, %s9389_s30 }
 0x852   : > { %p8247_p0 = scmp.ne.s32.totalorder %s11305_s6, %s8246_s11  ;;  %p8252_p3 = scmp.lt.s32.totalorder %s9414_s10, %s8246_s11 }
 0x854   : > { %p8253_p2 = por %p8252_p3, %p8251_p1 }
 0x856   : > { %p8254_p4 = pnand %p8253_p2, %p8247_p0 }
 0x858   : > { %8257 = shalt.err (!%p8254_p4)  }
 0x859   : > { %1515 = dma.hbm_to_vmem [thread:$0]  %s1509_s29, 32, %s11305_s6, [#allocation3], %s9131_s3, %s9131_s3, %s9132_s2 }
 0x85a   : > { %s1517_s17 = sand.u32 7, %s11307_s9   ;;  %s5817_s5 = sshll.u32 %s1516_s21, 4 }
 0x85b   : > { %s1519_s14 = sadd.s32 %s5817_s5, %s1517_s17  ;;  %s343_s16 = sadd.s32 93, %s9382_s22 }
 0x85c   : > { %s5818_s25 = sshll.u32 %s1519_s14, 4  ;;  %s11349_s15 = sld [smem:[#allocation5 + %s343_s16]] }
 0x85d   : > { %s1521_s13 = scalar_lea.hbm %s12555_s1, %s5818_s25 }
 0x85e   : > { %s8258_s12 = scalar_lea.hbm %s1521_s13, 32  ;;  %p8261_p7 = scmp.lt.s32.totalorder %s1521_s13, %s12555_s1 }
 0x85f   : > { %p8259_p13 = scmp.ne.s32.totalorder %s1521_s13, %s8258_s12  ;;  %p8262_p6 = scmp.lt.s32.totalorder %s9405_s7, %s8258_s12 }
 0x861   : > { %p8263_p9 = por %p8262_p6, %p8261_p7 }
 0x863   : > { %p8264_p10 = pnand %p8263_p9, %p8259_p13 }
 0x865   : > { %8267 = shalt.err (!%p8264_p10)  }
 0x866   : > { %s8268_s6 = scalar_lea.vmem %s1525_s28, 32  ;;  %p8273_p8 = scmp.lt.s32.totalorder %s1525_s28, %s9389_s30 }
 0x867   : > { %p8269_p12 = scmp.ne.s32.totalorder %s1525_s28, %s8268_s6  ;;  %p8274_p11 = scmp.lt.s32.totalorder %s9414_s10, %s8268_s6 }
 0x869   : > { %p8275_p0 = por %p8274_p11, %p8273_p8 }
 0x86b   : > { %p8276_p1 = pnand %p8275_p0, %p8269_p12 }
 0x86d   : > { %8279 = shalt.err (!%p8276_p1)  }
 0x86e   : > { %1527 = dma.hbm_to_vmem [thread:$0]  %s1521_s13, 32, %s1525_s28, [#allocation3], %s9131_s3, %s9131_s3, %s9132_s2 }
 0x86f   : > { %s345_s9 = sadd.s32 94, %s9382_s22  ;;  %s9224_s29 = smov [#allocation2 + $0xb5]  }
 0x870   : > { %s1536_s21 = sshll.u32 %s9224_s29, 4  ;;  %s11361_s18 = sld [smem:[#allocation5 + %s345_s9]]  ;;  %s11363_s21 = int_to_ptr.vmem [resolvable:$true] %s1536_s21 }
 0x871   : > { %s9225_s11 = smov [#allocation2 + $0xb6]   ;;  %s347_s5 = sadd.s32 95, %s9382_s22 }
 0x872   : > { %s1548_s17 = sshll.u32 %s9225_s11, 4  ;;  %s1528_s14 = sshrl.u32 %s11349_s15, 3  ;;  %s11368_s17 = int_to_ptr.vmem [resolvable:$true] %s1548_s17 }
 0x873   : > { %s1529_s25 = sand.u32 7, %s11349_s15   ;;  %s5819_s16 = sshll.u32 %s1528_s14, 4 }
 0x874   : > { %s1531_s26 = sadd.s32 %s5819_s16, %s1529_s25  ;;  %s11370_s28 = sld [smem:[#allocation5 + %s347_s5]] }
 0x875   : > { %s5820_s20 = sshll.u32 %s1531_s26, 4 }
 0x876   : > { %s1540_s13 = sshrl.u32 %s11361_s18, 3  ;;  %s1533_s23 = scalar_lea.hbm %s12555_s1, %s5820_s20 }
 0x877   : > { %s1541_s6 = sand.u32 7, %s11361_s18   ;;  %s8280_s9 = scalar_lea.hbm %s1533_s23, 32 }
 0x878   : > { %p8281_p3 = scmp.ne.s32.totalorder %s1533_s23, %s8280_s9  ;;  %p8283_p2 = scmp.lt.s32.totalorder %s1533_s23, %s12555_s1 }
 0x879   : > { %p8284_p4 = scmp.lt.s32.totalorder %s9405_s7, %s8280_s9 }
 0x87b   : > { %p8285_p13 = por %p8284_p4, %p8283_p2 }
 0x87d   : > { %p8286_p7 = pnand %p8285_p13, %p8281_p3 }
 0x87f   : > { %8289 = shalt.err (!%p8286_p7)  }
 0x880   : > { %s8290_s15 = scalar_lea.vmem %s11363_s21, 32  ;;  %p8295_p9 = scmp.lt.s32.totalorder %s11363_s21, %s9389_s30 }
 0x881   : > { %p8291_p6 = scmp.ne.s32.totalorder %s11363_s21, %s8290_s15  ;;  %p8296_p10 = scmp.lt.s32.totalorder %s9414_s10, %s8290_s15 }
 0x883   : > { %p8297_p12 = por %p8296_p10, %p8295_p9 }
 0x885   : > { %p8298_p8 = pnand %p8297_p12, %p8291_p6 }
 0x887   : > { %8301 = shalt.err (!%p8298_p8)  }
 0x888   : > { %1539 = dma.hbm_to_vmem [thread:$0]  %s1533_s23, 32, %s11363_s21, [#allocation3], %s9131_s3, %s9131_s3, %s9132_s2 }
 0x889   : > { %s5821_s18 = sshll.u32 %s1540_s13, 4  ;;  %s9226_s14 = smov [#allocation2 + $0xb7]  }
 0x88a   : > { %s1543_s5 = sadd.s32 %s5821_s18, %s1541_s6  ;;  %s1560_s25 = sshll.u32 %s9226_s14, 4  ;;  %s1561_s25 = int_to_ptr.vmem [resolvable:$true] %s1560_s25 }
 0x88b   : > { %s5822_s16 = sshll.u32 %s1543_s5, 4  ;;  %s1552_s26 = sshrl.u32 %s11370_s28, 3 }
 0x88c   : > { %s1545_s8 = scalar_lea.hbm %s12555_s1, %s5822_s16  ;;  %s1553_s9 = sand.u32 7, %s11370_s28  }
 0x88d   : > { %s8302_s29 = scalar_lea.hbm %s1545_s8, 32  ;;  %p8305_p0 = scmp.lt.s32.totalorder %s1545_s8, %s12555_s1 }
 0x88e   : > { %p8303_p11 = scmp.ne.s32.totalorder %s1545_s8, %s8302_s29  ;;  %p8306_p1 = scmp.lt.s32.totalorder %s9405_s7, %s8302_s29 }
 0x890   : > { %p8307_p3 = por %p8306_p1, %p8305_p0 }
 0x892   : > { %p8308_p2 = pnand %p8307_p3, %p8303_p11 }
 0x894   : > { %8311 = shalt.err (!%p8308_p2)  }
 0x895   : > { %s8312_s21 = scalar_lea.vmem %s11368_s17, 32  ;;  %p8317_p13 = scmp.lt.s32.totalorder %s11368_s17, %s9389_s30 }
 0x896   : > { %p8313_p4 = scmp.ne.s32.totalorder %s11368_s17, %s8312_s21  ;;  %p8318_p7 = scmp.lt.s32.totalorder %s9414_s10, %s8312_s21 }
 0x898   : > { %p8319_p6 = por %p8318_p7, %p8317_p13 }
 0x89a   : > { %p8320_p9 = pnand %p8319_p6, %p8313_p4 }
 0x89c   : > { %8323 = shalt.err (!%p8320_p9)  }
 0x89d   : > { %1551 = dma.hbm_to_vmem [thread:$0]  %s1545_s8, 32, %s11368_s17, [#allocation3], %s9131_s3, %s9131_s3, %s9132_s2 }
 0x89e   : > { %s5823_s28 = sshll.u32 %s1552_s26, 4  ;;  %s349_s23 = sadd.s32 96, %s9382_s22 }
 0x89f   : > { %s1555_s13 = sadd.s32 %s5823_s28, %s1553_s9  ;;  %s11409_s18 = sld [smem:[#allocation5 + %s349_s23]] }
 0x8a0   : > { %s5824_s6 = sshll.u32 %s1555_s13, 4 }
 0x8a1   : > { %s1557_s16 = scalar_lea.hbm %s12555_s1, %s5824_s6 }
 0x8a2   : > { %s8324_s20 = scalar_lea.hbm %s1557_s16, 32  ;;  %p8327_p12 = scmp.lt.s32.totalorder %s1557_s16, %s12555_s1 }
 0x8a3   : > { %p8325_p10 = scmp.ne.s32.totalorder %s1557_s16, %s8324_s20  ;;  %p8328_p8 = scmp.lt.s32.totalorder %s9405_s7, %s8324_s20 }
 0x8a5   : > { %p8329_p11 = por %p8328_p8, %p8327_p12 }
 0x8a7   : > { %p8330_p0 = pnand %p8329_p11, %p8325_p10 }
 0x8a9   : > { %8333 = shalt.err (!%p8330_p0)  }
 0x8aa   : > { %s8334_s17 = scalar_lea.vmem %s1561_s25, 32  ;;  %p8339_p3 = scmp.lt.s32.totalorder %s1561_s25, %s9389_s30 }
 0x8ab   : > { %p8335_p1 = scmp.ne.s32.totalorder %s1561_s25, %s8334_s17  ;;  %p8340_p2 = scmp.lt.s32.totalorder %s9414_s10, %s8334_s17 }
 0x8ad   : > { %p8341_p4 = por %p8340_p2, %p8339_p3 }
 0x8af   : > { %p8342_p13 = pnand %p8341_p4, %p8335_p1 }
 0x8b1   : > { %8345 = shalt.err (!%p8342_p13)  }
 0x8b2   : > { %1563 = dma.hbm_to_vmem [thread:$0]  %s1557_s16, 32, %s1561_s25, [#allocation3], %s9131_s3, %s9131_s3, %s9132_s2 }
 0x8b3   : > { %s9227_s26 = smov [#allocation2 + $0xc0]   ;;  %s351_s9 = sadd.s32 97, %s9382_s22 }
 0x8b4   : > { %s1572_s8 = sshll.u32 %s9227_s26, 4  ;;  %s11426_s11 = sld [smem:[#allocation5 + %s351_s9]]  ;;  %s11424_s8 = int_to_ptr.vmem [resolvable:$true] %s1572_s8 }
 0x8b5   : > { %s353_s15 = sadd.s32 98, %s9382_s22  ;;  %s1564_s21 = sshrl.u32 %s11409_s18, 3 }
 0x8b6   : > { %s1565_s28 = sand.u32 7, %s11409_s18   ;;  %s5825_s13 = sshll.u32 %s1564_s21, 4 }
 0x8b7   : > { %s9228_s23 = smov [#allocation2 + $0xc1]   ;;  %s1567_s5 = sadd.s32 %s5825_s13, %s1565_s28 }
 0x8b8   : > { %s1584_s6 = sshll.u32 %s9228_s23, 4  ;;  %s5826_s14 = sshll.u32 %s1567_s5, 4  ;;  %s11431_s6 = int_to_ptr.vmem [resolvable:$true] %s1584_s6 }
 0x8b9   : > { %s11433_s25 = sld [smem:[#allocation5 + %s353_s15]]  ;;  %s1569_s12 = scalar_lea.hbm %s12555_s1, %s5826_s14 }
 0x8ba   : > { %s1576_s29 = sshrl.u32 %s11426_s11, 3  ;;  %s8346_s17 = scalar_lea.hbm %s1569_s12, 32 }
 0x8bb   : > { %p8347_p7 = scmp.ne.s32.totalorder %s1569_s12, %s8346_s17  ;;  %p8349_p6 = scmp.lt.s32.totalorder %s1569_s12, %s12555_s1 }
 0x8bc   : > { %p8350_p9 = scmp.lt.s32.totalorder %s9405_s7, %s8346_s17 }
 0x8be   : > { %p8351_p10 = por %p8350_p9, %p8349_p6 }
 0x8c0   : > { %p8352_p12 = pnand %p8351_p10, %p8347_p7 }
 0x8c2   : > { %8355 = shalt.err (!%p8352_p12)  }
 0x8c3   : > { %s8356_s18 = scalar_lea.vmem %s11424_s8, 32  ;;  %p8361_p11 = scmp.lt.s32.totalorder %s11424_s8, %s9389_s30 }
 0x8c4   : > { %p8357_p8 = scmp.ne.s32.totalorder %s11424_s8, %s8356_s18  ;;  %p8362_p0 = scmp.lt.s32.totalorder %s9414_s10, %s8356_s18 }
 0x8c6   : > { %p8363_p1 = por %p8362_p0, %p8361_p11 }
 0x8c8   : > { %p8364_p3 = pnand %p8363_p1, %p8357_p8 }
 0x8ca   : > { %8367 = shalt.err (!%p8364_p3)  }
 0x8cb   : > { %1575 = dma.hbm_to_vmem [thread:$0]  %s1569_s12, 32, %s11424_s8, [#allocation3], %s9131_s3, %s9131_s3, %s9132_s2 }
 0x8cc   : > { %s1577_s15 = sand.u32 7, %s11426_s11   ;;  %s5827_s21 = sshll.u32 %s1576_s29, 4 }
 0x8cd   : > { %s1579_s28 = sadd.s32 %s5827_s21, %s1577_s15  ;;  %s9229_s23 = smov [#allocation2 + $0xc2]  }
 0x8ce   : > { %s5828_s13 = sshll.u32 %s1579_s28, 4  ;;  %s1596_s5 = sshll.u32 %s9229_s23, 4  ;;  %s1597_s5 = int_to_ptr.vmem [resolvable:$true] %s1596_s5 }
 0x8cf   : > { %s1581_s20 = scalar_lea.hbm %s12555_s1, %s5828_s13  ;;  %s1588_s17 = sshrl.u32 %s11433_s25, 3 }
 0x8d0   : > { %s8368_s26 = scalar_lea.hbm %s1581_s20, 32  ;;  %p8371_p4 = scmp.lt.s32.totalorder %s1581_s20, %s12555_s1 }
 0x8d1   : > { %p8369_p2 = scmp.ne.s32.totalorder %s1581_s20, %s8368_s26  ;;  %p8372_p13 = scmp.lt.s32.totalorder %s9405_s7, %s8368_s26 }
 0x8d3   : > { %p8373_p7 = por %p8372_p13, %p8371_p4 }
 0x8d5   : > { %p8374_p6 = pnand %p8373_p7, %p8369_p2 }
 0x8d7   : > { %8377 = shalt.err (!%p8374_p6)  }
 0x8d8   : > { %s8378_s8 = scalar_lea.vmem %s11431_s6, 32  ;;  %p8383_p10 = scmp.lt.s32.totalorder %s11431_s6, %s9389_s30 }
 0x8d9   : > { %p8379_p9 = scmp.ne.s32.totalorder %s11431_s6, %s8378_s8  ;;  %p8384_p12 = scmp.lt.s32.totalorder %s9414_s10, %s8378_s8 }
 0x8db   : > { %p8385_p8 = por %p8384_p12, %p8383_p10 }
 0x8dd   : > { %p8386_p11 = pnand %p8385_p8, %p8379_p9 }
 0x8df   : > { %8389 = shalt.err (!%p8386_p11)  }
 0x8e0   : > { %1587 = dma.hbm_to_vmem [thread:$0]  %s1581_s20, 32, %s11431_s6, [#allocation3], %s9131_s3, %s9131_s3, %s9132_s2 }
 0x8e1   : > { %s1589_s11 = sand.u32 7, %s11433_s25   ;;  %s5829_s12 = sshll.u32 %s1588_s17, 4 }
 0x8e2   : > { %s1591_s29 = sadd.s32 %s5829_s12, %s1589_s11  ;;  %s355_s21 = sadd.s32 99, %s9382_s22 }
 0x8e3   : > { %s5830_s15 = sshll.u32 %s1591_s29, 4  ;;  %s11475_s14 = sld [smem:[#allocation5 + %s355_s21]] }
 0x8e4   : > { %s1593_s23 = scalar_lea.hbm %s12555_s1, %s5830_s15 }
 0x8e5   : > { %s8390_s16 = scalar_lea.hbm %s1593_s23, 32  ;;  %p8393_p1 = scmp.lt.s32.totalorder %s1593_s23, %s12555_s1 }
 0x8e6   : > { %p8391_p0 = scmp.ne.s32.totalorder %s1593_s23, %s8390_s16  ;;  %p8394_p3 = scmp.lt.s32.totalorder %s9405_s7, %s8390_s16 }
 0x8e8   : > { %p8395_p2 = por %p8394_p3, %p8393_p1 }
 0x8ea   : > { %p8396_p4 = pnand %p8395_p2, %p8391_p0 }
 0x8ec   : > { %8399 = shalt.err (!%p8396_p4)  }
 0x8ed   : > { %s8400_s6 = scalar_lea.vmem %s1597_s5, 32  ;;  %p8405_p7 = scmp.lt.s32.totalorder %s1597_s5, %s9389_s30 }
 0x8ee   : > { %p8401_p13 = scmp.ne.s32.totalorder %s1597_s5, %s8400_s6  ;;  %p8406_p6 = scmp.lt.s32.totalorder %s9414_s10, %s8400_s6 }
 0x8f0   : > { %p8407_p9 = por %p8406_p6, %p8405_p7 }
 0x8f2   : > { %p8408_p10 = pnand %p8407_p9, %p8401_p13 }
 0x8f4   : > { %8411 = shalt.err (!%p8408_p10)  }
 0x8f5   : > { %1599 = dma.hbm_to_vmem [thread:$0]  %s1593_s23, 32, %s1597_s5, [#allocation3], %s9131_s3, %s9131_s3, %s9132_s2 }
 0x8f6   : > { %s357_s25 = sadd.s32 100, %s9382_s22  ;;  %s9230_s20 = smov [#allocation2 + $0xc3]  }
 0x8f7   : > { %s1608_s17 = sshll.u32 %s9230_s20, 4  ;;  %s11487_s18 = sld [smem:[#allocation5 + %s357_s25]]  ;;  %s11489_s17 = int_to_ptr.vmem [resolvable:$true] %s1608_s17 }
 0x8f8   : > { %s9231_s8 = smov [#allocation2 + $0xc4]   ;;  %s359_s12 = sadd.s32 101, %s9382_s22 }
 0x8f9   : > { %s1620_s11 = sshll.u32 %s9231_s8, 4  ;;  %s1600_s29 = sshrl.u32 %s11475_s14, 3  ;;  %s11494_s11 = int_to_ptr.vmem [resolvable:$true] %s1620_s11 }
 0x8fa   : > { %s1601_s15 = sand.u32 7, %s11475_s14   ;;  %s5831_s21 = sshll.u32 %s1600_s29, 4 }
 0x8fb   : > { %s1603_s28 = sadd.s32 %s5831_s21, %s1601_s15  ;;  %s11496_s5 = sld [smem:[#allocation5 + %s359_s12]] }
 0x8fc   : > { %s5832_s13 = sshll.u32 %s1603_s28, 4 }
 0x8fd   : > { %s1612_s23 = sshrl.u32 %s11487_s18, 3  ;;  %s1605_s9 = scalar_lea.hbm %s12555_s1, %s5832_s13 }
 0x8fe   : > { %s1613_s6 = sand.u32 7, %s11487_s18   ;;  %s8412_s25 = scalar_lea.hbm %s1605_s9, 32 }
 0x8ff   : > { %p8413_p12 = scmp.ne.s32.totalorder %s1605_s9, %s8412_s25  ;;  %p8415_p8 = scmp.lt.s32.totalorder %s1605_s9, %s12555_s1 }
 0x900   : > { %p8416_p11 = scmp.lt.s32.totalorder %s9405_s7, %s8412_s25 }
 0x902   : > { %p8417_p0 = por %p8416_p11, %p8415_p8 }
 0x904   : > { %p8418_p1 = pnand %p8417_p0, %p8413_p12 }
 0x906   : > { %8421 = shalt.err (!%p8418_p1)  }
 0x907   : > { %s8422_s14 = scalar_lea.vmem %s11489_s17, 32  ;;  %p8427_p2 = scmp.lt.s32.totalorder %s11489_s17, %s9389_s30 }
 0x908   : > { %p8423_p3 = scmp.ne.s32.totalorder %s11489_s17, %s8422_s14  ;;  %p8428_p4 = scmp.lt.s32.totalorder %s9414_s10, %s8422_s14 }
 0x90a   : > { %p8429_p13 = por %p8428_p4, %p8427_p2 }
 0x90c   : > { %p8430_p7 = pnand %p8429_p13, %p8423_p3 }
 0x90e   : > { %8433 = shalt.err (!%p8430_p7)  }
 0x90f   : > { %1611 = dma.hbm_to_vmem [thread:$0]  %s1605_s9, 32, %s11489_s17, [#allocation3], %s9131_s3, %s9131_s3, %s9132_s2 }
 0x910   : > { %s5833_s18 = sshll.u32 %s1612_s23, 4  ;;  %s9232_s29 = smov [#allocation2 + $0xc5]  }
 0x911   : > { %s1615_s12 = sadd.s32 %s5833_s18, %s1613_s6  ;;  %s1632_s15 = sshll.u32 %s9232_s29, 4  ;;  %s1633_s15 = int_to_ptr.vmem [resolvable:$true] %s1632_s15 }
 0x912   : > { %s5834_s21 = sshll.u32 %s1615_s12, 4  ;;  %s1624_s28 = sshrl.u32 %s11496_s5, 3 }
 0x913   : > { %s1617_s26 = scalar_lea.hbm %s12555_s1, %s5834_s21  ;;  %s1625_s25 = sand.u32 7, %s11496_s5  }
 0x914   : > { %s8434_s20 = scalar_lea.hbm %s1617_s26, 32  ;;  %p8437_p9 = scmp.lt.s32.totalorder %s1617_s26, %s12555_s1 }
 0x915   : > { %p8435_p6 = scmp.ne.s32.totalorder %s1617_s26, %s8434_s20  ;;  %p8438_p10 = scmp.lt.s32.totalorder %s9405_s7, %s8434_s20 }
 0x917   : > { %p8439_p12 = por %p8438_p10, %p8437_p9 }
 0x919   : > { %p8440_p8 = pnand %p8439_p12, %p8435_p6 }
 0x91b   : > { %8443 = shalt.err (!%p8440_p8)  }
 0x91c   : > { %s8444_s17 = scalar_lea.vmem %s11494_s11, 32  ;;  %p8449_p0 = scmp.lt.s32.totalorder %s11494_s11, %s9389_s30 }
 0x91d   : > { %p8445_p11 = scmp.ne.s32.totalorder %s11494_s11, %s8444_s17  ;;  %p8450_p1 = scmp.lt.s32.totalorder %s9414_s10, %s8444_s17 }
 0x91f   : > { %p8451_p3 = por %p8450_p1, %p8449_p0 }
 0x921   : > { %p8452_p2 = pnand %p8451_p3, %p8445_p11 }
 0x923   : > { %8455 = shalt.err (!%p8452_p2)  }
 0x924   : > { %1623 = dma.hbm_to_vmem [thread:$0]  %s1617_s26, 32, %s11494_s11, [#allocation3], %s9131_s3, %s9131_s3, %s9132_s2 }
 0x925   : > { %s5835_s5 = sshll.u32 %s1624_s28, 4  ;;  %s361_s9 = sadd.s32 102, %s9382_s22 }
 0x926   : > { %s1627_s23 = sadd.s32 %s5835_s5, %s1625_s25  ;;  %s11535_s18 = sld [smem:[#allocation5 + %s361_s9]] }
 0x927   : > { %s5836_s6 = sshll.u32 %s1627_s23, 4 }
 0x928   : > { %s1629_s21 = scalar_lea.hbm %s12555_s1, %s5836_s6 }
 0x929   : > { %s8456_s13 = scalar_lea.hbm %s1629_s21, 32  ;;  %p8459_p13 = scmp.lt.s32.totalorder %s1629_s21, %s12555_s1 }
 0x92a   : > { %p8457_p4 = scmp.ne.s32.totalorder %s1629_s21, %s8456_s13  ;;  %p8460_p7 = scmp.lt.s32.totalorder %s9405_s7, %s8456_s13 }
 0x92c   : > { %p8461_p6 = por %p8460_p7, %p8459_p13 }
 0x92e   : > { %p8462_p9 = pnand %p8461_p6, %p8457_p4 }
 0x930   : > { %8465 = shalt.err (!%p8462_p9)  }
 0x931   : > { %s8466_s11 = scalar_lea.vmem %s1633_s15, 32  ;;  %p8471_p12 = scmp.lt.s32.totalorder %s1633_s15, %s9389_s30 }
 0x932   : > { %p8467_p10 = scmp.ne.s32.totalorder %s1633_s15, %s8466_s11  ;;  %p8472_p8 = scmp.lt.s32.totalorder %s9414_s10, %s8466_s11 }
 0x934   : > { %p8473_p11 = por %p8472_p8, %p8471_p12 }
 0x936   : > { %p8474_p0 = pnand %p8473_p11, %p8467_p10 }
 0x938   : > { %8477 = shalt.err (!%p8474_p0)  }
 0x939   : > { %1635 = dma.hbm_to_vmem [thread:$0]  %s1629_s21, 32, %s1633_s15, [#allocation3], %s9131_s3, %s9131_s3, %s9132_s2 }
 0x93a   : > { %s9233_s28 = smov [#allocation2 + $0xc6]   ;;  %s363_s25 = sadd.s32 103, %s9382_s22 }
 0x93b   : > { %s1644_s26 = sshll.u32 %s9233_s28, 4  ;;  %s11552_s8 = sld [smem:[#allocation5 + %s363_s25]]  ;;  %s11550_s26 = int_to_ptr.vmem [resolvable:$true] %s1644_s26 }
 0x93c   : > { %s365_s14 = sadd.s32 104, %s9382_s22  ;;  %s1636_s17 = sshrl.u32 %s11535_s18, 3 }
 0x93d   : > { %s1637_s5 = sand.u32 7, %s11535_s18   ;;  %s5837_s23 = sshll.u32 %s1636_s17, 4 }
 0x93e   : > { %s9234_s9 = smov [#allocation2 + $0xc7]   ;;  %s1639_s12 = sadd.s32 %s5837_s23, %s1637_s5 }
 0x93f   : > { %s1656_s6 = sshll.u32 %s9234_s9, 4  ;;  %s5838_s29 = sshll.u32 %s1639_s12, 4  ;;  %s11557_s6 = int_to_ptr.vmem [resolvable:$true] %s1656_s6 }
 0x940   : > { %s11559_s15 = sld [smem:[#allocation5 + %s365_s14]]  ;;  %s1641_s16 = scalar_lea.hbm %s12555_s1, %s5838_s29 }
 0x941   : > { %s1648_s20 = sshrl.u32 %s11552_s8, 3  ;;  %s8478_s11 = scalar_lea.hbm %s1641_s16, 32 }
 0x942   : > { %p8479_p1 = scmp.ne.s32.totalorder %s1641_s16, %s8478_s11  ;;  %p8481_p3 = scmp.lt.s32.totalorder %s1641_s16, %s12555_s1 }
 0x943   : > { %p8482_p2 = scmp.lt.s32.totalorder %s9405_s7, %s8478_s11 }
 0x945   : > { %p8483_p4 = por %p8482_p2, %p8481_p3 }
 0x947   : > { %p8484_p13 = pnand %p8483_p4, %p8479_p1 }
 0x949   : > { %8487 = shalt.err (!%p8484_p13)  }
 0x94a   : > { %s8488_s18 = scalar_lea.vmem %s11550_s26, 32  ;;  %p8493_p6 = scmp.lt.s32.totalorder %s11550_s26, %s9389_s30 }
 0x94b   : > { %p8489_p7 = scmp.ne.s32.totalorder %s11550_s26, %s8488_s18  ;;  %p8494_p9 = scmp.lt.s32.totalorder %s9414_s10, %s8488_s18 }
 0x94d   : > { %p8495_p10 = por %p8494_p9, %p8493_p6 }
 0x94f   : > { %p8496_p12 = pnand %p8495_p10, %p8489_p7 }
 0x951   : > { %8499 = shalt.err (!%p8496_p12)  }
 0x952   : > { %1647 = dma.hbm_to_vmem [thread:$0]  %s1641_s16, 32, %s11550_s26, [#allocation3], %s9131_s3, %s9131_s3, %s9132_s2 }
 0x953   : > { %s1649_s14 = sand.u32 7, %s11552_s8   ;;  %s5839_s17 = sshll.u32 %s1648_s20, 4 }
 0x954   : > { %s1651_s5 = sadd.s32 %s5839_s17, %s1649_s14  ;;  %s9235_s9 = smov [#allocation2 + $0xd0]  }
 0x955   : > { %s5840_s23 = sshll.u32 %s1651_s5, 4  ;;  %s1668_s12 = sshll.u32 %s9235_s9, 4  ;;  %s1669_s12 = int_to_ptr.vmem [resolvable:$true] %s1668_s12 }
 0x956   : > { %s1653_s13 = scalar_lea.hbm %s12555_s1, %s5840_s23  ;;  %s1660_s11 = sshrl.u32 %s11559_s15, 3 }
 0x957   : > { %s8500_s28 = scalar_lea.hbm %s1653_s13, 32  ;;  %p8503_p11 = scmp.lt.s32.totalorder %s1653_s13, %s12555_s1 }
 0x958   : > { %p8501_p8 = scmp.ne.s32.totalorder %s1653_s13, %s8500_s28  ;;  %p8504_p0 = scmp.lt.s32.totalorder %s9405_s7, %s8500_s28 }
 0x95a   : > { %p8505_p1 = por %p8504_p0, %p8503_p11 }
 0x95c   : > { %p8506_p3 = pnand %p8505_p1, %p8501_p8 }
 0x95e   : > { %8509 = shalt.err (!%p8506_p3)  }
 0x95f   : > { %s8510_s26 = scalar_lea.vmem %s11557_s6, 32  ;;  %p8515_p4 = scmp.lt.s32.totalorder %s11557_s6, %s9389_s30 }
 0x960   : > { %p8511_p2 = scmp.ne.s32.totalorder %s11557_s6, %s8510_s26  ;;  %p8516_p13 = scmp.lt.s32.totalorder %s9414_s10, %s8510_s26 }
 0x962   : > { %p8517_p7 = por %p8516_p13, %p8515_p4 }
 0x964   : > { %p8518_p6 = pnand %p8517_p7, %p8511_p2 }
 0x966   : > { %8521 = shalt.err (!%p8518_p6)  }
 0x967   : > { %1659 = dma.hbm_to_vmem [thread:$0]  %s1653_s13, 32, %s11557_s6, [#allocation3], %s9131_s3, %s9131_s3, %s9132_s2 }
 0x968   : > { %s1661_s8 = sand.u32 7, %s11559_s15   ;;  %s5841_s16 = sshll.u32 %s1660_s11, 4 }
 0x969   : > { %s1663_s20 = sadd.s32 %s5841_s16, %s1661_s8  ;;  %s367_s17 = sadd.s32 105, %s9382_s22 }
 0x96a   : > { %s5842_s14 = sshll.u32 %s1663_s20, 4  ;;  %s11601_s29 = sld [smem:[#allocation5 + %s367_s17]] }
 0x96b   : > { %s1665_s9 = scalar_lea.hbm %s12555_s1, %s5842_s14 }
 0x96c   : > { %s8522_s21 = scalar_lea.hbm %s1665_s9, 32  ;;  %p8525_p10 = scmp.lt.s32.totalorder %s1665_s9, %s12555_s1 }
 0x96d   : > { %p8523_p9 = scmp.ne.s32.totalorder %s1665_s9, %s8522_s21  ;;  %p8526_p12 = scmp.lt.s32.totalorder %s9405_s7, %s8522_s21 }
 0x96f   : > { %p8527_p8 = por %p8526_p12, %p8525_p10 }
 0x971   : > { %p8528_p11 = pnand %p8527_p8, %p8523_p9 }
 0x973   : > { %8531 = shalt.err (!%p8528_p11)  }
 0x974   : > { %s8532_s6 = scalar_lea.vmem %s1669_s12, 32  ;;  %p8537_p1 = scmp.lt.s32.totalorder %s1669_s12, %s9389_s30 }
 0x975   : > { %p8533_p0 = scmp.ne.s32.totalorder %s1669_s12, %s8532_s6  ;;  %p8538_p3 = scmp.lt.s32.totalorder %s9414_s10, %s8532_s6 }
 0x977   : > { %p8539_p2 = por %p8538_p3, %p8537_p1 }
 0x979   : > { %p8540_p4 = pnand %p8539_p2, %p8533_p0 }
 0x97b   : > { %8543 = shalt.err (!%p8540_p4)  }
 0x97c   : > { %1671 = dma.hbm_to_vmem [thread:$0]  %s1665_s9, 32, %s1669_s12, [#allocation3], %s9131_s3, %s9131_s3, %s9132_s2 }
 0x97d   : > { %s369_s15 = sadd.s32 106, %s9382_s22  ;;  %s9236_s13 = smov [#allocation2 + $0xd1]  }
 0x97e   : > { %s1680_s11 = sshll.u32 %s9236_s13, 4  ;;  %s11613_s18 = sld [smem:[#allocation5 + %s369_s15]]  ;;  %s11615_s11 = int_to_ptr.vmem [resolvable:$true] %s1680_s11 }
 0x97f   : > { %s9237_s26 = smov [#allocation2 + $0xd2]   ;;  %s371_s16 = sadd.s32 107, %s9382_s22 }
 0x980   : > { %s1692_s8 = sshll.u32 %s9237_s26, 4  ;;  %s1672_s20 = sshrl.u32 %s11601_s29, 3  ;;  %s11620_s8 = int_to_ptr.vmem [resolvable:$true] %s1692_s8 }
 0x981   : > { %s1673_s14 = sand.u32 7, %s11601_s29   ;;  %s5843_s17 = sshll.u32 %s1672_s20, 4 }
 0x982   : > { %s1675_s5 = sadd.s32 %s5843_s17, %s1673_s14  ;;  %s11622_s12 = sld [smem:[#allocation5 + %s371_s16]] }
 0x983   : > { %s5844_s23 = sshll.u32 %s1675_s5, 4 }
 0x984   : > { %s1684_s9 = sshrl.u32 %s11613_s18, 3  ;;  %s1677_s25 = scalar_lea.hbm %s12555_s1, %s5844_s23 }
 0x985   : > { %s1685_s6 = sand.u32 7, %s11613_s18   ;;  %s8544_s15 = scalar_lea.hbm %s1677_s25, 32 }
 0x986   : > { %p8545_p13 = scmp.ne.s32.totalorder %s1677_s25, %s8544_s15  ;;  %p8547_p7 = scmp.lt.s32.totalorder %s1677_s25, %s12555_s1 }
 0x987   : > { %p8548_p6 = scmp.lt.s32.totalorder %s9405_s7, %s8544_s15 }
 0x989   : > { %p8549_p9 = por %p8548_p6, %p8547_p7 }
 0x98b   : > { %p8550_p10 = pnand %p8549_p9, %p8545_p13 }
 0x98d   : > { %8553 = shalt.err (!%p8550_p10)  }
 0x98e   : > { %s8554_s29 = scalar_lea.vmem %s11615_s11, 32  ;;  %p8559_p8 = scmp.lt.s32.totalorder %s11615_s11, %s9389_s30 }
 0x98f   : > { %p8555_p12 = scmp.ne.s32.totalorder %s11615_s11, %s8554_s29  ;;  %p8560_p11 = scmp.lt.s32.totalorder %s9414_s10, %s8554_s29 }
 0x991   : > { %p8561_p0 = por %p8560_p11, %p8559_p8 }
 0x993   : > { %p8562_p1 = pnand %p8561_p0, %p8555_p12 }
 0x995   : > { %8565 = shalt.err (!%p8562_p1)  }
 0x996   : > { %1683 = dma.hbm_to_vmem [thread:$0]  %s1677_s25, 32, %s11615_s11, [#allocation3], %s9131_s3, %s9131_s3, %s9132_s2 }
 0x997   : > { %s5845_s18 = sshll.u32 %s1684_s9, 4  ;;  %s9238_s20 = smov [#allocation2 + $0xd3]  }
 0x998   : > { %s1687_s16 = sadd.s32 %s5845_s18, %s1685_s6  ;;  %s1704_s14 = sshll.u32 %s9238_s20, 4  ;;  %s1705_s14 = int_to_ptr.vmem [resolvable:$true] %s1704_s14 }
 0x999   : > { %s5846_s17 = sshll.u32 %s1687_s16, 4  ;;  %s1696_s5 = sshrl.u32 %s11622_s12, 3 }
 0x99a   : > { %s1689_s28 = scalar_lea.hbm %s12555_s1, %s5846_s17  ;;  %s1697_s15 = sand.u32 7, %s11622_s12  }
 0x99b   : > { %s8566_s13 = scalar_lea.hbm %s1689_s28, 32  ;;  %p8569_p2 = scmp.lt.s32.totalorder %s1689_s28, %s12555_s1 }
 0x99c   : > { %p8567_p3 = scmp.ne.s32.totalorder %s1689_s28, %s8566_s13  ;;  %p8570_p4 = scmp.lt.s32.totalorder %s9405_s7, %s8566_s13 }
 0x99e   : > { %p8571_p13 = por %p8570_p4, %p8569_p2 }
 0x9a0   : > { %p8572_p7 = pnand %p8571_p13, %p8567_p3 }
 0x9a2   : > { %8575 = shalt.err (!%p8572_p7)  }
 0x9a3   : > { %s8576_s11 = scalar_lea.vmem %s11620_s8, 32  ;;  %p8581_p9 = scmp.lt.s32.totalorder %s11620_s8, %s9389_s30 }
 0x9a4   : > { %p8577_p6 = scmp.ne.s32.totalorder %s11620_s8, %s8576_s11  ;;  %p8582_p10 = scmp.lt.s32.totalorder %s9414_s10, %s8576_s11 }
 0x9a6   : > { %p8583_p12 = por %p8582_p10, %p8581_p9 }
 0x9a8   : > { %p8584_p8 = pnand %p8583_p12, %p8577_p6 }
 0x9aa   : > { %8587 = shalt.err (!%p8584_p8)  }
 0x9ab   : > { %1695 = dma.hbm_to_vmem [thread:$0]  %s1689_s28, 32, %s11620_s8, [#allocation3], %s9131_s3, %s9131_s3, %s9132_s2 }
 0x9ac   : > { %s5847_s12 = sshll.u32 %s1696_s5, 4  ;;  %s373_s25 = sadd.s32 108, %s9382_s22 }
 0x9ad   : > { %s1699_s9 = sadd.s32 %s5847_s12, %s1697_s15  ;;  %s11661_s18 = sld [smem:[#allocation5 + %s373_s25]] }
 0x9ae   : > { %s5848_s6 = sshll.u32 %s1699_s9, 4 }
 0x9af   : > { %s1701_s17 = scalar_lea.hbm %s12555_s1, %s5848_s6 }
 0x9b0   : > { %s8588_s23 = scalar_lea.hbm %s1701_s17, 32  ;;  %p8591_p0 = scmp.lt.s32.totalorder %s1701_s17, %s12555_s1 }
 0x9b1   : > { %p8589_p11 = scmp.ne.s32.totalorder %s1701_s17, %s8588_s23  ;;  %p8592_p1 = scmp.lt.s32.totalorder %s9405_s7, %s8588_s23 }
 0x9b3   : > { %p8593_p3 = por %p8592_p1, %p8591_p0 }
 0x9b5   : > { %p8594_p2 = pnand %p8593_p3, %p8589_p11 }
 0x9b7   : > { %8597 = shalt.err (!%p8594_p2)  }
 0x9b8   : > { %s8598_s8 = scalar_lea.vmem %s1705_s14, 32  ;;  %p8603_p13 = scmp.lt.s32.totalorder %s1705_s14, %s9389_s30 }
 0x9b9   : > { %p8599_p4 = scmp.ne.s32.totalorder %s1705_s14, %s8598_s8  ;;  %p8604_p7 = scmp.lt.s32.totalorder %s9414_s10, %s8598_s8 }
 0x9bb   : > { %p8605_p6 = por %p8604_p7, %p8603_p13 }
 0x9bd   : > { %p8606_p9 = pnand %p8605_p6, %p8599_p4 }
 0x9bf   : > { %8609 = shalt.err (!%p8606_p9)  }
 0x9c0   : > { %1707 = dma.hbm_to_vmem [thread:$0]  %s1701_s17, 32, %s1705_s14, [#allocation3], %s9131_s3, %s9131_s3, %s9132_s2 }
 0x9c1   : > { %s9239_s5 = smov [#allocation2 + $0xd4]   ;;  %s375_s15 = sadd.s32 109, %s9382_s22 }
 0x9c2   : > { %s1716_s28 = sshll.u32 %s9239_s5, 4  ;;  %s11678_s26 = sld [smem:[#allocation5 + %s375_s15]]  ;;  %s11676_s28 = int_to_ptr.vmem [resolvable:$true] %s1716_s28 }
 0x9c3   : > { %s377_s29 = sadd.s32 110, %s9382_s22  ;;  %s1708_s11 = sshrl.u32 %s11661_s18, 3 }
 0x9c4   : > { %s1709_s12 = sand.u32 7, %s11661_s18   ;;  %s5849_s9 = sshll.u32 %s1708_s11, 4 }
 0x9c5   : > { %s9240_s25 = smov [#allocation2 + $0xd5]   ;;  %s1711_s16 = sadd.s32 %s5849_s9, %s1709_s12 }
 0x9c6   : > { %s1728_s6 = sshll.u32 %s9240_s25, 4  ;;  %s5850_s20 = sshll.u32 %s1711_s16, 4  ;;  %s11683_s6 = int_to_ptr.vmem [resolvable:$true] %s1728_s6 }
 0x9c7   : > { %s11685_s14 = sld [smem:[#allocation5 + %s377_s29]]  ;;  %s1713_s21 = scalar_lea.hbm %s12555_s1, %s5850_s20 }
 0x9c8   : > { %s1720_s13 = sshrl.u32 %s11678_s26, 3  ;;  %s8610_s8 = scalar_lea.hbm %s1713_s21, 32 }
 0x9c9   : > { %p8611_p10 = scmp.ne.s32.totalorder %s1713_s21, %s8610_s8  ;;  %p8613_p12 = scmp.lt.s32.totalorder %s1713_s21, %s12555_s1 }
 0x9ca   : > { %p8614_p8 = scmp.lt.s32.totalorder %s9405_s7, %s8610_s8 }
 0x9cc   : > { %p8615_p11 = por %p8614_p8, %p8613_p12 }
 0x9ce   : > { %p8616_p0 = pnand %p8615_p11, %p8611_p10 }
 0x9d0   : > { %8619 = shalt.err (!%p8616_p0)  }
 0x9d1   : > { %s8620_s18 = scalar_lea.vmem %s11676_s28, 32  ;;  %p8625_p3 = scmp.lt.s32.totalorder %s11676_s28, %s9389_s30 }
 0x9d2   : > { %p8621_p1 = scmp.ne.s32.totalorder %s11676_s28, %s8620_s18  ;;  %p8626_p2 = scmp.lt.s32.totalorder %s9414_s10, %s8620_s18 }
 0x9d4   : > { %p8627_p4 = por %p8626_p2, %p8625_p3 }
 0x9d6   : > { %p8628_p13 = pnand %p8627_p4, %p8621_p1 }
 0x9d8   : > { %8631 = shalt.err (!%p8628_p13)  }
 0x9d9   : > { %1719 = dma.hbm_to_vmem [thread:$0]  %s1713_s21, 32, %s11676_s28, [#allocation3], %s9131_s3, %s9131_s3, %s9132_s2 }
 0x9da   : > { %s1721_s29 = sand.u32 7, %s11678_s26   ;;  %s5851_s11 = sshll.u32 %s1720_s13, 4 }
 0x9db   : > { %s1723_s12 = sadd.s32 %s5851_s11, %s1721_s29  ;;  %s9241_s25 = smov [#allocation2 + $0xd6]  }
 0x9dc   : > { %s5852_s9 = sshll.u32 %s1723_s12, 4  ;;  %s1740_s16 = sshll.u32 %s9241_s25, 4  ;;  %s1741_s16 = int_to_ptr.vmem [resolvable:$true] %s1740_s16 }
 0x9dd   : > { %s1725_s23 = scalar_lea.hbm %s12555_s1, %s5852_s9  ;;  %s1732_s8 = sshrl.u32 %s11685_s14, 3 }
 0x9de   : > { %s8632_s5 = scalar_lea.hbm %s1725_s23, 32  ;;  %p8635_p6 = scmp.lt.s32.totalorder %s1725_s23, %s12555_s1 }
 0x9df   : > { %p8633_p7 = scmp.ne.s32.totalorder %s1725_s23, %s8632_s5  ;;  %p8636_p9 = scmp.lt.s32.totalorder %s9405_s7, %s8632_s5 }
 0x9e1   : > { %p8637_p10 = por %p8636_p9, %p8635_p6 }
 0x9e3   : > { %p8638_p12 = pnand %p8637_p10, %p8633_p7 }
 0x9e5   : > { %8641 = shalt.err (!%p8638_p12)  }
 0x9e6   : > { %s8642_s28 = scalar_lea.vmem %s11683_s6, 32  ;;  %p8647_p11 = scmp.lt.s32.totalorder %s11683_s6, %s9389_s30 }
 0x9e7   : > { %p8643_p8 = scmp.ne.s32.totalorder %s11683_s6, %s8642_s28  ;;  %p8648_p0 = scmp.lt.s32.totalorder %s9414_s10, %s8642_s28 }
 0x9e9   : > { %p8649_p1 = por %p8648_p0, %p8647_p11 }
 0x9eb   : > { %p8650_p3 = pnand %p8649_p1, %p8643_p8 }
 0x9ed   : > { %8653 = shalt.err (!%p8650_p3)  }
 0x9ee   : > { %1731 = dma.hbm_to_vmem [thread:$0]  %s1725_s23, 32, %s11683_s6, [#allocation3], %s9131_s3, %s9131_s3, %s9132_s2 }
 0x9ef   : > { %s1733_s26 = sand.u32 7, %s11685_s14   ;;  %s5853_s21 = sshll.u32 %s1732_s8, 4 }
 0x9f0   : > { %s1735_s13 = sadd.s32 %s5853_s21, %s1733_s26  ;;  %s379_s11 = sadd.s32 111, %s9382_s22 }
 0x9f1   : > { %s5854_s29 = sshll.u32 %s1735_s13, 4  ;;  %s11727_s20 = sld [smem:[#allocation5 + %s379_s11]] }
 0x9f2   : > { %s1737_s25 = scalar_lea.hbm %s12555_s1, %s5854_s29 }
 0x9f3   : > { %s8654_s17 = scalar_lea.hbm %s1737_s25, 32  ;;  %p8657_p4 = scmp.lt.s32.totalorder %s1737_s25, %s12555_s1 }
 0x9f4   : > { %p8655_p2 = scmp.ne.s32.totalorder %s1737_s25, %s8654_s17  ;;  %p8658_p13 = scmp.lt.s32.totalorder %s9405_s7, %s8654_s17 }
 0x9f6   : > { %p8659_p7 = por %p8658_p13, %p8657_p4 }
 0x9f8   : > { %p8660_p6 = pnand %p8659_p7, %p8655_p2 }
 0x9fa   : > { %8663 = shalt.err (!%p8660_p6)  }
 0x9fb   : > { %s8664_s6 = scalar_lea.vmem %s1741_s16, 32  ;;  %p8669_p10 = scmp.lt.s32.totalorder %s1741_s16, %s9389_s30 }
 0x9fc   : > { %p8665_p9 = scmp.ne.s32.totalorder %s1741_s16, %s8664_s6  ;;  %p8670_p12 = scmp.lt.s32.totalorder %s9414_s10, %s8664_s6 }
 0x9fe   : > { %p8671_p8 = por %p8670_p12, %p8669_p10 }
 0xa00   : > { %p8672_p11 = pnand %p8671_p8, %p8665_p9 }
 0xa02   : > { %8675 = shalt.err (!%p8672_p11)  }
 0xa03   : > { %1743 = dma.hbm_to_vmem [thread:$0]  %s1737_s25, 32, %s1741_s16, [#allocation3], %s9131_s3, %s9131_s3, %s9132_s2 }
 0xa04   : > { %s381_s14 = sadd.s32 112, %s9382_s22  ;;  %s9242_s23 = smov [#allocation2 + $0xd7]  }
 0xa05   : > { %s1752_s8 = sshll.u32 %s9242_s23, 4  ;;  %s11739_s18 = sld [smem:[#allocation5 + %s381_s14]]  ;;  %s11741_s8 = int_to_ptr.vmem [resolvable:$true] %s1752_s8 }
 0xa06   : > { %s9243_s28 = smov [#allocation2 + $0xe0]   ;;  %s383_s21 = sadd.s32 113, %s9382_s22 }
 0xa07   : > { %s1764_s26 = sshll.u32 %s9243_s28, 4  ;;  %s1744_s13 = sshrl.u32 %s11727_s20, 3  ;;  %s11746_s26 = int_to_ptr.vmem [resolvable:$true] %s1764_s26 }
 0xa08   : > { %s1745_s29 = sand.u32 7, %s11727_s20   ;;  %s5855_s11 = sshll.u32 %s1744_s13, 4 }
 0xa09   : > { %s1747_s12 = sadd.s32 %s5855_s11, %s1745_s29  ;;  %s11748_s16 = sld [smem:[#allocation5 + %s383_s21]] }
 0xa0a   : > { %s5856_s9 = sshll.u32 %s1747_s12, 4 }
 0xa0b   : > { %s1756_s25 = sshrl.u32 %s11739_s18, 3  ;;  %s1749_s15 = scalar_lea.hbm %s12555_s1, %s5856_s9 }
 0xa0c   : > { %s1757_s6 = sand.u32 7, %s11739_s18   ;;  %s8676_s14 = scalar_lea.hbm %s1749_s15, 32 }
 0xa0d   : > { %p8677_p0 = scmp.ne.s32.totalorder %s1749_s15, %s8676_s14  ;;  %p8679_p1 = scmp.lt.s32.totalorder %s1749_s15, %s12555_s1 }
 0xa0e   : > { %p8680_p3 = scmp.lt.s32.totalorder %s9405_s7, %s8676_s14 }
 0xa10   : > { %p8681_p2 = por %p8680_p3, %p8679_p1 }
 0xa12   : > { %p8682_p4 = pnand %p8681_p2, %p8677_p0 }
 0xa14   : > { %8685 = shalt.err (!%p8682_p4)  }
 0xa15   : > { %s8686_s20 = scalar_lea.vmem %s11741_s8, 32  ;;  %p8691_p7 = scmp.lt.s32.totalorder %s11741_s8, %s9389_s30 }
 0xa16   : > { %p8687_p13 = scmp.ne.s32.totalorder %s11741_s8, %s8686_s20  ;;  %p8692_p6 = scmp.lt.s32.totalorder %s9414_s10, %s8686_s20 }
 0xa18   : > { %p8693_p9 = por %p8692_p6, %p8691_p7 }
 0xa1a   : > { %p8694_p10 = pnand %p8693_p9, %p8687_p13 }
 0xa1c   : > { %8697 = shalt.err (!%p8694_p10)  }
 0xa1d   : > { %1755 = dma.hbm_to_vmem [thread:$0]  %s1749_s15, 32, %s11741_s8, [#allocation3], %s9131_s3, %s9131_s3, %s9132_s2 }
 0xa1e   : > { %s5857_s18 = sshll.u32 %s1756_s25, 4  ;;  %s9244_s13 = smov [#allocation2 + $0xe1]  }
 0xa1f   : > { %s1759_s21 = sadd.s32 %s5857_s18, %s1757_s6  ;;  %s1776_s29 = sshll.u32 %s9244_s13, 4  ;;  %s1777_s29 = int_to_ptr.vmem [resolvable:$true] %s1776_s29 }
 0xa20   : > { %s5858_s11 = sshll.u32 %s1759_s21, 4  ;;  %s1768_s12 = sshrl.u32 %s11748_s16, 3 }
 0xa21   : > { %s1761_s5 = scalar_lea.hbm %s12555_s1, %s5858_s11  ;;  %s1769_s14 = sand.u32 7, %s11748_s16  }
 0xa22   : > { %s8698_s23 = scalar_lea.hbm %s1761_s5, 32  ;;  %p8701_p8 = scmp.lt.s32.totalorder %s1761_s5, %s12555_s1 }
 0xa23   : > { %p8699_p12 = scmp.ne.s32.totalorder %s1761_s5, %s8698_s23  ;;  %p8702_p11 = scmp.lt.s32.totalorder %s9405_s7, %s8698_s23 }
 0xa25   : > { %p8703_p0 = por %p8702_p11, %p8701_p8 }
 0xa27   : > { %p8704_p1 = pnand %p8703_p0, %p8699_p12 }
 0xa29   : > { %8707 = shalt.err (!%p8704_p1)  }
 0xa2a   : > { %s8708_s8 = scalar_lea.vmem %s11746_s26, 32  ;;  %p8713_p2 = scmp.lt.s32.totalorder %s11746_s26, %s9389_s30 }
 0xa2b   : > { %p8709_p3 = scmp.ne.s32.totalorder %s11746_s26, %s8708_s8  ;;  %p8714_p4 = scmp.lt.s32.totalorder %s9414_s10, %s8708_s8 }
 0xa2d   : > { %p8715_p13 = por %p8714_p4, %p8713_p2 }
 0xa2f   : > { %p8716_p7 = pnand %p8715_p13, %p8709_p3 }
 0xa31   : > { %8719 = shalt.err (!%p8716_p7)  }
 0xa32   : > { %1767 = dma.hbm_to_vmem [thread:$0]  %s1761_s5, 32, %s11746_s26, [#allocation3], %s9131_s3, %s9131_s3, %s9132_s2 }
 0xa33   : > { %s5859_s16 = sshll.u32 %s1768_s12, 4  ;;  %s385_s15 = sadd.s32 114, %s9382_s22 }
 0xa34   : > { %s1771_s25 = sadd.s32 %s5859_s16, %s1769_s14  ;;  %s11787_s18 = sld [smem:[#allocation5 + %s385_s15]] }
 0xa35   : > { %s5860_s6 = sshll.u32 %s1771_s25, 4 }
 0xa36   : > { %s1773_s11 = scalar_lea.hbm %s12555_s1, %s5860_s6 }
 0xa37   : > { %s8720_s9 = scalar_lea.hbm %s1773_s11, 32  ;;  %p8723_p9 = scmp.lt.s32.totalorder %s1773_s11, %s12555_s1 }
 0xa38   : > { %p8721_p6 = scmp.ne.s32.totalorder %s1773_s11, %s8720_s9  ;;  %p8724_p10 = scmp.lt.s32.totalorder %s9405_s7, %s8720_s9 }
 0xa3a   : > { %p8725_p12 = por %p8724_p10, %p8723_p9 }
 0xa3c   : > { %p8726_p8 = pnand %p8725_p12, %p8721_p6 }
 0xa3e   : > { %8729 = shalt.err (!%p8726_p8)  }
 0xa3f   : > { %s8730_s26 = scalar_lea.vmem %s1777_s29, 32  ;;  %p8735_p0 = scmp.lt.s32.totalorder %s1777_s29, %s9389_s30 }
 0xa40   : > { %p8731_p11 = scmp.ne.s32.totalorder %s1777_s29, %s8730_s26  ;;  %p8736_p1 = scmp.lt.s32.totalorder %s9414_s10, %s8730_s26 }
 0xa42   : > { %p8737_p3 = por %p8736_p1, %p8735_p0 }
 0xa44   : > { %p8738_p2 = pnand %p8737_p3, %p8731_p11 }
 0xa46   : > { %8741 = shalt.err (!%p8738_p2)  }
 0xa47   : > { %1779 = dma.hbm_to_vmem [thread:$0]  %s1773_s11, 32, %s1777_s29, [#allocation3], %s9131_s3, %s9131_s3, %s9132_s2 }
 0xa48   : > { %s9245_s12 = smov [#allocation2 + $0xe2]   ;;  %s387_s14 = sadd.s32 115, %s9382_s22 }
 0xa49   : > { %s1788_s5 = sshll.u32 %s9245_s12, 4  ;;  %s11804_s28 = sld [smem:[#allocation5 + %s387_s14]]  ;;  %s11802_s5 = int_to_ptr.vmem [resolvable:$true] %s1788_s5 }
 0xa4a   : > { %s389_s20 = sadd.s32 116, %s9382_s22  ;;  %s1780_s8 = sshrl.u32 %s11787_s18, 3 }
 0xa4b   : > { %s1781_s16 = sand.u32 7, %s11787_s18   ;;  %s5861_s25 = sshll.u32 %s1780_s8, 4 }
 0xa4c   : > { %s9246_s15 = smov [#allocation2 + $0xe3]   ;;  %s1783_s21 = sadd.s32 %s5861_s25, %s1781_s16 }
 0xa4d   : > { %s1800_s6 = sshll.u32 %s9246_s15, 4  ;;  %s5862_s13 = sshll.u32 %s1783_s21, 4  ;;  %s11809_s6 = int_to_ptr.vmem [resolvable:$true] %s1800_s6 }
 0xa4e   : > { %s11811_s29 = sld [smem:[#allocation5 + %s389_s20]]  ;;  %s1785_s17 = scalar_lea.hbm %s12555_s1, %s5862_s13 }
 0xa4f   : > { %s1792_s23 = sshrl.u32 %s11804_s28, 3  ;;  %s8742_s26 = scalar_lea.hbm %s1785_s17, 32 }
 0xa50   : > { %p8743_p4 = scmp.ne.s32.totalorder %s1785_s17, %s8742_s26  ;;  %p8745_p13 = scmp.lt.s32.totalorder %s1785_s17, %s12555_s1 }
 0xa51   : > { %p8746_p7 = scmp.lt.s32.totalorder %s9405_s7, %s8742_s26 }
 0xa53   : > { %p8747_p6 = por %p8746_p7, %p8745_p13 }
 0xa55   : > { %p8748_p9 = pnand %p8747_p6, %p8743_p4 }
 0xa57   : > { %8751 = shalt.err (!%p8748_p9)  }
 0xa58   : > { %s8752_s18 = scalar_lea.vmem %s11802_s5, 32  ;;  %p8757_p12 = scmp.lt.s32.totalorder %s11802_s5, %s9389_s30 }
 0xa59   : > { %p8753_p10 = scmp.ne.s32.totalorder %s11802_s5, %s8752_s18  ;;  %p8758_p8 = scmp.lt.s32.totalorder %s9414_s10, %s8752_s18 }
 0xa5b   : > { %p8759_p11 = por %p8758_p8, %p8757_p12 }
 0xa5d   : > { %p8760_p0 = pnand %p8759_p11, %p8753_p10 }
 0xa5f   : > { %8763 = shalt.err (!%p8760_p0)  }
 0xa60   : > { %1791 = dma.hbm_to_vmem [thread:$0]  %s1785_s17, 32, %s11802_s5, [#allocation3], %s9131_s3, %s9131_s3, %s9132_s2 }
 0xa61   : > { %s1793_s20 = sand.u32 7, %s11804_s28   ;;  %s5863_s8 = sshll.u32 %s1792_s23, 4 }
 0xa62   : > { %s1795_s16 = sadd.s32 %s5863_s8, %s1793_s20  ;;  %s9247_s15 = smov [#allocation2 + $0xe4]  }
 0xa63   : > { %s5864_s25 = sshll.u32 %s1795_s16, 4  ;;  %s1812_s21 = sshll.u32 %s9247_s15, 4  ;;  %s1813_s21 = int_to_ptr.vmem [resolvable:$true] %s1812_s21 }
 0xa64   : > { %s1797_s9 = scalar_lea.hbm %s12555_s1, %s5864_s25  ;;  %s1804_s26 = sshrl.u32 %s11811_s29, 3 }
 0xa65   : > { %s8764_s12 = scalar_lea.hbm %s1797_s9, 32  ;;  %p8767_p3 = scmp.lt.s32.totalorder %s1797_s9, %s12555_s1 }
 0xa66   : > { %p8765_p1 = scmp.ne.s32.totalorder %s1797_s9, %s8764_s12  ;;  %p8768_p2 = scmp.lt.s32.totalorder %s9405_s7, %s8764_s12 }
 0xa68   : > { %p8769_p4 = por %p8768_p2, %p8767_p3 }
 0xa6a   : > { %p8770_p13 = pnand %p8769_p4, %p8765_p1 }
 0xa6c   : > { %8773 = shalt.err (!%p8770_p13)  }
 0xa6d   : > { %s8774_s5 = scalar_lea.vmem %s11809_s6, 32  ;;  %p8779_p6 = scmp.lt.s32.totalorder %s11809_s6, %s9389_s30 }
 0xa6e   : > { %p8775_p7 = scmp.ne.s32.totalorder %s11809_s6, %s8774_s5  ;;  %p8780_p9 = scmp.lt.s32.totalorder %s9414_s10, %s8774_s5 }
 0xa70   : > { %p8781_p10 = por %p8780_p9, %p8779_p6 }
 0xa72   : > { %p8782_p12 = pnand %p8781_p10, %p8775_p7 }
 0xa74   : > { %8785 = shalt.err (!%p8782_p12)  }
 0xa75   : > { %1803 = dma.hbm_to_vmem [thread:$0]  %s1797_s9, 32, %s11809_s6, [#allocation3], %s9131_s3, %s9131_s3, %s9132_s2 }
 0xa76   : > { %s1805_s28 = sand.u32 7, %s11811_s29   ;;  %s5865_s17 = sshll.u32 %s1804_s26, 4 }
 0xa77   : > { %s1807_s23 = sadd.s32 %s5865_s17, %s1805_s28  ;;  %s391_s8 = sadd.s32 117, %s9382_s22 }
 0xa78   : > { %s5866_s20 = sshll.u32 %s1807_s23, 4  ;;  %s11853_s13 = sld [smem:[#allocation5 + %s391_s8]] }
 0xa79   : > { %s1809_s15 = scalar_lea.hbm %s12555_s1, %s5866_s20 }
 0xa7a   : > { %s8786_s11 = scalar_lea.hbm %s1809_s15, 32  ;;  %p8789_p11 = scmp.lt.s32.totalorder %s1809_s15, %s12555_s1 }
 0xa7b   : > { %p8787_p8 = scmp.ne.s32.totalorder %s1809_s15, %s8786_s11  ;;  %p8790_p0 = scmp.lt.s32.totalorder %s9405_s7, %s8786_s11 }
 0xa7d   : > { %p8791_p1 = por %p8790_p0, %p8789_p11 }
 0xa7f   : > { %p8792_p3 = pnand %p8791_p1, %p8787_p8 }
 0xa81   : > { %8795 = shalt.err (!%p8792_p3)  }
 0xa82   : > { %s8796_s6 = scalar_lea.vmem %s1813_s21, 32  ;;  %p8801_p4 = scmp.lt.s32.totalorder %s1813_s21, %s9389_s30 }
 0xa83   : > { %p8797_p2 = scmp.ne.s32.totalorder %s1813_s21, %s8796_s6  ;;  %p8802_p13 = scmp.lt.s32.totalorder %s9414_s10, %s8796_s6 }
 0xa85   : > { %p8803_p7 = por %p8802_p13, %p8801_p4 }
 0xa87   : > { %p8804_p6 = pnand %p8803_p7, %p8797_p2 }
 0xa89   : > { %8807 = shalt.err (!%p8804_p6)  }
 0xa8a   : > { %1815 = dma.hbm_to_vmem [thread:$0]  %s1809_s15, 32, %s1813_s21, [#allocation3], %s9131_s3, %s9131_s3, %s9132_s2 }
 0xa8b   : > { %s393_s29 = sadd.s32 118, %s9382_s22  ;;  %s9248_s9 = smov [#allocation2 + $0xe5]  }
 0xa8c   : > { %s1824_s26 = sshll.u32 %s9248_s9, 4  ;;  %s11865_s18 = sld [smem:[#allocation5 + %s393_s29]]  ;;  %s11867_s26 = int_to_ptr.vmem [resolvable:$true] %s1824_s26 }
 0xa8d   : > { %s9249_s5 = smov [#allocation2 + $0xe6]   ;;  %s395_s17 = sadd.s32 119, %s9382_s22 }
 0xa8e   : > { %s1836_s28 = sshll.u32 %s9249_s5, 4  ;;  %s1816_s23 = sshrl.u32 %s11853_s13, 3  ;;  %s11872_s28 = int_to_ptr.vmem [resolvable:$true] %s1836_s28 }
 0xa8f   : > { %s1817_s20 = sand.u32 7, %s11853_s13   ;;  %s5867_s8 = sshll.u32 %s1816_s23, 4 }
 0xa90   : > { %s1819_s16 = sadd.s32 %s5867_s8, %s1817_s20  ;;  %s11874_s21 = sld [smem:[#allocation5 + %s395_s17]] }
 0xa91   : > { %s5868_s25 = sshll.u32 %s1819_s16, 4 }
 0xa92   : > { %s1828_s15 = sshrl.u32 %s11865_s18, 3  ;;  %s1821_s14 = scalar_lea.hbm %s12555_s1, %s5868_s25 }
 0xa93   : > { %s1829_s6 = sand.u32 7, %s11865_s18   ;;  %s8808_s29 = scalar_lea.hbm %s1821_s14, 32 }
 0xa94   : > { %p8809_p9 = scmp.ne.s32.totalorder %s1821_s14, %s8808_s29  ;;  %p8811_p10 = scmp.lt.s32.totalorder %s1821_s14, %s12555_s1 }
 0xa95   : > { %p8812_p12 = scmp.lt.s32.totalorder %s9405_s7, %s8808_s29 }
 0xa97   : > { %p8813_p8 = por %p8812_p12, %p8811_p10 }
 0xa99   : > { %p8814_p11 = pnand %p8813_p8, %p8809_p9 }
 0xa9b   : > { %8817 = shalt.err (!%p8814_p11)  }
 0xa9c   : > { %s8818_s13 = scalar_lea.vmem %s11867_s26, 32  ;;  %p8823_p1 = scmp.lt.s32.totalorder %s11867_s26, %s9389_s30 }
 0xa9d   : > { %p8819_p0 = scmp.ne.s32.totalorder %s11867_s26, %s8818_s13  ;;  %p8824_p3 = scmp.lt.s32.totalorder %s9414_s10, %s8818_s13 }
 0xa9f   : > { %p8825_p2 = por %p8824_p3, %p8823_p1 }
 0xaa1   : > { %p8826_p4 = pnand %p8825_p2, %p8819_p0 }
 0xaa3   : > { %8829 = shalt.err (!%p8826_p4)  }
 0xaa4   : > { %1827 = dma.hbm_to_vmem [thread:$0]  %s1821_s14, 32, %s11867_s26, [#allocation3], %s9131_s3, %s9131_s3, %s9132_s2 }
 0xaa5   : > { %s5869_s18 = sshll.u32 %s1828_s15, 4  ;;  %s9250_s23 = smov [#allocation2 + $0xe7]  }
 0xaa6   : > { %s1831_s17 = sadd.s32 %s5869_s18, %s1829_s6  ;;  %s1848_s20 = sshll.u32 %s9250_s23, 4  ;;  %s1849_s20 = int_to_ptr.vmem [resolvable:$true] %s1848_s20 }
 0xaa7   : > { %s5870_s8 = sshll.u32 %s1831_s17, 4  ;;  %s1840_s16 = sshrl.u32 %s11874_s21, 3 }
 0xaa8   : > { %s1833_s12 = scalar_lea.hbm %s12555_s1, %s5870_s8  ;;  %s1841_s29 = sand.u32 7, %s11874_s21  }
 0xaa9   : > { %s8830_s9 = scalar_lea.hbm %s1833_s12, 32  ;;  %p8833_p7 = scmp.lt.s32.totalorder %s1833_s12, %s12555_s1 }
 0xaaa   : > { %p8831_p13 = scmp.ne.s32.totalorder %s1833_s12, %s8830_s9  ;;  %p8834_p6 = scmp.lt.s32.totalorder %s9405_s7, %s8830_s9 }
 0xaac   : > { %p8835_p9 = por %p8834_p6, %p8833_p7 }
 0xaae   : > { %p8836_p10 = pnand %p8835_p9, %p8831_p13 }
 0xab0   : > { %8839 = shalt.err (!%p8836_p10)  }
 0xab1   : > { %s8840_s26 = scalar_lea.vmem %s11872_s28, 32  ;;  %p8845_p8 = scmp.lt.s32.totalorder %s11872_s28, %s9389_s30 }
 0xab2   : > { %p8841_p12 = scmp.ne.s32.totalorder %s11872_s28, %s8840_s26  ;;  %p8846_p11 = scmp.lt.s32.totalorder %s9414_s10, %s8840_s26 }
 0xab4   : > { %p8847_p0 = por %p8846_p11, %p8845_p8 }
 0xab6   : > { %p8848_p1 = pnand %p8847_p0, %p8841_p12 }
 0xab8   : > { %8851 = shalt.err (!%p8848_p1)  }
 0xab9   : > { %1839 = dma.hbm_to_vmem [thread:$0]  %s1833_s12, 32, %s11872_s28, [#allocation3], %s9131_s3, %s9131_s3, %s9132_s2 }
 0xaba   : > { %s5871_s21 = sshll.u32 %s1840_s16, 4  ;;  %s397_s14 = sadd.s32 120, %s9382_s22 }
 0xabb   : > { %s1843_s15 = sadd.s32 %s5871_s21, %s1841_s29  ;;  %s11913_s18 = sld [smem:[#allocation5 + %s397_s14]] }
 0xabc   : > { %s5872_s6 = sshll.u32 %s1843_s15, 4 }
 0xabd   : > { %s1845_s8 = scalar_lea.hbm %s12555_s1, %s5872_s6 }
 0xabe   : > { %s8852_s25 = scalar_lea.hbm %s1845_s8, 32  ;;  %p8855_p2 = scmp.lt.s32.totalorder %s1845_s8, %s12555_s1 }
 0xabf   : > { %p8853_p3 = scmp.ne.s32.totalorder %s1845_s8, %s8852_s25  ;;  %p8856_p4 = scmp.lt.s32.totalorder %s9405_s7, %s8852_s25 }
 0xac1   : > { %p8857_p13 = por %p8856_p4, %p8855_p2 }
 0xac3   : > { %p8858_p7 = pnand %p8857_p13, %p8853_p3 }
 0xac5   : > { %8861 = shalt.err (!%p8858_p7)  }
 0xac6   : > { %s8862_s28 = scalar_lea.vmem %s1849_s20, 32  ;;  %p8867_p9 = scmp.lt.s32.totalorder %s1849_s20, %s9389_s30 }
 0xac7   : > { %p8863_p6 = scmp.ne.s32.totalorder %s1849_s20, %s8862_s28  ;;  %p8868_p10 = scmp.lt.s32.totalorder %s9414_s10, %s8862_s28 }
 0xac9   : > { %p8869_p12 = por %p8868_p10, %p8867_p9 }
 0xacb   : > { %p8870_p8 = pnand %p8869_p12, %p8863_p6 }
 0xacd   : > { %8873 = shalt.err (!%p8870_p8)  }
 0xace   : > { %1851 = dma.hbm_to_vmem [thread:$0]  %s1845_s8, 32, %s1849_s20, [#allocation3], %s9131_s3, %s9131_s3, %s9132_s2 }
 0xacf   : > { %s9251_s16 = smov [#allocation2 + $0xf0]   ;;  %s399_s29 = sadd.s32 121, %s9382_s22 }
 0xad0   : > { %s1860_s12 = sshll.u32 %s9251_s16, 4  ;;  %s11930_s5 = sld [smem:[#allocation5 + %s399_s29]]  ;;  %s11928_s12 = int_to_ptr.vmem [resolvable:$true] %s1860_s12 }
 0xad1   : > { %s401_s13 = sadd.s32 122, %s9382_s22  ;;  %s1852_s26 = sshrl.u32 %s11913_s18, 3 }
 0xad2   : > { %s1853_s21 = sand.u32 7, %s11913_s18   ;;  %s5873_s15 = sshll.u32 %s1852_s26, 4 }
 0xad3   : > { %s9252_s14 = smov [#allocation2 + $0xf1]   ;;  %s1855_s17 = sadd.s32 %s5873_s15, %s1853_s21 }
 0xad4   : > { %s1872_s6 = sshll.u32 %s9252_s14, 4  ;;  %s5874_s23 = sshll.u32 %s1855_s17, 4  ;;  %s11935_s6 = int_to_ptr.vmem [resolvable:$true] %s1872_s6 }
 0xad5   : > { %s11937_s20 = sld [smem:[#allocation5 + %s401_s13]]  ;;  %s1857_s11 = scalar_lea.hbm %s12555_s1, %s5874_s23 }
 0xad6   : > { %s1864_s9 = sshrl.u32 %s11930_s5, 3  ;;  %s8874_s28 = scalar_lea.hbm %s1857_s11, 32 }
 0xad7   : > { %p8875_p11 = scmp.ne.s32.totalorder %s1857_s11, %s8874_s28  ;;  %p8877_p0 = scmp.lt.s32.totalorder %s1857_s11, %s12555_s1 }
 0xad8   : > { %p8878_p1 = scmp.lt.s32.totalorder %s9405_s7, %s8874_s28 }
 0xada   : > { %p8879_p3 = por %p8878_p1, %p8877_p0 }
 0xadc   : > { %p8880_p2 = pnand %p8879_p3, %p8875_p11 }
 0xade   : > { %8883 = shalt.err (!%p8880_p2)  }
 0xadf   : > { %s8884_s18 = scalar_lea.vmem %s11928_s12, 32  ;;  %p8889_p13 = scmp.lt.s32.totalorder %s11928_s12, %s9389_s30 }
 0xae0   : > { %p8885_p4 = scmp.ne.s32.totalorder %s11928_s12, %s8884_s18  ;;  %p8890_p7 = scmp.lt.s32.totalorder %s9414_s10, %s8884_s18 }
 0xae2   : > { %p8891_p6 = por %p8890_p7, %p8889_p13 }
 0xae4   : > { %p8892_p9 = pnand %p8891_p6, %p8885_p4 }
 0xae6   : > { %8895 = shalt.err (!%p8892_p9)  }
 0xae7   : > { %1863 = dma.hbm_to_vmem [thread:$0]  %s1857_s11, 32, %s11928_s12, [#allocation3], %s9131_s3, %s9131_s3, %s9132_s2 }
 0xae8   : > { %s1865_s13 = sand.u32 7, %s11930_s5   ;;  %s5875_s26 = sshll.u32 %s1864_s9, 4 }
 0xae9   : > { %s1867_s21 = sadd.s32 %s5875_s26, %s1865_s13  ;;  %s9253_s14 = smov [#allocation2 + $0xf2]  }
 0xaea   : > { %s5876_s15 = sshll.u32 %s1867_s21, 4  ;;  %s1884_s17 = sshll.u32 %s9253_s14, 4  ;;  %s1885_s17 = int_to_ptr.vmem [resolvable:$true] %s1884_s17 }
 0xaeb   : > { %s1869_s25 = scalar_lea.hbm %s12555_s1, %s5876_s15  ;;  %s1876_s28 = sshrl.u32 %s11937_s20, 3 }
 0xaec   : > { %s8896_s16 = scalar_lea.hbm %s1869_s25, 32  ;;  %p8899_p12 = scmp.lt.s32.totalorder %s1869_s25, %s12555_s1 }
 0xaed   : > { %p8897_p10 = scmp.ne.s32.totalorder %s1869_s25, %s8896_s16  ;;  %p8900_p8 = scmp.lt.s32.totalorder %s9405_s7, %s8896_s16 }
 0xaef   : > { %p8901_p11 = por %p8900_p8, %p8899_p12 }
 0xaf1   : > { %p8902_p0 = pnand %p8901_p11, %p8897_p10 }
 0xaf3   : > { %8905 = shalt.err (!%p8902_p0)  }
 0xaf4   : > { %s8906_s12 = scalar_lea.vmem %s11935_s6, 32  ;;  %p8911_p3 = scmp.lt.s32.totalorder %s11935_s6, %s9389_s30 }
 0xaf5   : > { %p8907_p1 = scmp.ne.s32.totalorder %s11935_s6, %s8906_s12  ;;  %p8912_p2 = scmp.lt.s32.totalorder %s9414_s10, %s8906_s12 }
 0xaf7   : > { %p8913_p4 = por %p8912_p2, %p8911_p3 }
 0xaf9   : > { %p8914_p13 = pnand %p8913_p4, %p8907_p1 }
 0xafb   : > { %8917 = shalt.err (!%p8914_p13)  }
 0xafc   : > { %1875 = dma.hbm_to_vmem [thread:$0]  %s1869_s25, 32, %s11935_s6, [#allocation3], %s9131_s3, %s9131_s3, %s9132_s2 }
 0xafd   : > { %s1877_s5 = sand.u32 7, %s11937_s20   ;;  %s5877_s11 = sshll.u32 %s1876_s28, 4 }
 0xafe   : > { %s1879_s9 = sadd.s32 %s5877_s11, %s1877_s5  ;;  %s403_s26 = sadd.s32 123, %s9382_s22 }
 0xaff   : > { %s5878_s13 = sshll.u32 %s1879_s9, 4  ;;  %s11979_s23 = sld [smem:[#allocation5 + %s403_s26]] }
 0xb00   : > { %s1881_s14 = scalar_lea.hbm %s12555_s1, %s5878_s13 }
 0xb01   : > { %s8918_s8 = scalar_lea.hbm %s1881_s14, 32  ;;  %p8921_p6 = scmp.lt.s32.totalorder %s1881_s14, %s12555_s1 }
 0xb02   : > { %p8919_p7 = scmp.ne.s32.totalorder %s1881_s14, %s8918_s8  ;;  %p8922_p9 = scmp.lt.s32.totalorder %s9405_s7, %s8918_s8 }
 0xb04   : > { %p8923_p10 = por %p8922_p9, %p8921_p6 }
 0xb06   : > { %p8924_p12 = pnand %p8923_p10, %p8919_p7 }
 0xb08   : > { %8927 = shalt.err (!%p8924_p12)  }
 0xb09   : > { %s8928_s6 = scalar_lea.vmem %s1885_s17, 32  ;;  %p8933_p11 = scmp.lt.s32.totalorder %s1885_s17, %s9389_s30 }
 0xb0a   : > { %p8929_p8 = scmp.ne.s32.totalorder %s1885_s17, %s8928_s6  ;;  %p8934_p0 = scmp.lt.s32.totalorder %s9414_s10, %s8928_s6 }
 0xb0c   : > { %p8935_p1 = por %p8934_p0, %p8933_p11 }
 0xb0e   : > { %p8936_p3 = pnand %p8935_p1, %p8929_p8 }
 0xb10   : > { %8939 = shalt.err (!%p8936_p3)  }
 0xb11   : > { %1887 = dma.hbm_to_vmem [thread:$0]  %s1881_s14, 32, %s1885_s17, [#allocation3], %s9131_s3, %s9131_s3, %s9132_s2 }
 0xb12   : > { %s405_s20 = sadd.s32 124, %s9382_s22  ;;  %s9254_s25 = smov [#allocation2 + $0xf3]  }
 0xb13   : > { %s1896_s28 = sshll.u32 %s9254_s25, 4  ;;  %s11991_s18 = sld [smem:[#allocation5 + %s405_s20]]  ;;  %s11993_s28 = int_to_ptr.vmem [resolvable:$true] %s1896_s28 }
 0xb14   : > { %s9255_s12 = smov [#allocation2 + $0xf4]   ;;  %s407_s11 = sadd.s32 125, %s9382_s22 }
 0xb15   : > { %s1908_s5 = sshll.u32 %s9255_s12, 4  ;;  %s1888_s9 = sshrl.u32 %s11979_s23, 3  ;;  %s11998_s5 = int_to_ptr.vmem [resolvable:$true] %s1908_s5 }
 0xb16   : > { %s1889_s13 = sand.u32 7, %s11979_s23   ;;  %s5879_s26 = sshll.u32 %s1888_s9, 4 }
 0xb17   : > { %s1891_s21 = sadd.s32 %s5879_s26, %s1889_s13  ;;  %s12000_s17 = sld [smem:[#allocation5 + %s407_s11]] }
 0xb18   : > { %s5880_s15 = sshll.u32 %s1891_s21, 4 }
 0xb19   : > { %s1900_s14 = sshrl.u32 %s11991_s18, 3  ;;  %s1893_s29 = scalar_lea.hbm %s12555_s1, %s5880_s15 }
 0xb1a   : > { %s1901_s6 = sand.u32 7, %s11991_s18   ;;  %s8940_s20 = scalar_lea.hbm %s1893_s29, 32 }
 0xb1b   : > { %p8941_p2 = scmp.ne.s32.totalorder %s1893_s29, %s8940_s20  ;;  %p8943_p4 = scmp.lt.s32.totalorder %s1893_s29, %s12555_s1 }
 0xb1c   : > { %p8944_p13 = scmp.lt.s32.totalorder %s9405_s7, %s8940_s20 }
 0xb1e   : > { %p8945_p7 = por %p8944_p13, %p8943_p4 }
 0xb20   : > { %p8946_p6 = pnand %p8945_p7, %p8941_p2 }
 0xb22   : > { %8949 = shalt.err (!%p8946_p6)  }
 0xb23   : > { %s8950_s23 = scalar_lea.vmem %s11993_s28, 32  ;;  %p8955_p10 = scmp.lt.s32.totalorder %s11993_s28, %s9389_s30 }
 0xb24   : > { %p8951_p9 = scmp.ne.s32.totalorder %s11993_s28, %s8950_s23  ;;  %p8956_p12 = scmp.lt.s32.totalorder %s9414_s10, %s8950_s23 }
 0xb26   : > { %p8957_p8 = por %p8956_p12, %p8955_p10 }
 0xb28   : > { %p8958_p11 = pnand %p8957_p8, %p8951_p9 }
 0xb2a   : > { %8961 = shalt.err (!%p8958_p11)  }
 0xb2b   : > { %1899 = dma.hbm_to_vmem [thread:$0]  %s1893_s29, 32, %s11993_s28, [#allocation3], %s9131_s3, %s9131_s3, %s9132_s2 }
 0xb2c   : > { %s5881_s18 = sshll.u32 %s1900_s14, 4  ;;  %s9256_s9 = smov [#allocation2 + $0xf5]  }
 0xb2d   : > { %s1903_s11 = sadd.s32 %s5881_s18, %s1901_s6  ;;  %s1920_s13 = sshll.u32 %s9256_s9, 4  ;;  %s1921_s13 = int_to_ptr.vmem [resolvable:$true] %s1920_s13 }
 0xb2e   : > { %s5882_s26 = sshll.u32 %s1903_s11, 4  ;;  %s1912_s21 = sshrl.u32 %s12000_s17, 3 }
 0xb2f   : > { %s1905_s16 = scalar_lea.hbm %s12555_s1, %s5882_s26  ;;  %s1913_s20 = sand.u32 7, %s12000_s17  }
 0xb30   : > { %s8962_s25 = scalar_lea.hbm %s1905_s16, 32  ;;  %p8965_p1 = scmp.lt.s32.totalorder %s1905_s16, %s12555_s1 }
 0xb31   : > { %p8963_p0 = scmp.ne.s32.totalorder %s1905_s16, %s8962_s25  ;;  %p8966_p3 = scmp.lt.s32.totalorder %s9405_s7, %s8962_s25 }
 0xb33   : > { %p8967_p2 = por %p8966_p3, %p8965_p1 }
 0xb35   : > { %p8968_p4 = pnand %p8967_p2, %p8963_p0 }
 0xb37   : > { %8971 = shalt.err (!%p8968_p4)  }
 0xb38   : > { %s8972_s28 = scalar_lea.vmem %s11998_s5, 32  ;;  %p8977_p7 = scmp.lt.s32.totalorder %s11998_s5, %s9389_s30 }
 0xb39   : > { %p8973_p13 = scmp.ne.s32.totalorder %s11998_s5, %s8972_s28  ;;  %p8978_p6 = scmp.lt.s32.totalorder %s9414_s10, %s8972_s28 }
 0xb3b   : > { %p8979_p9 = por %p8978_p6, %p8977_p7 }
 0xb3d   : > { %p8980_p10 = pnand %p8979_p9, %p8973_p13 }
 0xb3f   : > { %8983 = shalt.err (!%p8980_p10)  }
 0xb40   : > { %1911 = dma.hbm_to_vmem [thread:$0]  %s1905_s16, 32, %s11998_s5, [#allocation3], %s9131_s3, %s9131_s3, %s9132_s2 }
 0xb41   : > { %s5883_s17 = sshll.u32 %s1912_s21, 4  ;;  %s409_s29 = sadd.s32 126, %s9382_s22 }
 0xb42   : > { %s1915_s14 = sadd.s32 %s5883_s17, %s1913_s20  ;;  %s410_s18 = sld [smem:[#allocation5 + %s409_s29]] }
 0xb43   : > { %s5884_s6 = sshll.u32 %s1915_s14, 4 }
 0xb44   : > { %s1917_s26 = scalar_lea.hbm %s12555_s1, %s5884_s6 }
 0xb45   : > { %s8984_s15 = scalar_lea.hbm %s1917_s26, 32  ;;  %p8987_p8 = scmp.lt.s32.totalorder %s1917_s26, %s12555_s1 }
 0xb46   : > { %p8985_p12 = scmp.ne.s32.totalorder %s1917_s26, %s8984_s15  ;;  %p8988_p11 = scmp.lt.s32.totalorder %s9405_s7, %s8984_s15 }
 0xb48   : > { %p8989_p0 = por %p8988_p11, %p8987_p8 }
 0xb4a   : > { %p8990_p1 = pnand %p8989_p0, %p8985_p12 }
 0xb4c   : > { %8993 = shalt.err (!%p8990_p1)  }
 0xb4d   : > { %s8994_s5 = scalar_lea.vmem %s1921_s13, 32  ;;  %p8999_p2 = scmp.lt.s32.totalorder %s1921_s13, %s9389_s30 }
 0xb4e   : > { %p8995_p3 = scmp.ne.s32.totalorder %s1921_s13, %s8994_s5  ;;  %p9000_p4 = scmp.lt.s32.totalorder %s9414_s10, %s8994_s5 }
 0xb50   : > { %p9001_p13 = por %p9000_p4, %p8999_p2 }
 0xb52   : > { %p9002_p7 = pnand %p9001_p13, %p8995_p3 }
 0xb54   : > { %9005 = shalt.err (!%p9002_p7)  }
 0xb55   : > { %1923 = dma.hbm_to_vmem [thread:$0]  %s1917_s26, 32, %s1921_s13, [#allocation3], %s9131_s3, %s9131_s3, %s9132_s2 }
 0xb56   : > { %s411_s21 = sadd.s32 127, %s9382_s22  ;;  %s9257_s20 = smov [#allocation2 + $0xf6]  }
 0xb57   : > { %s12052_s16 = sld [smem:[#allocation5 + %s411_s21]]  ;;  %s1932_s12 = sshll.u32 %s9257_s20, 4  ;;  %s1933_s12 = int_to_ptr.vmem [resolvable:$true] %s1932_s12 }
 0xb58   : > { %s1924_s23 = sshrl.u32 %s410_s18, 3  ;;  %s1925_s28 = sand.u32 7, %s410_s18  }
 0xb59   : > { %s5885_s17 = sshll.u32 %s1924_s23, 4  ;;  %s9258_s6 = smov [#allocation2 + $0xf7]  }
 0xb5a   : > { %s1927_s14 = sadd.s32 %s5885_s17, %s1925_s28  ;;  %s1944_s11 = sshll.u32 %s9258_s6, 4  ;;  %s1945_s11 = int_to_ptr.vmem [resolvable:$true] %s1944_s11 }
 0xb5b   : > { %s5886_s29 = sshll.u32 %s1927_s14, 4 }
 0xb5c   : > { %s1929_s8 = scalar_lea.hbm %s12555_s1, %s5886_s29 }
 0xb5d   : > { %s1936_s13 = sshrl.u32 %s12052_s16, 3  ;;  %s9006_s22 = scalar_lea.hbm %s1929_s8, 32 }
 0xb5e   : > { %p9007_p6 = scmp.ne.s32.totalorder %s1929_s8, %s9006_s22  ;;  %p9009_p9 = scmp.lt.s32.totalorder %s1929_s8, %s12555_s1 }
 0xb5f   : > { %p9010_p10 = scmp.lt.s32.totalorder %s9405_s7, %s9006_s22 }
 0xb61   : > { %p9011_p12 = por %p9010_p10, %p9009_p9 }
 0xb63   : > { %p9012_p8 = pnand %p9011_p12, %p9007_p6 }
 0xb65   : > { %9015 = shalt.err (!%p9012_p8)  }
 0xb66   : > { %s9016_s18 = scalar_lea.vmem %s1933_s12, 32  ;;  %p9021_p0 = scmp.lt.s32.totalorder %s1933_s12, %s9389_s30 }
 0xb67   : > { %p9017_p11 = scmp.ne.s32.totalorder %s1933_s12, %s9016_s18  ;;  %p9022_p1 = scmp.lt.s32.totalorder %s9414_s10, %s9016_s18 }
 0xb69   : > { %p9023_p3 = por %p9022_p1, %p9021_p0 }
 0xb6b   : > { %p9024_p2 = pnand %p9023_p3, %p9017_p11 }
 0xb6d   : > { %9027 = shalt.err (!%p9024_p2)  }
 0xb6e   : > { %1935 = dma.hbm_to_vmem [thread:$0]  %s1929_s8, 32, %s1933_s12, [#allocation3], %s9131_s3, %s9131_s3, %s9132_s2 }
 0xb6f   : > { %s1937_s5 = sand.u32 7, %s12052_s16   ;;  %s5887_s21 = sshll.u32 %s1936_s13, 4 }
 0xb70   : > { %s1939_s20 = sadd.s32 %s5887_s21, %s1937_s5 }
 0xb71   : > { %s5888_s23 = sshll.u32 %s1939_s20, 4 }
 0xb72   : > { %s1941_s14 = scalar_lea.hbm %s12555_s1, %s5888_s23 }
 0xb73   : > { %s9028_s29 = scalar_lea.hbm %s1941_s14, 32  ;;  %p9031_p13 = scmp.lt.s32.totalorder %s1941_s14, %s12555_s1 }
 0xb74   : > { %p9029_p4 = scmp.ne.s32.totalorder %s1941_s14, %s9028_s29  ;;  %p9032_p7 = scmp.lt.s32.totalorder %s9405_s7, %s9028_s29 }
 0xb76   : > { %p9033_p6 = por %p9032_p7, %p9031_p13 }
 0xb78   : > { %p9034_p9 = pnand %p9033_p6, %p9029_p4 }
 0xb7a   : > { %9037 = shalt.err (!%p9034_p9)  }
 0xb7b   : > { %s9038_s12 = scalar_lea.vmem %s1945_s11, 32  ;;  %p9043_p12 = scmp.lt.s32.totalorder %s1945_s11, %s9389_s30 }
 0xb7c   : > { %p9039_p10 = scmp.ne.s32.totalorder %s1945_s11, %s9038_s12  ;;  %p9044_p8 = scmp.lt.s32.totalorder %s9414_s10, %s9038_s12 }
 0xb7e   : > { %p9045_p11 = por %p9044_p8, %p9043_p12 }
 0xb80   : > { %p9046_p0 = pnand %p9045_p11, %p9039_p10 }
 0xb82   : > { %9049 = shalt.err (!%p9046_p0)  }
 0xb83   : > { %1947 = dma.hbm_to_vmem [thread:$0]  %s1941_s14, 32, %s1945_s11, [#allocation3], %s9131_s3, %s9131_s3, %s9132_s2 }
 0xb84   : > { %s12081_s16 = scalar_lea.vmem [#allocation11], %s9386_s24 }
 0xb85   : > { %9102 = dma.done.wait [#allocation3], 4096 }
 0xb86   : > { %9103 = vsyncadd [#allocation3], 4294963200  ;;  %v2252_v0 = vld [vmem:[#allocation6 + $0x78] sm:$0xff]  ;;  %v2251_v1 = vld [vmem:[#allocation6 + $0x70] sm:$0xff]  ;;  %vm3626_vm0 = vcmask 64512   ;;  %s5913_s24 = sshll.u32 %s9312_s0, 12 }
 0xb87   : > { %v2250_v2 = vld [vmem:[#allocation6 + $0x68] sm:$0xff]  ;;  %v2300_v3 = vunpack.c.h.bf16 %v2252_v0  ;;  %v2299_v4 = vunpack.c.l.bf16 %v2252_v0  ;;  %v2298_v5 = vunpack.c.h.bf16 %v2251_v1  ;;  %v2297_v6 = vunpack.c.l.bf16 %v2251_v1  ;;  %v2249_v7 = vld [vmem:[#allocation6 + $0x60] sm:$0xff]  ;;  %v2248_v10 = vld [vmem:[#allocation6 + $0x58] sm:$0xff]  ;;  %s5034_s30 = sshll.u32 %s12081_s16, 4  ;;  %s12506_s3 = scalar_lea.hbm %s12558_s4, %s5913_s24  ;;  %s12508_s30 = int_to_ptr.vmem [resolvable:$true] %s5034_s30 }
 0xb88   : > { %v2296_v8 = vunpack.c.h.bf16 %v2250_v2  ;;  %v2295_v9 = vunpack.c.l.bf16 %v2250_v2  ;;  %v2294_v11 = vunpack.c.h.bf16 %v2249_v7  ;;  %v2293_v12 = vunpack.c.l.bf16 %v2249_v7  ;;  %v2247_v13 = vld [vmem:[#allocation6 + $0x50] sm:$0xff]  ;;  %v2246_v16 = vld [vmem:[#allocation6 + $0x48] sm:$0xff]  ;;  %v2245_v19 = vld [vmem:[#allocation6 + $0x40] sm:$0xff]  ;;  %s12585_s2 = sand.u32 1, %s9114_s19   ;;  %s9050_s0 = scalar_lea.vmem %s12508_s30, 4096 }
 0xb89   : > { %2345 = vmatprep.subr.mxu0 %v2300_v3  ;;  %v2292_v14 = vunpack.c.h.bf16 %v2248_v10  ;;  %v2291_v15 = vunpack.c.l.bf16 %v2248_v10  ;;  %v2290_v17 = vunpack.c.h.bf16 %v2247_v13  ;;  %v2289_v18 = vunpack.c.l.bf16 %v2247_v13  ;;  %v12083_v20 = vld [vmem:[#allocation2 + $0x8] sm:$0xff]  ;;  %v2244_v23 = vld [vmem:[#allocation6 + $0x38] sm:$0xff]  ;;  %v12086_v24 = vld [vmem:[#allocation2] sm:$0xff]  ;;  %s12514_s11 = scalar_lea.sflag [#allocation8], %s12585_s2  ;;  %p9051_p1 = scmp.ne.s32.totalorder %s12508_s30, %s9050_s0 }
 0xb8a   : > { %2346 = vmatpush1.msra.mxu0 %v2299_v4  ;;  %v2288_v21 = vunpack.c.h.bf16 %v2246_v16  ;;  %2409 = vmatprep.mubr.f32.mxu0 %v12083_v20  ;;  %v2287_v22 = vunpack.c.l.bf16 %v2246_v16  ;;  %v2286_v25 = vunpack.c.h.bf16 %v2245_v19  ;;  %v12089_v26 = vld [vmem:[#allocation2 + $0x18] sm:$0xff]  ;;  %v2285_v27 = vunpack.c.l.bf16 %v2245_v19  ;;  %v2243_v28 = vld [vmem:[#allocation6 + $0x30] sm:$0xff]  ;;  %v2242_v31 = vld [vmem:[#allocation6 + $0x28] sm:$0xff]  ;;  %s9260_s15 = smov [#allocation11]  }
 0xb8b   : > { %2347 = vmatprep.subr.mxu0 %v2298_v5  ;;  %2536 = vmatprep.subr.mxu1 %v12083_v20  ;;  %v2284_v29 = vunpack.c.h.bf16 %v2244_v23  ;;  %v2283_v30 = vunpack.c.l.bf16 %v2244_v23  ;;  %v2282_v32 = vunpack.c.h.bf16 %v2243_v28  ;;  %v2281_v33 = vunpack.c.l.bf16 %v2243_v28  ;;  %v2241_v34 = vld [vmem:[#allocation6 + $0x20] sm:$0xff]  ;;  %v2240_v37 = vld [vmem:[#allocation6 + $0x18] sm:$0xff]  ;;  %v2239_v40 = vld [vmem:[#allocation6 + $0x10] sm:$0xff]  ;;  %p9052_p3 = pnand %p9051_p1, %p9329_p5  ;;  %s9054_s8 = sshll.u32 %s9260_s15, 4  ;;  %s9055_s8 = int_to_ptr.vmem [resolvable:$false] %s9054_s8 }
 0xb8c   : > { %2348 = vmatpush1.msra.mxu0 %v2297_v6  ;;  %2537 = vmatpush1.xpose.msra.mxu1 %v12086_v24  ;;  %v2280_v35 = vunpack.c.h.bf16 %v2242_v31  ;;  %v2279_v36 = vunpack.c.l.bf16 %v2242_v31  ;;  %v2278_v38 = vunpack.c.h.bf16 %v2241_v34  ;;  %v2277_v39 = vunpack.c.l.bf16 %v2241_v34  ;;  %v2238_v43 = vld [vmem:[#allocation6 + $0x8] sm:$0xff]  ;;  %v2237_v46 = vld [vmem:[#allocation6] sm:$0xff]  ;;  %v2268_v49 = vld [vmem:[#allocation6 + $0xf8] sm:$0xff]  ;;  %s9056_s13 = scalar_lea.vmem %s9055_s8, 8192  ;;  %p9057_p4 = scmp.lt.s32.totalorder %s12508_s30, %s9055_s8 }
 0xb8d   : > { %2349 = vmatprep.subr.mxu0 %v2296_v8  ;;  %2606 = vmatprep.subr.mxu1 %v12089_v26  ;;  %v2276_v41 = vunpack.c.h.bf16 %v2240_v37  ;;  %v2275_v42 = vunpack.c.l.bf16 %v2240_v37  ;;  %v2274_v44 = vunpack.c.h.bf16 %v2239_v40  ;;  %v2273_v45 = vunpack.c.l.bf16 %v2239_v40  ;;  %v2267_v52 = vld [vmem:[#allocation6 + $0xf0] sm:$0xff]  ;;  %v2266_v55 = vld [vmem:[#allocation6 + $0xe8] sm:$0xff]  ;;  %v2265_v58 = vld [vmem:[#allocation6 + $0xe0] sm:$0xff]  ;;  %p9053_p2 = pneg %p9052_p3  ;;  %p9058_p13 = scmp.lt.s32.totalorder %s9056_s13, %s9050_s0 }
 0xb8e   : > { %2350 = vmatpush1.msra.mxu0 %v2295_v9  ;;  %v2272_v47 = vunpack.c.h.bf16 %v2238_v43  ;;  %v2271_v48 = vunpack.c.l.bf16 %v2238_v43  ;;  %v2270_v50 = vunpack.c.h.bf16 %v2237_v46  ;;  %v2269_v51 = vunpack.c.l.bf16 %v2237_v46  ;;  %v2264_v61 = vld [vmem:[#allocation6 + $0xd8] sm:$0xff]  ;;  %v2263_v0 = vld [vmem:[#allocation6 + $0xd0] sm:$0xff]  ;;  %v2262_v3 = vld [vmem:[#allocation6 + $0xc8] sm:$0xff] }
 0xb8f   : > { %2351 = vmatprep.subr.mxu0 %v2294_v11  ;;  %v2332_v53 = vunpack.c.h.bf16 %v2268_v49  ;;  %v2331_v54 = vunpack.c.l.bf16 %v2268_v49  ;;  %v2330_v56 = vunpack.c.h.bf16 %v2267_v52  ;;  %v2329_v57 = vunpack.c.l.bf16 %v2267_v52  ;;  %v2261_v6 = vld [vmem:[#allocation6 + $0xc0] sm:$0xff]  ;;  %v2260_v9 = vld [vmem:[#allocation6 + $0xb8] sm:$0xff]  ;;  %v12100_v40 = vld [vmem:[#allocation2 + $0x10] sm:$0xff]  ;;  %p9059_p7 = por %p9058_p13, %p9057_p4 }
 0xb90   : > { %2352 = vmatpush1.msra.mxu0 %v2293_v12  ;;  %v2328_v59 = vunpack.c.h.bf16 %v2266_v55  ;;  %v2327_v60 = vunpack.c.l.bf16 %v2266_v55  ;;  %v2326_v62 = vunpack.c.h.bf16 %v2265_v58  ;;  %v2325_v63 = vunpack.c.l.bf16 %v2265_v58  ;;  %v2259_v12 = vld [vmem:[#allocation6 + $0xb0] sm:$0xff]  ;;  %v12109_v43 = vld [vmem:[#allocation2 + $0x38] sm:$0xff]  ;;  %v12119_v46 = vld [vmem:[#allocation2 + $0x40] sm:$0xff] }
 0xb91   : > { %2353 = vmatprep.subr.mxu0 %v2292_v14  ;;  %v2324_v1 = vunpack.c.h.bf16 %v2264_v61  ;;  %v2323_v2 = vunpack.c.l.bf16 %v2264_v61  ;;  %v2322_v4 = vunpack.c.h.bf16 %v2263_v0  ;;  %v2321_v5 = vunpack.c.l.bf16 %v2263_v0  ;;  %v12127_v49 = vld [vmem:[#allocation2 + $0x68] sm:$0xff]  ;;  %v12137_v52 = vld [vmem:[#allocation2 + $0x70] sm:$0xff]  ;;  %v12145_v55 = vld [vmem:[#allocation2 + $0x98] sm:$0xff]  ;;  %p9060_p6 = pnand %p9059_p7, %p9053_p2 }
 0xb92   : > { %2354 = vmatpush1.msra.mxu0 %v2291_v15  ;;  %v2320_v7 = vunpack.c.h.bf16 %v2262_v3  ;;  %v2319_v8 = vunpack.c.l.bf16 %v2262_v3  ;;  %v2318_v10 = vunpack.c.h.bf16 %v2261_v6  ;;  %v2317_v11 = vunpack.c.l.bf16 %v2261_v6  ;;  %v2258_v15 = vld [vmem:[#allocation6 + $0xa8] sm:$0xff]  ;;  %v12155_v58 = vld [vmem:[#allocation2 + $0xa0] sm:$0xff]  ;;  %v12173_v0 = vld [vmem:[#allocation2 + $0xd0] sm:$0xff] }
 0xb93   : > { %2355 = vmatprep.subr.mxu0 %v2290_v17  ;;  %v2316_v13 = vunpack.c.h.bf16 %v2260_v9  ;;  %v2315_v14 = vunpack.c.l.bf16 %v2260_v9  ;;  %v2314_v16 = vunpack.c.h.bf16 %v2259_v12  ;;  %v2313_v17 = vunpack.c.l.bf16 %v2259_v12  ;;  %v12163_v61 = vld [vmem:[#allocation2 + $0xc8] sm:$0xff] }
 0xb94   : > { %2356 = vmatpush1.msra.mxu0 %v2289_v18  ;;  %v2257_v18 = vld [vmem:[#allocation6 + $0xa0] sm:$0xff]  ;;  %v2312_v19 = vunpack.c.h.bf16 %v2258_v15  ;;  %v2335_v3 = vlaneseq }
 0xb95   : > { %2357 = vmatprep.subr.mxu0 %v2288_v21  ;;  %v2311_v21 = vunpack.c.l.bf16 %v2258_v15  ;;  %v2310_v23 = vunpack.c.h.bf16 %v2257_v18 }
 0xb96   : > { %2358 = vmatpush1.msra.mxu0 %v2287_v22  ;;  %v2256_v22 = vld [vmem:[#allocation6 + $0x98] sm:$0xff] }
 0xb97   : > { %2359 = vmatprep.subr.mxu0 %v2286_v25  ;;  %v2309_v25 = vunpack.c.l.bf16 %v2257_v18  ;;  %v2308_v28 = vunpack.c.h.bf16 %v2256_v22 }
 0xb98   : > { %2360 = vmatpush1.msra.mxu0 %v2285_v27  ;;  %v2255_v27 = vld [vmem:[#allocation6 + $0x90] sm:$0xff] }
 0xb99   : > { %2361 = vmatprep.subr.mxu0 %v2284_v29  ;;  %v2307_v29 = vunpack.c.l.bf16 %v2256_v22  ;;  %v2306_v31 = vunpack.c.h.bf16 %v2255_v27 }
 0xb9a   : > { %2362 = vmatpush1.msra.mxu0 %v2283_v30  ;;  %v2254_v30 = vld [vmem:[#allocation6 + $0x88] sm:$0xff] }
 0xb9b   : > { %2363 = vmatprep.subr.mxu0 %v2282_v32  ;;  %v2305_v32 = vunpack.c.l.bf16 %v2255_v27  ;;  %v2304_v34 = vunpack.c.h.bf16 %v2254_v30 }
 0xb9c   : > { %2364 = vmatpush1.msra.mxu0 %v2281_v33  ;;  %v2253_v33 = vld [vmem:[#allocation6 + $0x80] sm:$0xff] }
 0xb9d   : > { %2365 = vmatprep.subr.mxu0 %v2280_v35  ;;  %v2303_v35 = vunpack.c.l.bf16 %v2254_v30  ;;  %v2301_v37 = vunpack.c.l.bf16 %v2253_v33 }
 0xb9e   : > { %2366 = vmatpush1.msra.mxu0 %v2279_v36  ;;  %v2302_v36 = vunpack.c.h.bf16 %v2253_v33 }
 0xb9f   : > { %2367 = vmatprep.subr.mxu0 %v2278_v38  ;;  %v12093_v38 = vld [vmem:[#allocation2 + $0xf8] sm:$0xff] }
 0xba0   : > { %2368 = vmatpush1.msra.mxu0 %v2277_v39  ;;  %v12096_v39 = vld [vmem:[#allocation2 + $0xf0] sm:$0xff] }
 0xba1   : > { %2369 = vmatprep.subr.mxu0 %v2276_v41  ;;  %v12103_v41 = vld [vmem:[#allocation2 + $0x28] sm:$0xff] }
 0xba2   : > { %2370 = vmatpush1.msra.mxu0 %v2275_v42  ;;  %v12107_v42 = vld [vmem:[#allocation2 + $0x20] sm:$0xff] }
 0xba3   : > { %2371 = vmatprep.subr.mxu0 %v2274_v44  ;;  %v12113_v44 = vld [vmem:[#allocation2 + $0x30] sm:$0xff] }
 0xba4   : > { %2372 = vmatpush1.msra.mxu0 %v2273_v45  ;;  %v12115_v45 = vld [vmem:[#allocation2 + $0x48] sm:$0xff] }
 0xba5   : > { %2373 = vmatprep.subr.mxu0 %v2272_v47  ;;  %v12121_v47 = vld [vmem:[#allocation2 + $0x58] sm:$0xff] }
 0xba6   : > { %2374 = vmatpush1.msra.mxu0 %v2271_v48  ;;  %v12125_v48 = vld [vmem:[#allocation2 + $0x50] sm:$0xff] }
 0xba7   : > { %2375 = vmatprep.subr.mxu0 %v2270_v50  ;;  %v12131_v50 = vld [vmem:[#allocation2 + $0x60] sm:$0xff] }
 0xba8   : > { %2376 = vmatpush1.msra.mxu0 %v2269_v51  ;;  %v12133_v51 = vld [vmem:[#allocation2 + $0x78] sm:$0xff] }
 0xba9   : > { %2377 = vmatprep.subr.mxu0 %v2332_v53  ;;  %v12139_v53 = vld [vmem:[#allocation2 + $0x88] sm:$0xff] }
 0xbaa   : > { %2378 = vmatpush2.msra.mxu0 %v2331_v54  ;;  %v12143_v54 = vld [vmem:[#allocation2 + $0x80] sm:$0xff] }
 0xbab   : > { %2379 = vmatprep.subr.mxu0 %v2330_v56  ;;  %v12149_v56 = vld [vmem:[#allocation2 + $0x90] sm:$0xff] }
 0xbac   : > { %2380 = vmatpush2.msra.mxu0 %v2329_v57  ;;  %v12151_v57 = vld [vmem:[#allocation2 + $0xa8] sm:$0xff] }
 0xbad   : > { %2381 = vmatprep.subr.mxu0 %v2328_v59  ;;  %v12157_v59 = vld [vmem:[#allocation2 + $0xb8] sm:$0xff] }
 0xbae   : > { %2382 = vmatpush2.msra.mxu0 %v2327_v60  ;;  %v12161_v60 = vld [vmem:[#allocation2 + $0xb0] sm:$0xff] }
 0xbaf   : > { %2383 = vmatprep.subr.mxu0 %v2326_v62  ;;  %v12167_v62 = vld [vmem:[#allocation2 + $0xc0] sm:$0xff] }
 0xbb0   : > { %2384 = vmatpush2.msra.mxu0 %v2325_v63  ;;  %v12169_v63 = vld [vmem:[#allocation2 + $0xd8] sm:$0xff] }
 0xbb1   : > { %2385 = vmatprep.subr.mxu0 %v2324_v1  ;;  %v12175_v1 = vld [vmem:[#allocation2 + $0xe8] sm:$0xff] }
 0xbb2   : > { %2386 = vmatpush2.msra.mxu0 %v2323_v2  ;;  %v12179_v2 = vld [vmem:[#allocation2 + $0xe0] sm:$0xff] }
 0xbb3   : > { %2387 = vmatprep.subr.mxu0 %v2322_v4  ;;  %v2336_v4 = vshrl.u32 %v2335_v3, 7 }
 0xbb4   : > { %2388 = vmatpush2.msra.mxu0 %v2321_v5 }
 0xbb5   : > { %2389 = vmatprep.subr.mxu0 %v2320_v7  ;;  %v2341_v5 = vsub.s32 1, %v2336_v4  ;;  %v2337_v6 = vsub.s32 0, %v2336_v4  ;;  %v2333_v7 = vld [vmem:[#allocation9] sm:$0x3] }
 0xbb6   : > { %2390 = vmatpush2.msra.mxu0 %v2319_v8 }
 0xbb7   : > { %2391 = vmatprep.subr.mxu0 %v2318_v10  ;;  %v12184_v8 = vrot.slane %v2333_v7, %v2341_v5  ;;  %v12186_v9 = vrot.slane %v2333_v7, %v2337_v6 }
 0xbb8   : > { %2392 = vmatpush2.msra.mxu0 %v2317_v11 }
 0xbb9   : > { %2393 = vmatprep.subr.mxu0 %v2316_v13 }
 0xbba   : > { %2394 = vmatpush2.msra.mxu0 %v2315_v14 }
 0xbbb   : > { %2395 = vmatprep.subr.mxu0 %v2314_v16 }
 0xbbc   : > { %2396 = vmatpush2.msra.mxu0 %v2313_v17 }
 0xbbd   : > { %2397 = vmatprep.subr.mxu0 %v2312_v19 }
 0xbbe   : > { %2398 = vmatpush2.msra.mxu0 %v2311_v21 }
 0xbbf   : > { %2399 = vmatprep.subr.mxu0 %v2310_v23 }
 0xbc0   : > { %2400 = vmatpush2.msra.mxu0 %v2309_v25 }
 0xbc1   : > { %2401 = vmatprep.subr.mxu0 %v2308_v28 }
 0xbc2   : > { %2402 = vmatpush2.msra.mxu0 %v2307_v29 }
 0xbc3   : > { %2403 = vmatprep.subr.mxu0 %v2306_v31 }
 0xbc4   : > { %2404 = vmatpush2.msra.mxu0 %v2305_v32 }
 0xbc5   : > { %2405 = vmatprep.subr.mxu0 %v2304_v34 }
 0xbc6   : > { %2406 = vmatpush2.msra.mxu0 %v2303_v35 }
 0xbc7   : > { %2407 = vmatprep.subr.mxu0 %v2302_v36 }
 0xbc8   : > { %2408 = vmatpush2.msra.mxu0 %v2301_v37 }
 0xbc9   : > { %2410 = vmatmul.mubr.f32.vlgmr.msra.gmra.mxu0 %v12086_v24  ;;  %4946 = vmatprep.subr.mxu0 %v12093_v38 }
 0xbca   : > { %2415 = vmatprep.mubr.f32.mxu0 %v12089_v26  ;;  %4947 = vmatpush1.msra.mxu0 %v12096_v39 }
 0xbcd   : > { %2416 = vmatmul.mubr.f32.gmra.mxu0 %v12100_v40 }
 0xbce   : > { %2421 = vmatprep.mubr.f32.mxu0 %v12103_v41 }
 0xbd1   : > { %2422 = vmatmul.mubr.f32.gmra.mxu0 %v12107_v42 }
 0xbd2   : > { %2427 = vmatprep.mubr.f32.mxu0 %v12109_v43 }
 0xbd5   : > { %2428 = vmatmul.mubr.f32.gmra.mxu0 %v12113_v44 }
 0xbd6   : > { %2433 = vmatprep.mubr.f32.mxu0 %v12115_v45 }
 0xbd9   : > { %2434 = vmatmul.mubr.f32.gmra.mxu0 %v12119_v46 }
 0xbda   : > { %2439 = vmatprep.mubr.f32.mxu0 %v12121_v47 }
 0xbdd   : > { %2440 = vmatmul.mubr.f32.gmra.mxu0 %v12125_v48 }
 0xbde   : > { %2445 = vmatprep.mubr.f32.mxu0 %v12127_v49 }
 0xbe1   : > { %2446 = vmatmul.mubr.f32.gmra.mxu0 %v12131_v50 }
 0xbe2   : > { %2451 = vmatprep.mubr.f32.mxu0 %v12133_v51 }
 0xbe5   : > { %2452 = vmatmul.mubr.f32.gmra.mxu0 %v12137_v52 }
 0xbe6   : > { %2457 = vmatprep.mubr.f32.mxu0 %v12139_v53 }
 0xbe9   : > { %2458 = vmatmul.mubr.f32.gmra.mxu0 %v12143_v54 }
 0xbea   : > { %2463 = vmatprep.mubr.f32.mxu0 %v12145_v55 }
 0xbed   : > { %2464 = vmatmul.mubr.f32.gmra.mxu0 %v12149_v56 }
 0xbee   : > { %2469 = vmatprep.mubr.f32.mxu0 %v12151_v57 }
 0xbf1   : > { %2470 = vmatmul.mubr.f32.gmra.mxu0 %v12155_v58 }
 0xbf2   : > { %2475 = vmatprep.mubr.f32.mxu0 %v12157_v59 }
 0xbf5   : > { %2476 = vmatmul.mubr.f32.gmra.mxu0 %v12161_v60 }
 0xbf6   : > { %2481 = vmatprep.mubr.f32.mxu0 %v12163_v61 }
 0xbf9   : > { %2482 = vmatmul.mubr.f32.gmra.mxu0 %v12167_v62 }
 0xbfa   : > { %2487 = vmatprep.mubr.f32.mxu0 %v12169_v63 }
 0xbfd   : > { %2488 = vmatmul.mubr.f32.gmra.mxu0 %v12173_v0 }
 0xbfe   : > { %2493 = vmatprep.mubr.f32.mxu0 %v12175_v1 }
 0xc01   : > { %2494 = vmatmul.mubr.f32.gmra.mxu0 %v12179_v2 }
 0xc02   : > { %2499 = vmatprep.mubr.f32.mxu0 %v12093_v38 }
 0xc05   : > { %2500 = vmatmul.mubr.f32.gmra.mxu0 %v12096_v39 }
 0xc89   : > { %v2411_v10 = vpop.f32.mrf.mxu0 }
 0xc8a   : > { %v2412_v13 = vadd.f32 %v2411_v10, %v12186_v9 }
 0xc8b   : > { %v2413_v11 = vpop.f32.mrf.mxu0 }
 0xc8c   : > { %v2414_v12 = vadd.f32 %v2413_v11, %v12184_v8 }
 0xc8d   : > { %v2417_v14 = vpop.f32.mrf.mxu0 }
 0xc8e   : > { %2570 = vmatprep.mubr.f32.mxu1 %v2414_v12  ;;  %v2418_v17 = vadd.f32 %v2417_v14, %v12186_v9 }
 0xc8f   : > { %v2419_v15 = vpop.f32.mrf.mxu0  ;;  %2571 = vmatmul.mubr.f32.vlgmr.msra.gmra.mxu1 %v2412_v13 }
 0xc90   : > { %v2420_v16 = vadd.f32 %v2419_v15, %v12184_v8  ;;  %2607 = vmatpush1.xpose.msra.mxu1 %v12100_v40 }
 0xc91   : > { %v2423_v18 = vpop.f32.mrf.mxu0  ;;  %2676 = vmatprep.subr.mxu1 %v12103_v41 }
 0xc92   : > { %2640 = vmatprep.mubr.f32.mxu1 %v2420_v16  ;;  %v2424_v22 = vadd.f32 %v2423_v18, %v12186_v9 }
 0xc93   : > { %v2425_v19 = vpop.f32.mrf.mxu0  ;;  %2641 = vmatmul.mubr.f32.vlgmr.msra.gmra.mxu1 %v2418_v17 }
 0xc94   : > { %v2426_v21 = vadd.f32 %v2425_v19, %v12184_v8  ;;  %2677 = vmatpush1.xpose.msra.mxu1 %v12107_v42 }
 0xc95   : > { %v2429_v23 = vpop.f32.mrf.mxu0  ;;  %2746 = vmatprep.subr.mxu1 %v12109_v43 }
 0xc96   : > { %2710 = vmatprep.mubr.f32.mxu1 %v2426_v21  ;;  %v2430_v28 = vadd.f32 %v2429_v23, %v12186_v9 }
 0xc97   : > { %v2431_v25 = vpop.f32.mrf.mxu0  ;;  %2711 = vmatmul.mubr.f32.vlgmr.msra.gmra.mxu1 %v2424_v22 }
 0xc98   : > { %v2432_v27 = vadd.f32 %v2431_v25, %v12184_v8  ;;  %2747 = vmatpush1.xpose.msra.mxu1 %v12113_v44 }
 0xc99   : > { %v2435_v29 = vpop.f32.mrf.mxu0  ;;  %2816 = vmatprep.subr.mxu1 %v12115_v45 }
 0xc9a   : > { %2780 = vmatprep.mubr.f32.mxu1 %v2432_v27  ;;  %v2436_v32 = vadd.f32 %v2435_v29, %v12186_v9 }
 0xc9b   : > { %v2437_v30 = vpop.f32.mrf.mxu0  ;;  %2781 = vmatmul.mubr.f32.vlgmr.msra.gmra.mxu1 %v2430_v28 }
 0xc9c   : > { %v2438_v31 = vadd.f32 %v2437_v30, %v12184_v8  ;;  %2817 = vmatpush1.xpose.msra.mxu1 %v12119_v46 }
 0xc9d   : > { %v2441_v33 = vpop.f32.mrf.mxu0  ;;  %2886 = vmatprep.subr.mxu1 %v12121_v47 }
 0xc9e   : > { %2850 = vmatprep.mubr.f32.mxu1 %v2438_v31  ;;  %v2442_v36 = vadd.f32 %v2441_v33, %v12186_v9 }
 0xc9f   : > { %v2443_v34 = vpop.f32.mrf.mxu0  ;;  %2851 = vmatmul.mubr.f32.vlgmr.msra.gmra.mxu1 %v2436_v32 }
 0xca0   : > { %v2444_v35 = vadd.f32 %v2443_v34, %v12184_v8  ;;  %2887 = vmatpush1.xpose.msra.mxu1 %v12125_v48 }
 0xca1   : > { %v2447_v37 = vpop.f32.mrf.mxu0  ;;  %2956 = vmatprep.subr.mxu1 %v12127_v49 }
 0xca2   : > { %2920 = vmatprep.mubr.f32.mxu1 %v2444_v35  ;;  %v2448_v5 = vadd.f32 %v2447_v37, %v12186_v9 }
 0xca3   : > { %v2449_v3 = vpop.f32.mrf.mxu0  ;;  %2921 = vmatmul.mubr.f32.vlgmr.msra.gmra.mxu1 %v2442_v36 }
 0xca4   : > { %v2450_v4 = vadd.f32 %v2449_v3, %v12184_v8  ;;  %2957 = vmatpush1.xpose.msra.mxu1 %v12131_v50 }
 0xca5   : > { %v2453_v6 = vpop.f32.mrf.mxu0  ;;  %3026 = vmatprep.subr.mxu1 %v12133_v51 }
 0xca6   : > { %2990 = vmatprep.mubr.f32.mxu1 %v2450_v4  ;;  %v2454_v11 = vadd.f32 %v2453_v6, %v12186_v9 }
 0xca7   : > { %v2455_v7 = vpop.f32.mrf.mxu0  ;;  %2991 = vmatmul.mubr.f32.vlgmr.msra.gmra.mxu1 %v2448_v5 }
 0xca8   : > { %v2456_v10 = vadd.f32 %v2455_v7, %v12184_v8  ;;  %3027 = vmatpush1.xpose.msra.mxu1 %v12137_v52 }
 0xca9   : > { %v2459_v12 = vpop.f32.mrf.mxu0  ;;  %3096 = vmatprep.subr.mxu1 %v12139_v53 }
 0xcaa   : > { %3060 = vmatprep.mubr.f32.mxu1 %v2456_v10  ;;  %v2460_v15 = vadd.f32 %v2459_v12, %v12186_v9 }
 0xcab   : > { %v2461_v13 = vpop.f32.mrf.mxu0  ;;  %3061 = vmatmul.mubr.f32.vlgmr.msra.gmra.mxu1 %v2454_v11 }
 0xcac   : > { %v2462_v14 = vadd.f32 %v2461_v13, %v12184_v8  ;;  %3097 = vmatpush1.xpose.msra.mxu1 %v12143_v54 }
 0xcad   : > { %v2465_v16 = vpop.f32.mrf.mxu0  ;;  %3166 = vmatprep.subr.mxu1 %v12145_v55 }
 0xcae   : > { %3130 = vmatprep.mubr.f32.mxu1 %v2462_v14  ;;  %v2466_v19 = vadd.f32 %v2465_v16, %v12186_v9 }
 0xcaf   : > { %v2467_v17 = vpop.f32.mrf.mxu0  ;;  %3131 = vmatmul.mubr.f32.vlgmr.msra.gmra.mxu1 %v2460_v15 }
 0xcb0   : > { %v2468_v18 = vadd.f32 %v2467_v17, %v12184_v8  ;;  %3167 = vmatpush1.xpose.msra.mxu1 %v12149_v56 }
 0xcb1   : > { %v2471_v21 = vpop.f32.mrf.mxu0  ;;  %3236 = vmatprep.subr.mxu1 %v12151_v57 }
 0xcb2   : > { %3200 = vmatprep.mubr.f32.mxu1 %v2468_v18  ;;  %v2472_v25 = vadd.f32 %v2471_v21, %v12186_v9 }
 0xcb3   : > { %v2473_v22 = vpop.f32.mrf.mxu0  ;;  %3201 = vmatmul.mubr.f32.vlgmr.msra.gmra.mxu1 %v2466_v19 }
 0xcb4   : > { %v2474_v23 = vadd.f32 %v2473_v22, %v12184_v8  ;;  %3237 = vmatpush1.xpose.msra.mxu1 %v12155_v58 }
 0xcb5   : > { %v2477_v27 = vpop.f32.mrf.mxu0  ;;  %3306 = vmatprep.subr.mxu1 %v12157_v59 }
 0xcb6   : > { %3270 = vmatprep.mubr.f32.mxu1 %v2474_v23  ;;  %v2478_v30 = vadd.f32 %v2477_v27, %v12186_v9 }
 0xcb7   : > { %v2479_v28 = vpop.f32.mrf.mxu0  ;;  %3271 = vmatmul.mubr.f32.vlgmr.msra.gmra.mxu1 %v2472_v25 }
 0xcb8   : > { %v2480_v29 = vadd.f32 %v2479_v28, %v12184_v8  ;;  %3307 = vmatpush1.xpose.msra.mxu1 %v12161_v60 }
 0xcb9   : > { %v2483_v31 = vpop.f32.mrf.mxu0  ;;  %3376 = vmatprep.subr.mxu1 %v12163_v61 }
 0xcba   : > { %3340 = vmatprep.mubr.f32.mxu1 %v2480_v29  ;;  %v2484_v34 = vadd.f32 %v2483_v31, %v12186_v9 }
 0xcbb   : > { %v2485_v32 = vpop.f32.mrf.mxu0  ;;  %3341 = vmatmul.mubr.f32.vlgmr.msra.gmra.mxu1 %v2478_v30 }
 0xcbc   : > { %v2486_v33 = vadd.f32 %v2485_v32, %v12184_v8  ;;  %3377 = vmatpush1.xpose.msra.mxu1 %v12167_v62 }
 0xcbd   : > { %v2489_v35 = vpop.f32.mrf.mxu0  ;;  %3446 = vmatprep.subr.mxu1 %v12169_v63 }
 0xcbe   : > { %3410 = vmatprep.mubr.f32.mxu1 %v2486_v33  ;;  %v2490_v3 = vadd.f32 %v2489_v35, %v12186_v9 }
 0xcbf   : > { %v2491_v36 = vpop.f32.mrf.mxu0  ;;  %3411 = vmatmul.mubr.f32.vlgmr.msra.gmra.mxu1 %v2484_v34 }
 0xcc0   : > { %v2492_v37 = vadd.f32 %v2491_v36, %v12184_v8  ;;  %3447 = vmatpush1.xpose.msra.mxu1 %v12173_v0 }
 0xcc1   : > { %v2495_v4 = vpop.f32.mrf.mxu0  ;;  %3516 = vmatprep.subr.mxu1 %v12175_v1 }
 0xcc2   : > { %3480 = vmatprep.mubr.f32.mxu1 %v2492_v37  ;;  %v2496_v7 = vadd.f32 %v2495_v4, %v12186_v9 }
 0xcc3   : > { %v2497_v5 = vpop.f32.mrf.mxu0  ;;  %3481 = vmatmul.mubr.f32.vlgmr.msra.gmra.mxu1 %v2490_v3 }
 0xcc4   : > { %v2498_v6 = vadd.f32 %v2497_v5, %v12184_v8  ;;  %3517 = vmatpush1.xpose.msra.mxu1 %v12179_v2 }
 0xcc5   : > { %v2501_v10 = vpop.f32.mrf.mxu0  ;;  %3586 = vmatprep.subr.mxu1 %v12093_v38 }
 0xcc6   : > { %3550 = vmatprep.mubr.f32.mxu1 %v2498_v6  ;;  %v2502_v13 = vadd.f32 %v2501_v10, %v12186_v9 }
 0xcc7   : > { %v2503_v11 = vpop.f32.mrf.mxu0  ;;  %3551 = vmatmul.mubr.f32.vlgmr.msra.gmra.mxu1 %v2496_v7 }
 0xcc8   : > { %v2504_v12 = vadd.f32 %v2503_v11, %v12184_v8  ;;  %3587 = vmatpush1.xpose.msra.mxu1 %v12096_v39 }
 0xcc9   : > { %3836 = vmatprep.subr.mxu1 %v12083_v20 }
 0xcca   : > { %3620 = vmatprep.mubr.f32.mxu1 %v2504_v12 }
 0xccb   : > { %3621 = vmatmul.mubr.f32.vlgmr.msra.gmra.mxu1 %v2502_v13 }
 0xccc   : > { %3837 = vmatpush1.msra.mxu1 %v12086_v24 }
 0xccd   : > { %3910 = vmatprep.subr.mxu1 %v12089_v26 }
 0xd4f   : > { %v12252_v14 = vpop.f32.mrf.mxu1 }
 0xd50   : > { %v3627_v38 = vsel %vm3626_vm0, %v12252_v14, -inf }
 0xd51   : > { %3628 = vmax.xlane.f32.xlu0 %v3627_v38  ;;  %v2574_v8 = vpop.f32.mrf.mxu1 }
 0xd53   : > { %v12256_v15 = vpop.f32.mrf.mxu1 }
 0xd54   : > { %v3630_v39 = vsel %vm3626_vm0, %v12256_v15, -inf }
 0xd55   : > { %3631 = vmax.xlane.f32.xlu0 %v3630_v39  ;;  %v2644_v20 = vpop.f32.mrf.mxu1 }
 0xd57   : > { %v12260_v9 = vpop.f32.mrf.mxu1 }
 0xd58   : > { %v3633_v24 = vsel %vm3626_vm0, %v12260_v9, -inf }
 0xd59   : > { %3634 = vmax.xlane.f32.xlu1 %v3633_v24  ;;  %v2714_v26 = vpop.f32.mrf.mxu1 }
 0xd5b   : > { %v12264_v16 = vpop.f32.mrf.mxu1 }
 0xd5c   : > { %v3636_v17 = vsel %vm3626_vm0, %v12264_v16, -inf }
 0xd5d   : > { %3637 = vmax.xlane.f32.xlu1 %v3636_v17  ;;  %v2784_v18 = vpop.f32.mrf.mxu1 }
 0xd5f   : > { %v12268_v19 = vpop.f32.mrf.mxu1 }
 0xd60   : > { %v3639_v21 = vsel %vm3626_vm0, %v12268_v19, -inf }
 0xd61   : > { %3640 = vmax.xlane.f32.xlu0 %v3639_v21  ;;  %v2854_v22 = vpop.f32.mrf.mxu1 }
 0xd63   : > { %v12272_v23 = vpop.f32.mrf.mxu1 }
 0xd64   : > { %v3642_v25 = vsel %vm3626_vm0, %v12272_v23, -inf }
 0xd65   : > { %3643 = vmax.xlane.f32.xlu1 %v3642_v25  ;;  %v2924_v27 = vpop.f32.mrf.mxu1 }
 0xd67   : > { %v12276_v28 = vpop.f32.mrf.mxu1 }
 0xd68   : > { %v3645_v29 = vsel %vm3626_vm0, %v12276_v28, -inf }
 0xd69   : > { %3646 = vmax.xlane.f32.xlu0 %v3645_v29  ;;  %v2994_v30 = vpop.f32.mrf.mxu1 }
 0xd6b   : > { %v12280_v31 = vpop.f32.mrf.mxu1 }
 0xd6c   : > { %v3648_v32 = vsel %vm3626_vm0, %v12280_v31, -inf }
 0xd6d   : > { %3649 = vmax.xlane.f32.xlu1 %v3648_v32  ;;  %v3064_v33 = vpop.f32.mrf.mxu1 }
 0xd6f   : > { %v12284_v34 = vpop.f32.mrf.mxu1 }
 0xd70   : > { %v3651_v35 = vsel %vm3626_vm0, %v12284_v34, -inf }
 0xd71   : > { %3652 = vmax.xlane.f32.xlu0 %v3651_v35  ;;  %v3134_v36 = vpop.f32.mrf.mxu1 }
 0xd73   : > { %v12288_v37 = vpop.f32.mrf.mxu1 }
 0xd74   : > { %v3654_v3 = vsel %vm3626_vm0, %v12288_v37, -inf }
 0xd75   : > { %3655 = vmax.xlane.f32.xlu1 %v3654_v3  ;;  %v3204_v4 = vpop.f32.mrf.mxu1 }
 0xd77   : > { %v12292_v5 = vpop.f32.mrf.mxu1 }
 0xd78   : > { %v3657_v6 = vsel %vm3626_vm0, %v12292_v5, -inf }
 0xd79   : > { %3658 = vmax.xlane.f32.xlu0 %v3657_v6  ;;  %v3274_v7 = vpop.f32.mrf.mxu1 }
 0xd7b   : > { %v12296_v10 = vpop.f32.mrf.mxu1 }
 0xd7c   : > { %v3660_v11 = vsel %vm3626_vm0, %v12296_v10, -inf }
 0xd7d   : > { %3661 = vmax.xlane.f32.xlu1 %v3660_v11  ;;  %v3344_v12 = vpop.f32.mrf.mxu1 }
 0xd7f   : > { %v12300_v13 = vpop.f32.mrf.mxu1 }
 0xd80   : > { %v3663_v38 = vsel %vm3626_vm0, %v12300_v13, -inf }
 0xd81   : > { %3664 = vmax.xlane.f32.xlu0 %v3663_v38  ;;  %v3414_v8 = vpop.f32.mrf.mxu1 }
 0xd83   : > { %v12304_v39 = vpop.f32.mrf.mxu1 }
 0xd84   : > { %v3666_v20 = vsel %vm3626_vm0, %v12304_v39, -inf }
 0xd85   : > { %3667 = vmax.xlane.f32.xlu1 %v3666_v20  ;;  %v3484_v24 = vpop.f32.mrf.mxu1 }
 0xd87   : > { %v12308_v26 = vpop.f32.mrf.mxu1 }
 0xd88   : > { %v3669_v17 = vsel %vm3626_vm0, %v12308_v26, -inf }
 0xd89   : > { %3670 = vmax.xlane.f32.xlu0 %v3669_v17  ;;  %v3554_v18 = vpop.f32.mrf.mxu1 }
 0xd8b   : > { %v12312_v21 = vpop.f32.mrf.mxu1 }
 0xd8c   : > { %v3672_v22 = vsel %vm3626_vm0, %v12312_v21, -inf }
 0xd8d   : > { %3673 = vmax.xlane.f32.xlu1 %v3672_v22  ;;  %v3624_v25 = vpop.f32.mrf.mxu1 }
 0xdda   : > { %v3629_v27 = vpop.xlane.xlu0 %3628 }
 0xddb   : > { %v3675_v29 = vsub.f32 %v12252_v14, %v3629_v27 }
 0xddd   : > { %v3691_v30 = vmul.f32 1.442695, %v3675_v29 }
 0xdde   : > { %v3632_v32 = vpop.xlane.xlu0 %3631 }
 0xddf   : > { %6110 = vpow2.f32 %v3691_v30  ;;  %v3676_v33 = vsub.f32 %v12256_v15, %v3632_v32 }
 0xde1   : > { %v3693_v35 = vmul.f32 1.442695, %v3676_v33 }
 0xde2   : > { %v3635_v36 = vpop.xlane.xlu1 %3634 }
 0xde3   : > { %6112 = vpow2.f32 %v3693_v35  ;;  %v3677_v3 = vsub.f32 %v12260_v9, %v3635_v36 }
 0xde5   : > { %v3695_v4 = vmul.f32 1.442695, %v3677_v3 }
 0xde6   : > { %v3638_v6 = vpop.xlane.xlu1 %3637 }
 0xde7   : > { %6114 = vpow2.f32 %v3695_v4  ;;  %v3678_v7 = vsub.f32 %v12264_v16, %v3638_v6 }
 0xde9   : > { %v3697_v11 = vmul.f32 1.442695, %v3678_v7 }
 0xdea   : > { %v3641_v12 = vpop.xlane.xlu0 %3640 }
 0xdeb   : > { %6116 = vpow2.f32 %v3697_v11  ;;  %v3679_v14 = vsub.f32 %v12268_v19, %v3641_v12 }
 0xdec   : > { %v12321_v38 = vpop.eup %6110 }
 0xded   : > { %v3699_v8 = vmul.f32 1.442695, %v3679_v14  ;;  %v3723_v15 = vsel %vm3626_vm0, %v12321_v38, 0.0 }
 0xdee   : > { %v3644_v20 = vpop.xlane.xlu1 %3643  ;;  %3724 = vadd.xlane.f32.xlu0 %v3723_v15 }
 0xdef   : > { %6118 = vpow2.f32 %v3699_v8  ;;  %v3680_v9 = vsub.f32 %v12272_v23, %v3644_v20 }
 0xdf0   : > { %v12326_v24 = vpop.eup %6112 }
 0xdf1   : > { %v3701_v17 = vmul.f32 1.442695, %v3680_v9  ;;  %v3726_v16 = vsel %vm3626_vm0, %v12326_v24, 0.0  ;;  %v9259_v9 = vmov 0.0  }
 0xdf2   : > { %v3647_v18 = vpop.xlane.xlu0 %3646  ;;  %3727 = vadd.xlane.f32.xlu1 %v3726_v16  ;;  %3870 = vmatprep.mubr.f32.mxu1 %v9259_v9 }
 0xdf3   : > { %6120 = vpow2.f32 %v3701_v17  ;;  %v3681_v19 = vsub.f32 %v12276_v28, %v3647_v18  ;;  %4980 = vmatprep.mubr.f32.mxu0 %v9259_v9 }
 0xdf4   : > { %v12331_v22 = vpop.eup %6114 }
 0xdf5   : > { %v3703_v25 = vmul.f32 1.442695, %v3681_v19  ;;  %v3729_v27 = vsel %vm3626_vm0, %v12331_v22, 0.0 }
 0xdf6   : > { %v3650_v29 = vpop.xlane.xlu1 %3649  ;;  %3730 = vadd.xlane.f32.xlu0 %v3729_v27 }
 0xdf7   : > { %6122 = vpow2.f32 %v3703_v25  ;;  %v3682_v23 = vsub.f32 %v12280_v31, %v3650_v29 }
 0xdf8   : > { %v12336_v30 = vpop.eup %6116 }
 0xdf9   : > { %v3705_v32 = vmul.f32 1.442695, %v3682_v23  ;;  %v3732_v33 = vsel %vm3626_vm0, %v12336_v30, 0.0 }
 0xdfa   : > { %v3653_v35 = vpop.xlane.xlu0 %3652  ;;  %3733 = vadd.xlane.f32.xlu1 %v3732_v33 }
 0xdfb   : > { %6124 = vpow2.f32 %v3705_v32  ;;  %v3683_v28 = vsub.f32 %v12284_v34, %v3653_v35 }
 0xdfc   : > { %v12341_v36 = vpop.eup %6118 }
 0xdfd   : > { %v3707_v3 = vmul.f32 1.442695, %v3683_v28  ;;  %v3735_v4 = vsel %vm3626_vm0, %v12341_v36, 0.0 }
 0xdfe   : > { %v3656_v6 = vpop.xlane.xlu1 %3655  ;;  %3736 = vadd.xlane.f32.xlu0 %v3735_v4 }
 0xdff   : > { %6126 = vpow2.f32 %v3707_v3  ;;  %v3684_v31 = vsub.f32 %v12288_v37, %v3656_v6 }
 0xe00   : > { %v12346_v7 = vpop.eup %6120 }
 0xe01   : > { %v3709_v11 = vmul.f32 1.442695, %v3684_v31  ;;  %v3738_v12 = vsel %vm3626_vm0, %v12346_v7, 0.0 }
 0xe02   : > { %v3659_v14 = vpop.xlane.xlu0 %3658  ;;  %3739 = vadd.xlane.f32.xlu1 %v3738_v12 }
 0xe03   : > { %6128 = vpow2.f32 %v3709_v11  ;;  %v3685_v34 = vsub.f32 %v12292_v5, %v3659_v14 }
 0xe04   : > { %v12351_v8 = vpop.eup %6122 }
 0xe05   : > { %v3711_v15 = vmul.f32 1.442695, %v3685_v34  ;;  %v3741_v20 = vsel %vm3626_vm0, %v12351_v8, 0.0 }
 0xe06   : > { %v3662_v37 = vpop.xlane.xlu1 %3661  ;;  %3742 = vadd.xlane.f32.xlu0 %v3741_v20 }
 0xe07   : > { %6130 = vpow2.f32 %v3711_v15  ;;  %v3686_v17 = vsub.f32 %v12296_v10, %v3662_v37 }
 0xe08   : > { %v12358_v16 = vpop.eup %6124 }
 0xe09   : > { %v3713_v18 = vmul.f32 1.442695, %v3686_v17  ;;  %v3744_v5 = vsel %vm3626_vm0, %v12358_v16, 0.0 }
 0xe0a   : > { %v3665_v19 = vpop.xlane.xlu0 %3664  ;;  %3745 = vadd.xlane.f32.xlu1 %v3744_v5 }
 0xe0b   : > { %6132 = vpow2.f32 %v3713_v18  ;;  %v3687_v25 = vsub.f32 %v12300_v13, %v3665_v19 }
 0xe0c   : > { %v12363_v27 = vpop.eup %6126 }
 0xe0d   : > { %v3715_v29 = vmul.f32 1.442695, %v3687_v25  ;;  %v3747_v23 = vsel %vm3626_vm0, %v12363_v27, 0.0 }
 0xe0e   : > { %v3668_v32 = vpop.xlane.xlu1 %3667  ;;  %3748 = vadd.xlane.f32.xlu0 %v3747_v23 }
 0xe0f   : > { %6134 = vpow2.f32 %v3715_v29  ;;  %v3688_v10 = vsub.f32 %v12304_v39, %v3668_v32 }
 0xe10   : > { %v12368_v33 = vpop.eup %6128 }
 0xe11   : > { %v3717_v35 = vmul.f32 1.442695, %v3688_v10  ;;  %v3750_v28 = vsel %vm3626_vm0, %v12368_v33, 0.0 }
 0xe12   : > { %v3671_v3 = vpop.xlane.xlu0 %3670  ;;  %3751 = vadd.xlane.f32.xlu1 %v3750_v28 }
 0xe13   : > { %6136 = vpow2.f32 %v3717_v35  ;;  %v3689_v13 = vsub.f32 %v12308_v26, %v3671_v3 }
 0xe14   : > { %v12373_v4 = vpop.eup %6130 }
 0xe15   : > { %v3719_v6 = vmul.f32 1.442695, %v3689_v13  ;;  %v3753_v31 = vsel %vm3626_vm0, %v12373_v4, 0.0 }
 0xe16   : > { %3754 = vadd.xlane.f32.xlu0 %v3753_v31  ;;  %v3674_v11 = vpop.xlane.xlu1 %3673 }
 0xe17   : > { %6138 = vpow2.f32 %v3719_v6  ;;  %v3690_v39 = vsub.f32 %v12312_v21, %v3674_v11 }
 0xe18   : > { %v12378_v12 = vpop.eup %6132 }
 0xe19   : > { %v3721_v14 = vmul.f32 1.442695, %v3690_v39  ;;  %v3756_v34 = vsel %vm3626_vm0, %v12378_v12, 0.0 }
 0xe1a   : > { %3757 = vadd.xlane.f32.xlu1 %v3756_v34 }
 0xe1b   : > { %6140 = vpow2.f32 %v3721_v14 }
 0xe1c   : > { %v12382_v26 = vpop.eup %6134 }
 0xe1d   : > { %v3759_v15 = vsel %vm3626_vm0, %v12382_v26, 0.0 }
 0xe1e   : > { %3760 = vadd.xlane.f32.xlu0 %v3759_v15 }
 0xe20   : > { %v12386_v20 = vpop.eup %6136 }
 0xe21   : > { %v3762_v37 = vsel %vm3626_vm0, %v12386_v20, 0.0 }
 0xe22   : > { %3763 = vadd.xlane.f32.xlu1 %v3762_v37 }
 0xe24   : > { %v12390_v21 = vpop.eup %6138 }
 0xe25   : > { %v3765_v17 = vsel %vm3626_vm0, %v12390_v21, 0.0 }
 0xe26   : > { %3766 = vadd.xlane.f32.xlu0 %v3765_v17 }
 0xe28   : > { %v12394_v18 = vpop.eup %6140 }
 0xe29   : > { %v3768_v5 = vsel %vm3626_vm0, %v12394_v18, 0.0 }
 0xe2a   : > { %3769 = vadd.xlane.f32.xlu1 %v3768_v5 }
 0xe77   : > { %v3725_v19 = vpop.xlane.xlu0 %3724 }
 0xe78   : > { %6142 = vrcp.f32 %v3725_v19 }
 0xe7b   : > { %v3728_v25 = vpop.xlane.xlu1 %3727 }
 0xe7c   : > { %6144 = vrcp.f32 %v3728_v25 }
 0xe7f   : > { %v3731_v29 = vpop.xlane.xlu0 %3730 }
 0xe80   : > { %6146 = vrcp.f32 %v3731_v29 }
 0xe83   : > { %v3734_v23 = vpop.xlane.xlu1 %3733 }
 0xe84   : > { %6148 = vrcp.f32 %v3734_v23 }
 0xe85   : > { %v6143_v32 = vpop.eup %6142 }
 0xe86   : > { %v3787_v10 = vmul.f32 %v6143_v32, %v12321_v38 }
 0xe87   : > { %v3737_v35 = vpop.xlane.xlu0 %3736 }
 0xe88   : > { %6150 = vrcp.f32 %v3737_v35  ;;  %5889 = vmatmul.mubr.msk.f32.vlgmr.msra.gmra.mxu1 %vm3626_vm0, %v3787_v10 }
 0xe89   : > { %v6145_v28 = vpop.eup %6144  ;;  %3911 = vmatpush1.msra.mxu1 %v12100_v40  ;;  %3944 = vmatprep.mubr.f32.mxu1 %v9259_v9 }
 0xe8a   : > { %v3788_v3 = vmul.f32 %v6145_v28, %v12326_v24  ;;  %3984 = vmatprep.subr.mxu1 %v12103_v41 }
 0xe8b   : > { %v3740_v13 = vpop.xlane.xlu1 %3739 }
 0xe8c   : > { %6152 = vrcp.f32 %v3740_v13  ;;  %5890 = vmatmul.mubr.msk.f32.vlgmr.msra.gmra.mxu1 %vm3626_vm0, %v3788_v3 }
 0xe8d   : > { %v6147_v6 = vpop.eup %6146  ;;  %3985 = vmatpush1.msra.mxu1 %v12107_v42  ;;  %4018 = vmatprep.mubr.f32.mxu1 %v9259_v9 }
 0xe8e   : > { %v3789_v38 = vmul.f32 %v6147_v6, %v12331_v22  ;;  %4058 = vmatprep.subr.mxu1 %v12109_v43 }
 0xe8f   : > { %v3743_v40 = vpop.xlane.xlu0 %3742 }
 0xe90   : > { %6154 = vrcp.f32 %v3743_v40  ;;  %5891 = vmatmul.mubr.msk.f32.vlgmr.msra.gmra.mxu1 %vm3626_vm0, %v3789_v38 }
 0xe91   : > { %v6149_v24 = vpop.eup %6148  ;;  %4059 = vmatpush1.msra.mxu1 %v12113_v44  ;;  %4092 = vmatprep.mubr.f32.mxu1 %v9259_v9 }
 0xe92   : > { %v3790_v41 = vmul.f32 %v6149_v24, %v12336_v30  ;;  %4132 = vmatprep.subr.mxu1 %v12115_v45 }
 0xe93   : > { %v3746_v42 = vpop.xlane.xlu1 %3745 }
 0xe94   : > { %6156 = vrcp.f32 %v3746_v42  ;;  %5892 = vmatmul.mubr.msk.f32.vlgmr.msra.gmra.mxu1 %vm3626_vm0, %v3790_v41 }
 0xe95   : > { %v6151_v22 = vpop.eup %6150  ;;  %4133 = vmatpush1.msra.mxu1 %v12119_v46  ;;  %4166 = vmatprep.mubr.f32.mxu1 %v9259_v9 }
 0xe96   : > { %v3791_v43 = vmul.f32 %v6151_v22, %v12341_v36  ;;  %4206 = vmatprep.subr.mxu1 %v12121_v47 }
 0xe97   : > { %v3749_v44 = vpop.xlane.xlu0 %3748 }
 0xe98   : > { %6158 = vrcp.f32 %v3749_v44  ;;  %5893 = vmatmul.mubr.msk.f32.vlgmr.msra.gmra.mxu1 %vm3626_vm0, %v3791_v43 }
 0xe99   : > { %v6153_v30 = vpop.eup %6152  ;;  %4207 = vmatpush1.msra.mxu1 %v12125_v48  ;;  %4240 = vmatprep.mubr.f32.mxu1 %v9259_v9 }
 0xe9a   : > { %v3792_v45 = vmul.f32 %v6153_v30, %v12346_v7  ;;  %4280 = vmatprep.subr.mxu1 %v12127_v49 }
 0xe9b   : > { %v3752_v46 = vpop.xlane.xlu1 %3751 }
 0xe9c   : > { %6160 = vrcp.f32 %v3752_v46  ;;  %5894 = vmatmul.mubr.msk.f32.vlgmr.msra.gmra.mxu1 %vm3626_vm0, %v3792_v45 }
 0xe9d   : > { %v6155_v36 = vpop.eup %6154  ;;  %4281 = vmatpush1.msra.mxu1 %v12131_v50  ;;  %4314 = vmatprep.mubr.f32.mxu1 %v9259_v9 }
 0xe9e   : > { %v3793_v47 = vmul.f32 %v6155_v36, %v12351_v8  ;;  %4354 = vmatprep.subr.mxu1 %v12133_v51 }
 0xe9f   : > { %v3755_v48 = vpop.xlane.xlu0 %3754 }
 0xea0   : > { %6162 = vrcp.f32 %v3755_v48  ;;  %5895 = vmatmul.mubr.msk.f32.vlgmr.msra.gmra.mxu1 %vm3626_vm0, %v3793_v47 }
 0xea1   : > { %v6157_v7 = vpop.eup %6156  ;;  %4355 = vmatpush1.msra.mxu1 %v12137_v52  ;;  %4388 = vmatprep.mubr.f32.mxu1 %v9259_v9 }
 0xea2   : > { %v3794_v49 = vmul.f32 %v6157_v7, %v12358_v16  ;;  %4428 = vmatprep.subr.mxu1 %v12139_v53 }
 0xea3   : > { %v3758_v50 = vpop.xlane.xlu1 %3757 }
 0xea4   : > { %6164 = vrcp.f32 %v3758_v50  ;;  %5896 = vmatmul.mubr.msk.f32.vlgmr.msra.gmra.mxu1 %vm3626_vm0, %v3794_v49 }
 0xea5   : > { %v6159_v8 = vpop.eup %6158  ;;  %4429 = vmatpush1.msra.mxu1 %v12143_v54  ;;  %4462 = vmatprep.mubr.f32.mxu1 %v9259_v9 }
 0xea6   : > { %v3795_v51 = vmul.f32 %v6159_v8, %v12363_v27  ;;  %4502 = vmatprep.subr.mxu1 %v12145_v55 }
 0xea7   : > { %v3761_v52 = vpop.xlane.xlu0 %3760 }
 0xea8   : > { %6166 = vrcp.f32 %v3761_v52  ;;  %5897 = vmatmul.mubr.msk.f32.vlgmr.msra.gmra.mxu1 %vm3626_vm0, %v3795_v51 }
 0xea9   : > { %v6161_v16 = vpop.eup %6160  ;;  %4503 = vmatpush1.msra.mxu1 %v12149_v56  ;;  %4536 = vmatprep.mubr.f32.mxu1 %v9259_v9 }
 0xeaa   : > { %v3796_v53 = vmul.f32 %v6161_v16, %v12368_v33  ;;  %4576 = vmatprep.subr.mxu1 %v12151_v57 }
 0xeab   : > { %v3764_v54 = vpop.xlane.xlu1 %3763 }
 0xeac   : > { %6168 = vrcp.f32 %v3764_v54  ;;  %5898 = vmatmul.mubr.msk.f32.vlgmr.msra.gmra.mxu1 %vm3626_vm0, %v3796_v53 }
 0xead   : > { %v6163_v27 = vpop.eup %6162  ;;  %4577 = vmatpush1.msra.mxu1 %v12155_v58  ;;  %4610 = vmatprep.mubr.f32.mxu1 %v9259_v9 }
 0xeae   : > { %v3797_v55 = vmul.f32 %v6163_v27, %v12373_v4  ;;  %4650 = vmatprep.subr.mxu1 %v12157_v59 }
 0xeaf   : > { %v3767_v56 = vpop.xlane.xlu0 %3766 }
 0xeb0   : > { %6170 = vrcp.f32 %v3767_v56  ;;  %5899 = vmatmul.mubr.msk.f32.vlgmr.msra.gmra.mxu1 %vm3626_vm0, %v3797_v55 }
 0xeb1   : > { %v6165_v33 = vpop.eup %6164  ;;  %4651 = vmatpush1.msra.mxu1 %v12161_v60  ;;  %4684 = vmatprep.mubr.f32.mxu1 %v9259_v9 }
 0xeb2   : > { %v3798_v57 = vmul.f32 %v6165_v33, %v12378_v12  ;;  %4724 = vmatprep.subr.mxu1 %v12163_v61 }
 0xeb3   : > { %v3770_v58 = vpop.xlane.xlu1 %3769 }
 0xeb4   : > { %6172 = vrcp.f32 %v3770_v58  ;;  %5900 = vmatmul.mubr.msk.f32.vlgmr.msra.gmra.mxu1 %vm3626_vm0, %v3798_v57 }
 0xeb5   : > { %v6167_v4 = vpop.eup %6166  ;;  %4725 = vmatpush1.msra.mxu1 %v12167_v62  ;;  %4758 = vmatprep.mubr.f32.mxu1 %v9259_v9 }
 0xeb6   : > { %v3799_v59 = vmul.f32 %v6167_v4, %v12382_v26  ;;  %4798 = vmatprep.subr.mxu1 %v12169_v63 }
 0xeb8   : > { %5901 = vmatmul.mubr.msk.f32.vlgmr.msra.gmra.mxu1 %vm3626_vm0, %v3799_v59 }
 0xeb9   : > { %v6169_v60 = vpop.eup %6168  ;;  %4799 = vmatpush1.msra.mxu1 %v12173_v0  ;;  %4832 = vmatprep.mubr.f32.mxu1 %v9259_v9 }
 0xeba   : > { %v3800_v61 = vmul.f32 %v6169_v60, %v12386_v20  ;;  %4872 = vmatprep.subr.mxu1 %v12175_v1 }
 0xebc   : > { %5902 = vmatmul.mubr.msk.f32.vlgmr.msra.gmra.mxu1 %vm3626_vm0, %v3800_v61 }
 0xebd   : > { %v6171_v62 = vpop.eup %6170  ;;  %4873 = vmatpush1.msra.mxu1 %v12179_v2  ;;  %4906 = vmatprep.mubr.f32.mxu1 %v9259_v9 }
 0xebe   : > { %v3801_v63 = vmul.f32 %v6171_v62, %v12390_v21 }
 0xec0   : > { %5903 = vmatmul.mubr.msk.f32.vlgmr.msra.gmra.mxu1 %vm3626_vm0, %v3801_v63 }
 0xec1   : > { %v6173_v0 = vpop.eup %6172 }
 0xec2   : > { %v3802_v31 = vmul.f32 %v6173_v0, %v12394_v18 }
 0xec4   : > { %5904 = vmatmul.mubr.msk.f32.vlgmr.msra.gmra.mxu0 %vm3626_vm0, %v3802_v31 }
 0xf48   : > { %v3872_v1 = vpop.f32.mrf.mxu1 }
 0xf49   : > { %4987 = vst [vmem:[%s12081_s16] sm:$0xff] %v3872_v1 }
 0xf4a   : > { %v3874_v11 = vpop.f32.mrf.mxu1 }
 0xf4b   : > { %4988 = vst [vmem:[%s12081_s16 + $0x8] sm:$0xff] %v3874_v11 }
 0xf4c   : > { %v3946_v2 = vpop.f32.mrf.mxu1 }
 0xf4d   : > { %4989 = vst [vmem:[%s12081_s16 + $0x10] sm:$0xff] %v3946_v2 }
 0xf4e   : > { %v3948_v9 = vpop.f32.mrf.mxu1 }
 0xf4f   : > { %4990 = vst [vmem:[%s12081_s16 + $0x18] sm:$0xff] %v3948_v9 }
 0xf50   : > { %v4020_v39 = vpop.f32.mrf.mxu1 }
 0xf51   : > { %4991 = vst [vmem:[%s12081_s16 + $0x20] sm:$0xff] %v4020_v39 }
 0xf52   : > { %v4022_v12 = vpop.f32.mrf.mxu1 }
 0xf53   : > { %4992 = vst [vmem:[%s12081_s16 + $0x28] sm:$0xff] %v4022_v12 }
 0xf54   : > { %v4094_v14 = vpop.f32.mrf.mxu1 }
 0xf55   : > { %4993 = vst [vmem:[%s12081_s16 + $0x30] sm:$0xff] %v4094_v14 }
 0xf56   : > { %v4096_v34 = vpop.f32.mrf.mxu1 }
 0xf57   : > { %4994 = vst [vmem:[%s12081_s16 + $0x38] sm:$0xff] %v4096_v34 }
 0xf58   : > { %v4168_v26 = vpop.f32.mrf.mxu1 }
 0xf59   : > { %4995 = vst [vmem:[%s12081_s16 + $0x40] sm:$0xff] %v4168_v26 }
 0xf5a   : > { %v4170_v15 = vpop.f32.mrf.mxu1 }
 0xf5b   : > { %4996 = vst [vmem:[%s12081_s16 + $0x48] sm:$0xff] %v4170_v15 }
 0xf5c   : > { %v4242_v20 = vpop.f32.mrf.mxu1 }
 0xf5d   : > { %4997 = vst [vmem:[%s12081_s16 + $0x50] sm:$0xff] %v4242_v20 }
 0xf5e   : > { %v4244_v37 = vpop.f32.mrf.mxu1 }
 0xf5f   : > { %4998 = vst [vmem:[%s12081_s16 + $0x58] sm:$0xff] %v4244_v37 }
 0xf60   : > { %v4316_v21 = vpop.f32.mrf.mxu1 }
 0xf61   : > { %4999 = vst [vmem:[%s12081_s16 + $0x60] sm:$0xff] %v4316_v21 }
 0xf62   : > { %v4318_v17 = vpop.f32.mrf.mxu1 }
 0xf63   : > { %5000 = vst [vmem:[%s12081_s16 + $0x68] sm:$0xff] %v4318_v17 }
 0xf64   : > { %v4390_v18 = vpop.f32.mrf.mxu1 }
 0xf65   : > { %5001 = vst [vmem:[%s12081_s16 + $0x70] sm:$0xff] %v4390_v18 }
 0xf66   : > { %v4392_v5 = vpop.f32.mrf.mxu1 }
 0xf67   : > { %5002 = vst [vmem:[%s12081_s16 + $0x78] sm:$0xff] %v4392_v5 }
 0xf68   : > { %v4464_v19 = vpop.f32.mrf.mxu1 }
 0xf69   : > { %5003 = vst [vmem:[%s12081_s16 + $0x80] sm:$0xff] %v4464_v19 }
 0xf6a   : > { %v4466_v25 = vpop.f32.mrf.mxu1 }
 0xf6b   : > { %5004 = vst [vmem:[%s12081_s16 + $0x88] sm:$0xff] %v4466_v25 }
 0xf6c   : > { %v4538_v29 = vpop.f32.mrf.mxu1 }
 0xf6d   : > { %5005 = vst [vmem:[%s12081_s16 + $0x90] sm:$0xff] %v4538_v29 }
 0xf6e   : > { %v4540_v23 = vpop.f32.mrf.mxu1 }
 0xf6f   : > { %5006 = vst [vmem:[%s12081_s16 + $0x98] sm:$0xff] %v4540_v23 }
 0xf70   : > { %v4612_v32 = vpop.f32.mrf.mxu1 }
 0xf71   : > { %5007 = vst [vmem:[%s12081_s16 + $0xa0] sm:$0xff] %v4612_v32 }
 0xf72   : > { %v4614_v10 = vpop.f32.mrf.mxu1 }
 0xf73   : > { %5008 = vst [vmem:[%s12081_s16 + $0xa8] sm:$0xff] %v4614_v10 }
 0xf74   : > { %v4686_v35 = vpop.f32.mrf.mxu1 }
 0xf75   : > { %5009 = vst [vmem:[%s12081_s16 + $0xb0] sm:$0xff] %v4686_v35 }
 0xf76   : > { %v4688_v28 = vpop.f32.mrf.mxu1 }
 0xf77   : > { %5010 = vst [vmem:[%s12081_s16 + $0xb8] sm:$0xff] %v4688_v28 }
 0xf78   : > { %v4760_v3 = vpop.f32.mrf.mxu1 }
 0xf79   : > { %5011 = vst [vmem:[%s12081_s16 + $0xc0] sm:$0xff] %v4760_v3 }
 0xf7a   : > { %v4762_v13 = vpop.f32.mrf.mxu1 }
 0xf7b   : > { %5012 = vst [vmem:[%s12081_s16 + $0xc8] sm:$0xff] %v4762_v13 }
 0xf7c   : > { %v4834_v6 = vpop.f32.mrf.mxu1 }
 0xf7d   : > { %5013 = vst [vmem:[%s12081_s16 + $0xd0] sm:$0xff] %v4834_v6 }
 0xf7e   : > { %v4836_v38 = vpop.f32.mrf.mxu1 }
 0xf7f   : > { %5014 = vst [vmem:[%s12081_s16 + $0xd8] sm:$0xff] %v4836_v38 }
 0xf80   : > { %v4908_v40 = vpop.f32.mrf.mxu1 }
 0xf81   : > { %5015 = vst [vmem:[%s12081_s16 + $0xe0] sm:$0xff] %v4908_v40 }
 0xf82   : > { %v4910_v24 = vpop.f32.mrf.mxu1 }
 0xf83   : > { %5016 = vst [vmem:[%s12081_s16 + $0xe8] sm:$0xff] %v4910_v24 }
 0xf84   : > { %v4982_v41 = vpop.f32.mrf.mxu0 }
 0xf85   : > { %5017 = vst [vmem:[%s12081_s16 + $0xf0] sm:$0xff] %v4982_v41 }
 0xf86   : > { %v4984_v42 = vpop.f32.mrf.mxu0 }
 0xf87   : > { %5018 = vst [vmem:[%s12081_s16 + $0xf8] sm:$0xff] %v4984_v42 }
 0xf88   : > { %9063 = shalt.err (!%p9060_p6)
}
 0xf89   : > { %s9064_s22 = scalar_lea.hbm %s12506_s3, 4096  ;;  %s9068_s18 = scalar_lea.hbm %s12558_s4, 8192 }
 0xf8a   : > { %p9065_p9 = scmp.ne.s32.totalorder %s12506_s3, %s9064_s22  ;;  %p9069_p8 = scmp.lt.s32.totalorder %s12506_s3, %s12558_s4 }
 0xf8b   : > { %p9070_p11 = scmp.lt.s32.totalorder %s9068_s18, %s9064_s22 }
 0xf8c   : > { %p9066_p10 = pnand %p9065_p9, %p9329_p5 }
 0xf8d   : > { %p9071_p0 = por %p9070_p11, %p9069_p8 }
 0xf8e   : > { %p9067_p12 = pneg %p9066_p10 }
 0xf90   : > { %p9072_p1 = pnand %p9071_p0, %p9067_p12 }
 0xf92   : > { %9075 = shalt.err (!%p9072_p1)
}
 0xf93   : > { %s9261_s20 = smov 256   ;;  %s9262_s23 = smov 16  }
 0xf94   : > { %5922 = dma.vmem_to_hbm [thread:$0]  (%p9329_p5), %s12508_s30, 4096, %s12506_s3, %s12514_s11, %s9261_s20, %s9261_s20, %s9262_s23  }
 0xf95 PF: > { %s12586_s28 = sld [smem:[#allocation147_spill]] }
 0xf96   : > { %s12587_s17 = sld [smem:[#allocation145_spill]] }
 0xf97   : > { %s12588_s14 = sld [smem:[#allocation150_spill]] }
 0xf9b   : > { %p5939_p3 = scmp.ge.s32.totalorder %s12586_s28, 2 }
 0xf9c   : > { %s5049_s29 = sand.u32 1, %s12587_s17  }
 0xf9d   : > { %p12589_p2 = scmp.ne.s32.totalorder %s12588_s14, 0  ;;  %s5050_s6 = scalar_lea.sflag [#allocation8], %s5049_s29 }
 0xf9f   : > { %p5932_p4 = pnand %p5939_p3, %p12589_p2 }
 0xfa1   : > { %p5933_p13 = pneg %p5932_p4 }
 0xfa3   : > { %9105 = dma.done.wait (%p5933_p13), %s5050_s6, 4096  }
 0xfa4   : > { %9107 = vsyncadd (%p5933_p13), %s5050_s6, 4294963200  ;;  %s12590_s21 = sld [smem:[#allocation148_spill]]  ;;  %s12593_s18 = smov %s9114_s19 }
 0xfa5   : > { %s12591_s9 = sld [smem:[#allocation146_spill]] }
 0xfa6   : > { %s12592_s20 = sld [smem:[#allocation149_spill]] }
 0xfaa   : > { %p20_p7 = scmp.ge.s32.totalorder %s12590_s21, 4  }
 0xfab   : > { %s12594_s19 = smov %s12591_s9 }
 0xfac   :  { %22 = sbr.rel (!%p20_p7) target bundleno = 12 (0xc), region = 324 }
 0xfb1   :  { %5055 = vsyncpa [#allocation7], 1 }
 0xfb2   :  { %5057 = vsyncpa [#allocation7 + $0x1], 1 }
 0xfb3   :  { %5058 = vsyncpa [#allocation10], 1 }
 0xfb4   :  { %5059 = vsyncpa [#allocation8], 1 }
 0xfb5   :  { %5061 = vsyncpa [#allocation8 + $0x1], 1 }
 0xfb6   :  { %5062 = vsyncmov [#allocation3] }
 0xfb9   :  { %s5063_s27 = vpop.sfrf %5062 }
 0xfba   :  { %p5911_p5 = scmp.ne.s32.totalorder %s5063_s27, 0 }
 0xfbc   :  { %5067 = shalt.err (%p5911_p5)  }

</bundles_post_ra>
